<compile_context>
chip_gen: v6e
topology: v6e:2x2x1
jax: 0.10.0
libtpu: 0.0.40
codegen_flags: <defaults>
</compile_context>

<pallas_src>
import jax
import jax.numpy as jnp
from jax import lax
from jax.experimental import pallas as pl
from jax.experimental.pallas import tpu as pltpu

_LANE = 128          # vreg lane width (last dim)
_SUBLANE_BF16 = 16   # sublane quantum for bf16-packed streamed tiles


def _round_up(v, m):
    return ((v + m - 1) // m) * m


def _tpu_vmem_info():
    """Returns (per-core VMEM capacity in bytes, likely-multi-TensorCore chip)."""
    vmem = 128 << 20
    try:
        info = pltpu.get_tpu_info()
        vmem = int(getattr(info, "vmem_capacity_bytes", vmem) or vmem)
    except Exception:
        pass
    multi_tc = vmem <= (64 << 20)   # v7x: 64 MiB per TC, 2 TCs per chip
    return vmem, multi_tc


def _make_dec_kernel(n_layers, n_enc, relu_flags, alpha):
    """Fused encoder -> decoder -> Student-t soft-assignment kernel, one batch tile."""
    power = (alpha + 1.0) * 0.5
    inv_alpha = 1.0 / alpha

    def kernel(*refs):
        # refs layout:
        #   refs[0]               : x tile       (TB, D)            bf16 (streamed)
        #   refs[1 + 2*i]         : W_i          (in[_pad], out_pad) bf16 (resident)
        #   refs[2 + 2*i]         : b_i          (1, out_pad)        f32  (resident)
        #   refs[1 + 2*n_layers]  : centroids^T  (H_pad, K_pad)      bf16 (resident)
        #   refs[2 + 2*n_layers]  : ||c||^2      (1, K_pad)          f32  (resident, poisoned pad)
        #   refs[3 + 2*n_layers]  : q tile       (TB, K_pad)         f32  (out)
        #   refs[4 + 2*n_layers]  : x_est tile   (TB, D_pad)         f32  (out)
        x_ref = refs[0]
        ct_ref = refs[1 + 2 * n_layers]
        c2_ref = refs[2 + 2 * n_layers]
        q_ref = refs[3 + 2 * n_layers]
        xest_ref = refs[4 + 2 * n_layers]

        # MLP: MXU matmuls in bf16 with f32 accumulation; elementwise math f32 (v5e-safe).
        h = x_ref[...]                                   # already bf16
        encoded = None
        for i in range(n_layers):
            w = refs[1 + 2 * i][...]
            b = refs[2 + 2 * i][...]
            lhs = h if h.dtype == jnp.bfloat16 else h.astype(jnp.bfloat16)
            h = jnp.dot(lhs, w, preferred_element_type=jnp.float32) + b
            if relu_flags[i]:
                h = jnp.maximum(h, 0.0)
            if i == n_enc - 1:
                encoded = h                              # bottleneck (TB, H_pad) f32

        xest_ref[...] = h                                # reconstruction

        # Student-t soft assignment: ||e-c||^2 = ||e||^2 + ||c||^2 - 2 e.c (MXU friendly).
        e2 = jnp.sum(encoded * encoded, axis=1, keepdims=True)             # (TB, 1)
        ec = jnp.dot(encoded.astype(jnp.bfloat16), ct_ref[...],
                     preferred_element_type=jnp.float32)                    # (TB, K_pad)
        # Padded cluster columns of c2 are poisoned (~1e30) on the host, so qu
        # underflows to ~0 there -> no in-kernel iota/where mask needed.
        dist2 = jnp.maximum(e2 + c2_ref[...] - 2.0 * ec, 0.0)
        base = 1.0 + dist2 * inv_alpha
        if power == 1.0:
            r = pl.reciprocal(base, approx=True)         # EUP slot
            qu = r * (2.0 - base * r)                    # one Newton step -> ~f32 exact
        else:
            qu = jnp.power(base, -power)
        denom = jnp.sum(qu, axis=1, keepdims=True)
        q_ref[...] = qu * pl.reciprocal(denom, approx=False)   # exact: keeps sum(q)==1

    return kernel


def prepare_dec_params(weights, biases, centroids):
    """One-time host-side lane padding / casting of DEC parameters.

    Hoisted out of the per-call path: call once, reuse across forward passes.
    weights[i]: (in, out) f32; biases[i]: (1, out) f32; centroids: (K, H) f32.
    """
    n_layers = len(weights)
    D = int(weights[0].shape[0])
    K, H = int(centroids.shape[0]), int(centroids.shape[1])

    dims = [D] + [int(w.shape[1]) for w in weights]
    dims_pad = [_round_up(d, _LANE) for d in dims]
    H_pad = _round_up(H, _LANE)
    K_pad = _round_up(K, _LANE)

    w_pad, b_pad = [], []
    for i, (w, b) in enumerate(zip(weights, biases)):
        # Layer 0 keeps its real input dim (x is streamed un-lane-padded);
        # all other dims pad to a 128-lane multiple for lane-dense MXU shapes.
        ip = dims[0] if i == 0 else dims_pad[i]
        op = dims_pad[i + 1]
        w_pad.append(jnp.zeros((ip, op), jnp.bfloat16)
                     .at[:w.shape[0], :w.shape[1]].set(w.astype(jnp.bfloat16)))
        b_pad.append(jnp.zeros((1, op), jnp.float32)
                     .at[:, :b.shape[1]].set(b.astype(jnp.float32)))

    c_f32 = centroids.astype(jnp.float32)
    cT = (jnp.zeros((H_pad, K_pad), jnp.bfloat16)
          .at[:H, :K].set(c_f32.T.astype(jnp.bfloat16)))            # pre-transposed
    # ||c||^2 with padded cluster columns poisoned so their q underflows to 0.
    c2 = (jnp.full((1, K_pad), 1e30, jnp.float32)
          .at[:, :K].set(jnp.sum(c_f32 * c_f32, axis=1)[None, :]))

    return {
        "w_pad": w_pad, "b_pad": b_pad, "cT": cT, "c2": c2,
        "dims": tuple(dims), "dims_pad": tuple(dims_pad),
        "K": K, "K_pad": K_pad, "H_pad": H_pad, "n_layers": n_layers,
    }


def dec_forward_pallas(x, params, n_enc, alpha=1.0, block_b=None):
    """Fused DEC forward pass. `params` comes from prepare_dec_params()."""
    n_layers = params["n_layers"]
    relu_flags = tuple(not (i == n_enc - 1 or i == n_layers - 1)
                       for i in range(n_layers))
    dims, dims_pad = params["dims"], params["dims_pad"]
    D, D_pad = dims[0], dims_pad[0]
    K, K_pad = params["K"], params["K_pad"]
    w_pad, b_pad = params["w_pad"], params["b_pad"]
    cT, c2 = params["cT"], params["c2"]

    B = int(x.shape[0])

    # ---- generation-aware tile / VMEM sizing ---------------------------------
    vmem_phys, multi_tc = _tpu_vmem_info()
    vmem_cap = (vmem_phys * 3) // 4                    # ~48 MiB v7x, ~96 MiB v5e/v6e

    resident = (sum(a.size * a.dtype.itemsize for a in w_pad)
                + sum(a.size * a.dtype.itemsize for a in b_pad)
                + cT.size * cT.dtype.itemsize + c2.size * c2.dtype.itemsize)
    max_dim = max(dims_pad + (K_pad, params["H_pad"]))

    def vmem_needed(tb_):
        streamed = tb_ * D * 2 + tb_ * (D_pad + K_pad) * 4   # bf16 x + f32 q/x_est
        working = 6 * tb_ * max_dim * 4                      # live f32 temporaries
        return 2 * (resident + streamed) + working           # conservative 2x buffering

    B_ru = _round_up(B, _SUBLANE_BF16)
    if block_b is not None:
        tb = _round_up(min(block_b, B_ru), _SUBLANE_BF16)
    elif multi_tc:
        # v7x: keep >=4 grid steps so each of the 2 TCs gets >=2 for DMA/compute overlap.
        tb = _round_up(-(-B_ru // 4), _SUBLANE_BF16)
    else:
        # Single TC (v5e/v6e): fewest, fattest tiles — per-grid-step overhead dominates.
        tb = min(B_ru, 1024)
    tb = max(_SUBLANE_BF16, tb)
    while tb > _SUBLANE_BF16 and vmem_needed(tb) > vmem_cap:
        tb = max(_SUBLANE_BF16, _round_up(tb // 2, _SUBLANE_BF16))
    vmem_limit = int(min(max(vmem_needed(tb) + (4 << 20), 32 << 20), vmem_phys))

    B_pad = _round_up(B, tb)
    n_blocks = B_pad // tb

    # x streamed as bf16 at its real feature width (no 4x lane-pad copy);
    # only the batch dim is padded up to a tile multiple.
    x_pad = jnp.zeros((B_pad, D), jnp.bfloat16).at[:B, :].set(x.astype(jnp.bfloat16))

    kernel = _make_dec_kernel(n_layers, n_enc, relu_flags, float(alpha))

    flat_params = []
    for wp, bp in zip(w_pad, b_pad):
        flat_params.append(wp)
        flat_params.append(bp)

    def run(single_buffer_residents):
        def resident_spec(shape):
            # Constant index_map -> fetched once; single-buffer to save VMEM.
            if single_buffer_residents:
                return pl.BlockSpec(shape, lambda i: (0, 0),
                                    pipeline_mode=pl.Buffered(1))
            return pl.BlockSpec(shape, lambda i: (0, 0))

        def batch_spec(last):
            return pl.BlockSpec((tb, last), lambda i: (i, 0))

        in_specs = [batch_spec(D)]
        for wp, bp in zip(w_pad, b_pad):
            in_specs.append(resident_spec(wp.shape))
            in_specs.append(resident_spec(bp.shape))
        in_specs.append(resident_spec(cT.shape))
        in_specs.append(resident_spec(c2.shape))

        return pl.pallas_call(
            kernel,
            grid=(n_blocks,),
            in_specs=in_specs,
            out_specs=(batch_spec(K_pad), batch_spec(D_pad)),
            out_shape=(jax.ShapeDtypeStruct((B_pad, K_pad), jnp.float32),
                       jax.ShapeDtypeStruct((B_pad, D_pad), jnp.float32)),
            compiler_params=pltpu.CompilerParams(
                dimension_semantics=("parallel",),   # shard batch tiles across TCs (v7x)
                vmem_limit_bytes=vmem_limit),
        )(x_pad, *flat_params, cT, c2)

    try:
        q_pad, xest_pad = run(True)                  # single-buffered residents
        jax.block_until_ready((q_pad, xest_pad))
    except Exception:
        q_pad, xest_pad = run(False)                 # fallback: default buffering

    return q_pad[:B, :K], xest_pad[:B, :D]


def dec_forward_ref(x, weights, biases, centroids, n_enc, alpha=1.0,
                    mirror_kernel_bf16=False):
    """Pure-JAX reference mirroring the PyTorch DEC.forward semantics.
    mirror_kernel_bf16=True reproduces the kernel's bf16-matmul / f32-elementwise
    numerics (tight check); False is the full-f32 PyTorch-style math."""
    n_layers = len(weights)
    md = jnp.bfloat16 if mirror_kernel_bf16 else jnp.float32
    h = x.astype(jnp.float32)
    encoded = None
    for i in range(n_layers):
        h = jnp.dot(h.astype(md), weights[i].astype(md),
                    preferred_element_type=jnp.float32) + biases[i].astype(jnp.float32)
        is_last_enc = i == n_enc - 1
        is_last_dec = i == n_layers - 1
        if not (is_last_enc or is_last_dec):
            h = jnp.maximum(h, 0.0)
        if is_last_enc:
            encoded = h
    decoded = h

    c = centroids.astype(jnp.float32)
    if mirror_kernel_bf16:
        e2 = jnp.sum(encoded * encoded, axis=1, keepdims=True)
        c2 = jnp.sum(c * c, axis=1)[None, :]
        ec = jnp.dot(encoded.astype(md), c.T.astype(md),
                     preferred_element_type=jnp.float32)
        dist2 = jnp.maximum(e2 + c2 - 2.0 * ec, 0.0)
    else:
        diff = c[None, :, :] - encoded[:, None, :]        # (B, K, H)
        dist2 = jnp.sum(diff * diff, axis=2)              # (B, K)
    power = (alpha + 1.0) * 0.5
    base = 1.0 + dist2 / alpha
    qu = 1.0 / base if power == 1.0 else jnp.power(base, -power)
    q = qu / jnp.sum(qu, axis=1, keepdims=True)
    return q, decoded


def init_params(key, ae_dims, n_cluster):
    """Deterministic synthetic params; layer order matches the PyTorch module:
       encoder: dims[0]->...->dims[-1]; decoder: symmetric back to dims[0]."""
    layer_dims = []
    for i in range(len(ae_dims) - 1):
        layer_dims.append((ae_dims[i], ae_dims[i + 1]))
    for i in range(len(ae_dims) - 1, 0, -1):
        layer_dims.append((ae_dims[i], ae_dims[i - 1]))

    weights, biases = [], []
    for (fan_in, fan_out) in layer_dims:
        key, wk, bk = jax.random.split(key, 3)
        limit = jnp.sqrt(6.0 / (fan_in + fan_out))
        weights.append(jax.random.uniform(wk, (fan_in, fan_out), jnp.float32,
                                          -limit, limit))
        biases.append(jax.random.uniform(bk, (1, fan_out), jnp.float32, -0.1, 0.1))

    key, ck = jax.random.split(key)
    centroids = jax.random.normal(ck, (n_cluster, ae_dims[-1]), jnp.float32)
    return weights, biases, centroids


if __name__ == "__main__":
    # Small shapes consistent with the module: MLP autoencoder + clustering head.
    batch = 500                  # non-multiple of the tile to exercise batch padding
    ae_dims = [32, 64, 32, 16]   # dims[0]=feature dim, dims[-1]=embedding dim
    n_cluster = 10
    alpha = 1.0
    n_enc = len(ae_dims) - 1     # number of encoder Linear layers

    key = jax.random.PRNGKey(0)
    key, xk = jax.random.split(key)
    x = jax.random.normal(xk, (batch, ae_dims[0]), jnp.float32)
    weights, biases, centroids = init_params(key, ae_dims, n_cluster)

    # Host-side padding/casting done ONCE (hoisted out of the per-call path).
    prepared = prepare_dec_params(weights, biases, centroids)

    q, x_est = dec_forward_pallas(x, prepared, n_enc, alpha)
    q = jax.block_until_ready(q)
    x_est = jax.block_until_ready(x_est)

    # Tight check vs a reference that mirrors the kernel's bf16-matmul numerics.
    q_emu, x_emu = dec_forward_ref(x, weights, biases, centroids, n_enc, alpha,
                                   mirror_kernel_bf16=True)
    # Loose semantics check vs the full-f32 PyTorch-style reference.
    q_f32, x_f32 = dec_forward_ref(x, weights, biases, centroids, n_enc, alpha,
                                   mirror_kernel_bf16=False)

    assert q.shape == (batch, n_cluster)
    assert x_est.shape == (batch, ae_dims[0])
    assert jnp.allclose(q, q_emu, atol=2e-3, rtol=2e-3), "q mismatch (bf16 ref)"
    assert jnp.allclose(x_est, x_emu, atol=2e-3, rtol=2e-3), "x_est mismatch (bf16 ref)"
    assert jnp.allclose(q, q_f32, atol=8e-2, rtol=8e-2), "q drift vs f32 reference"
    assert jnp.allclose(x_est, x_f32, atol=8e-2, rtol=8e-2), "x_est drift vs f32 reference"
    assert jnp.allclose(jnp.sum(q, axis=1), jnp.ones((batch,)), atol=1e-5)

    print("KERNEL_OK")
</pallas_src>

<mosaic_0001>
module attributes {stable_mosaic.version = 11 : i64} {
  func.func @kernel(%arg0: i32, %arg1: memref<512x32xbf16, #tpu.memory_space<vmem>>, %arg2: memref<32x128xbf16, #tpu.memory_space<vmem>>, %arg3: memref<1x128xf32, #tpu.memory_space<vmem>>, %arg4: memref<128x128xbf16, #tpu.memory_space<vmem>>, %arg5: memref<1x128xf32, #tpu.memory_space<vmem>>, %arg6: memref<128x128xbf16, #tpu.memory_space<vmem>>, %arg7: memref<1x128xf32, #tpu.memory_space<vmem>>, %arg8: memref<128x128xbf16, #tpu.memory_space<vmem>>, %arg9: memref<1x128xf32, #tpu.memory_space<vmem>>, %arg10: memref<128x128xbf16, #tpu.memory_space<vmem>>, %arg11: memref<1x128xf32, #tpu.memory_space<vmem>>, %arg12: memref<128x128xbf16, #tpu.memory_space<vmem>>, %arg13: memref<1x128xf32, #tpu.memory_space<vmem>>, %arg14: memref<128x128xbf16, #tpu.memory_space<vmem>>, %arg15: memref<1x128xf32, #tpu.memory_space<vmem>>, %arg16: memref<512x128xf32, #tpu.memory_space<vmem>>, %arg17: memref<512x128xf32, #tpu.memory_space<vmem>>) attributes {dimension_semantics = [#tpu.dimension_semantics<parallel>], iteration_bounds = array<i64: 1>, scalar_prefetch = 0 : i64, scratch_operands = 0 : i64, tpu.core_type = #tpu.core_type<tc>, window_params = [{transform_indices = @transform_0, window_bounds = array<i64: 512, 32>}, {pipeline_mode = #tpu.pipeline_mode<synchronous>, transform_indices = @transform_1, window_bounds = array<i64: 32, 128>}, {pipeline_mode = #tpu.pipeline_mode<synchronous>, transform_indices = @transform_2, window_bounds = array<i64: 1, 128>}, {pipeline_mode = #tpu.pipeline_mode<synchronous>, transform_indices = @transform_3, window_bounds = array<i64: 128, 128>}, {pipeline_mode = #tpu.pipeline_mode<synchronous>, transform_indices = @transform_4, window_bounds = array<i64: 1, 128>}, {pipeline_mode = #tpu.pipeline_mode<synchronous>, transform_indices = @transform_5, window_bounds = array<i64: 128, 128>}, {pipeline_mode = #tpu.pipeline_mode<synchronous>, transform_indices = @transform_6, window_bounds = array<i64: 1, 128>}, {pipeline_mode = #tpu.pipeline_mode<synchronous>, transform_indices = @transform_7, window_bounds = array<i64: 128, 128>}, {pipeline_mode = #tpu.pipeline_mode<synchronous>, transform_indices = @transform_8, window_bounds = array<i64: 1, 128>}, {pipeline_mode = #tpu.pipeline_mode<synchronous>, transform_indices = @transform_9, window_bounds = array<i64: 128, 128>}, {pipeline_mode = #tpu.pipeline_mode<synchronous>, transform_indices = @transform_10, window_bounds = array<i64: 1, 128>}, {pipeline_mode = #tpu.pipeline_mode<synchronous>, transform_indices = @transform_11, window_bounds = array<i64: 128, 128>}, {pipeline_mode = #tpu.pipeline_mode<synchronous>, transform_indices = @transform_12, window_bounds = array<i64: 1, 128>}, {pipeline_mode = #tpu.pipeline_mode<synchronous>, transform_indices = @transform_13, window_bounds = array<i64: 128, 128>}, {pipeline_mode = #tpu.pipeline_mode<synchronous>, transform_indices = @transform_14, window_bounds = array<i64: 1, 128>}, {transform_indices = @transform_15, window_bounds = array<i64: 512, 128>}, {transform_indices = @transform_16, window_bounds = array<i64: 512, 128>}]} {
    %c0 = arith.constant 0 : index
    %c0_0 = arith.constant 0 : index
    %0 = vector.load %arg1[%c0, %c0_0] : memref<512x32xbf16, #tpu.memory_space<vmem>>, vector<512x32xbf16>
    %c0_1 = arith.constant 0 : index
    %c0_2 = arith.constant 0 : index
    %1 = vector.load %arg2[%c0_1, %c0_2] : memref<32x128xbf16, #tpu.memory_space<vmem>>, vector<32x128xbf16>
    %c0_3 = arith.constant 0 : index
    %c0_4 = arith.constant 0 : index
    %2 = vector.load %arg3[%c0_3, %c0_4] : memref<1x128xf32, #tpu.memory_space<vmem>>, vector<1x128xf32>
    %cst = arith.constant dense<0.000000e+00> : vector<512x128xf32>
    %3 = tpu.matmul %0, %1, %cst {dimension_numbers = #tpu.dot_dimension_numbers<[1], [0], [0], [1], [0, 0, 1, 1], [], []>} : vector<512x32xbf16>, vector<32x128xbf16>, vector<512x128xf32> -> vector<512x128xf32>
    %4 = vector.broadcast %2 : vector<1x128xf32> to vector<512x128xf32>
    %5 = arith.addf %3, %4 : vector<512x128xf32>
    %cst_5 = arith.constant 0.000000e+00 : f32
    %6 = vector.broadcast %cst_5 : f32 to vector<512x128xf32>
    %7 = arith.maximumf %5, %6 : vector<512x128xf32>
    %c0_6 = arith.constant 0 : index
    %c0_7 = arith.constant 0 : index
    %8 = vector.load %arg4[%c0_6, %c0_7] : memref<128x128xbf16, #tpu.memory_space<vmem>>, vector<128x128xbf16>
    %c0_8 = arith.constant 0 : index
    %c0_9 = arith.constant 0 : index
    %9 = vector.load %arg5[%c0_8, %c0_9] : memref<1x128xf32, #tpu.memory_space<vmem>>, vector<1x128xf32>
    %10 = arith.truncf %7 : vector<512x128xf32> to vector<512x128xbf16>
    %cst_10 = arith.constant dense<0.000000e+00> : vector<512x128xf32>
    %11 = tpu.matmul %10, %8, %cst_10 {dimension_numbers = #tpu.dot_dimension_numbers<[1], [0], [0], [1], [0, 0, 1, 1], [], []>} : vector<512x128xbf16>, vector<128x128xbf16>, vector<512x128xf32> -> vector<512x128xf32>
    %12 = vector.broadcast %9 : vector<1x128xf32> to vector<512x128xf32>
    %13 = arith.addf %11, %12 : vector<512x128xf32>
    %cst_11 = arith.constant 0.000000e+00 : f32
    %14 = vector.broadcast %cst_11 : f32 to vector<512x128xf32>
    %15 = arith.maximumf %13, %14 : vector<512x128xf32>
    %c0_12 = arith.constant 0 : index
    %c0_13 = arith.constant 0 : index
    %16 = vector.load %arg6[%c0_12, %c0_13] : memref<128x128xbf16, #tpu.memory_space<vmem>>, vector<128x128xbf16>
    %c0_14 = arith.constant 0 : index
    %c0_15 = arith.constant 0 : index
    %17 = vector.load %arg7[%c0_14, %c0_15] : memref<1x128xf32, #tpu.memory_space<vmem>>, vector<1x128xf32>
    %18 = arith.truncf %15 : vector<512x128xf32> to vector<512x128xbf16>
    %cst_16 = arith.constant dense<0.000000e+00> : vector<512x128xf32>
    %19 = tpu.matmul %18, %16, %cst_16 {dimension_numbers = #tpu.dot_dimension_numbers<[1], [0], [0], [1], [0, 0, 1, 1], [], []>} : vector<512x128xbf16>, vector<128x128xbf16>, vector<512x128xf32> -> vector<512x128xf32>
    %20 = vector.broadcast %17 : vector<1x128xf32> to vector<512x128xf32>
    %21 = arith.addf %19, %20 : vector<512x128xf32>
    %c0_17 = arith.constant 0 : index
    %c0_18 = arith.constant 0 : index
    %22 = vector.load %arg8[%c0_17, %c0_18] : memref<128x128xbf16, #tpu.memory_space<vmem>>, vector<128x128xbf16>
    %c0_19 = arith.constant 0 : index
    %c0_20 = arith.constant 0 : index
    %23 = vector.load %arg9[%c0_19, %c0_20] : memref<1x128xf32, #tpu.memory_space<vmem>>, vector<1x128xf32>
    %24 = arith.truncf %21 : vector<512x128xf32> to vector<512x128xbf16>
    %cst_21 = arith.constant dense<0.000000e+00> : vector<512x128xf32>
    %25 = tpu.matmul %24, %22, %cst_21 {dimension_numbers = #tpu.dot_dimension_numbers<[1], [0], [0], [1], [0, 0, 1, 1], [], []>} : vector<512x128xbf16>, vector<128x128xbf16>, vector<512x128xf32> -> vector<512x128xf32>
    %26 = vector.broadcast %23 : vector<1x128xf32> to vector<512x128xf32>
    %27 = arith.addf %25, %26 : vector<512x128xf32>
    %cst_22 = arith.constant 0.000000e+00 : f32
    %28 = vector.broadcast %cst_22 : f32 to vector<512x128xf32>
    %29 = arith.maximumf %27, %28 : vector<512x128xf32>
    %c0_23 = arith.constant 0 : index
    %c0_24 = arith.constant 0 : index
    %30 = vector.load %arg10[%c0_23, %c0_24] : memref<128x128xbf16, #tpu.memory_space<vmem>>, vector<128x128xbf16>
    %c0_25 = arith.constant 0 : index
    %c0_26 = arith.constant 0 : index
    %31 = vector.load %arg11[%c0_25, %c0_26] : memref<1x128xf32, #tpu.memory_space<vmem>>, vector<1x128xf32>
    %32 = arith.truncf %29 : vector<512x128xf32> to vector<512x128xbf16>
    %cst_27 = arith.constant dense<0.000000e+00> : vector<512x128xf32>
    %33 = tpu.matmul %32, %30, %cst_27 {dimension_numbers = #tpu.dot_dimension_numbers<[1], [0], [0], [1], [0, 0, 1, 1], [], []>} : vector<512x128xbf16>, vector<128x128xbf16>, vector<512x128xf32> -> vector<512x128xf32>
    %34 = vector.broadcast %31 : vector<1x128xf32> to vector<512x128xf32>
    %35 = arith.addf %33, %34 : vector<512x128xf32>
    %cst_28 = arith.constant 0.000000e+00 : f32
    %36 = vector.broadcast %cst_28 : f32 to vector<512x128xf32>
    %37 = arith.maximumf %35, %36 : vector<512x128xf32>
    %c0_29 = arith.constant 0 : index
    %c0_30 = arith.constant 0 : index
    %38 = vector.load %arg12[%c0_29, %c0_30] : memref<128x128xbf16, #tpu.memory_space<vmem>>, vector<128x128xbf16>
    %c0_31 = arith.constant 0 : index
    %c0_32 = arith.constant 0 : index
    %39 = vector.load %arg13[%c0_31, %c0_32] : memref<1x128xf32, #tpu.memory_space<vmem>>, vector<1x128xf32>
    %40 = arith.truncf %37 : vector<512x128xf32> to vector<512x128xbf16>
    %cst_33 = arith.constant dense<0.000000e+00> : vector<512x128xf32>
    %41 = tpu.matmul %40, %38, %cst_33 {dimension_numbers = #tpu.dot_dimension_numbers<[1], [0], [0], [1], [0, 0, 1, 1], [], []>} : vector<512x128xbf16>, vector<128x128xbf16>, vector<512x128xf32> -> vector<512x128xf32>
    %42 = vector.broadcast %39 : vector<1x128xf32> to vector<512x128xf32>
    %43 = arith.addf %41, %42 : vector<512x128xf32>
    %c0_34 = arith.constant 0 : index
    %c0_35 = arith.constant 0 : index
    %44 = vector.load %arg17[%c0_34, %c0_35] : memref<512x128xf32, #tpu.memory_space<vmem>>, vector<512x128xf32>
    tpu.vector_store %arg17[%c0_34, %c0_35], %43 {strides = array<i32>} : memref<512x128xf32, #tpu.memory_space<vmem>>, vector<512x128xf32>,
    %45 = arith.mulf %21, %21 : vector<512x128xf32>
    %cst_36 = arith.constant dense<0.000000e+00> : vector<512xf32>
    %46 = vector.multi_reduction <add>, %45, %cst_36 [1] : vector<512x128xf32> to vector<512xf32>
    %47 = vector.shape_cast %46 : vector<512xf32> to vector<512x1xf32>
    %48 = arith.truncf %21 : vector<512x128xf32> to vector<512x128xbf16>
    %c0_37 = arith.constant 0 : index
    %c0_38 = arith.constant 0 : index
    %49 = vector.load %arg14[%c0_37, %c0_38] : memref<128x128xbf16, #tpu.memory_space<vmem>>, vector<128x128xbf16>
    %cst_39 = arith.constant dense<0.000000e+00> : vector<512x128xf32>
    %50 = tpu.matmul %48, %49, %cst_39 {dimension_numbers = #tpu.dot_dimension_numbers<[1], [0], [0], [1], [0, 0, 1, 1], [], []>} : vector<512x128xbf16>, vector<128x128xbf16>, vector<512x128xf32> -> vector<512x128xf32>
    %c0_40 = arith.constant 0 : index
    %c0_41 = arith.constant 0 : index
    %51 = vector.load %arg15[%c0_40, %c0_41] : memref<1x128xf32, #tpu.memory_space<vmem>>, vector<1x128xf32>
    %52 = vector.broadcast %47 : vector<512x1xf32> to vector<512x128xf32>
    %53 = vector.broadcast %51 : vector<1x128xf32> to vector<512x128xf32>
    %54 = arith.addf %52, %53 : vector<512x128xf32>
    %cst_42 = arith.constant 2.000000e+00 : f32
    %55 = vector.broadcast %cst_42 : f32 to vector<512x128xf32>
    %56 = arith.mulf %55, %50 : vector<512x128xf32>
    %57 = arith.subf %54, %56 : vector<512x128xf32>
    %cst_43 = arith.constant 0.000000e+00 : f32
    %58 = vector.broadcast %cst_43 : f32 to vector<512x128xf32>
    %59 = arith.maximumf %57, %58 : vector<512x128xf32>
    %cst_44 = arith.constant 1.000000e+00 : f32
    %60 = vector.broadcast %cst_44 : f32 to vector<512x128xf32>
    %61 = arith.mulf %59, %60 : vector<512x128xf32>
    %cst_45 = arith.constant 1.000000e+00 : f32
    %62 = vector.broadcast %cst_45 : f32 to vector<512x128xf32>
    %63 = arith.addf %62, %61 : vector<512x128xf32>
    %64 = tpu.reciprocal %63 {approx = true} : vector<512x128xf32> -> vector<512x128xf32>
    %65 = arith.mulf %63, %64 : vector<512x128xf32>
    %cst_46 = arith.constant 2.000000e+00 : f32
    %66 = vector.broadcast %cst_46 : f32 to vector<512x128xf32>
    %67 = arith.subf %66, %65 : vector<512x128xf32>
    %68 = arith.mulf %64, %67 : vector<512x128xf32>
    %cst_47 = arith.constant dense<0.000000e+00> : vector<512xf32>
    %69 = vector.multi_reduction <add>, %68, %cst_47 [1] : vector<512x128xf32> to vector<512xf32>
    %70 = vector.shape_cast %69 : vector<512xf32> to vector<512x1xf32>
    %71 = tpu.reciprocal %70 : vector<512x1xf32> -> vector<512x1xf32>
    %72 = vector.broadcast %71 : vector<512x1xf32> to vector<512x128xf32>
    %73 = arith.mulf %68, %72 : vector<512x128xf32>
    %c0_48 = arith.constant 0 : index
    %c0_49 = arith.constant 0 : index
    %74 = vector.load %arg16[%c0_48, %c0_49] : memref<512x128xf32, #tpu.memory_space<vmem>>, vector<512x128xf32>
    tpu.vector_store %arg16[%c0_48, %c0_49], %73 {strides = array<i32>} : memref<512x128xf32, #tpu.memory_space<vmem>>, vector<512x128xf32>,
    return
  }
  func.func @transform_0(%arg0: i32) -> (i32, i32) {
    %c0_i32 = arith.constant 0 : i32
    %c0_i32_0 = arith.constant 0 : i32
    return %arg0, %c0_i32 : i32, i32
  }
  func.func @transform_1(%arg0: i32) -> (i32, i32) {
    %c0_i32 = arith.constant 0 : i32
    %c0_i32_0 = arith.constant 0 : i32
    %c0_i32_1 = arith.constant 0 : i32
    return %c0_i32, %c0_i32_0 : i32, i32
  }
  func.func @transform_2(%arg0: i32) -> (i32, i32) {
    %c0_i32 = arith.constant 0 : i32
    %c0_i32_0 = arith.constant 0 : i32
    %c0_i32_1 = arith.constant 0 : i32
    return %c0_i32, %c0_i32_0 : i32, i32
  }
  func.func @transform_3(%arg0: i32) -> (i32, i32) {
    %c0_i32 = arith.constant 0 : i32
    %c0_i32_0 = arith.constant 0 : i32
    %c0_i32_1 = arith.constant 0 : i32
    return %c0_i32, %c0_i32_0 : i32, i32
  }
  func.func @transform_4(%arg0: i32) -> (i32, i32) {
    %c0_i32 = arith.constant 0 : i32
    %c0_i32_0 = arith.constant 0 : i32
    %c0_i32_1 = arith.constant 0 : i32
    return %c0_i32, %c0_i32_0 : i32, i32
  }
  func.func @transform_5(%arg0: i32) -> (i32, i32) {
    %c0_i32 = arith.constant 0 : i32
    %c0_i32_0 = arith.constant 0 : i32
    %c0_i32_1 = arith.constant 0 : i32
    return %c0_i32, %c0_i32_0 : i32, i32
  }
  func.func @transform_6(%arg0: i32) -> (i32, i32) {
    %c0_i32 = arith.constant 0 : i32
    %c0_i32_0 = arith.constant 0 : i32
    %c0_i32_1 = arith.constant 0 : i32
    return %c0_i32, %c0_i32_0 : i32, i32
  }
  func.func @transform_7(%arg0: i32) -> (i32, i32) {
    %c0_i32 = arith.constant 0 : i32
    %c0_i32_0 = arith.constant 0 : i32
    %c0_i32_1 = arith.constant 0 : i32
    return %c0_i32, %c0_i32_0 : i32, i32
  }
  func.func @transform_8(%arg0: i32) -> (i32, i32) {
    %c0_i32 = arith.constant 0 : i32
    %c0_i32_0 = arith.constant 0 : i32
    %c0_i32_1 = arith.constant 0 : i32
    return %c0_i32, %c0_i32_0 : i32, i32
  }
  func.func @transform_9(%arg0: i32) -> (i32, i32) {
    %c0_i32 = arith.constant 0 : i32
    %c0_i32_0 = arith.constant 0 : i32
    %c0_i32_1 = arith.constant 0 : i32
    return %c0_i32, %c0_i32_0 : i32, i32
  }
  func.func @transform_10(%arg0: i32) -> (i32, i32) {
    %c0_i32 = arith.constant 0 : i32
    %c0_i32_0 = arith.constant 0 : i32
    %c0_i32_1 = arith.constant 0 : i32
    return %c0_i32, %c0_i32_0 : i32, i32
  }
  func.func @transform_11(%arg0: i32) -> (i32, i32) {
    %c0_i32 = arith.constant 0 : i32
    %c0_i32_0 = arith.constant 0 : i32
    %c0_i32_1 = arith.constant 0 : i32
    return %c0_i32, %c0_i32_0 : i32, i32
  }
  func.func @transform_12(%arg0: i32) -> (i32, i32) {
    %c0_i32 = arith.constant 0 : i32
    %c0_i32_0 = arith.constant 0 : i32
    %c0_i32_1 = arith.constant 0 : i32
    return %c0_i32, %c0_i32_0 : i32, i32
  }
  func.func @transform_13(%arg0: i32) -> (i32, i32) {
    %c0_i32 = arith.constant 0 : i32
    %c0_i32_0 = arith.constant 0 : i32
    %c0_i32_1 = arith.constant 0 : i32
    return %c0_i32, %c0_i32_0 : i32, i32
  }
  func.func @transform_14(%arg0: i32) -> (i32, i32) {
    %c0_i32 = arith.constant 0 : i32
    %c0_i32_0 = arith.constant 0 : i32
    %c0_i32_1 = arith.constant 0 : i32
    return %c0_i32, %c0_i32_0 : i32, i32
  }
  func.func @transform_15(%arg0: i32) -> (i32, i32) {
    %c0_i32 = arith.constant 0 : i32
    %c0_i32_0 = arith.constant 0 : i32
    return %arg0, %c0_i32 : i32, i32
  }
  func.func @transform_16(%arg0: i32) -> (i32, i32) {
    %c0_i32 = arith.constant 0 : i32
    %c0_i32_0 = arith.constant 0 : i32
    return %arg0, %c0_i32 : i32, i32
  }
}

module attributes {stable_mosaic.version = 11 : i64} {
  func.func @kernel(%arg0: i32, %arg1: memref<512x32xbf16, #tpu.memory_space<vmem>>, %arg2: memref<32x128xbf16, #tpu.memory_space<vmem>>, %arg3: memref<1x128xf32, #tpu.memory_space<vmem>>, %arg4: memref<128x128xbf16, #tpu.memory_space<vmem>>, %arg5: memref<1x128xf32, #tpu.memory_space<vmem>>, %arg6: memref<128x128xbf16, #tpu.memory_space<vmem>>, %arg7: memref<1x128xf32, #tpu.memory_space<vmem>>, %arg8: memref<128x128xbf16, #tpu.memory_space<vmem>>, %arg9: memref<1x128xf32, #tpu.memory_space<vmem>>, %arg10: memref<128x128xbf16, #tpu.memory_space<vmem>>, %arg11: memref<1x128xf32, #tpu.memory_space<vmem>>, %arg12: memref<128x128xbf16, #tpu.memory_space<vmem>>, %arg13: memref<1x128xf32, #tpu.memory_space<vmem>>, %arg14: memref<128x128xbf16, #tpu.memory_space<vmem>>, %arg15: memref<1x128xf32, #tpu.memory_space<vmem>>, %arg16: memref<512x128xf32, #tpu.memory_space<vmem>>, %arg17: memref<512x128xf32, #tpu.memory_space<vmem>>) attributes {dimension_semantics = [#tpu.dimension_semantics<parallel>], iteration_bounds = array<i64: 1>, scalar_prefetch = 0 : i64, scratch_operands = 0 : i64, tpu.core_type = #tpu.core_type<tc>, window_params = [{transform_indices = @transform_0, window_bounds = array<i64: 512, 32>}, {pipeline_mode = #tpu.pipeline_mode<synchronous>, transform_indices = @transform_1, window_bounds = array<i64: 32, 128>}, {pipeline_mode = #tpu.pipeline_mode<synchronous>, transform_indices = @transform_2, window_bounds = array<i64: 1, 128>}, {pipeline_mode = #tpu.pipeline_mode<synchronous>, transform_indices = @transform_3, window_bounds = array<i64: 128, 128>}, {pipeline_mode = #tpu.pipeline_mode<synchronous>, transform_indices = @transform_4, window_bounds = array<i64: 1, 128>}, {pipeline_mode = #tpu.pipeline_mode<synchronous>, transform_indices = @transform_5, window_bounds = array<i64: 128, 128>}, {pipeline_mode = #tpu.pipeline_mode<synchronous>, transform_indices = @transform_6, window_bounds = array<i64: 1, 128>}, {pipeline_mode = #tpu.pipeline_mode<synchronous>, transform_indices = @transform_7, window_bounds = array<i64: 128, 128>}, {pipeline_mode = #tpu.pipeline_mode<synchronous>, transform_indices = @transform_8, window_bounds = array<i64: 1, 128>}, {pipeline_mode = #tpu.pipeline_mode<synchronous>, transform_indices = @transform_9, window_bounds = array<i64: 128, 128>}, {pipeline_mode = #tpu.pipeline_mode<synchronous>, transform_indices = @transform_10, window_bounds = array<i64: 1, 128>}, {pipeline_mode = #tpu.pipeline_mode<synchronous>, transform_indices = @transform_11, window_bounds = array<i64: 128, 128>}, {pipeline_mode = #tpu.pipeline_mode<synchronous>, transform_indices = @transform_12, window_bounds = array<i64: 1, 128>}, {pipeline_mode = #tpu.pipeline_mode<synchronous>, transform_indices = @transform_13, window_bounds = array<i64: 128, 128>}, {pipeline_mode = #tpu.pipeline_mode<synchronous>, transform_indices = @transform_14, window_bounds = array<i64: 1, 128>}, {transform_indices = @transform_15, window_bounds = array<i64: 512, 128>}, {transform_indices = @transform_16, window_bounds = array<i64: 512, 128>}]} {
    %c0 = arith.constant 0 : index
    %c0_0 = arith.constant 0 : index
    %0 = vector.load %arg1[%c0, %c0_0] : memref<512x32xbf16, #tpu.memory_space<vmem>>, vector<512x32xbf16>
    %c0_1 = arith.constant 0 : index
    %c0_2 = arith.constant 0 : index
    %1 = vector.load %arg2[%c0_1, %c0_2] : memref<32x128xbf16, #tpu.memory_space<vmem>>, vector<32x128xbf16>
    %c0_3 = arith.constant 0 : index
    %c0_4 = arith.constant 0 : index
    %2 = vector.load %arg3[%c0_3, %c0_4] : memref<1x128xf32, #tpu.memory_space<vmem>>, vector<1x128xf32>
    %cst = arith.constant dense<0.000000e+00> : vector<512x128xf32>
    %3 = tpu.matmul %0, %1, %cst {dimension_numbers = #tpu.dot_dimension_numbers<[1], [0], [0], [1], [0, 0, 1, 1], [], []>} : vector<512x32xbf16>, vector<32x128xbf16>, vector<512x128xf32> -> vector<512x128xf32>
    %4 = vector.broadcast %2 : vector<1x128xf32> to vector<512x128xf32>
    %5 = arith.addf %3, %4 : vector<512x128xf32>
    %cst_5 = arith.constant 0.000000e+00 : f32
    %6 = vector.broadcast %cst_5 : f32 to vector<512x128xf32>
    %7 = arith.maximumf %5, %6 : vector<512x128xf32>
    %c0_6 = arith.constant 0 : index
    %c0_7 = arith.constant 0 : index
    %8 = vector.load %arg4[%c0_6, %c0_7] : memref<128x128xbf16, #tpu.memory_space<vmem>>, vector<128x128xbf16>
    %c0_8 = arith.constant 0 : index
    %c0_9 = arith.constant 0 : index
    %9 = vector.load %arg5[%c0_8, %c0_9] : memref<1x128xf32, #tpu.memory_space<vmem>>, vector<1x128xf32>
    %10 = arith.truncf %7 : vector<512x128xf32> to vector<512x128xbf16>
    %cst_10 = arith.constant dense<0.000000e+00> : vector<512x128xf32>
    %11 = tpu.matmul %10, %8, %cst_10 {dimension_numbers = #tpu.dot_dimension_numbers<[1], [0], [0], [1], [0, 0, 1, 1], [], []>} : vector<512x128xbf16>, vector<128x128xbf16>, vector<512x128xf32> -> vector<512x128xf32>
    %12 = vector.broadcast %9 : vector<1x128xf32> to vector<512x128xf32>
    %13 = arith.addf %11, %12 : vector<512x128xf32>
    %cst_11 = arith.constant 0.000000e+00 : f32
    %14 = vector.broadcast %cst_11 : f32 to vector<512x128xf32>
    %15 = arith.maximumf %13, %14 : vector<512x128xf32>
    %c0_12 = arith.constant 0 : index
    %c0_13 = arith.constant 0 : index
    %16 = vector.load %arg6[%c0_12, %c0_13] : memref<128x128xbf16, #tpu.memory_space<vmem>>, vector<128x128xbf16>
    %c0_14 = arith.constant 0 : index
    %c0_15 = arith.constant 0 : index
    %17 = vector.load %arg7[%c0_14, %c0_15] : memref<1x128xf32, #tpu.memory_space<vmem>>, vector<1x128xf32>
    %18 = arith.truncf %15 : vector<512x128xf32> to vector<512x128xbf16>
    %cst_16 = arith.constant dense<0.000000e+00> : vector<512x128xf32>
    %19 = tpu.matmul %18, %16, %cst_16 {dimension_numbers = #tpu.dot_dimension_numbers<[1], [0], [0], [1], [0, 0, 1, 1], [], []>} : vector<512x128xbf16>, vector<128x128xbf16>, vector<512x128xf32> -> vector<512x128xf32>
    %20 = vector.broadcast %17 : vector<1x128xf32> to vector<512x128xf32>
    %21 = arith.addf %19, %20 : vector<512x128xf32>
    %c0_17 = arith.constant 0 : index
    %c0_18 = arith.constant 0 : index
    %22 = vector.load %arg8[%c0_17, %c0_18] : memref<128x128xbf16, #tpu.memory_space<vmem>>, vector<128x128xbf16>
    %c0_19 = arith.constant 0 : index
    %c0_20 = arith.constant 0 : index
    %23 = vector.load %arg9[%c0_19, %c0_20] : memref<1x128xf32, #tpu.memory_space<vmem>>, vector<1x128xf32>
    %24 = arith.truncf %21 : vector<512x128xf32> to vector<512x128xbf16>
    %cst_21 = arith.constant dense<0.000000e+00> : vector<512x128xf32>
    %25 = tpu.matmul %24, %22, %cst_21 {dimension_numbers = #tpu.dot_dimension_numbers<[1], [0], [0], [1], [0, 0, 1, 1], [], []>} : vector<512x128xbf16>, vector<128x128xbf16>, vector<512x128xf32> -> vector<512x128xf32>
    %26 = vector.broadcast %23 : vector<1x128xf32> to vector<512x128xf32>
    %27 = arith.addf %25, %26 : vector<512x128xf32>
    %cst_22 = arith.constant 0.000000e+00 : f32
    %28 = vector.broadcast %cst_22 : f32 to vector<512x128xf32>
    %29 = arith.maximumf %27, %28 : vector<512x128xf32>
    %c0_23 = arith.constant 0 : index
    %c0_24 = arith.constant 0 : index
    %30 = vector.load %arg10[%c0_23, %c0_24] : memref<128x128xbf16, #tpu.memory_space<vmem>>, vector<128x128xbf16>
    %c0_25 = arith.constant 0 : index
    %c0_26 = arith.constant 0 : index
    %31 = vector.load %arg11[%c0_25, %c0_26] : memref<1x128xf32, #tpu.memory_space<vmem>>, vector<1x128xf32>
    %32 = arith.truncf %29 : vector<512x128xf32> to vector<512x128xbf16>
    %cst_27 = arith.constant dense<0.000000e+00> : vector<512x128xf32>
    %33 = tpu.matmul %32, %30, %cst_27 {dimension_numbers = #tpu.dot_dimension_numbers<[1], [0], [0], [1], [0, 0, 1, 1], [], []>} : vector<512x128xbf16>, vector<128x128xbf16>, vector<512x128xf32> -> vector<512x128xf32>
    %34 = vector.broadcast %31 : vector<1x128xf32> to vector<512x128xf32>
    %35 = arith.addf %33, %34 : vector<512x128xf32>
    %cst_28 = arith.constant 0.000000e+00 : f32
    %36 = vector.broadcast %cst_28 : f32 to vector<512x128xf32>
    %37 = arith.maximumf %35, %36 : vector<512x128xf32>
    %c0_29 = arith.constant 0 : index
    %c0_30 = arith.constant 0 : index
    %38 = vector.load %arg12[%c0_29, %c0_30] : memref<128x128xbf16, #tpu.memory_space<vmem>>, vector<128x128xbf16>
    %c0_31 = arith.constant 0 : index
    %c0_32 = arith.constant 0 : index
    %39 = vector.load %arg13[%c0_31, %c0_32] : memref<1x128xf32, #tpu.memory_space<vmem>>, vector<1x128xf32>
    %40 = arith.truncf %37 : vector<512x128xf32> to vector<512x128xbf16>
    %cst_33 = arith.constant dense<0.000000e+00> : vector<512x128xf32>
    %41 = tpu.matmul %40, %38, %cst_33 {dimension_numbers = #tpu.dot_dimension_numbers<[1], [0], [0], [1], [0, 0, 1, 1], [], []>} : vector<512x128xbf16>, vector<128x128xbf16>, vector<512x128xf32> -> vector<512x128xf32>
    %42 = vector.broadcast %39 : vector<1x128xf32> to vector<512x128xf32>
    %43 = arith.addf %41, %42 : vector<512x128xf32>
    %c0_34 = arith.constant 0 : index
    %c0_35 = arith.constant 0 : index
    %44 = vector.load %arg17[%c0_34, %c0_35] : memref<512x128xf32, #tpu.memory_space<vmem>>, vector<512x128xf32>
    tpu.vector_store %arg17[%c0_34, %c0_35], %43 {strides = array<i32>} : memref<512x128xf32, #tpu.memory_space<vmem>>, vector<512x128xf32>,
    %45 = arith.mulf %21, %21 : vector<512x128xf32>
    %cst_36 = arith.constant dense<0.000000e+00> : vector<512xf32>
    %46 = vector.multi_reduction <add>, %45, %cst_36 [1] : vector<512x128xf32> to vector<512xf32>
    %47 = vector.shape_cast %46 : vector<512xf32> to vector<512x1xf32>
    %48 = arith.truncf %21 : vector<512x128xf32> to vector<512x128xbf16>
    %c0_37 = arith.constant 0 : index
    %c0_38 = arith.constant 0 : index
    %49 = vector.load %arg14[%c0_37, %c0_38] : memref<128x128xbf16, #tpu.memory_space<vmem>>, vector<128x128xbf16>
    %cst_39 = arith.constant dense<0.000000e+00> : vector<512x128xf32>
    %50 = tpu.matmul %48, %49, %cst_39 {dimension_numbers = #tpu.dot_dimension_numbers<[1], [0], [0], [1], [0, 0, 1, 1], [], []>} : vector<512x128xbf16>, vector<128x128xbf16>, vector<512x128xf32> -> vector<512x128xf32>
    %c0_40 = arith.constant 0 : index
    %c0_41 = arith.constant 0 : index
    %51 = vector.load %arg15[%c0_40, %c0_41] : memref<1x128xf32, #tpu.memory_space<vmem>>, vector<1x128xf32>
    %52 = vector.broadcast %47 : vector<512x1xf32> to vector<512x128xf32>
    %53 = vector.broadcast %51 : vector<1x128xf32> to vector<512x128xf32>
    %54 = arith.addf %52, %53 : vector<512x128xf32>
    %cst_42 = arith.constant 2.000000e+00 : f32
    %55 = vector.broadcast %cst_42 : f32 to vector<512x128xf32>
    %56 = arith.mulf %55, %50 : vector<512x128xf32>
    %57 = arith.subf %54, %56 : vector<512x128xf32>
    %cst_43 = arith.constant 0.000000e+00 : f32
    %58 = vector.broadcast %cst_43 : f32 to vector<512x128xf32>
    %59 = arith.maximumf %57, %58 : vector<512x128xf32>
    %cst_44 = arith.constant 1.000000e+00 : f32
    %60 = vector.broadcast %cst_44 : f32 to vector<512x128xf32>
    %61 = arith.mulf %59, %60 : vector<512x128xf32>
    %cst_45 = arith.constant 1.000000e+00 : f32
    %62 = vector.broadcast %cst_45 : f32 to vector<512x128xf32>
    %63 = arith.addf %62, %61 : vector<512x128xf32>
    %64 = tpu.reciprocal %63 {approx = true} : vector<512x128xf32> -> vector<512x128xf32>
    %65 = arith.mulf %63, %64 : vector<512x128xf32>
    %cst_46 = arith.constant 2.000000e+00 : f32
    %66 = vector.broadcast %cst_46 : f32 to vector<512x128xf32>
    %67 = arith.subf %66, %65 : vector<512x128xf32>
    %68 = arith.mulf %64, %67 : vector<512x128xf32>
    %cst_47 = arith.constant dense<0.000000e+00> : vector<512xf32>
    %69 = vector.multi_reduction <add>, %68, %cst_47 [1] : vector<512x128xf32> to vector<512xf32>
    %70 = vector.shape_cast %69 : vector<512xf32> to vector<512x1xf32>
    %71 = tpu.reciprocal %70 : vector<512x1xf32> -> vector<512x1xf32>
    %72 = vector.broadcast %71 : vector<512x1xf32> to vector<512x128xf32>
    %73 = arith.mulf %68, %72 : vector<512x128xf32>
    %c0_48 = arith.constant 0 : index
    %c0_49 = arith.constant 0 : index
    %74 = vector.load %arg16[%c0_48, %c0_49] : memref<512x128xf32, #tpu.memory_space<vmem>>, vector<512x128xf32>
    tpu.vector_store %arg16[%c0_48, %c0_49], %73 {strides = array<i32>} : memref<512x128xf32, #tpu.memory_space<vmem>>, vector<512x128xf32>,
    return
  }
  func.func @transform_0(%arg0: i32) -> (i32, i32) {
    %c0_i32 = arith.constant 0 : i32
    %c0_i32_0 = arith.constant 0 : i32
    return %arg0, %c0_i32 : i32, i32
  }
  func.func @transform_1(%arg0: i32) -> (i32, i32) {
    %c0_i32 = arith.constant 0 : i32
    %c0_i32_0 = arith.constant 0 : i32
    %c0_i32_1 = arith.constant 0 : i32
    return %c0_i32, %c0_i32_0 : i32, i32
  }
  func.func @transform_2(%arg0: i32) -> (i32, i32) {
    %c0_i32 = arith.constant 0 : i32
    %c0_i32_0 = arith.constant 0 : i32
    %c0_i32_1 = arith.constant 0 : i32
    return %c0_i32, %c0_i32_0 : i32, i32
  }
  func.func @transform_3(%arg0: i32) -> (i32, i32) {
    %c0_i32 = arith.constant 0 : i32
    %c0_i32_0 = arith.constant 0 : i32
    %c0_i32_1 = arith.constant 0 : i32
    return %c0_i32, %c0_i32_0 : i32, i32
  }
  func.func @transform_4(%arg0: i32) -> (i32, i32) {
    %c0_i32 = arith.constant 0 : i32
    %c0_i32_0 = arith.constant 0 : i32
    %c0_i32_1 = arith.constant 0 : i32
    return %c0_i32, %c0_i32_0 : i32, i32
  }
  func.func @transform_5(%arg0: i32) -> (i32, i32) {
    %c0_i32 = arith.constant 0 : i32
    %c0_i32_0 = arith.constant 0 : i32
    %c0_i32_1 = arith.constant 0 : i32
    return %c0_i32, %c0_i32_0 : i32, i32
  }
  func.func @transform_6(%arg0: i32) -> (i32, i32) {
    %c0_i32 = arith.constant 0 : i32
    %c0_i32_0 = arith.constant 0 : i32
    %c0_i32_1 = arith.constant 0 : i32
    return %c0_i32, %c0_i32_0 : i32, i32
  }
  func.func @transform_7(%arg0: i32) -> (i32, i32) {
    %c0_i32 = arith.constant 0 : i32
    %c0_i32_0 = arith.constant 0 : i32
    %c0_i32_1 = arith.constant 0 : i32
    return %c0_i32, %c0_i32_0 : i32, i32
  }
  func.func @transform_8(%arg0: i32) -> (i32, i32) {
    %c0_i32 = arith.constant 0 : i32
    %c0_i32_0 = arith.constant 0 : i32
    %c0_i32_1 = arith.constant 0 : i32
    return %c0_i32, %c0_i32_0 : i32, i32
  }
  func.func @transform_9(%arg0: i32) -> (i32, i32) {
    %c0_i32 = arith.constant 0 : i32
    %c0_i32_0 = arith.constant 0 : i32
    %c0_i32_1 = arith.constant 0 : i32
    return %c0_i32, %c0_i32_0 : i32, i32
  }
  func.func @transform_10(%arg0: i32) -> (i32, i32) {
    %c0_i32 = arith.constant 0 : i32
    %c0_i32_0 = arith.constant 0 : i32
    %c0_i32_1 = arith.constant 0 : i32
    return %c0_i32, %c0_i32_0 : i32, i32
  }
  func.func @transform_11(%arg0: i32) -> (i32, i32) {
    %c0_i32 = arith.constant 0 : i32
    %c0_i32_0 = arith.constant 0 : i32
    %c0_i32_1 = arith.constant 0 : i32
    return %c0_i32, %c0_i32_0 : i32, i32
  }
  func.func @transform_12(%arg0: i32) -> (i32, i32) {
    %c0_i32 = arith.constant 0 : i32
    %c0_i32_0 = arith.constant 0 : i32
    %c0_i32_1 = arith.constant 0 : i32
    return %c0_i32, %c0_i32_0 : i32, i32
  }
  func.func @transform_13(%arg0: i32) -> (i32, i32) {
    %c0_i32 = arith.constant 0 : i32
    %c0_i32_0 = arith.constant 0 : i32
    %c0_i32_1 = arith.constant 0 : i32
    return %c0_i32, %c0_i32_0 : i32, i32
  }
  func.func @transform_14(%arg0: i32) -> (i32, i32) {
    %c0_i32 = arith.constant 0 : i32
    %c0_i32_0 = arith.constant 0 : i32
    %c0_i32_1 = arith.constant 0 : i32
    return %c0_i32, %c0_i32_0 : i32, i32
  }
  func.func @transform_15(%arg0: i32) -> (i32, i32) {
    %c0_i32 = arith.constant 0 : i32
    %c0_i32_0 = arith.constant 0 : i32
    return %arg0, %c0_i32 : i32, i32
  }
  func.func @transform_16(%arg0: i32) -> (i32, i32) {
    %c0_i32 = arith.constant 0 : i32
    %c0_i32_0 = arith.constant 0 : i32
    return %arg0, %c0_i32 : i32, i32
  }
}

</mosaic_0001>

<bundles_post_ra>
// kernel: tpu_custom_call.1
= control target key start
LH: loop header
LB: loop body
LE: loop exit
PB: predicated region body
PF: predicated region fallthrough
CT: control target
= control target key end

     0   :  { %s7924_s0 = inlined_call_operand.vmem [shape: bf16[512,32], index: 0, kind: input, shape index: {}]   ;;  %s7925_s1 = inlined_call_operand.hbm [shape: bf16[32,128], index: 1, kind: input, shape index: {}]   ;;  %s7926_s2 = inlined_call_operand.vmem [shape: f32[1,128], index: 2, kind: input, shape index: {}]   ;;  %s7927_s3 = inlined_call_operand.vmem [shape: bf16[128,128], index: 3, kind: input, shape index: {}]   ;;  %s7928_s4 = inlined_call_operand.vmem [shape: f32[1,128], index: 4, kind: input, shape index: {}]   ;;  %s7929_s5 = inlined_call_operand.vmem [shape: bf16[128,128], index: 5, kind: input, shape index: {}]   ;;  %s7930_s6 = inlined_call_operand.vmem [shape: f32[1,128], index: 6, kind: input, shape index: {}]   ;;  %s7931_s7 = inlined_call_operand.vmem [shape: bf16[128,128], index: 7, kind: input, shape index: {}]   ;;  %s7932_s8 = inlined_call_operand.vmem [shape: f32[1,128], index: 8, kind: input, shape index: {}]   ;;  %s7933_s9 = inlined_call_operand.vmem [shape: bf16[128,128], index: 9, kind: input, shape index: {}]   ;;  %s7934_s10 = inlined_call_operand.vmem [shape: f32[1,128], index: 10, kind: input, shape index: {}]   ;;  %s7935_s11 = inlined_call_operand.vmem [shape: bf16[128,128], index: 11, kind: input, shape index: {}]   ;;  %s7936_s12 = inlined_call_operand.vmem [shape: f32[1,128], index: 12, kind: input, shape index: {}]   ;;  %s7937_s13 = inlined_call_operand.hbm [shape: bf16[128,128], index: 13, kind: input, shape index: {}]   ;;  %s7938_s14 = inlined_call_operand.vmem [shape: f32[1,128], index: 14, kind: input, shape index: {}]   ;;  %s7939_s15 = inlined_call_operand.hbm [shape: f32[512,128], index: 15, kind: output, shape index: {0}]   ;;  %s7940_s16 = inlined_call_operand.hbm [shape: f32[512,128], index: 16, kind: output, shape index: {1}]  }
   0x1   :  { %7966 = sst [smem:[#allocation43_spill]] %s7924_s0 }
   0x2   :  { %22 = vsyncpa [#allocation3], 0 }
   0x3   :  { %23 = vsyncpa [#allocation6], 0 }
   0x4   :  { %24 = vsyncpa [#allocation4], 0 }
   0x5   :  { %25 = vsyncpa [#allocation9], 0  ;;  %s5861_s21 = smov [#allocation2]  }
   0x6   :  { %s33_s22 = sshll.u32 %s5861_s21, 4  ;;  %s34_s22 = int_to_ptr.vmem [resolvable:$true] %s33_s22 }
   0x7   :  { %s5781_s23 = scalar_lea.vmem %s34_s22, 256  ;;  %p5786_p1 = scmp.lt.s32.totalorder %s34_s22, %s34_s22 }
   0x8   :  { %p5782_p0 = scmp.ne.s32.totalorder %s34_s22, %s5781_s23  ;;  %p5787_p2 = scmp.lt.s32.totalorder %s5781_s23, %s5781_s23 }
   0xa   :  { %p5788_p3 = por %p5787_p2, %p5786_p1 }
   0xc   :  { %p5789_p4 = pnand %p5788_p3, %p5782_p0 }
   0xe   :  { %5792 = shalt.err (!%p5789_p4)
}
   0xf   :  { %s5862_s24 = smov 64   ;;  %s5863_s25 = smov 4  }
  0x10   :  { %39 = dma.hbm_to_vmem [thread:$0]  %s7925_s1, 256, %s34_s22, [#allocation3], %s5862_s24, %s5862_s24, %s5863_s25  }
  0x11   :  { %s5864_s28 = smov [#allocation5]  }
  0x12   :  { %s67_s29 = sshll.u32 %s5864_s28, 4  ;;  %s68_s29 = int_to_ptr.vmem [resolvable:$true] %s67_s29 }
  0x13   :  { %s5801_s30 = scalar_lea.vmem %s68_s29, 1024  ;;  %p5806_p6 = scmp.lt.s32.totalorder %s68_s29, %s68_s29 }
  0x14   :  { %p5802_p5 = scmp.ne.s32.totalorder %s68_s29, %s5801_s30  ;;  %p5807_p7 = scmp.lt.s32.totalorder %s5801_s30, %s5801_s30 }
  0x16   :  { %p5808_p8 = por %p5807_p7, %p5806_p6 }
  0x18   :  { %p5809_p9 = pnand %p5808_p8, %p5802_p5 }
  0x1a   :  { %5812 = shalt.err (!%p5809_p9)
}
  0x1b   :  { %73 = dma.hbm_to_vmem [thread:$0]  %s7937_s13, 1024, %s68_s29, [#allocation6], %s5862_s24, %s5862_s24, %s5863_s25  }
  0x1c   :  { %5853 = dma.done.wait [#allocation3], 256  }
  0x1d   :  { %5854 = vsyncadd [#allocation3], 4294967040 }
  0x1e   :  { %5855 = dma.done.wait [#allocation6], 1024  }
  0x1f   :  { %5856 = vsyncadd [#allocation6], 4294966272  ;;  %v5433_v0 = vld [vmem:[#allocation2 + $0x8] sm:$0xff]   ;;  %v5434_v1 = vld [vmem:[#allocation2] sm:$0xff]   ;;  %vm330_vm0 = vcmask 261120   ;;  %s7967_s19 = sld [smem:[#allocation43_spill]] }
  0x20   :  { %4873 = vmatprep.subr.bf16.mxu0 %v5433_v0  ;;  %5421 = vmatprep.subr.bf16.mxu1 %v5433_v0  ;;  %v5467_v18 = vld [vmem:[%s7927_s3 + $0x38] sm:$0xff]   ;;  %v5468_v19 = vld [vmem:[%s7927_s3 + $0x30] sm:$0xff]   ;;  %v5469_v23 = vld [vmem:[%s7927_s3 + $0x28] sm:$0xff]  }
  0x21   :  { %4874 = vmatpush3.bf16.msra.mxu0 %v5433_v0  ;;  %5423 = vmatpush3.bf16.msra.mxu1 %v5433_v0  ;;  %v5470_v25 = vld [vmem:[%s7927_s3 + $0x20] sm:$0xff]   ;;  %v5471_v28 = vld [vmem:[%s7927_s3 + $0x18] sm:$0xff]   ;;  %v5472_v31 = vld [vmem:[%s7927_s3 + $0x10] sm:$0xff]  }
  0x22   :  { %4875 = vmatprep.subr.bf16.mxu0 %v5434_v1  ;;  %5422 = vmatprep.subr.bf16.mxu1 %v5434_v1  ;;  %v5473_v34 = vld [vmem:[%s7927_s3 + $0x8] sm:$0xff]   ;;  %v5474_v41 = vld [vmem:[%s7927_s3] sm:$0xff]   ;;  %v5475_v50 = vld [vmem:[%s7929_s5 + $0x38] sm:$0xff]  }
  0x23   :  { %v6115_v44 = vld [vmem:[%s7926_s2] ss:$0 sm:$0xff]  ;;  %v5476_v51 = vld [vmem:[%s7929_s5 + $0x30] sm:$0xff]   ;;  %v5477_v59 = vld [vmem:[%s7929_s5 + $0x28] sm:$0xff]  }
  0x25   :  { %v5435_v2 = vld [vmem:[%s7967_s19] sm:$0xff]   ;;  %v5436_v3 = vld [vmem:[%s7967_s19 + $0x8] sm:$0xff]   ;;  %4876 = vmatpush3.bf16.msra.mxu0 %v5434_v1  ;;  %v5437_v4 = vld [vmem:[%s7967_s19 + $0x10] sm:$0xff]   ;;  %5424 = vmatpush3.bf16.msra.mxu1 %v5434_v1 }
  0x26   :  { %4877 = vmatprep.mubr.msk.bf16.mxu0 %vm330_vm0, %v5435_v2  ;;  %v5438_v5 = vld [vmem:[%s7967_s19 + $0x18] sm:$0xff]   ;;  %v5439_v6 = vld [vmem:[%s7967_s19 + $0x20] sm:$0xff]   ;;  %v5452_v8 = vld [vmem:[%s7967_s19 + $0x88] sm:$0xff]   ;;  %4941 = vmatprep.subr.bf16.mxu1 %v5467_v18 }
  0x27   :  { %v5451_v7 = vld [vmem:[%s7967_s19 + $0x80] sm:$0xff]   ;;  %v5453_v9 = vld [vmem:[%s7967_s19 + $0x90] sm:$0xff]   ;;  %v5440_v10 = vld [vmem:[%s7967_s19 + $0x28] sm:$0xff]   ;;  %5021 = vmatprep.subr.bf16.mxu0 %v5475_v50 }
  0x28   :  { %4878 = vmatmul.mubr.msk.bf16.vlgmr.msra.gmra.mxu0 %vm330_vm0, %v5436_v3  ;;  %4909 = vmatprep.mubr.msk.bf16.mxu1 %vm330_vm0, %v5451_v7  ;;  %v5441_v11 = vld [vmem:[%s7967_s19 + $0x30] sm:$0xff]   ;;  %v5454_v12 = vld [vmem:[%s7967_s19 + $0x98] sm:$0xff]   ;;  %v5455_v13 = vld [vmem:[%s7967_s19 + $0xa0] sm:$0xff]  }
  0x29   :  { %4881 = vmatprep.mubr.msk.bf16.mxu0 %vm330_vm0, %v5437_v4  ;;  %4910 = vmatmul.mubr.msk.bf16.vlgmr.msra.gmra.mxu1 %vm330_vm0, %v5452_v8  ;;  %v5442_v14 = vld [vmem:[%s7967_s19 + $0x38] sm:$0xff]   ;;  %v5443_v15 = vld [vmem:[%s7967_s19 + $0x40] sm:$0xff]   ;;  %v5456_v16 = vld [vmem:[%s7967_s19 + $0xa8] sm:$0xff]  }
  0x2a   :  { %4913 = vmatprep.mubr.msk.bf16.mxu1 %vm330_vm0, %v5453_v9  ;;  %v5457_v17 = vld [vmem:[%s7967_s19 + $0xb0] sm:$0xff]   ;;  %v5444_v20 = vld [vmem:[%s7967_s19 + $0x48] sm:$0xff]   ;;  %4942 = vmatpush3.bf16.msra.mxu1 %v5467_v18  ;;  %v5458_v22 = vld [vmem:[%s7967_s19 + $0xb8] sm:$0xff]  }
  0x2b   :  { %v5445_v21 = vld [vmem:[%s7967_s19 + $0x50] sm:$0xff]   ;;  %4943 = vmatprep.subr.bf16.mxu1 %v5468_v19  ;;  %v5459_v24 = vld [vmem:[%s7967_s19 + $0xc0] sm:$0xff]   ;;  %v5446_v26 = vld [vmem:[%s7967_s19 + $0x58] sm:$0xff]   ;;  %5022 = vmatpush3.bf16.msra.mxu0 %v5475_v50 }
  0x2c   :  { %v5447_v27 = vld [vmem:[%s7967_s19 + $0x60] sm:$0xff]   ;;  %v5460_v29 = vld [vmem:[%s7967_s19 + $0xc8] sm:$0xff]   ;;  %v5461_v30 = vld [vmem:[%s7967_s19 + $0xd0] sm:$0xff]   ;;  %5023 = vmatprep.subr.bf16.mxu0 %v5476_v51 }
  0x2d   :  { %v5448_v32 = vld [vmem:[%s7967_s19 + $0x68] sm:$0xff]   ;;  %v5449_v33 = vld [vmem:[%s7967_s19 + $0x70] sm:$0xff]   ;;  %v5462_v35 = vld [vmem:[%s7967_s19 + $0xd8] sm:$0xff]  }
  0x2e   :  { %4944 = vmatpush3.bf16.msra.mxu1 %v5468_v19  ;;  %v5463_v36 = vld [vmem:[%s7967_s19 + $0xe0] sm:$0xff]   ;;  %v5450_v37 = vld [vmem:[%s7967_s19 + $0x78] sm:$0xff]   ;;  %v5464_v38 = vld [vmem:[%s7967_s19 + $0xe8] sm:$0xff]  }
  0x2f   :  { %4945 = vmatprep.subr.bf16.mxu1 %v5469_v23  ;;  %v5465_v39 = vld [vmem:[%s7967_s19 + $0xf0] sm:$0xff]   ;;  %v5466_v40 = vld [vmem:[%s7967_s19 + $0xf8] sm:$0xff]   ;;  %5024 = vmatpush3.bf16.msra.mxu0 %v5476_v51 }
  0x30   :  { %4882 = vmatmul.mubr.msk.bf16.gmra.mxu0 %vm330_vm0, %v5438_v5  ;;  %5025 = vmatprep.subr.bf16.mxu0 %v5477_v59  ;;  %v5478_v5 = vld [vmem:[%s7929_s5 + $0x20] sm:$0xff]  }
  0x31   :  { %4885 = vmatprep.mubr.msk.bf16.mxu0 %vm330_vm0, %v5439_v6  ;;  %4914 = vmatmul.mubr.msk.bf16.gmra.mxu1 %vm330_vm0, %v5454_v12 }
  0x32   :  { %4917 = vmatprep.mubr.msk.bf16.mxu1 %vm330_vm0, %v5455_v13  ;;  %4946 = vmatpush3.bf16.msra.mxu1 %v5469_v23 }
  0x33   :  { %4947 = vmatprep.subr.bf16.mxu1 %v5470_v25  ;;  %5026 = vmatpush3.bf16.msra.mxu0 %v5477_v59 }
  0x34   :  { %5027 = vmatprep.subr.bf16.mxu0 %v5478_v5 }
  0x36   :  { %4948 = vmatpush3.bf16.msra.mxu1 %v5470_v25  ;;  %v5480_v25 = vld [vmem:[%s7929_s5 + $0x10] sm:$0xff]  }
  0x37   :  { %4949 = vmatprep.subr.bf16.mxu1 %v5471_v28  ;;  %5028 = vmatpush3.bf16.msra.mxu0 %v5478_v5 }
  0x38   :  { %4886 = vmatmul.mubr.msk.bf16.gmra.mxu0 %vm330_vm0, %v5440_v10 }
  0x39   :  { %4889 = vmatprep.mubr.msk.bf16.mxu0 %vm330_vm0, %v5441_v11  ;;  %4918 = vmatmul.mubr.msk.bf16.gmra.mxu1 %vm330_vm0, %v5456_v16 }
  0x3a   :  { %4921 = vmatprep.mubr.msk.bf16.mxu1 %vm330_vm0, %v5457_v17  ;;  %4950 = vmatpush3.bf16.msra.mxu1 %v5471_v28 }
  0x3b   :  { %4951 = vmatprep.subr.bf16.mxu1 %v5472_v31 }
  0x3e   :  { %4952 = vmatpush3.bf16.msra.mxu1 %v5472_v31 }
  0x3f   :  { %4953 = vmatprep.subr.bf16.mxu1 %v5473_v34 }
  0x40   :  { %4890 = vmatmul.mubr.msk.bf16.gmra.mxu0 %vm330_vm0, %v5442_v14 }
  0x41   :  { %4893 = vmatprep.mubr.msk.bf16.mxu0 %vm330_vm0, %v5443_v15  ;;  %4922 = vmatmul.mubr.msk.bf16.gmra.mxu1 %vm330_vm0, %v5458_v22  ;;  %v5479_v15 = vld [vmem:[%s7929_s5 + $0x18] sm:$0xff]  }
  0x42   :  { %4925 = vmatprep.mubr.msk.bf16.mxu1 %vm330_vm0, %v5459_v24  ;;  %4954 = vmatpush3.bf16.msra.mxu1 %v5473_v34 }
  0x43   :  { %4955 = vmatprep.subr.bf16.mxu1 %v5474_v41  ;;  %5029 = vmatprep.subr.bf16.mxu0 %v5479_v15 }
  0x44   :  { %5030 = vmatpush3.bf16.msra.mxu0 %v5479_v15 }
  0x45   :  { %5031 = vmatprep.subr.bf16.mxu0 %v5480_v25 }
  0x46   :  { %4956 = vmatpush3.bf16.msra.mxu1 %v5474_v41 }
  0x48   :  { %4894 = vmatmul.mubr.msk.bf16.gmra.mxu0 %vm330_vm0, %v5444_v20 }
  0x49   :  { %4897 = vmatprep.mubr.msk.bf16.mxu0 %vm330_vm0, %v5445_v21  ;;  %4926 = vmatmul.mubr.msk.bf16.gmra.mxu1 %vm330_vm0, %v5460_v29 }
  0x4a   :  { %4929 = vmatprep.mubr.msk.bf16.mxu1 %vm330_vm0, %v5461_v30  ;;  %5032 = vmatpush3.bf16.msra.mxu0 %v5480_v25 }
  0x50   :  { %4898 = vmatmul.mubr.msk.bf16.gmra.mxu0 %vm330_vm0, %v5446_v26 }
  0x51   :  { %4901 = vmatprep.mubr.msk.bf16.mxu0 %vm330_vm0, %v5447_v27  ;;  %4930 = vmatmul.mubr.msk.bf16.gmra.mxu1 %vm330_vm0, %v5462_v35  ;;  %v5481_v35 = vld [vmem:[%s7929_s5 + $0x8] sm:$0xff]  }
  0x52   :  { %4933 = vmatprep.mubr.msk.bf16.mxu1 %vm330_vm0, %v5463_v36  ;;  %5033 = vmatprep.subr.bf16.mxu0 %v5481_v35 }
  0x53   :  { %5034 = vmatpush3.bf16.msra.mxu0 %v5481_v35 }
  0x58   :  { %4902 = vmatmul.mubr.msk.bf16.gmra.mxu0 %vm330_vm0, %v5448_v32 }
  0x59   :  { %4905 = vmatprep.mubr.msk.bf16.mxu0 %vm330_vm0, %v5449_v33  ;;  %4934 = vmatmul.mubr.msk.bf16.gmra.mxu1 %vm330_vm0, %v5464_v38 }
  0x5a   :  { %4937 = vmatprep.mubr.msk.bf16.mxu1 %vm330_vm0, %v5465_v39 }
  0x60   :  { %4906 = vmatmul.mubr.msk.bf16.gmra.mxu0 %vm330_vm0, %v5450_v37 }
  0x61   :  { %4938 = vmatmul.mubr.msk.bf16.gmra.mxu1 %vm330_vm0, %v5466_v40 }
  0xe8   :  { %v4879_v42 = vpop.f32.mrf.mxu0 }
  0xe9   :  { %v470_v48 = vadd.f32 %v4879_v42, %v6115_v44  ;;  %v6130_v61 = vpop.f32.mrf.mxu1 }
  0xea   :  { %v461_v43 = vpop.f32.mrf.mxu0 }
  0xeb   :  { %v462_v46 = vadd.f32 %v6115_v44, %v461_v43  ;;  %v718_v57 = vmax.f32 %v470_v48, 0.0  ;;  %v6134_v2 = vpop.f32.mrf.mxu1 }
  0xec   :  { %v4880_v45 = vpop.f32.mrf.mxu0 }
  0xed   :  { %v473_v47 = vadd.f32 %v4880_v45, %v6115_v44  ;;  %v716_v55 = vmax.f32 %v462_v46, 0.0  ;;  %v6141_v7 = vpop.f32.mrf.mxu1 }
  0xee   :  { %v464_v49 = vpop.f32.mrf.mxu0 }
  0xef   :  { %v465_v52 = vadd.f32 %v6115_v44, %v464_v49  ;;  %v719_v53 = vmax.f32 %v473_v47, 0.0  ;;  %v6143_v12 = vpop.f32.mrf.mxu1 }
  0xf0   :  { %v4883_v54 = vpop.f32.mrf.mxu0 }
  0xf1   :  { %v717_v56 = vmax.f32 %v465_v52, 0.0  ;;  %v798_v62 = vpack.c.bf16 %v719_v53, %v718_v57  ;;  %v486_v3 = vadd.f32 %v4883_v54, %v6115_v44  ;;  %v6148_v17 = vpop.f32.mrf.mxu1 }
  0xf2   :  { %v477_v58 = vpop.f32.mrf.mxu0 }
  0xf3   :  { %v797_v60 = vpack.c.bf16 %v717_v56, %v716_v55  ;;  %v478_v0 = vadd.f32 %v6115_v44, %v477_v58  ;;  %v722_v13 = vmax.f32 %v486_v3, 0.0  ;;  %v6152_v22 = vpop.f32.mrf.mxu1 }
  0xf4   :  { %v4884_v63 = vpop.f32.mrf.mxu0 }
  0xf5   :  { %v489_v1 = vadd.f32 %v4884_v63, %v6115_v44  ;;  %4957 = vmatprep.mubr.bf16.mxu1 %v797_v60  ;;  %v720_v10 = vmax.f32 %v478_v0, 0.0  ;;  %v6159_v27 = vpop.f32.mrf.mxu1 }
  0xf6   :  { %v480_v4 = vpop.f32.mrf.mxu0  ;;  %4958 = vmatmul.mubr.bf16.vlgmr.msra.gmra.mxu1 %v798_v62 }
  0xf7   :  { %v481_v6 = vadd.f32 %v6115_v44, %v480_v4  ;;  %v723_v8 = vmax.f32 %v489_v1, 0.0  ;;  %v6161_v32 = vpop.f32.mrf.mxu1 }
  0xf8   :  { %v4887_v9 = vpop.f32.mrf.mxu0 }
  0xf9   :  { %v721_v11 = vmax.f32 %v481_v6, 0.0  ;;  %v800_v18 = vpack.c.bf16 %v723_v8, %v722_v13  ;;  %v502_v23 = vadd.f32 %v4887_v9, %v6115_v44  ;;  %v6166_v37 = vpop.f32.mrf.mxu1 }
  0xfa   :  { %v493_v14 = vpop.f32.mrf.mxu0 }
  0xfb   :  { %v799_v16 = vpack.c.bf16 %v721_v11, %v720_v10  ;;  %v494_v20 = vadd.f32 %v6115_v44, %v493_v14  ;;  %v726_v33 = vmax.f32 %v502_v23, 0.0  ;;  %v6170_v42 = vpop.f32.mrf.mxu1 }
  0xfc   :  { %v4888_v19 = vpop.f32.mrf.mxu0 }
  0xfd   :  { %v505_v21 = vadd.f32 %v4888_v19, %v6115_v44  ;;  %4961 = vmatprep.mubr.bf16.mxu1 %v799_v16  ;;  %v724_v30 = vmax.f32 %v494_v20, 0.0  ;;  %v6174_v47 = vpop.f32.mrf.mxu1 }
  0xfe   :  { %v496_v24 = vpop.f32.mrf.mxu0  ;;  %4962 = vmatmul.mubr.bf16.gmra.mxu1 %v800_v18 }
  0xff   :  { %v497_v26 = vadd.f32 %v6115_v44, %v496_v24  ;;  %v727_v28 = vmax.f32 %v505_v21, 0.0  ;;  %v6176_v52 = vpop.f32.mrf.mxu1 }
 0x100   :  { %v4891_v29 = vpop.f32.mrf.mxu0 }
 0x101   :  { %v725_v31 = vmax.f32 %v497_v26, 0.0  ;;  %v802_v38 = vpack.c.bf16 %v727_v28, %v726_v33  ;;  %v518_v43 = vadd.f32 %v4891_v29, %v6115_v44  ;;  %v6178_v58 = vpop.f32.mrf.mxu1 }
 0x102   :  { %v509_v34 = vpop.f32.mrf.mxu0 }
 0x103   :  { %v801_v36 = vpack.c.bf16 %v725_v31, %v724_v30  ;;  %v510_v40 = vadd.f32 %v6115_v44, %v509_v34  ;;  %v730_v53 = vmax.f32 %v518_v43, 0.0  ;;  %v6184_v4 = vpop.f32.mrf.mxu1 }
 0x104   :  { %v4892_v39 = vpop.f32.mrf.mxu0 }
 0x105   :  { %v521_v41 = vadd.f32 %v4892_v39, %v6115_v44  ;;  %4965 = vmatprep.mubr.bf16.mxu1 %v801_v36  ;;  %v728_v50 = vmax.f32 %v510_v40, 0.0  ;;  %v6186_v14 = vpop.f32.mrf.mxu1 }
 0x106   :  { %v512_v45 = vpop.f32.mrf.mxu0  ;;  %4966 = vmatmul.mubr.bf16.gmra.mxu1 %v802_v38 }
 0x107   :  { %v513_v46 = vadd.f32 %v6115_v44, %v512_v45  ;;  %v731_v48 = vmax.f32 %v521_v41, 0.0  ;;  %v6192_v24 = vpop.f32.mrf.mxu1 }
 0x108   :  { %v4895_v49 = vpop.f32.mrf.mxu0 }
 0x109   :  { %v729_v51 = vmax.f32 %v513_v46, 0.0  ;;  %v804_v56 = vpack.c.bf16 %v731_v48, %v730_v53  ;;  %v534_v62 = vadd.f32 %v4895_v49, %v6115_v44  ;;  %v6194_v34 = vpop.f32.mrf.mxu1 }
 0x10a   :  { %v525_v54 = vpop.f32.mrf.mxu0 }
 0x10b   :  { %v803_v55 = vpack.c.bf16 %v729_v51, %v728_v50  ;;  %v526_v59 = vadd.f32 %v6115_v44, %v525_v54  ;;  %v734_v8 = vmax.f32 %v534_v62, 0.0  ;;  %v6200_v45 = vpop.f32.mrf.mxu1  ;;  %v590_v51 = vadd.f32 %v6115_v44, %v6134_v2 }
 0x10c   :  { %v4896_v57 = vpop.f32.mrf.mxu0  ;;  %v593_v54 = vadd.f32 %v6115_v44, %v6143_v12 }
 0x10d   :  { %v537_v60 = vadd.f32 %v4896_v57, %v6115_v44  ;;  %4969 = vmatprep.mubr.bf16.mxu1 %v803_v55  ;;  %v732_v5 = vmax.f32 %v526_v59, 0.0  ;;  %v6206_v57 = vpop.f32.mrf.mxu1 }
 0x10e   :  { %v528_v63 = vpop.f32.mrf.mxu0  ;;  %4970 = vmatmul.mubr.bf16.gmra.mxu1 %v804_v56 }
 0x10f   :  { %v529_v0 = vadd.f32 %v6115_v44, %v528_v63  ;;  %v735_v1 = vmax.f32 %v537_v60, 0.0 }
 0x110   :  { %v4899_v3 = vpop.f32.mrf.mxu0 }
 0x111   :  { %v733_v6 = vmax.f32 %v529_v0, 0.0  ;;  %v806_v11 = vpack.c.bf16 %v735_v1, %v734_v8  ;;  %v550_v18 = vadd.f32 %v4899_v3, %v6115_v44  ;;  %v748_v0 = vmax.f32 %v590_v51, 0.0 }
 0x112   :  { %v541_v9 = vpop.f32.mrf.mxu0  ;;  %v749_v1 = vmax.f32 %v593_v54, 0.0  ;;  %v649_v54 = vadd.f32 %v6186_v14, %v6115_v44  ;;  %v665_v14 = vadd.f32 %v6206_v57, %v6115_v44 }
 0x113   :  { %v805_v10 = vpack.c.bf16 %v733_v6, %v732_v5  ;;  %v542_v15 = vadd.f32 %v6115_v44, %v541_v9  ;;  %v738_v28 = vmax.f32 %v550_v18, 0.0  ;;  %v656_v5 = vpop.f32.mrf.mxu1  ;;  %v606_v9 = vadd.f32 %v6115_v44, %v6152_v22 }
 0x114   :  { %v4900_v13 = vpop.f32.mrf.mxu0  ;;  %v601_v18 = vadd.f32 %v6141_v7, %v6115_v44  ;;  %v614_v7 = vadd.f32 %v6148_v17, %v6115_v44  ;;  %v630_v17 = vadd.f32 %v6166_v37, %v6115_v44  ;;  %v654_v37 = vadd.f32 %v6115_v44, %v6200_v45 }
 0x115   :  { %v553_v16 = vadd.f32 %v4900_v13, %v6115_v44  ;;  %4973 = vmatprep.mubr.bf16.mxu1 %v805_v10  ;;  %v736_v25 = vmax.f32 %v542_v15, 0.0  ;;  %v609_v13 = vadd.f32 %v6115_v44, %v6161_v32  ;;  %v598_v15 = vadd.f32 %v6130_v61, %v6115_v44 }
 0x116   :  { %v544_v19 = vpop.f32.mrf.mxu0  ;;  %4974 = vmatmul.mubr.bf16.gmra.mxu1 %v806_v11  ;;  %v813_v11 = vpack.c.bf16 %v749_v1, %v748_v0  ;;  %v622_v32 = vadd.f32 %v6115_v44, %v6170_v42  ;;  %v625_v61 = vadd.f32 %v6115_v44, %v6176_v52  ;;  %v638_v42 = vadd.f32 %v6115_v44, %v6184_v4 }
 0x117   :  { %v545_v20 = vadd.f32 %v6115_v44, %v544_v19  ;;  %v739_v21 = vmax.f32 %v553_v16, 0.0  ;;  %v6220_v19 = vpop.f32.mrf.mxu1  ;;  %v750_v22 = vmax.f32 %v598_v15, 0.0  ;;  %v641_v52 = vadd.f32 %v6115_v44, %v6192_v24 }
 0x118   :  { %v4903_v23 = vpop.f32.mrf.mxu0 }
 0x119   :  { %v737_v26 = vmax.f32 %v545_v20, 0.0  ;;  %v808_v31 = vpack.c.bf16 %v739_v21, %v738_v28  ;;  %v566_v38 = vadd.f32 %v4903_v23, %v6115_v44  ;;  %v752_v20 = vmax.f32 %v606_v9, 0.0 }
 0x11a   :  { %v557_v29 = vpop.f32.mrf.mxu0  ;;  %v753_v21 = vmax.f32 %v609_v13, 0.0  ;;  %v751_v23 = vmax.f32 %v601_v18, 0.0  ;;  %v761_v4 = vmax.f32 %v641_v52, 0.0 }
 0x11b   :  { %v807_v30 = vpack.c.bf16 %v737_v26, %v736_v25  ;;  %v558_v35 = vadd.f32 %v6115_v44, %v557_v29  ;;  %v742_v49 = vmax.f32 %v566_v38, 0.0  ;;  %v669_v25 = vpop.f32.mrf.mxu1  ;;  %v617_v29 = vadd.f32 %v6159_v27, %v6115_v44 }
 0x11c   :  { %v4904_v33 = vpop.f32.mrf.mxu0  ;;  %v815_v26 = vpack.c.bf16 %v753_v21, %v752_v20  ;;  %v814_v28 = vpack.c.bf16 %v751_v23, %v750_v22  ;;  %v633_v27 = vadd.f32 %v6174_v47, %v6115_v44  ;;  %v657_v47 = vadd.f32 %v6115_v44, %v656_v5 }
 0x11d   :  { %v569_v36 = vadd.f32 %v4904_v33, %v6115_v44  ;;  %4977 = vmatprep.mubr.bf16.mxu1 %v807_v30  ;;  %v740_v46 = vmax.f32 %v558_v35, 0.0  ;;  %v4932_v30 = vpop.f32.mrf.mxu1  ;;  %v757_v33 = vmax.f32 %v625_v61, 0.0  ;;  %v754_v35 = vmax.f32 %v614_v7, 0.0 }
 0x11e   :  { %v560_v39 = vpop.f32.mrf.mxu0  ;;  %4978 = vmatmul.mubr.bf16.gmra.mxu1 %v808_v31  ;;  %v756_v31 = vmax.f32 %v622_v32, 0.0  ;;  %v670_v45 = vadd.f32 %v6115_v44, %v669_v25 }
 0x11f   :  { %v561_v40 = vadd.f32 %v6115_v44, %v560_v39  ;;  %v743_v41 = vmax.f32 %v569_v36, 0.0  ;;  %v755_v36 = vmax.f32 %v617_v29, 0.0  ;;  %v672_v38 = vpop.f32.mrf.mxu1 }
 0x120   :  { %v4907_v43 = vpop.f32.mrf.mxu0  ;;  %v817_v39 = vpack.c.bf16 %v757_v33, %v756_v31  ;;  %v768_v5 = vmax.f32 %v670_v45, 0.0 }
 0x121   :  { %v741_v48 = vmax.f32 %v561_v40, 0.0  ;;  %v810_v55 = vpack.c.bf16 %v743_v41, %v742_v49  ;;  %v582_v62 = vadd.f32 %v4907_v43, %v6115_v44  ;;  %v816_v40 = vpack.c.bf16 %v755_v36, %v754_v35  ;;  %v4935_v41 = vpop.f32.mrf.mxu1  ;;  %v5482_v43 = vld [vmem:[%s7929_s5] sm:$0xff]  }
 0x122   :  { %v573_v50 = vpop.f32.mrf.mxu0  ;;  %v759_v49 = vmax.f32 %v633_v27, 0.0  ;;  %5035 = vmatprep.subr.bf16.mxu0 %v5482_v43 }
 0x123   :  { %v809_v53 = vpack.c.bf16 %v741_v48, %v740_v46  ;;  %v574_v59 = vadd.f32 %v6115_v44, %v573_v50  ;;  %v746_v8 = vmax.f32 %v582_v62, 0.0  ;;  %v760_v46 = vmax.f32 %v638_v42, 0.0  ;;  %v685_v50 = vpop.f32.mrf.mxu1  ;;  %5036 = vmatpush3.bf16.msra.mxu0 %v5482_v43  ;;  %v6277_v43 = vld [vmem:[%s7928_s4] ss:$0 sm:$0xff] }
 0x124   :  { %v4908_v56 = vpop.f32.mrf.mxu0  ;;  %v758_v48 = vmax.f32 %v630_v17, 0.0  ;;  %v763_v62 = vmax.f32 %v649_v54, 0.0  ;;  %v5484_v17 = vld [vmem:[%s7931_s7 + $0x30] sm:$0xff]  }
 0x125   :  { %v585_v60 = vadd.f32 %v4908_v56, %v6115_v44  ;;  %4981 = vmatprep.mubr.bf16.mxu1 %v809_v53  ;;  %v744_v12 = vmax.f32 %v574_v59, 0.0  ;;  %v819_v24 = vpack.c.bf16 %v761_v4, %v760_v46  ;;  %v646_v53 = vadd.f32 %v6178_v58, %v6115_v44 }
 0x126   :  { %v576_v63 = vpop.f32.mrf.mxu0  ;;  %4982 = vmatmul.mubr.bf16.gmra.mxu1 %v810_v55  ;;  %v818_v51 = vpack.c.bf16 %v759_v49, %v758_v48  ;;  %v4936_v55 = vpop.f32.mrf.mxu1  ;;  %v764_v56 = vmax.f32 %v654_v37, 0.0  ;;  %v765_v59 = vmax.f32 %v657_v47, 0.0  ;;  %v662_v58 = vadd.f32 %v6194_v34, %v6115_v44  ;;  %v5486_v37 = vld [vmem:[%s7931_s7 + $0x20] sm:$0xff]  }
 0x127   :  { %v577_v2 = vadd.f32 %v6115_v44, %v576_v63  ;;  %v747_v3 = vmax.f32 %v585_v60, 0.0  ;;  %v762_v60 = vmax.f32 %v646_v53, 0.0  ;;  %v678_v34 = vadd.f32 %v6220_v19, %v6115_v44 }
 0x128   :  { %v688_v63 = vpop.f32.mrf.mxu1  ;;  %v821_v0 = vpack.c.bf16 %v765_v59, %v764_v56  ;;  %v697_v19 = vadd.f32 %v4936_v55, %v6115_v44 }
 0x129   :  { %v745_v6 = vmax.f32 %v577_v2, 0.0  ;;  %v812_v16 = vpack.c.bf16 %v747_v3, %v746_v8  ;;  %v673_v2 = vadd.f32 %v6115_v44, %v672_v38  ;;  %v820_v1 = vpack.c.bf16 %v763_v62, %v762_v60  ;;  %v5488_v60 = vld [vmem:[%s7931_s7 + $0x10] sm:$0xff]  }
 0x12a   :  { %v4939_v3 = vpop.f32.mrf.mxu1  ;;  %v767_v8 = vmax.f32 %v665_v14, 0.0  ;;  %v689_v13 = vadd.f32 %v6115_v44, %v688_v63  ;;  %v770_v21 = vmax.f32 %v678_v34, 0.0  ;;  %v775_v31 = vmax.f32 %v697_v19, 0.0  ;;  %v5489_v14 = vld [vmem:[%s7931_s7 + $0x8] sm:$0xff]  }
 0x12b   :  { %v811_v10 = vpack.c.bf16 %v745_v6, %v744_v12  ;;  %v769_v12 = vmax.f32 %v673_v2, 0.0  ;;  %v766_v6 = vmax.f32 %v662_v58, 0.0  ;;  %v710_v36 = vadd.f32 %v4939_v3, %v6115_v44 }
 0x12c   :  { %v701_v9 = vpop.f32.mrf.mxu1  ;;  %v773_v20 = vmax.f32 %v689_v13, 0.0 }
 0x12d   :  { %4985 = vmatprep.mubr.bf16.mxu1 %v811_v10  ;;  %v686_v10 = vadd.f32 %v6115_v44, %v685_v50  ;;  %v822_v15 = vpack.c.bf16 %v767_v8, %v766_v6  ;;  %v702_v25 = vadd.f32 %v6115_v44, %v701_v9  ;;  %v778_v42 = vmax.f32 %v710_v36, 0.0 }
 0x12e   :  { %4986 = vmatmul.mubr.bf16.gmra.mxu1 %v812_v16  ;;  %v681_v16 = vadd.f32 %v4932_v30, %v6115_v44  ;;  %v4940_v57 = vpop.f32.mrf.mxu1 }
 0x12f   :  { %4989 = vmatprep.mubr.bf16.mxu1 %v813_v11  ;;  %v823_v11 = vpack.c.bf16 %v769_v12, %v768_v5  ;;  %v772_v18 = vmax.f32 %v686_v10, 0.0  ;;  %v776_v7 = vmax.f32 %v702_v25, 0.0  ;;  %v713_v38 = vadd.f32 %v4940_v57, %v6115_v44 }
 0x130   :  { %v771_v22 = vmax.f32 %v681_v16, 0.0  ;;  %v704_v23 = vpop.f32.mrf.mxu1 }
 0x131   :  { %v825_v32 = vpack.c.bf16 %v773_v20, %v772_v18 }
 0x132   :  { %v824_v61 = vpack.c.bf16 %v771_v22, %v770_v21 }
 0x136   :  { %4990 = vmatmul.mubr.bf16.gmra.mxu1 %v814_v28  ;;  %v694_v28 = vadd.f32 %v4935_v41, %v6115_v44 }
 0x137   :  { %4993 = vmatprep.mubr.bf16.mxu1 %v815_v26  ;;  %v705_v26 = vadd.f32 %v6115_v44, %v704_v23  ;;  %v5485_v44 = vld [vmem:[%s7931_s7 + $0x28] sm:$0xff]  }
 0x138   :  { %v774_v30 = vmax.f32 %v694_v28, 0.0 }
 0x139   :  { %v777_v29 = vmax.f32 %v705_v26, 0.0 }
 0x13a   :  { %v826_v35 = vpack.c.bf16 %v775_v31, %v774_v30 }
 0x13b   :  { %v827_v33 = vpack.c.bf16 %v777_v29, %v776_v7 }
 0x13e   :  { %4994 = vmatmul.mubr.bf16.gmra.mxu1 %v816_v40  ;;  %v5483_v40 = vld [vmem:[%s7931_s7 + $0x38] sm:$0xff]  }
 0x13f   :  { %4997 = vmatprep.mubr.bf16.mxu1 %v817_v39  ;;  %v779_v39 = vmax.f32 %v713_v38, 0.0  ;;  %5101 = vmatprep.subr.bf16.mxu1 %v5483_v40 }
 0x140   :  { %5102 = vmatpush3.bf16.msra.mxu1 %v5483_v40 }
 0x141   :  { %v828_v52 = vpack.c.bf16 %v779_v39, %v778_v42  ;;  %5103 = vmatprep.subr.bf16.mxu1 %v5484_v17 }
 0x144   :  { %5104 = vmatpush3.bf16.msra.mxu1 %v5484_v17 }
 0x145   :  { %5105 = vmatprep.subr.bf16.mxu1 %v5485_v44 }
 0x146   :  { %4998 = vmatmul.mubr.bf16.gmra.mxu1 %v818_v51 }
 0x147   :  { %5001 = vmatprep.mubr.bf16.mxu1 %v819_v24  ;;  %v5487_v24 = vld [vmem:[%s7931_s7 + $0x18] sm:$0xff]  }
 0x148   :  { %5106 = vmatpush3.bf16.msra.mxu1 %v5485_v44 }
 0x149   :  { %5107 = vmatprep.subr.bf16.mxu1 %v5486_v37 }
 0x14c   :  { %5108 = vmatpush3.bf16.msra.mxu1 %v5486_v37 }
 0x14d   :  { %5109 = vmatprep.subr.bf16.mxu1 %v5487_v24 }
 0x14e   :  { %5002 = vmatmul.mubr.bf16.gmra.mxu1 %v820_v1 }
 0x14f   :  { %5005 = vmatprep.mubr.bf16.mxu1 %v821_v0 }
 0x150   :  { %5110 = vmatpush3.bf16.msra.mxu1 %v5487_v24 }
 0x151   :  { %5111 = vmatprep.subr.bf16.mxu1 %v5488_v60 }
 0x154   :  { %5112 = vmatpush3.bf16.msra.mxu1 %v5488_v60 }
 0x155   :  { %5113 = vmatprep.subr.bf16.mxu1 %v5489_v14 }
 0x156   :  { %5006 = vmatmul.mubr.bf16.gmra.mxu1 %v822_v15 }
 0x157   :  { %5009 = vmatprep.mubr.bf16.mxu1 %v823_v11  ;;  %v5490_v11 = vld [vmem:[%s7931_s7] sm:$0xff]  }
 0x158   :  { %5114 = vmatpush3.bf16.msra.mxu1 %v5489_v14 }
 0x159   :  { %5115 = vmatprep.subr.bf16.mxu1 %v5490_v11 }
 0x15c   :  { %5116 = vmatpush3.bf16.msra.mxu1 %v5490_v11 }
 0x15e   :  { %5010 = vmatmul.mubr.bf16.gmra.mxu1 %v824_v61 }
 0x15f   :  { %5013 = vmatprep.mubr.bf16.mxu1 %v825_v32 }
 0x166   :  { %5014 = vmatmul.mubr.bf16.gmra.mxu1 %v826_v35 }
 0x167   :  { %5017 = vmatprep.mubr.bf16.mxu1 %v827_v33 }
 0x16e   :  { %5018 = vmatmul.mubr.bf16.gmra.mxu1 %v828_v52 }
 0x1b6   :  { %v4959_v27 = vpop.f32.mrf.mxu1 }
 0x1b7   :  { %v926_v49 = vadd.f32 %v4959_v27, %v6277_v43 }
 0x1b8   :  { %v917_v41 = vpop.f32.mrf.mxu1 }
 0x1b9   :  { %v918_v4 = vadd.f32 %v6277_v43, %v917_v41  ;;  %v1174_v56 = vmax.f32 %v926_v49, 0.0 }
 0x1ba   :  { %v4960_v46 = vpop.f32.mrf.mxu1 }
 0x1bb   :  { %v929_v48 = vadd.f32 %v4960_v46, %v6277_v43  ;;  %v1172_v54 = vmax.f32 %v918_v4, 0.0 }
 0x1bc   :  { %v920_v50 = vpop.f32.mrf.mxu1 }
 0x1bd   :  { %v921_v47 = vadd.f32 %v6277_v43, %v920_v50  ;;  %v1175_v51 = vmax.f32 %v929_v48, 0.0 }
 0x1be   :  { %v4963_v53 = vpop.f32.mrf.mxu1 }
 0x1bf   :  { %v1173_v55 = vmax.f32 %v921_v47, 0.0  ;;  %v1254_v63 = vpack.c.bf16 %v1175_v51, %v1174_v56  ;;  %v942_v1 = vadd.f32 %v4963_v53, %v6277_v43 }
 0x1c0   :  { %v933_v59 = vpop.f32.mrf.mxu1 }
 0x1c1   :  { %v1253_v62 = vpack.c.bf16 %v1173_v55, %v1172_v54  ;;  %v934_v0 = vadd.f32 %v6277_v43, %v933_v59  ;;  %v1178_v9 = vmax.f32 %v942_v1, 0.0 }
 0x1c2   :  { %v4964_v45 = vpop.f32.mrf.mxu1 }
 0x1c3   :  { %v945_v2 = vadd.f32 %v4964_v45, %v6277_v43  ;;  %5037 = vmatprep.mubr.bf16.mxu0 %v1253_v62  ;;  %v1176_v6 = vmax.f32 %v934_v0, 0.0 }
 0x1c4   :  { %v936_v58 = vpop.f32.mrf.mxu1  ;;  %5038 = vmatmul.mubr.bf16.vlgmr.msra.gmra.mxu0 %v1254_v63 }
 0x1c5   :  { %v937_v3 = vadd.f32 %v6277_v43, %v936_v58  ;;  %v1179_v5 = vmax.f32 %v945_v2, 0.0 }
 0x1c6   :  { %v4967_v12 = vpop.f32.mrf.mxu1 }
 0x1c7   :  { %v1177_v8 = vmax.f32 %v937_v3, 0.0  ;;  %v1256_v15 = vpack.c.bf16 %v1179_v5, %v1178_v9  ;;  %v958_v18 = vadd.f32 %v4967_v12, %v6277_v43 }
 0x1c8   :  { %v949_v10 = vpop.f32.mrf.mxu1 }
 0x1c9   :  { %v1255_v13 = vpack.c.bf16 %v1177_v8, %v1176_v6  ;;  %v950_v16 = vadd.f32 %v6277_v43, %v949_v10  ;;  %v1182_v26 = vmax.f32 %v958_v18, 0.0 }
 0x1ca   :  { %v4968_v34 = vpop.f32.mrf.mxu1 }
 0x1cb   :  { %v961_v57 = vadd.f32 %v4968_v34, %v6277_v43  ;;  %5041 = vmatprep.mubr.bf16.mxu0 %v1255_v13  ;;  %v1180_v25 = vmax.f32 %v950_v16, 0.0 }
 0x1cc   :  { %v952_v20 = vpop.f32.mrf.mxu1  ;;  %5042 = vmatmul.mubr.bf16.gmra.mxu0 %v1256_v15 }
 0x1cd   :  { %v953_v21 = vadd.f32 %v6277_v43, %v952_v20  ;;  %v1183_v22 = vmax.f32 %v961_v57, 0.0 }
 0x1ce   :  { %v4971_v23 = vpop.f32.mrf.mxu1 }
 0x1cf   :  { %v1181_v32 = vmax.f32 %v953_v21, 0.0  ;;  %v1258_v19 = vpack.c.bf16 %v1183_v22, %v1182_v26  ;;  %v974_v31 = vadd.f32 %v4971_v23, %v6277_v43 }
 0x1d0   :  { %v965_v61 = vpop.f32.mrf.mxu1 }
 0x1d1   :  { %v1257_v28 = vpack.c.bf16 %v1181_v32, %v1180_v25  ;;  %v966_v29 = vadd.f32 %v6277_v43, %v965_v61  ;;  %v1186_v52 = vmax.f32 %v974_v31, 0.0 }
 0x1d2   :  { %v4972_v7 = vpop.f32.mrf.mxu1 }
 0x1d3   :  { %v977_v30 = vadd.f32 %v4972_v7, %v6277_v43  ;;  %5045 = vmatprep.mubr.bf16.mxu0 %v1257_v28  ;;  %v1184_v42 = vmax.f32 %v966_v29, 0.0 }
 0x1d4   :  { %v968_v33 = vpop.f32.mrf.mxu1  ;;  %5046 = vmatmul.mubr.bf16.gmra.mxu0 %v1258_v19 }
 0x1d5   :  { %v969_v35 = vadd.f32 %v6277_v43, %v968_v33  ;;  %v1187_v36 = vmax.f32 %v977_v30, 0.0 }
 0x1d6   :  { %v4975_v38 = vpop.f32.mrf.mxu1 }
 0x1d7   :  { %v1185_v39 = vmax.f32 %v969_v35, 0.0  ;;  %v1260_v44 = vpack.c.bf16 %v1187_v36, %v1186_v52  ;;  %v990_v4 = vadd.f32 %v4975_v38, %v6277_v43 }
 0x1d8   :  { %v981_v40 = vpop.f32.mrf.mxu1 }
 0x1d9   :  { %v1259_v17 = vpack.c.bf16 %v1185_v39, %v1184_v42  ;;  %v982_v41 = vadd.f32 %v6277_v43, %v981_v40  ;;  %v1190_v51 = vmax.f32 %v990_v4, 0.0 }
 0x1da   :  { %v4976_v27 = vpop.f32.mrf.mxu1 }
 0x1db   :  { %v993_v46 = vadd.f32 %v4976_v27, %v6277_v43  ;;  %5049 = vmatprep.mubr.bf16.mxu0 %v1259_v17  ;;  %v1188_v24 = vmax.f32 %v982_v41, 0.0 }
 0x1dc   :  { %v984_v48 = vpop.f32.mrf.mxu1  ;;  %5050 = vmatmul.mubr.bf16.gmra.mxu0 %v1260_v44 }
 0x1dd   :  { %v985_v49 = vadd.f32 %v6277_v43, %v984_v48  ;;  %v1191_v50 = vmax.f32 %v993_v46, 0.0 }
 0x1de   :  { %v4979_v37 = vpop.f32.mrf.mxu1 }
 0x1df   :  { %v1189_v47 = vmax.f32 %v985_v49, 0.0  ;;  %v1262_v55 = vpack.c.bf16 %v1191_v50, %v1190_v51  ;;  %v1006_v62 = vadd.f32 %v4979_v37, %v6277_v43 }
 0x1e0   :  { %v997_v53 = vpop.f32.mrf.mxu1 }
 0x1e1   :  { %v1261_v54 = vpack.c.bf16 %v1189_v47, %v1188_v24  ;;  %v998_v59 = vadd.f32 %v6277_v43, %v997_v53  ;;  %v1194_v14 = vmax.f32 %v1006_v62, 0.0 }
 0x1e2   :  { %v4980_v56 = vpop.f32.mrf.mxu1 }
 0x1e3   :  { %v1009_v60 = vadd.f32 %v4980_v56, %v6277_v43  ;;  %5053 = vmatprep.mubr.bf16.mxu0 %v1261_v54  ;;  %v1192_v1 = vmax.f32 %v998_v59, 0.0 }
 0x1e4   :  { %v1000_v63 = vpop.f32.mrf.mxu1  ;;  %5054 = vmatmul.mubr.bf16.gmra.mxu0 %v1262_v55 }
 0x1e5   :  { %v1001_v45 = vadd.f32 %v6277_v43, %v1000_v63  ;;  %v1195_v0 = vmax.f32 %v1009_v60, 0.0 }
 0x1e6   :  { %v4983_v2 = vpop.f32.mrf.mxu1 }
 0x1e7   :  { %v1193_v58 = vmax.f32 %v1001_v45, 0.0  ;;  %v1264_v12 = vpack.c.bf16 %v1195_v0, %v1194_v14  ;;  %v1022_v10 = vadd.f32 %v4983_v2, %v6277_v43 }
 0x1e8   :  { %v1013_v3 = vpop.f32.mrf.mxu1 }
 0x1e9   :  { %v1263_v5 = vpack.c.bf16 %v1193_v58, %v1192_v1  ;;  %v1014_v8 = vadd.f32 %v6277_v43, %v1013_v3  ;;  %v1198_v18 = vmax.f32 %v1022_v10, 0.0 }
 0x1ea   :  { %v4984_v6 = vpop.f32.mrf.mxu1 }
 0x1eb   :  { %v1025_v9 = vadd.f32 %v4984_v6, %v6277_v43  ;;  %5057 = vmatprep.mubr.bf16.mxu0 %v1263_v5  ;;  %v1196_v16 = vmax.f32 %v1014_v8, 0.0 }
 0x1ec   :  { %v1016_v11 = vpop.f32.mrf.mxu1  ;;  %5058 = vmatmul.mubr.bf16.gmra.mxu0 %v1264_v12 }
 0x1ed   :  { %v1017_v13 = vadd.f32 %v6277_v43, %v1016_v11  ;;  %v1199_v15 = vmax.f32 %v1025_v9, 0.0 }
 0x1ee   :  { %v4987_v34 = vpop.f32.mrf.mxu1 }
 0x1ef   :  { %v1197_v57 = vmax.f32 %v1017_v13, 0.0  ;;  %v1266_v22 = vpack.c.bf16 %v1199_v15, %v1198_v18  ;;  %v1038_v26 = vadd.f32 %v4987_v34, %v6277_v43 }
 0x1f0   :  { %v1029_v20 = vpop.f32.mrf.mxu1 }
 0x1f1   :  { %v1265_v21 = vpack.c.bf16 %v1197_v57, %v1196_v16  ;;  %v1030_v25 = vadd.f32 %v6277_v43, %v1029_v20  ;;  %v1202_v31 = vmax.f32 %v1038_v26, 0.0 }
 0x1f2   :  { %v4988_v23 = vpop.f32.mrf.mxu1 }
 0x1f3   :  { %v1041_v32 = vadd.f32 %v4988_v23, %v6277_v43  ;;  %5061 = vmatprep.mubr.bf16.mxu0 %v1265_v21  ;;  %v1200_v29 = vmax.f32 %v1030_v25, 0.0 }
 0x1f4   :  { %v1032_v61 = vpop.f32.mrf.mxu1  ;;  %5062 = vmatmul.mubr.bf16.gmra.mxu0 %v1266_v22 }
 0x1f5   :  { %v1033_v28 = vadd.f32 %v6277_v43, %v1032_v61  ;;  %v1203_v19 = vmax.f32 %v1041_v32, 0.0 }
 0x1f6   :  { %v4991_v7 = vpop.f32.mrf.mxu1 }
 0x1f7   :  { %v1201_v30 = vmax.f32 %v1033_v28, 0.0  ;;  %v1268_v36 = vpack.c.bf16 %v1203_v19, %v1202_v31  ;;  %v1054_v52 = vadd.f32 %v4991_v7, %v6277_v43 }
 0x1f8   :  { %v1045_v33 = vpop.f32.mrf.mxu1 }
 0x1f9   :  { %v1267_v35 = vpack.c.bf16 %v1201_v30, %v1200_v29  ;;  %v1046_v42 = vadd.f32 %v6277_v43, %v1045_v33  ;;  %v1206_v4 = vmax.f32 %v1054_v52, 0.0 }
 0x1fa   :  { %v4992_v38 = vpop.f32.mrf.mxu1 }
 0x1fb   :  { %v1057_v39 = vadd.f32 %v4992_v38, %v6277_v43  ;;  %5065 = vmatprep.mubr.bf16.mxu0 %v1267_v35  ;;  %v1204_v41 = vmax.f32 %v1046_v42, 0.0 }
 0x1fc   :  { %v1048_v40 = vpop.f32.mrf.mxu1  ;;  %5066 = vmatmul.mubr.bf16.gmra.mxu0 %v1268_v36 }
 0x1fd   :  { %v1049_v17 = vadd.f32 %v6277_v43, %v1048_v40  ;;  %v1207_v44 = vmax.f32 %v1057_v39, 0.0 }
 0x1fe   :  { %v4995_v27 = vpop.f32.mrf.mxu1 }
 0x1ff   :  { %v1205_v46 = vmax.f32 %v1049_v17, 0.0  ;;  %v1270_v50 = vpack.c.bf16 %v1207_v44, %v1206_v4  ;;  %v1070_v51 = vadd.f32 %v4995_v27, %v6277_v43 }
 0x200   :  { %v1061_v48 = vpop.f32.mrf.mxu1 }
 0x201   :  { %v1269_v49 = vpack.c.bf16 %v1205_v46, %v1204_v41  ;;  %v1062_v24 = vadd.f32 %v6277_v43, %v1061_v48  ;;  %v1210_v62 = vmax.f32 %v1070_v51, 0.0 }
 0x202   :  { %v4996_v37 = vpop.f32.mrf.mxu1 }
 0x203   :  { %v1073_v47 = vadd.f32 %v4996_v37, %v6277_v43  ;;  %5069 = vmatprep.mubr.bf16.mxu0 %v1269_v49  ;;  %v1208_v59 = vmax.f32 %v1062_v24, 0.0 }
 0x204   :  { %v1064_v53 = vpop.f32.mrf.mxu1  ;;  %5070 = vmatmul.mubr.bf16.gmra.mxu0 %v1270_v50 }
 0x205   :  { %v1065_v54 = vadd.f32 %v6277_v43, %v1064_v53  ;;  %v1211_v55 = vmax.f32 %v1073_v47, 0.0 }
 0x206   :  { %v4999_v56 = vpop.f32.mrf.mxu1 }
 0x207   :  { %v1209_v60 = vmax.f32 %v1065_v54, 0.0  ;;  %v1272_v0 = vpack.c.bf16 %v1211_v55, %v1210_v62  ;;  %v1086_v14 = vadd.f32 %v4999_v56, %v6277_v43 }
 0x208   :  { %v1077_v63 = vpop.f32.mrf.mxu1 }
 0x209   :  { %v1271_v45 = vpack.c.bf16 %v1209_v60, %v1208_v59  ;;  %v1078_v1 = vadd.f32 %v6277_v43, %v1077_v63  ;;  %v1214_v10 = vmax.f32 %v1086_v14, 0.0 }
 0x20a   :  { %v5000_v2 = vpop.f32.mrf.mxu1 }
 0x20b   :  { %v1089_v58 = vadd.f32 %v5000_v2, %v6277_v43  ;;  %5073 = vmatprep.mubr.bf16.mxu0 %v1271_v45  ;;  %v1212_v8 = vmax.f32 %v1078_v1, 0.0 }
 0x20c   :  { %v1080_v3 = vpop.f32.mrf.mxu1  ;;  %5074 = vmatmul.mubr.bf16.gmra.mxu0 %v1272_v0 }
 0x20d   :  { %v1081_v5 = vadd.f32 %v6277_v43, %v1080_v3  ;;  %v1215_v12 = vmax.f32 %v1089_v58, 0.0 }
 0x20e   :  { %v5003_v6 = vpop.f32.mrf.mxu1 }
 0x20f   :  { %v1213_v9 = vmax.f32 %v1081_v5, 0.0  ;;  %v1274_v15 = vpack.c.bf16 %v1215_v12, %v1214_v10  ;;  %v1102_v18 = vadd.f32 %v5003_v6, %v6277_v43 }
 0x210   :  { %v1093_v11 = vpop.f32.mrf.mxu1 }
 0x211   :  { %v1273_v13 = vpack.c.bf16 %v1213_v9, %v1212_v8  ;;  %v1094_v16 = vadd.f32 %v6277_v43, %v1093_v11  ;;  %v1218_v26 = vmax.f32 %v1102_v18, 0.0 }
 0x212   :  { %v5004_v34 = vpop.f32.mrf.mxu1 }
 0x213   :  { %v1105_v57 = vadd.f32 %v5004_v34, %v6277_v43  ;;  %5077 = vmatprep.mubr.bf16.mxu0 %v1273_v13  ;;  %v1216_v25 = vmax.f32 %v1094_v16, 0.0 }
 0x214   :  { %v1096_v20 = vpop.f32.mrf.mxu1  ;;  %5078 = vmatmul.mubr.bf16.gmra.mxu0 %v1274_v15 }
 0x215   :  { %v1097_v21 = vadd.f32 %v6277_v43, %v1096_v20  ;;  %v1219_v22 = vmax.f32 %v1105_v57, 0.0 }
 0x216   :  { %v5007_v23 = vpop.f32.mrf.mxu1 }
 0x217   :  { %v1217_v32 = vmax.f32 %v1097_v21, 0.0  ;;  %v1276_v19 = vpack.c.bf16 %v1219_v22, %v1218_v26  ;;  %v1118_v31 = vadd.f32 %v5007_v23, %v6277_v43  ;;  %v5491_v21 = vld [vmem:[%s7933_s9 + $0x38] sm:$0xff]   ;;  %v5492_v22 = vld [vmem:[%s7933_s9 + $0x30] sm:$0xff]   ;;  %v6370_v23 = vld [vmem:[%s7930_s6] ss:$0 sm:$0xff] }
 0x218   :  { %v1109_v61 = vpop.f32.mrf.mxu1  ;;  %5181 = vmatprep.subr.bf16.mxu0 %v5491_v21 }
 0x219   :  { %v1275_v28 = vpack.c.bf16 %v1217_v32, %v1216_v25  ;;  %v1110_v29 = vadd.f32 %v6277_v43, %v1109_v61  ;;  %v1222_v52 = vmax.f32 %v1118_v31, 0.0  ;;  %5182 = vmatpush3.bf16.msra.mxu0 %v5491_v21 }
 0x21a   :  { %v5008_v7 = vpop.f32.mrf.mxu1  ;;  %5183 = vmatprep.subr.bf16.mxu0 %v5492_v22 }
 0x21b   :  { %v1121_v30 = vadd.f32 %v5008_v7, %v6277_v43  ;;  %5081 = vmatprep.mubr.bf16.mxu0 %v1275_v28  ;;  %v1220_v42 = vmax.f32 %v1110_v29, 0.0 }
 0x21c   :  { %v1112_v33 = vpop.f32.mrf.mxu1  ;;  %5082 = vmatmul.mubr.bf16.gmra.mxu0 %v1276_v19 }
 0x21d   :  { %v1113_v35 = vadd.f32 %v6277_v43, %v1112_v33  ;;  %v1223_v36 = vmax.f32 %v1121_v30, 0.0  ;;  %5184 = vmatpush3.bf16.msra.mxu0 %v5492_v22  ;;  %v5494_v30 = vld [vmem:[%s7933_s9 + $0x20] sm:$0xff]  }
 0x21e   :  { %v5011_v38 = vpop.f32.mrf.mxu1 }
 0x21f   :  { %v1221_v39 = vmax.f32 %v1113_v35, 0.0  ;;  %v1278_v44 = vpack.c.bf16 %v1223_v36, %v1222_v52  ;;  %v1134_v4 = vadd.f32 %v5011_v38, %v6277_v43 }
 0x220   :  { %v1125_v40 = vpop.f32.mrf.mxu1 }
 0x221   :  { %v1277_v17 = vpack.c.bf16 %v1221_v39, %v1220_v42  ;;  %v1126_v41 = vadd.f32 %v6277_v43, %v1125_v40  ;;  %v1226_v51 = vmax.f32 %v1134_v4, 0.0 }
 0x222   :  { %v5012_v27 = vpop.f32.mrf.mxu1 }
 0x223   :  { %v1137_v46 = vadd.f32 %v5012_v27, %v6277_v43  ;;  %5085 = vmatprep.mubr.bf16.mxu0 %v1277_v17  ;;  %v1224_v24 = vmax.f32 %v1126_v41, 0.0 }
 0x224   :  { %v1128_v48 = vpop.f32.mrf.mxu1  ;;  %5086 = vmatmul.mubr.bf16.gmra.mxu0 %v1278_v44 }
 0x225   :  { %v1129_v49 = vadd.f32 %v6277_v43, %v1128_v48  ;;  %v1227_v50 = vmax.f32 %v1137_v46, 0.0 }
 0x226   :  { %v5015_v37 = vpop.f32.mrf.mxu1 }
 0x227   :  { %v1225_v47 = vmax.f32 %v1129_v49, 0.0  ;;  %v1280_v55 = vpack.c.bf16 %v1227_v50, %v1226_v51  ;;  %v1150_v62 = vadd.f32 %v5015_v37, %v6277_v43 }
 0x228   :  { %v1141_v53 = vpop.f32.mrf.mxu1 }
 0x229   :  { %v1279_v54 = vpack.c.bf16 %v1225_v47, %v1224_v24  ;;  %v1142_v59 = vadd.f32 %v6277_v43, %v1141_v53  ;;  %v1230_v14 = vmax.f32 %v1150_v62, 0.0 }
 0x22a   :  { %v5016_v56 = vpop.f32.mrf.mxu1 }
 0x22b   :  { %v1153_v60 = vadd.f32 %v5016_v56, %v6277_v43  ;;  %5089 = vmatprep.mubr.bf16.mxu0 %v1279_v54  ;;  %v1228_v1 = vmax.f32 %v1142_v59, 0.0 }
 0x22c   :  { %v1144_v63 = vpop.f32.mrf.mxu1  ;;  %5090 = vmatmul.mubr.bf16.gmra.mxu0 %v1280_v55 }
 0x22d   :  { %v1145_v45 = vadd.f32 %v6277_v43, %v1144_v63  ;;  %v1231_v0 = vmax.f32 %v1153_v60, 0.0 }
 0x22e   :  { %v5019_v2 = vpop.f32.mrf.mxu1 }
 0x22f   :  { %v1229_v58 = vmax.f32 %v1145_v45, 0.0  ;;  %v1282_v12 = vpack.c.bf16 %v1231_v0, %v1230_v14  ;;  %v1166_v10 = vadd.f32 %v5019_v2, %v6277_v43 }
 0x230   :  { %v1157_v3 = vpop.f32.mrf.mxu1 }
 0x231   :  { %v1281_v5 = vpack.c.bf16 %v1229_v58, %v1228_v1  ;;  %v1158_v8 = vadd.f32 %v6277_v43, %v1157_v3  ;;  %v1234_v57 = vmax.f32 %v1166_v10, 0.0  ;;  %v5495_v58 = vld [vmem:[%s7933_s9 + $0x18] sm:$0xff]  }
 0x232   :  { %v5020_v6 = vpop.f32.mrf.mxu1 }
 0x233   :  { %v1169_v9 = vadd.f32 %v5020_v6, %v6277_v43  ;;  %5093 = vmatprep.mubr.bf16.mxu0 %v1281_v5  ;;  %v1232_v34 = vmax.f32 %v1158_v8, 0.0 }
 0x234   :  { %v1160_v11 = vpop.f32.mrf.mxu1  ;;  %5094 = vmatmul.mubr.bf16.gmra.mxu0 %v1282_v12 }
 0x235   :  { %v1161_v13 = vadd.f32 %v6277_v43, %v1160_v11  ;;  %v1235_v15 = vmax.f32 %v1169_v9, 0.0  ;;  %v5493_v43 = vld [vmem:[%s7933_s9 + $0x28] sm:$0xff]  }
 0x236   :  { %5185 = vmatprep.subr.bf16.mxu0 %v5493_v43 }
 0x237   :  { %v1233_v16 = vmax.f32 %v1161_v13, 0.0  ;;  %v1284_v20 = vpack.c.bf16 %v1235_v15, %v1234_v57  ;;  %5186 = vmatpush3.bf16.msra.mxu0 %v5493_v43 }
 0x238   :  { %5187 = vmatprep.subr.bf16.mxu0 %v5494_v30 }
 0x239   :  { %v1283_v18 = vpack.c.bf16 %v1233_v16, %v1232_v34 }
 0x23b   :  { %5097 = vmatprep.mubr.bf16.mxu0 %v1283_v18  ;;  %5188 = vmatpush3.bf16.msra.mxu0 %v5494_v30 }
 0x23c   :  { %5098 = vmatmul.mubr.bf16.gmra.mxu0 %v1284_v20  ;;  %5189 = vmatprep.subr.bf16.mxu0 %v5495_v58 }
 0x23f   :  { %5190 = vmatpush3.bf16.msra.mxu0 %v5495_v58  ;;  %v5497_v58 = vld [vmem:[%s7933_s9 + $0x8] sm:$0xff]  }
 0x284   :  { %v5039_v25 = vpop.f32.mrf.mxu0 }
 0x285   :  { %v1382_v32 = vadd.f32 %v5039_v25, %v6370_v23 }
 0x286   :  { %v1373_v26 = vpop.f32.mrf.mxu0 }
 0x287   :  { %v1374_v61 = vadd.f32 %v6370_v23, %v1373_v26  ;;  %v2998_v28 = vmul.f32 %v1382_v32, %v1382_v32 }
 0x288   :  { %v5040_v19 = vpop.f32.mrf.mxu0 }
 0x289   :  { %v1385_v7 = vadd.f32 %v5040_v19, %v6370_v23  ;;  %3064 = vadd.xlane.f32.xlu1 %v2998_v28  ;;  %v2996_v29 = vmul.f32 %v1374_v61, %v1374_v61 }
 0x28a   :  { %v1376_v31 = vpop.f32.mrf.mxu0 }
 0x28b   :  { %v1377_v33 = vadd.f32 %v6370_v23, %v1376_v31  ;;  %3060 = vadd.xlane.f32.xlu0 %v2996_v29  ;;  %v2999_v35 = vmul.f32 %v1385_v7, %v1385_v7  ;;  %v6382_v52 = vpack.c.bf16 %v1385_v7, %v1382_v32  ;;  %v5496_v31 = vld [vmem:[%s7933_s9 + $0x10] sm:$0xff]  }
 0x28c   :  { %v5043_v36 = vpop.f32.mrf.mxu0  ;;  %5191 = vmatprep.subr.bf16.mxu0 %v5496_v31 }
 0x28d   :  { %v6379_v38 = vpack.c.bf16 %v1377_v33, %v1374_v61  ;;  %v1398_v42 = vadd.f32 %v5043_v36, %v6370_v23  ;;  %3066 = vadd.xlane.f32.xlu1 %v2999_v35  ;;  %v2997_v39 = vmul.f32 %v1377_v33, %v1377_v33  ;;  %5192 = vmatpush3.bf16.msra.mxu0 %v5496_v31 }
 0x28e   :  { %v1389_v40 = vpop.f32.mrf.mxu0  ;;  %5193 = vmatprep.subr.bf16.mxu0 %v5497_v58 }
 0x28f   :  { %3062 = vadd.xlane.f32.xlu0 %v2997_v39  ;;  %5117 = vmatprep.mubr.bf16.mxu1 %v6379_v38  ;;  %v1390_v44 = vadd.f32 %v6370_v23, %v1389_v40  ;;  %v3002_v41 = vmul.f32 %v1398_v42, %v1398_v42 }
 0x290   :  { %v5044_v17 = vpop.f32.mrf.mxu0  ;;  %5118 = vmatmul.mubr.bf16.vlgmr.msra.gmra.mxu1 %v6382_v52 }
 0x291   :  { %v1401_v27 = vadd.f32 %v5044_v17, %v6370_v23  ;;  %v3000_v24 = vmul.f32 %v1390_v44, %v1390_v44  ;;  %5194 = vmatpush3.bf16.msra.mxu0 %v5497_v58 }
 0x292   :  { %v1392_v46 = vpop.f32.mrf.mxu0 }
 0x293   :  { %v1393_v4 = vadd.f32 %v6370_v23, %v1392_v46  ;;  %3072 = vadd.xlane.f32.xlu0 %v3002_v41  ;;  %v3003_v48 = vmul.f32 %v1401_v27, %v1401_v27  ;;  %v6392_v47 = vpack.c.bf16 %v1401_v27, %v1398_v42 }
 0x294   :  { %v5047_v49 = vpop.f32.mrf.mxu0 }
 0x295   :  { %v6389_v50 = vpack.c.bf16 %v1393_v4, %v1390_v44  ;;  %v1414_v37 = vadd.f32 %v5047_v49, %v6370_v23  ;;  %3074 = vadd.xlane.f32.xlu1 %v3003_v48  ;;  %v3001_v53 = vmul.f32 %v1393_v4, %v1393_v4 }
 0x296   :  { %v1405_v51 = vpop.f32.mrf.mxu0 }
 0x297   :  { %3068 = vadd.xlane.f32.xlu0 %v3000_v24  ;;  %5121 = vmatprep.mubr.bf16.mxu1 %v6389_v50  ;;  %v1406_v55 = vadd.f32 %v6370_v23, %v1405_v51  ;;  %v3006_v59 = vmul.f32 %v1414_v37, %v1414_v37 }
 0x298   :  { %v5048_v54 = vpop.f32.mrf.mxu0  ;;  %5122 = vmatmul.mubr.bf16.gmra.mxu1 %v6392_v47 }
 0x299   :  { %v1417_v56 = vadd.f32 %v5048_v54, %v6370_v23  ;;  %3070 = vadd.xlane.f32.xlu1 %v3001_v53  ;;  %v3004_v1 = vmul.f32 %v1406_v55, %v1406_v55 }
 0x29a   :  { %v1408_v60 = vpop.f32.mrf.mxu0 }
 0x29b   :  { %v1409_v62 = vadd.f32 %v6370_v23, %v1408_v60  ;;  %3080 = vadd.xlane.f32.xlu0 %v3006_v59  ;;  %v3007_v63 = vmul.f32 %v1417_v56, %v1417_v56  ;;  %v6405_v14 = vpack.c.bf16 %v1417_v56, %v1414_v37 }
 0x29c   :  { %v5051_v45 = vpop.f32.mrf.mxu0 }
 0x29d   :  { %v6399_v0 = vpack.c.bf16 %v1409_v62, %v1406_v55  ;;  %v1430_v2 = vadd.f32 %v5051_v45, %v6370_v23  ;;  %3082 = vadd.xlane.f32.xlu1 %v3007_v63  ;;  %v3005_v5 = vmul.f32 %v1409_v62, %v1409_v62 }
 0x29e   :  { %v1421_v3 = vpop.f32.mrf.mxu0 }
 0x29f   :  { %3076 = vadd.xlane.f32.xlu0 %v3004_v1  ;;  %5125 = vmatprep.mubr.bf16.mxu1 %v6399_v0  ;;  %v1422_v6 = vadd.f32 %v6370_v23, %v1421_v3  ;;  %v3010_v9 = vmul.f32 %v1430_v2, %v1430_v2 }
 0x2a0   :  { %v5052_v12 = vpop.f32.mrf.mxu0  ;;  %5126 = vmatmul.mubr.bf16.gmra.mxu1 %v6405_v14 }
 0x2a1   :  { %v1433_v8 = vadd.f32 %v5052_v12, %v6370_v23  ;;  %3078 = vadd.xlane.f32.xlu1 %v3005_v5  ;;  %v3008_v57 = vmul.f32 %v1422_v6, %v1422_v6 }
 0x2a2   :  { %v1424_v10 = vpop.f32.mrf.mxu0 }
 0x2a3   :  { %v1425_v11 = vadd.f32 %v6370_v23, %v1424_v10  ;;  %3088 = vadd.xlane.f32.xlu0 %v3010_v9  ;;  %v3011_v13 = vmul.f32 %v1433_v8, %v1433_v8  ;;  %v6415_v18 = vpack.c.bf16 %v1433_v8, %v1430_v2 }
 0x2a4   :  { %v5055_v15 = vpop.f32.mrf.mxu0 }
 0x2a5   :  { %v6412_v34 = vpack.c.bf16 %v1425_v11, %v1422_v6  ;;  %v1446_v16 = vadd.f32 %v5055_v15, %v6370_v23  ;;  %3090 = vadd.xlane.f32.xlu1 %v3011_v13  ;;  %v3009_v21 = vmul.f32 %v1425_v11, %v1425_v11 }
 0x2a6   :  { %v1437_v20 = vpop.f32.mrf.mxu0 }
 0x2a7   :  { %3084 = vadd.xlane.f32.xlu0 %v3008_v57  ;;  %5129 = vmatprep.mubr.bf16.mxu1 %v6412_v34  ;;  %v1438_v43 = vadd.f32 %v6370_v23, %v1437_v20  ;;  %v3014_v32 = vmul.f32 %v1446_v16, %v1446_v16 }
 0x2a8   :  { %v5056_v22 = vpop.f32.mrf.mxu0  ;;  %5130 = vmatmul.mubr.bf16.gmra.mxu1 %v6415_v18 }
 0x2a9   :  { %v1449_v25 = vadd.f32 %v5056_v22, %v6370_v23  ;;  %3086 = vadd.xlane.f32.xlu1 %v3009_v21  ;;  %v3012_v30 = vmul.f32 %v1438_v43, %v1438_v43 }
 0x2aa   :  { %v1440_v26 = vpop.f32.mrf.mxu0 }
 0x2ab   :  { %v1441_v61 = vadd.f32 %v6370_v23, %v1440_v26  ;;  %3096 = vadd.xlane.f32.xlu0 %v3014_v32  ;;  %v3015_v28 = vmul.f32 %v1449_v25, %v1449_v25  ;;  %v6428_v33 = vpack.c.bf16 %v1449_v25, %v1446_v16 }
 0x2ac   :  { %v5059_v19 = vpop.f32.mrf.mxu0 }
 0x2ad   :  { %v6422_v7 = vpack.c.bf16 %v1441_v61, %v1438_v43  ;;  %v1462_v29 = vadd.f32 %v5059_v19, %v6370_v23  ;;  %3098 = vadd.xlane.f32.xlu1 %v3015_v28  ;;  %v3013_v36 = vmul.f32 %v1441_v61, %v1441_v61 }
 0x2ae   :  { %v1453_v35 = vpop.f32.mrf.mxu0 }
 0x2af   :  { %3092 = vadd.xlane.f32.xlu0 %v3012_v30  ;;  %5133 = vmatprep.mubr.bf16.mxu1 %v6422_v7  ;;  %v1454_v39 = vadd.f32 %v6370_v23, %v1453_v35  ;;  %v3018_v17 = vmul.f32 %v1462_v29, %v1462_v29 }
 0x2b0   :  { %v5060_v42 = vpop.f32.mrf.mxu0  ;;  %5134 = vmatmul.mubr.bf16.gmra.mxu1 %v6428_v33 }
 0x2b1   :  { %v1465_v40 = vadd.f32 %v5060_v42, %v6370_v23  ;;  %3094 = vadd.xlane.f32.xlu1 %v3013_v36  ;;  %v3016_v49 = vmul.f32 %v1454_v39, %v1454_v39 }
 0x2b2   :  { %v1456_v44 = vpop.f32.mrf.mxu0 }
 0x2b3   :  { %v1457_v27 = vadd.f32 %v6370_v23, %v1456_v44  ;;  %3104 = vadd.xlane.f32.xlu0 %v3018_v17  ;;  %v3019_v41 = vmul.f32 %v1465_v40, %v1465_v40  ;;  %v6438_v37 = vpack.c.bf16 %v1465_v40, %v1462_v29 }
 0x2b4   :  { %v5063_v46 = vpop.f32.mrf.mxu0 }
 0x2b5   :  { %v6435_v4 = vpack.c.bf16 %v1457_v27, %v1454_v39  ;;  %v1478_v48 = vadd.f32 %v5063_v46, %v6370_v23  ;;  %3106 = vadd.xlane.f32.xlu1 %v3019_v41  ;;  %v3017_v51 = vmul.f32 %v1457_v27, %v1457_v27  ;;  %v5498_v39 = vld [vmem:[%s7933_s9] sm:$0xff]  }
 0x2b6   :  { %v1469_v24 = vpop.f32.mrf.mxu0  ;;  %5195 = vmatprep.subr.bf16.mxu0 %v5498_v39 }
 0x2b7   :  { %3100 = vadd.xlane.f32.xlu0 %v3016_v49  ;;  %5137 = vmatprep.mubr.bf16.mxu1 %v6435_v4  ;;  %v1470_v54 = vadd.f32 %v6370_v23, %v1469_v24  ;;  %v3022_v56 = vmul.f32 %v1478_v48, %v1478_v48 }
 0x2b8   :  { %v5064_v53 = vpop.f32.mrf.mxu0  ;;  %5138 = vmatmul.mubr.bf16.gmra.mxu1 %v6438_v37  ;;  %5196 = vmatpush3.bf16.msra.mxu0 %v5498_v39 }
 0x2b9   :  { %v1481_v55 = vadd.f32 %v5064_v53, %v6370_v23  ;;  %3102 = vadd.xlane.f32.xlu1 %v3017_v51  ;;  %v3020_v1 = vmul.f32 %v1470_v54, %v1470_v54 }
 0x2ba   :  { %v1472_v59 = vpop.f32.mrf.mxu0 }
 0x2bb   :  { %v1473_v60 = vadd.f32 %v6370_v23, %v1472_v59  ;;  %3112 = vadd.xlane.f32.xlu0 %v3022_v56  ;;  %v3023_v62 = vmul.f32 %v1481_v55, %v1481_v55  ;;  %v6451_v3 = vpack.c.bf16 %v1481_v55, %v1478_v48 }
 0x2bc   :  { %v5067_v63 = vpop.f32.mrf.mxu0 }
 0x2bd   :  { %v6445_v45 = vpack.c.bf16 %v1473_v60, %v1470_v54  ;;  %v1494_v2 = vadd.f32 %v5067_v63, %v6370_v23  ;;  %3114 = vadd.xlane.f32.xlu1 %v3023_v62  ;;  %v3021_v12 = vmul.f32 %v1473_v60, %v1473_v60 }
 0x2be   :  { %v1485_v5 = vpop.f32.mrf.mxu0 }
 0x2bf   :  { %3108 = vadd.xlane.f32.xlu0 %v3020_v1  ;;  %5141 = vmatprep.mubr.bf16.mxu1 %v6445_v45  ;;  %v1486_v8 = vadd.f32 %v6370_v23, %v1485_v5  ;;  %v3026_v10 = vmul.f32 %v1494_v2, %v1494_v2 }
 0x2c0   :  { %v5068_v6 = vpop.f32.mrf.mxu0  ;;  %5142 = vmatmul.mubr.bf16.gmra.mxu1 %v6451_v3 }
 0x2c1   :  { %v1497_v9 = vadd.f32 %v5068_v6, %v6370_v23  ;;  %3110 = vadd.xlane.f32.xlu1 %v3021_v12  ;;  %v3024_v21 = vmul.f32 %v1486_v8, %v1486_v8 }
 0x2c2   :  { %v1488_v11 = vpop.f32.mrf.mxu0 }
 0x2c3   :  { %v1489_v13 = vadd.f32 %v6370_v23, %v1488_v11  ;;  %3120 = vadd.xlane.f32.xlu0 %v3026_v10  ;;  %v3027_v15 = vmul.f32 %v1497_v9, %v1497_v9  ;;  %v6461_v22 = vpack.c.bf16 %v1497_v9, %v1494_v2 }
 0x2c4   :  { %v5071_v16 = vpop.f32.mrf.mxu0 }
 0x2c5   :  { %v6458_v57 = vpack.c.bf16 %v1489_v13, %v1486_v8  ;;  %v1510_v20 = vadd.f32 %v5071_v16, %v6370_v23  ;;  %3122 = vadd.xlane.f32.xlu1 %v3027_v15  ;;  %v3025_v25 = vmul.f32 %v1489_v13, %v1489_v13 }
 0x2c6   :  { %v1501_v43 = vpop.f32.mrf.mxu0 }
 0x2c7   :  { %3116 = vadd.xlane.f32.xlu0 %v3024_v21  ;;  %5145 = vmatprep.mubr.bf16.mxu1 %v6458_v57  ;;  %v1502_v26 = vadd.f32 %v6370_v23, %v1501_v43  ;;  %v3030_v28 = vmul.f32 %v1510_v20, %v1510_v20 }
 0x2c8   :  { %v5072_v32 = vpop.f32.mrf.mxu0  ;;  %5146 = vmatmul.mubr.bf16.gmra.mxu1 %v6461_v22 }
 0x2c9   :  { %v1513_v61 = vadd.f32 %v5072_v32, %v6370_v23  ;;  %3118 = vadd.xlane.f32.xlu1 %v3025_v25  ;;  %v3028_v42 = vmul.f32 %v1502_v26, %v1502_v26  ;;  %v6500_v32 = vld [vmem:[#allocation5 + $0x38] sm:$0xff]  }
 0x2ca   :  { %v1504_v19 = vpop.f32.mrf.mxu0  ;;  %5341 = vmatprep.subr.bf16.mxu0 %v6500_v32 }
 0x2cb   :  { %v1505_v29 = vadd.f32 %v6370_v23, %v1504_v19  ;;  %3128 = vadd.xlane.f32.xlu0 %v3030_v28  ;;  %v3031_v30 = vmul.f32 %v1513_v61, %v1513_v61  ;;  %v6474_v40 = vpack.c.bf16 %v1513_v61, %v1510_v20 }
 0x2cc   :  { %v5075_v31 = vpop.f32.mrf.mxu0 }
 0x2cd   :  { %v6468_v35 = vpack.c.bf16 %v1505_v29, %v1502_v26  ;;  %v1526_v36 = vadd.f32 %v5075_v31, %v6370_v23  ;;  %3130 = vadd.xlane.f32.xlu1 %v3031_v30  ;;  %v3029_v44 = vmul.f32 %v1505_v29, %v1505_v29 }
 0x2ce   :  { %v1517_v17 = vpop.f32.mrf.mxu0 }
 0x2cf   :  { %3124 = vadd.xlane.f32.xlu0 %v3028_v42  ;;  %5149 = vmatprep.mubr.bf16.mxu1 %v6468_v35  ;;  %v1518_v41 = vadd.f32 %v6370_v23, %v1517_v17  ;;  %v3034_v48 = vmul.f32 %v1526_v36, %v1526_v36 }
 0x2d0   :  { %v5076_v27 = vpop.f32.mrf.mxu0  ;;  %5150 = vmatmul.mubr.bf16.gmra.mxu1 %v6474_v40 }
 0x2d1   :  { %v1529_v46 = vadd.f32 %v5076_v27, %v6370_v23  ;;  %3126 = vadd.xlane.f32.xlu1 %v3029_v44  ;;  %v3032_v56 = vmul.f32 %v1518_v41, %v1518_v41 }
 0x2d2   :  { %v1520_v49 = vpop.f32.mrf.mxu0 }
 0x2d3   :  { %v1521_v24 = vadd.f32 %v6370_v23, %v1520_v49  ;;  %3136 = vadd.xlane.f32.xlu0 %v3034_v48  ;;  %v3035_v51 = vmul.f32 %v1529_v46, %v1529_v46  ;;  %v6484_v59 = vpack.c.bf16 %v1529_v46, %v1526_v36 }
 0x2d4   :  { %v5079_v53 = vpop.f32.mrf.mxu0 }
 0x2d5   :  { %v6481_v54 = vpack.c.bf16 %v1521_v24, %v1518_v41  ;;  %v1542_v55 = vadd.f32 %v5079_v53, %v6370_v23  ;;  %3138 = vadd.xlane.f32.xlu1 %v3035_v51  ;;  %v3033_v62 = vmul.f32 %v1521_v24, %v1521_v24 }
 0x2d6   :  { %v1533_v60 = vpop.f32.mrf.mxu0 }
 0x2d7   :  { %3132 = vadd.xlane.f32.xlu0 %v3032_v56  ;;  %5153 = vmatprep.mubr.bf16.mxu1 %v6481_v54  ;;  %v1534_v2 = vadd.f32 %v6370_v23, %v1533_v60  ;;  %v3038_v58 = vmul.f32 %v1542_v55, %v1542_v55 }
 0x2d8   :  { %v5080_v63 = vpop.f32.mrf.mxu0  ;;  %5154 = vmatmul.mubr.bf16.gmra.mxu1 %v6484_v59 }
 0x2d9   :  { %v1545_v1 = vadd.f32 %v5080_v63, %v6370_v23  ;;  %3134 = vadd.xlane.f32.xlu1 %v3033_v62  ;;  %v3036_v11 = vmul.f32 %v1534_v2, %v1534_v2 }
 0x2da   :  { %v1536_v5 = vpop.f32.mrf.mxu0 }
 0x2db   :  { %v1537_v12 = vadd.f32 %v6370_v23, %v1536_v5  ;;  %3144 = vadd.xlane.f32.xlu0 %v3038_v58  ;;  %v3039_v6 = vmul.f32 %v1545_v1, %v1545_v1  ;;  %v6494_v13 = vpack.c.bf16 %v1545_v1, %v1542_v55 }
 0x2dc   :  { %v5083_v8 = vpop.f32.mrf.mxu0 }
 0x2dd   :  { %v6491_v9 = vpack.c.bf16 %v1537_v12, %v1534_v2  ;;  %v1558_v10 = vadd.f32 %v5083_v8, %v6370_v23  ;;  %3146 = vadd.xlane.f32.xlu1 %v3039_v6  ;;  %v3037_v16 = vmul.f32 %v1537_v12, %v1537_v12 }
 0x2de   :  { %v1549_v15 = vpop.f32.mrf.mxu0 }
 0x2df   :  { %3140 = vadd.xlane.f32.xlu0 %v3036_v11  ;;  %5157 = vmatprep.mubr.bf16.mxu1 %v6491_v9  ;;  %v1550_v21 = vadd.f32 %v6370_v23, %v1549_v15  ;;  %v3042_v25 = vmul.f32 %v1558_v10, %v1558_v10 }
 0x2e0   :  { %v5084_v20 = vpop.f32.mrf.mxu0  ;;  %5158 = vmatmul.mubr.bf16.gmra.mxu1 %v6494_v13 }
 0x2e1   :  { %v1561_v43 = vadd.f32 %v5084_v20, %v6370_v23  ;;  %3142 = vadd.xlane.f32.xlu1 %v3037_v16  ;;  %v3040_v31 = vmul.f32 %v1550_v21, %v1550_v21 }
 0x2e2   :  { %v1552_v26 = vpop.f32.mrf.mxu0 }
 0x2e3   :  { %v1553_v61 = vadd.f32 %v6370_v23, %v1552_v26  ;;  %3152 = vadd.xlane.f32.xlu0 %v3042_v25  ;;  %v3043_v28 = vmul.f32 %v1561_v43, %v1561_v43  ;;  %v6507_v36 = vpack.c.bf16 %v1561_v43, %v1558_v10 }
 0x2e4   :  { %v5087_v19 = vpop.f32.mrf.mxu0 }
 0x2e5   :  { %v6504_v29 = vpack.c.bf16 %v1553_v61, %v1550_v21  ;;  %v1574_v30 = vadd.f32 %v5087_v19, %v6370_v23  ;;  %3154 = vadd.xlane.f32.xlu1 %v3043_v28  ;;  %v3041_v39 = vmul.f32 %v1553_v61, %v1553_v61 }
 0x2e6   :  { %v1565_v42 = vpop.f32.mrf.mxu0 }
 0x2e7   :  { %3148 = vadd.xlane.f32.xlu0 %v3040_v31  ;;  %5161 = vmatprep.mubr.bf16.mxu1 %v6504_v29  ;;  %v1566_v44 = vadd.f32 %v6370_v23, %v1565_v42  ;;  %v3046_v41 = vmul.f32 %v1574_v30, %v1574_v30 }
 0x2e8   :  { %v5088_v17 = vpop.f32.mrf.mxu0  ;;  %5162 = vmatmul.mubr.bf16.gmra.mxu1 %v6507_v36 }
 0x2e9   :  { %v1577_v27 = vadd.f32 %v5088_v17, %v6370_v23  ;;  %3150 = vadd.xlane.f32.xlu1 %v3041_v39  ;;  %v3044_v55 = vmul.f32 %v1566_v44, %v1566_v44 }
 0x2ea   :  { %v1568_v46 = vpop.f32.mrf.mxu0 }
 0x2eb   :  { %v1569_v48 = vadd.f32 %v6370_v23, %v1568_v46  ;;  %3160 = vadd.xlane.f32.xlu0 %v3046_v41  ;;  %v3047_v49 = vmul.f32 %v1577_v27, %v1577_v27  ;;  %v6517_v56 = vpack.c.bf16 %v1577_v27, %v1574_v30 }
 0x2ec   :  { %v5091_v24 = vpop.f32.mrf.mxu0 }
 0x2ed   :  { %v6514_v51 = vpack.c.bf16 %v1569_v48, %v1566_v44  ;;  %v1590_v53 = vadd.f32 %v5091_v24, %v6370_v23  ;;  %3162 = vadd.xlane.f32.xlu1 %v3047_v49  ;;  %v3045_v62 = vmul.f32 %v1569_v48, %v1569_v48 }
 0x2ee   :  { %v1581_v60 = vpop.f32.mrf.mxu0 }
 0x2ef   :  { %3156 = vadd.xlane.f32.xlu0 %v3044_v55  ;;  %5165 = vmatprep.mubr.bf16.mxu1 %v6514_v51  ;;  %v1582_v2 = vadd.f32 %v6370_v23, %v1581_v60  ;;  %v3050_v58 = vmul.f32 %v1590_v53, %v1590_v53 }
 0x2f0   :  { %v5092_v63 = vpop.f32.mrf.mxu0  ;;  %5166 = vmatmul.mubr.bf16.gmra.mxu1 %v6517_v56 }
 0x2f1   :  { %v1593_v1 = vadd.f32 %v5092_v63, %v6370_v23  ;;  %3158 = vadd.xlane.f32.xlu1 %v3045_v62  ;;  %v3048_v15 = vmul.f32 %v1582_v2, %v1582_v2 }
 0x2f2   :  { %v1584_v5 = vpop.f32.mrf.mxu0 }
 0x2f3   :  { %v1585_v12 = vadd.f32 %v6370_v23, %v1584_v5  ;;  %3168 = vadd.xlane.f32.xlu0 %v3050_v58  ;;  %v3051_v6 = vmul.f32 %v1593_v1, %v1593_v1  ;;  %v6527_v16 = vpack.c.bf16 %v1593_v1, %v1590_v53 }
 0x2f4   :  { %v5095_v8 = vpop.f32.mrf.mxu0 }
 0x2f5   :  { %v6524_v10 = vpack.c.bf16 %v1585_v12, %v1582_v2  ;;  %v1606_v11 = vadd.f32 %v5095_v8, %v6370_v23  ;;  %3170 = vadd.xlane.f32.xlu1 %v3051_v6  ;;  %v3049_v21 = vmul.f32 %v1585_v12, %v1585_v12 }
 0x2f6   :  { %v1597_v20 = vpop.f32.mrf.mxu0 }
 0x2f7   :  { %3164 = vadd.xlane.f32.xlu0 %v3048_v15  ;;  %5169 = vmatprep.mubr.bf16.mxu1 %v6524_v10  ;;  %v1598_v25 = vadd.f32 %v6370_v23, %v1597_v20  ;;  %v3054_v61 = vmul.f32 %v1606_v11, %v1606_v11 }
 0x2f8   :  { %v5096_v43 = vpop.f32.mrf.mxu0  ;;  %5170 = vmatmul.mubr.bf16.gmra.mxu1 %v6527_v16 }
 0x2f9   :  { %v1609_v26 = vadd.f32 %v5096_v43, %v6370_v23  ;;  %3166 = vadd.xlane.f32.xlu1 %v3049_v21  ;;  %v3052_v17 = vmul.f32 %v1598_v25, %v1598_v25 }
 0x2fa   :  { %v1600_v28 = vpop.f32.mrf.mxu0 }
 0x2fb   :  { %v1601_v19 = vadd.f32 %v6370_v23, %v1600_v28  ;;  %3176 = vadd.xlane.f32.xlu0 %v3054_v61  ;;  %v3055_v30 = vmul.f32 %v1609_v26, %v1609_v26  ;;  %v6537_v44 = vpack.c.bf16 %v1609_v26, %v1606_v11 }
 0x2fc   :  { %v5099_v31 = vpop.f32.mrf.mxu0 }
 0x2fd   :  { %v6534_v42 = vpack.c.bf16 %v1601_v19, %v1598_v25  ;;  %v1622_v39 = vadd.f32 %v5099_v31, %v6370_v23  ;;  %3178 = vadd.xlane.f32.xlu1 %v3055_v30  ;;  %v3053_v41 = vmul.f32 %v1601_v19, %v1601_v19 }
 0x2fe   :  { %v1613_v27 = vpop.f32.mrf.mxu0 }
 0x2ff   :  { %3172 = vadd.xlane.f32.xlu0 %v3052_v17  ;;  %5173 = vmatprep.mubr.bf16.mxu1 %v6534_v42  ;;  %v1614_v48 = vadd.f32 %v6370_v23, %v1613_v27  ;;  %v3058_v24 = vmul.f32 %v1622_v39, %v1622_v39 }
 0x300   :  { %v5100_v46 = vpop.f32.mrf.mxu0  ;;  %5174 = vmatmul.mubr.bf16.gmra.mxu1 %v6537_v44 }
 0x301   :  { %v1625_v49 = vadd.f32 %v5100_v46, %v6370_v23  ;;  %3174 = vadd.xlane.f32.xlu1 %v3053_v41  ;;  %v3056_v63 = vmul.f32 %v1614_v48, %v1614_v48 }
 0x302   :  { %v1616_v53 = vpop.f32.mrf.mxu0 }
 0x303   :  { %v1617_v55 = vadd.f32 %v6370_v23, %v1616_v53  ;;  %3184 = vadd.xlane.f32.xlu0 %v3058_v24  ;;  %v3059_v60 = vmul.f32 %v1625_v49, %v1625_v49  ;;  %v6546_v2 = vpack.c.bf16 %v1625_v49, %v1622_v39  ;;  %v6553_v23 = vld [vmem:[%s7932_s8] ss:$0 sm:$0xff]  ;;  %v5501_v53 = vld [vmem:[#allocation5 + $0x28] sm:$0xff]  }
 0x304   :  { %v5500_v39 = vld [vmem:[#allocation5 + $0x30] sm:$0xff]  }
 0x305   :  { %v6544_v62 = vpack.c.bf16 %v1617_v55, %v1614_v48  ;;  %3186 = vadd.xlane.f32.xlu1 %v3059_v60  ;;  %v3057_v1 = vmul.f32 %v1617_v55, %v1617_v55 }
 0x307   :  { %3180 = vadd.xlane.f32.xlu0 %v3056_v63  ;;  %5177 = vmatprep.mubr.bf16.mxu1 %v6544_v62 }
 0x308   :  { %5178 = vmatmul.mubr.bf16.gmra.mxu1 %v6546_v2 }
 0x309   :  { %3182 = vadd.xlane.f32.xlu1 %v3057_v1 }
 0x350   :  { %v5119_v58 = vpop.f32.mrf.mxu1 }
 0x351   :  { %v1774_v11 = vadd.f32 %v5119_v58, %v6553_v23 }
 0x352   :  { %v1765_v5 = vpop.f32.mrf.mxu1 }
 0x353   :  { %v1766_v6 = vadd.f32 %v6553_v23, %v1765_v5  ;;  %v2022_v61 = vmax.f32 %v1774_v11, 0.0 }
 0x354   :  { %v5120_v12 = vpop.f32.mrf.mxu1 }
 0x355   :  { %v1777_v8 = vadd.f32 %v5120_v12, %v6553_v23  ;;  %v2020_v25 = vmax.f32 %v1766_v6, 0.0  ;;  %v5502_v6 = vld [vmem:[#allocation5 + $0x20] sm:$0xff]  }
 0x356   :  { %v1768_v15 = vpop.f32.mrf.mxu1 }
 0x357   :  { %v1769_v20 = vadd.f32 %v6553_v23, %v1768_v15  ;;  %v2023_v21 = vmax.f32 %v1777_v8, 0.0 }
 0x358   :  { %v5123_v43 = vpop.f32.mrf.mxu1 }
 0x359   :  { %v2021_v26 = vmax.f32 %v1769_v20, 0.0  ;;  %v2102_v30 = vpack.c.bf16 %v2023_v21, %v2022_v61  ;;  %v1790_v41 = vadd.f32 %v5123_v43, %v6553_v23 }
 0x35a   :  { %v1781_v28 = vpop.f32.mrf.mxu1 }
 0x35b   :  { %v2101_v19 = vpack.c.bf16 %v2021_v26, %v2020_v25  ;;  %v1782_v17 = vadd.f32 %v6553_v23, %v1781_v28  ;;  %v2026_v63 = vmax.f32 %v1790_v41, 0.0  ;;  %v5503_v25 = vld [vmem:[#allocation5 + $0x18] sm:$0xff]  }
 0x35c   :  { %v5124_v31 = vpop.f32.mrf.mxu1 }
 0x35d   :  { %v1793_v27 = vadd.f32 %v5124_v31, %v6553_v23  ;;  %5197 = vmatprep.mubr.bf16.mxu0 %v2101_v19  ;;  %v2024_v55 = vmax.f32 %v1782_v17, 0.0  ;;  %v5504_v17 = vld [vmem:[#allocation5 + $0x10] sm:$0xff]  }
 0x35e   :  { %v1784_v46 = vpop.f32.mrf.mxu1  ;;  %5198 = vmatmul.mubr.bf16.vlgmr.msra.gmra.mxu0 %v2102_v30 }
 0x35f   :  { %v1785_v48 = vadd.f32 %v6553_v23, %v1784_v46  ;;  %5342 = vmatpush3.bf16.msra.mxu0 %v6500_v32  ;;  %v2027_v49 = vmax.f32 %v1793_v27, 0.0 }
 0x360   :  { %v5127_v24 = vpop.f32.mrf.mxu1  ;;  %5343 = vmatprep.subr.bf16.mxu0 %v5500_v39 }
 0x361   :  { %v2025_v60 = vmax.f32 %v1785_v48, 0.0  ;;  %v2104_v5 = vpack.c.bf16 %v2027_v49, %v2026_v63  ;;  %v1806_v32 = vadd.f32 %v5127_v24, %v6553_v23 }
 0x362   :  { %v1797_v1 = vpop.f32.mrf.mxu1 }
 0x363   :  { %v2103_v58 = vpack.c.bf16 %v2025_v60, %v2024_v55  ;;  %5344 = vmatpush3.bf16.msra.mxu0 %v5500_v39  ;;  %v1798_v8 = vadd.f32 %v6553_v23, %v1797_v1  ;;  %v2030_v28 = vmax.f32 %v1806_v32, 0.0  ;;  %v5505_v55 = vld [vmem:[#allocation5 + $0x8] sm:$0xff]  }
 0x364   :  { %v5128_v12 = vpop.f32.mrf.mxu1  ;;  %5345 = vmatprep.subr.bf16.mxu0 %v5501_v53 }
 0x365   :  { %v1809_v11 = vadd.f32 %v5128_v12, %v6553_v23  ;;  %5201 = vmatprep.mubr.bf16.mxu0 %v2103_v58  ;;  %v2028_v26 = vmax.f32 %v1798_v8, 0.0  ;;  %v5506_v8 = vld [vmem:[#allocation5] sm:$0xff]  }
 0x366   :  { %v1800_v15 = vpop.f32.mrf.mxu1  ;;  %5202 = vmatmul.mubr.bf16.gmra.mxu0 %v2104_v5 }
 0x367   :  { %v1801_v20 = vadd.f32 %v6553_v23, %v1800_v15  ;;  %5346 = vmatpush3.bf16.msra.mxu0 %v5501_v53  ;;  %v2031_v21 = vmax.f32 %v1809_v11, 0.0 }
 0x368   :  { %v5131_v43 = vpop.f32.mrf.mxu1  ;;  %5347 = vmatprep.subr.bf16.mxu0 %v5502_v6 }
 0x369   :  { %v2029_v61 = vmax.f32 %v1801_v20, 0.0  ;;  %v2106_v31 = vpack.c.bf16 %v2031_v21, %v2030_v28  ;;  %v1822_v46 = vadd.f32 %v5131_v43, %v6553_v23 }
 0x36a   :  { %v1813_v19 = vpop.f32.mrf.mxu1 }
 0x36b   :  { %v2105_v30 = vpack.c.bf16 %v2029_v61, %v2028_v26  ;;  %5348 = vmatpush3.bf16.msra.mxu0 %v5502_v6  ;;  %v1814_v27 = vadd.f32 %v6553_v23, %v1813_v19  ;;  %v2034_v1 = vmax.f32 %v1822_v46, 0.0 }
 0x36c   :  { %v5132_v39 = vpop.f32.mrf.mxu1  ;;  %5349 = vmatprep.subr.bf16.mxu0 %v5503_v25 }
 0x36d   :  { %v1825_v41 = vadd.f32 %v5132_v39, %v6553_v23  ;;  %5205 = vmatprep.mubr.bf16.mxu0 %v2105_v30  ;;  %v2032_v60 = vmax.f32 %v1814_v27, 0.0 }
 0x36e   :  { %v1816_v48 = vpop.f32.mrf.mxu1  ;;  %5206 = vmatmul.mubr.bf16.gmra.mxu0 %v2106_v31 }
 0x36f   :  { %v1817_v49 = vadd.f32 %v6553_v23, %v1816_v48  ;;  %5350 = vmatpush3.bf16.msra.mxu0 %v5503_v25  ;;  %v2035_v24 = vmax.f32 %v1825_v41, 0.0 }
 0x370   :  { %v5135_v53 = vpop.f32.mrf.mxu1  ;;  %5351 = vmatprep.subr.bf16.mxu0 %v5504_v17 }
 0x371   :  { %v2033_v63 = vmax.f32 %v1817_v49, 0.0  ;;  %v2108_v12 = vpack.c.bf16 %v2035_v24, %v2034_v1  ;;  %v1838_v15 = vadd.f32 %v5135_v53, %v6553_v23 }
 0x372   :  { %v1829_v58 = vpop.f32.mrf.mxu1 }
 0x373   :  { %v2107_v5 = vpack.c.bf16 %v2033_v63, %v2032_v60  ;;  %5352 = vmatpush3.bf16.msra.mxu0 %v5504_v17  ;;  %v1830_v11 = vadd.f32 %v6553_v23, %v1829_v58  ;;  %v2038_v28 = vmax.f32 %v1838_v15, 0.0  ;;  %v5507_v15 = vld [vmem:[%s7935_s11 + $0x38] sm:$0xff]  }
 0x374   :  { %v5136_v6 = vpop.f32.mrf.mxu1  ;;  %5353 = vmatprep.subr.bf16.mxu0 %v5505_v55  ;;  %5261 = vmatprep.subr.bf16.mxu1 %v5507_v15 }
 0x375   :  { %v1841_v32 = vadd.f32 %v5136_v6, %v6553_v23  ;;  %5209 = vmatprep.mubr.bf16.mxu0 %v2107_v5  ;;  %v2036_v26 = vmax.f32 %v1830_v11, 0.0  ;;  %5262 = vmatpush3.bf16.msra.mxu1 %v5507_v15 }
 0x376   :  { %v1832_v20 = vpop.f32.mrf.mxu1  ;;  %5210 = vmatmul.mubr.bf16.gmra.mxu0 %v2108_v12 }
 0x377   :  { %v1833_v21 = vadd.f32 %v6553_v23, %v1832_v20  ;;  %5354 = vmatpush3.bf16.msra.mxu0 %v5505_v55  ;;  %v2039_v43 = vmax.f32 %v1841_v32, 0.0 }
 0x378   :  { %v5139_v25 = vpop.f32.mrf.mxu1  ;;  %5355 = vmatprep.subr.bf16.mxu0 %v5506_v8 }
 0x379   :  { %v2037_v61 = vmax.f32 %v1833_v21, 0.0  ;;  %v2110_v31 = vpack.c.bf16 %v2039_v43, %v2038_v28  ;;  %v1854_v41 = vadd.f32 %v5139_v25, %v6553_v23 }
 0x37a   :  { %v1845_v19 = vpop.f32.mrf.mxu1 }
 0x37b   :  { %v2109_v30 = vpack.c.bf16 %v2037_v61, %v2036_v26  ;;  %5356 = vmatpush3.bf16.msra.mxu0 %v5506_v8  ;;  %v1846_v17 = vadd.f32 %v6553_v23, %v1845_v19  ;;  %v2042_v60 = vmax.f32 %v1854_v41, 0.0  ;;  %v5508_v41 = vld [vmem:[%s7935_s11 + $0x30] sm:$0xff]  }
 0x37c   :  { %v5140_v39 = vpop.f32.mrf.mxu1  ;;  %5263 = vmatprep.subr.bf16.mxu1 %v5508_v41 }
 0x37d   :  { %v1857_v27 = vadd.f32 %v5140_v39, %v6553_v23  ;;  %5213 = vmatprep.mubr.bf16.mxu0 %v2109_v30  ;;  %v2040_v53 = vmax.f32 %v1846_v17, 0.0  ;;  %5264 = vmatpush3.bf16.msra.mxu1 %v5508_v41 }
 0x37e   :  { %v1848_v46 = vpop.f32.mrf.mxu1  ;;  %5214 = vmatmul.mubr.bf16.gmra.mxu0 %v2110_v31 }
 0x37f   :  { %v1849_v48 = vadd.f32 %v6553_v23, %v1848_v46  ;;  %v2043_v49 = vmax.f32 %v1857_v27, 0.0 }
 0x380   :  { %v5143_v24 = vpop.f32.mrf.mxu1 }
 0x381   :  { %v2041_v55 = vmax.f32 %v1849_v48, 0.0  ;;  %v2112_v58 = vpack.c.bf16 %v2043_v49, %v2042_v60  ;;  %v1870_v8 = vadd.f32 %v5143_v24, %v6553_v23  ;;  %v5509_v48 = vld [vmem:[%s7935_s11 + $0x28] sm:$0xff]  }
 0x382   :  { %v1861_v63 = vpop.f32.mrf.mxu1  ;;  %5265 = vmatprep.subr.bf16.mxu1 %v5509_v48 }
 0x383   :  { %v2111_v1 = vpack.c.bf16 %v2041_v55, %v2040_v53  ;;  %v1862_v12 = vadd.f32 %v6553_v23, %v1861_v63  ;;  %v2046_v26 = vmax.f32 %v1870_v8, 0.0  ;;  %5266 = vmatpush3.bf16.msra.mxu1 %v5509_v48 }
 0x384   :  { %v5144_v5 = vpop.f32.mrf.mxu1 }
 0x385   :  { %v1873_v6 = vadd.f32 %v5144_v5, %v6553_v23  ;;  %5217 = vmatprep.mubr.bf16.mxu0 %v2111_v1  ;;  %v2044_v43 = vmax.f32 %v1862_v12, 0.0 }
 0x386   :  { %v1864_v11 = vpop.f32.mrf.mxu1  ;;  %5218 = vmatmul.mubr.bf16.gmra.mxu0 %v2112_v58 }
 0x387   :  { %v1865_v32 = vadd.f32 %v6553_v23, %v1864_v11  ;;  %v2047_v20 = vmax.f32 %v1873_v6, 0.0 }
 0x388   :  { %v5147_v21 = vpop.f32.mrf.mxu1 }
 0x389   :  { %v2045_v25 = vmax.f32 %v1865_v32, 0.0  ;;  %v2114_v19 = vpack.c.bf16 %v2047_v20, %v2046_v26  ;;  %v1886_v17 = vadd.f32 %v5147_v21, %v6553_v23  ;;  %v5510_v32 = vld [vmem:[%s7935_s11 + $0x20] sm:$0xff]   ;;  %v5511_v20 = vld [vmem:[%s7935_s11 + $0x18] sm:$0xff]  }
 0x38a   :  { %v1877_v61 = vpop.f32.mrf.mxu1  ;;  %5267 = vmatprep.subr.bf16.mxu1 %v5510_v32 }
 0x38b   :  { %v2113_v28 = vpack.c.bf16 %v2045_v25, %v2044_v43  ;;  %v1878_v31 = vadd.f32 %v6553_v23, %v1877_v61  ;;  %v2050_v60 = vmax.f32 %v1886_v17, 0.0  ;;  %5268 = vmatpush3.bf16.msra.mxu1 %v5510_v32 }
 0x38c   :  { %v5148_v30 = vpop.f32.mrf.mxu1  ;;  %5269 = vmatprep.subr.bf16.mxu1 %v5511_v20 }
 0x38d   :  { %v1889_v39 = vadd.f32 %v5148_v30, %v6553_v23  ;;  %5221 = vmatprep.mubr.bf16.mxu0 %v2113_v28  ;;  %v2048_v53 = vmax.f32 %v1878_v31, 0.0 }
 0x38e   :  { %v1880_v27 = vpop.f32.mrf.mxu1  ;;  %5222 = vmatmul.mubr.bf16.gmra.mxu0 %v2114_v19 }
 0x38f   :  { %v1881_v46 = vadd.f32 %v6553_v23, %v1880_v27  ;;  %v2051_v49 = vmax.f32 %v1889_v39, 0.0  ;;  %5270 = vmatpush3.bf16.msra.mxu1 %v5511_v20 }
 0x390   :  { %v5151_v24 = vpop.f32.mrf.mxu1 }
 0x391   :  { %v2049_v55 = vmax.f32 %v1881_v46, 0.0  ;;  %v2116_v58 = vpack.c.bf16 %v2051_v49, %v2050_v60  ;;  %v1902_v8 = vadd.f32 %v5151_v24, %v6553_v23  ;;  %v5512_v46 = vld [vmem:[%s7935_s11 + $0x10] sm:$0xff]  }
 0x392   :  { %v1893_v63 = vpop.f32.mrf.mxu1  ;;  %5271 = vmatprep.subr.bf16.mxu1 %v5512_v46 }
 0x393   :  { %v2115_v1 = vpack.c.bf16 %v2049_v55, %v2048_v53  ;;  %v1894_v12 = vadd.f32 %v6553_v23, %v1893_v63  ;;  %v2054_v61 = vmax.f32 %v1902_v8, 0.0  ;;  %5272 = vmatpush3.bf16.msra.mxu1 %v5512_v46 }
 0x394   :  { %v5152_v5 = vpop.f32.mrf.mxu1 }
 0x395   :  { %v1905_v6 = vadd.f32 %v5152_v5, %v6553_v23  ;;  %5225 = vmatprep.mubr.bf16.mxu0 %v2115_v1  ;;  %v2052_v25 = vmax.f32 %v1894_v12, 0.0  ;;  %v5513_v1 = vld [vmem:[%s7935_s11 + $0x8] sm:$0xff]  }
 0x396   :  { %v1896_v11 = vpop.f32.mrf.mxu1  ;;  %5226 = vmatmul.mubr.bf16.gmra.mxu0 %v2116_v58  ;;  %5273 = vmatprep.subr.bf16.mxu1 %v5513_v1 }
 0x397   :  { %v1897_v15 = vadd.f32 %v6553_v23, %v1896_v11  ;;  %v2055_v21 = vmax.f32 %v1905_v6, 0.0  ;;  %5274 = vmatpush3.bf16.msra.mxu1 %v5513_v1 }
 0x398   :  { %v5155_v43 = vpop.f32.mrf.mxu1 }
 0x399   :  { %v2053_v26 = vmax.f32 %v1897_v15, 0.0  ;;  %v2118_v30 = vpack.c.bf16 %v2055_v21, %v2054_v61  ;;  %v1918_v27 = vadd.f32 %v5155_v43, %v6553_v23  ;;  %v5514_v15 = vld [vmem:[%s7935_s11] sm:$0xff]  }
 0x39a   :  { %v1909_v28 = vpop.f32.mrf.mxu1  ;;  %5275 = vmatprep.subr.bf16.mxu1 %v5514_v15 }
 0x39b   :  { %v2117_v19 = vpack.c.bf16 %v2053_v26, %v2052_v25  ;;  %v1910_v39 = vadd.f32 %v6553_v23, %v1909_v28  ;;  %v2058_v60 = vmax.f32 %v1918_v27, 0.0  ;;  %5276 = vmatpush3.bf16.msra.mxu1 %v5514_v15 }
 0x39c   :  { %v5156_v31 = vpop.f32.mrf.mxu1 }
 0x39d   :  { %v1921_v17 = vadd.f32 %v5156_v31, %v6553_v23  ;;  %5229 = vmatprep.mubr.bf16.mxu0 %v2117_v19  ;;  %v2056_v53 = vmax.f32 %v1910_v39, 0.0 }
 0x39e   :  { %v1912_v41 = vpop.f32.mrf.mxu1  ;;  %5230 = vmatmul.mubr.bf16.gmra.mxu0 %v2118_v30 }
 0x39f   :  { %v1913_v48 = vadd.f32 %v6553_v23, %v1912_v41  ;;  %v2059_v49 = vmax.f32 %v1921_v17, 0.0 }
 0x3a0   :  { %v5159_v24 = vpop.f32.mrf.mxu1 }
 0x3a1   :  { %v2057_v55 = vmax.f32 %v1913_v48, 0.0  ;;  %v2120_v5 = vpack.c.bf16 %v2059_v49, %v2058_v60  ;;  %v1934_v11 = vadd.f32 %v5159_v24, %v6553_v23 }
 0x3a2   :  { %v1925_v63 = vpop.f32.mrf.mxu1 }
 0x3a3   :  { %v2119_v58 = vpack.c.bf16 %v2057_v55, %v2056_v53  ;;  %v1926_v6 = vadd.f32 %v6553_v23, %v1925_v63  ;;  %v2062_v61 = vmax.f32 %v1934_v11, 0.0 }
 0x3a4   :  { %v5160_v12 = vpop.f32.mrf.mxu1 }
 0x3a5   :  { %v1937_v8 = vadd.f32 %v5160_v12, %v6553_v23  ;;  %5233 = vmatprep.mubr.bf16.mxu0 %v2119_v58  ;;  %v2060_v25 = vmax.f32 %v1926_v6, 0.0 }
 0x3a6   :  { %v1928_v32 = vpop.f32.mrf.mxu1  ;;  %5234 = vmatmul.mubr.bf16.gmra.mxu0 %v2120_v5 }
 0x3a7   :  { %v1929_v20 = vadd.f32 %v6553_v23, %v1928_v32  ;;  %v2063_v21 = vmax.f32 %v1937_v8, 0.0 }
 0x3a8   :  { %v5163_v43 = vpop.f32.mrf.mxu1 }
 0x3a9   :  { %v2061_v26 = vmax.f32 %v1929_v20, 0.0  ;;  %v2122_v30 = vpack.c.bf16 %v2063_v21, %v2062_v61  ;;  %v1950_v27 = vadd.f32 %v5163_v43, %v6553_v23 }
 0x3aa   :  { %v1941_v28 = vpop.f32.mrf.mxu1 }
 0x3ab   :  { %v2121_v19 = vpack.c.bf16 %v2061_v26, %v2060_v25  ;;  %v1942_v39 = vadd.f32 %v6553_v23, %v1941_v28  ;;  %v2066_v55 = vmax.f32 %v1950_v27, 0.0 }
 0x3ac   :  { %v5164_v31 = vpop.f32.mrf.mxu1 }
 0x3ad   :  { %v1953_v17 = vadd.f32 %v5164_v31, %v6553_v23  ;;  %5237 = vmatprep.mubr.bf16.mxu0 %v2121_v19  ;;  %v2064_v24 = vmax.f32 %v1942_v39, 0.0 }
 0x3ae   :  { %v1944_v41 = vpop.f32.mrf.mxu1  ;;  %5238 = vmatmul.mubr.bf16.gmra.mxu0 %v2122_v30 }
 0x3af   :  { %v1945_v46 = vadd.f32 %v6553_v23, %v1944_v41  ;;  %v2067_v48 = vmax.f32 %v1953_v17, 0.0 }
 0x3b0   :  { %v5167_v49 = vpop.f32.mrf.mxu1 }
 0x3b1   :  { %v2065_v53 = vmax.f32 %v1945_v46, 0.0  ;;  %v2124_v1 = vpack.c.bf16 %v2067_v48, %v2066_v55  ;;  %v1966_v6 = vadd.f32 %v5167_v49, %v6553_v23 }
 0x3b2   :  { %v1957_v60 = vpop.f32.mrf.mxu1 }
 0x3b3   :  { %v2123_v63 = vpack.c.bf16 %v2065_v53, %v2064_v24  ;;  %v1958_v5 = vadd.f32 %v6553_v23, %v1957_v60  ;;  %v2070_v43 = vmax.f32 %v1966_v6, 0.0 }
 0x3b4   :  { %v5168_v58 = vpop.f32.mrf.mxu1 }
 0x3b5   :  { %v1969_v12 = vadd.f32 %v5168_v58, %v6553_v23  ;;  %5241 = vmatprep.mubr.bf16.mxu0 %v2123_v63  ;;  %v2068_v20 = vmax.f32 %v1958_v5, 0.0 }
 0x3b6   :  { %v1960_v8 = vpop.f32.mrf.mxu1  ;;  %5242 = vmatmul.mubr.bf16.gmra.mxu0 %v2124_v1 }
 0x3b7   :  { %v1961_v11 = vadd.f32 %v6553_v23, %v1960_v8  ;;  %v2071_v32 = vmax.f32 %v1969_v12, 0.0 }
 0x3b8   :  { %v5171_v15 = vpop.f32.mrf.mxu1 }
 0x3b9   :  { %v2069_v21 = vmax.f32 %v1961_v11, 0.0  ;;  %v2126_v61 = vpack.c.bf16 %v2071_v32, %v2070_v43  ;;  %v1982_v31 = vadd.f32 %v5171_v15, %v6553_v23 }
 0x3ba   :  { %v1973_v25 = vpop.f32.mrf.mxu1 }
 0x3bb   :  { %v2125_v26 = vpack.c.bf16 %v2069_v21, %v2068_v20  ;;  %v1974_v19 = vadd.f32 %v6553_v23, %v1973_v25  ;;  %v2074_v49 = vmax.f32 %v1982_v31, 0.0 }
 0x3bc   :  { %v5172_v28 = vpop.f32.mrf.mxu1 }
 0x3bd   :  { %v1985_v30 = vadd.f32 %v5172_v28, %v6553_v23  ;;  %5245 = vmatprep.mubr.bf16.mxu0 %v2125_v26  ;;  %v2072_v46 = vmax.f32 %v1974_v19, 0.0 }
 0x3be   :  { %v1976_v39 = vpop.f32.mrf.mxu1  ;;  %5246 = vmatmul.mubr.bf16.gmra.mxu0 %v2126_v61 }
 0x3bf   :  { %v1977_v17 = vadd.f32 %v6553_v23, %v1976_v39  ;;  %v2075_v27 = vmax.f32 %v1985_v30, 0.0 }
 0x3c0   :  { %v5175_v41 = vpop.f32.mrf.mxu1 }
 0x3c1   :  { %v2073_v48 = vmax.f32 %v1977_v17, 0.0  ;;  %v2128_v55 = vpack.c.bf16 %v2075_v27, %v2074_v49  ;;  %v1998_v58 = vadd.f32 %v5175_v41, %v6553_v23 }
 0x3c2   :  { %v1989_v24 = vpop.f32.mrf.mxu1 }
 0x3c3   :  { %v2127_v53 = vpack.c.bf16 %v2073_v48, %v2072_v46  ;;  %v1990_v63 = vadd.f32 %v6553_v23, %v1989_v24  ;;  %v2078_v15 = vmax.f32 %v1998_v58, 0.0 }
 0x3c4   :  { %v5176_v60 = vpop.f32.mrf.mxu1 }
 0x3c5   :  { %v2001_v1 = vadd.f32 %v5176_v60, %v6553_v23  ;;  %5249 = vmatprep.mubr.bf16.mxu0 %v2127_v53  ;;  %v2076_v11 = vmax.f32 %v1990_v63, 0.0 }
 0x3c6   :  { %v1992_v5 = vpop.f32.mrf.mxu1  ;;  %5250 = vmatmul.mubr.bf16.gmra.mxu0 %v2128_v55 }
 0x3c7   :  { %v1993_v12 = vadd.f32 %v6553_v23, %v1992_v5  ;;  %v2079_v6 = vmax.f32 %v2001_v1, 0.0 }
 0x3c8   :  { %v5179_v8 = vpop.f32.mrf.mxu1 }
 0x3c9   :  { %v2077_v32 = vmax.f32 %v1993_v12, 0.0  ;;  %v2130_v43 = vpack.c.bf16 %v2079_v6, %v2078_v15  ;;  %v2014_v28 = vadd.f32 %v5179_v8, %v6553_v23 }
 0x3ca   :  { %v2005_v20 = vpop.f32.mrf.mxu1 }
 0x3cb   :  { %v2129_v21 = vpack.c.bf16 %v2077_v32, %v2076_v11  ;;  %v2006_v26 = vadd.f32 %v6553_v23, %v2005_v20  ;;  %v2082_v27 = vmax.f32 %v2014_v28, 0.0 }
 0x3cc   :  { %v5180_v25 = vpop.f32.mrf.mxu1 }
 0x3cd   :  { %v2017_v61 = vadd.f32 %v5180_v25, %v6553_v23  ;;  %5253 = vmatprep.mubr.bf16.mxu0 %v2129_v21  ;;  %v2080_v39 = vmax.f32 %v2006_v26, 0.0 }
 0x3ce   :  { %v2008_v19 = vpop.f32.mrf.mxu1  ;;  %5254 = vmatmul.mubr.bf16.gmra.mxu0 %v2130_v43 }
 0x3cf   :  { %v2009_v30 = vadd.f32 %v6553_v23, %v2008_v19  ;;  %v2083_v31 = vmax.f32 %v2017_v61, 0.0  ;;  %v6653_v23 = vpop.xlane.xlu0 %3060 }
 0x3d1   :  { %v2081_v17 = vmax.f32 %v2009_v30, 0.0  ;;  %v2132_v46 = vpack.c.bf16 %v2083_v31, %v2082_v27 }
 0x3d3   :  { %v2131_v41 = vpack.c.bf16 %v2081_v17, %v2080_v39 }
 0x3d5   :  { %5257 = vmatprep.mubr.bf16.mxu0 %v2131_v41 }
 0x3d6   :  { %5258 = vmatmul.mubr.bf16.gmra.mxu0 %v2132_v46 }
 0x3d7   :  { %5357 = vmatprep.mubr.bf16.mxu0 %v6379_v38  ;;  %v6657_v38 = vpop.xlane.xlu1 %3064 }
 0x3de   :  { %5358 = vmatmul.mubr.bf16.vlgmr.msra.gmra.mxu0 %v6382_v52  ;;  %v6659_v52 = vpop.xlane.xlu0 %3062 }
 0x3df   :  { %5361 = vmatprep.mubr.bf16.mxu0 %v6389_v50  ;;  %v6662_v50 = vpop.xlane.xlu1 %3066 }
 0x3e6   :  { %5362 = vmatmul.mubr.bf16.gmra.mxu0 %v6392_v47  ;;  %v6664_v47 = vpop.xlane.xlu0 %3072 }
 0x3e7   :  { %5365 = vmatprep.mubr.bf16.mxu0 %v6399_v0  ;;  %v6667_v0 = vpop.xlane.xlu1 %3074 }
 0x3ee   :  { %5366 = vmatmul.mubr.bf16.gmra.mxu0 %v6405_v14  ;;  %v6669_v14 = vpop.xlane.xlu0 %3068 }
 0x3ef   :  { %5369 = vmatprep.mubr.bf16.mxu0 %v6412_v34  ;;  %v6673_v34 = vpop.xlane.xlu1 %3070 }
 0x3f6   :  { %5370 = vmatmul.mubr.bf16.gmra.mxu0 %v6415_v18  ;;  %v6675_v18 = vpop.xlane.xlu0 %3080 }
 0x3f7   :  { %5373 = vmatprep.mubr.bf16.mxu0 %v6422_v7  ;;  %v6678_v7 = vpop.xlane.xlu1 %3082 }
 0x3fe   :  { %5374 = vmatmul.mubr.bf16.gmra.mxu0 %v6428_v33  ;;  %v6681_v33 = vpop.xlane.xlu0 %3076 }
 0x3ff   :  { %5377 = vmatprep.mubr.bf16.mxu0 %v6435_v4  ;;  %v6683_v4 = vpop.xlane.xlu1 %3078 }
 0x403   :  { %v6694_v48 = vpop.xlane.xlu1 %3090 }
 0x406   :  { %5378 = vmatmul.mubr.bf16.gmra.mxu0 %v6438_v37 }
 0x407   :  { %5381 = vmatprep.mubr.bf16.mxu0 %v6445_v45  ;;  %v6686_v45 = vpop.xlane.xlu0 %3088  ;;  %v6704_v12 = vpop.xlane.xlu1 %3086 }
 0x40b   :  { %v6699_v53 = vpop.xlane.xlu0 %3084  ;;  %v6713_v26 = vpop.xlane.xlu1 %3098 }
 0x40e   :  { %5382 = vmatmul.mubr.bf16.gmra.mxu0 %v6451_v3 }
 0x40f   :  { %5385 = vmatprep.mubr.bf16.mxu0 %v6458_v57  ;;  %v6692_v57 = vld [vmem:[%s7934_s10] ss:$0 sm:$0xff]  ;;  %v6706_v32 = vpop.xlane.xlu0 %3096 }
 0x413   :  { %v6716_v31 = vpop.xlane.xlu0 %3092 }
 0x416   :  { %5386 = vmatmul.mubr.bf16.gmra.mxu0 %v6461_v22 }
 0x417   :  { %5389 = vmatprep.mubr.bf16.mxu0 %v6468_v35 }
 0x41e   :  { %v5199_v37 = vpop.f32.mrf.mxu0  ;;  %5390 = vmatmul.mubr.bf16.gmra.mxu0 %v6474_v40 }
 0x41f   :  { %5393 = vmatprep.mubr.bf16.mxu0 %v6481_v54  ;;  %v2230_v24 = vadd.f32 %v5199_v37, %v6692_v57 }
 0x420   :  { %v2221_v3 = vpop.f32.mrf.mxu0 }
 0x421   :  { %v2222_v35 = vadd.f32 %v6692_v57, %v2221_v3  ;;  %v2478_v58 = vmax.f32 %v2230_v24, 0.0  ;;  %v6721_v3 = vpop.xlane.xlu1 %3094 }
 0x422   :  { %v5200_v22 = vpop.f32.mrf.mxu0 }
 0x423   :  { %v2233_v49 = vadd.f32 %v5200_v22, %v6692_v57  ;;  %v2476_v63 = vmax.f32 %v2222_v35, 0.0 }
 0x424   :  { %v2224_v40 = vpop.f32.mrf.mxu0 }
 0x425   :  { %v2225_v54 = vadd.f32 %v6692_v57, %v2224_v40  ;;  %v2479_v55 = vmax.f32 %v2233_v49, 0.0  ;;  %v6725_v49 = vpop.xlane.xlu0 %3104 }
 0x426   :  { %v5203_v60 = vpop.f32.mrf.mxu0  ;;  %5394 = vmatmul.mubr.bf16.gmra.mxu0 %v6484_v59 }
 0x427   :  { %v2477_v1 = vmax.f32 %v2225_v54, 0.0  ;;  %5397 = vmatprep.mubr.bf16.mxu0 %v6491_v9  ;;  %v2558_v8 = vpack.c.bf16 %v2479_v55, %v2478_v58  ;;  %v2246_v59 = vadd.f32 %v5203_v60, %v6692_v57  ;;  %v6728_v58 = vpop.xlane.xlu1 %3106 }
 0x428   :  { %v2237_v5 = vpop.f32.mrf.mxu0 }
 0x429   :  { %v2557_v6 = vpack.c.bf16 %v2477_v1, %v2476_v63  ;;  %v2238_v15 = vadd.f32 %v6692_v57, %v2237_v5  ;;  %v2482_v19 = vmax.f32 %v2246_v59, 0.0 }
 0x42a   :  { %v5204_v11 = vpop.f32.mrf.mxu0 }
 0x42b   :  { %v2249_v20 = vadd.f32 %v5204_v11, %v6692_v57  ;;  %5277 = vmatprep.mubr.bf16.mxu1 %v2557_v6  ;;  %v2480_v61 = vmax.f32 %v2238_v15, 0.0  ;;  %v6733_v11 = vpop.xlane.xlu0 %3100 }
 0x42c   :  { %v2240_v21 = vpop.f32.mrf.mxu0  ;;  %5278 = vmatmul.mubr.bf16.vlgmr.msra.gmra.mxu1 %v2558_v8 }
 0x42d   :  { %v2241_v9 = vadd.f32 %v6692_v57, %v2240_v21  ;;  %v2483_v43 = vmax.f32 %v2249_v20, 0.0 }
 0x42e   :  { %v5207_v25 = vpop.f32.mrf.mxu0  ;;  %5398 = vmatmul.mubr.bf16.gmra.mxu0 %v6494_v13 }
 0x42f   :  { %v2481_v28 = vmax.f32 %v2241_v9, 0.0  ;;  %5401 = vmatprep.mubr.bf16.mxu0 %v6504_v29  ;;  %v2560_v17 = vpack.c.bf16 %v2483_v43, %v2482_v19  ;;  %v2262_v13 = vadd.f32 %v5207_v25, %v6692_v57  ;;  %v6738_v25 = vpop.xlane.xlu1 %3102 }
 0x430   :  { %v2253_v30 = vpop.f32.mrf.mxu0 }
 0x431   :  { %v2559_v39 = vpack.c.bf16 %v2481_v28, %v2480_v61  ;;  %v2254_v41 = vadd.f32 %v6692_v57, %v2253_v30  ;;  %v2486_v54 = vmax.f32 %v2262_v13, 0.0  ;;  %v6740_v30 = vpop.xlane.xlu0 %3112 }
 0x432   :  { %v5208_v27 = vpop.f32.mrf.mxu0 }
 0x433   :  { %v2265_v46 = vadd.f32 %v5208_v27, %v6692_v57  ;;  %5281 = vmatprep.mubr.bf16.mxu1 %v2559_v39  ;;  %v2484_v24 = vmax.f32 %v2254_v41, 0.0  ;;  %v6747_v13 = vpop.xlane.xlu1 %3114 }
 0x434   :  { %v2256_v37 = vpop.f32.mrf.mxu0  ;;  %5282 = vmatmul.mubr.bf16.gmra.mxu1 %v2560_v17 }
 0x435   :  { %v2257_v29 = vadd.f32 %v6692_v57, %v2256_v37  ;;  %v2487_v22 = vmax.f32 %v2265_v46, 0.0 }
 0x436   :  { %v5211_v35 = vpop.f32.mrf.mxu0  ;;  %5402 = vmatmul.mubr.bf16.gmra.mxu0 %v6507_v36 }
 0x437   :  { %v2485_v40 = vmax.f32 %v2257_v29, 0.0  ;;  %5405 = vmatprep.mubr.bf16.mxu0 %v6514_v51  ;;  %v2562_v63 = vpack.c.bf16 %v2487_v22, %v2486_v54  ;;  %v2278_v36 = vadd.f32 %v5211_v35, %v6692_v57 }
 0x438   :  { %v2269_v55 = vpop.f32.mrf.mxu0 }
 0x439   :  { %v2561_v60 = vpack.c.bf16 %v2485_v40, %v2484_v24  ;;  %v2270_v5 = vadd.f32 %v6692_v57, %v2269_v55  ;;  %v2490_v9 = vmax.f32 %v2278_v36, 0.0  ;;  %v6750_v24 = vpop.xlane.xlu0 %3108 }
 0x43a   :  { %v5212_v1 = vpop.f32.mrf.mxu0 }
 0x43b   :  { %v2281_v6 = vadd.f32 %v5212_v1, %v6692_v57  ;;  %5285 = vmatprep.mubr.bf16.mxu1 %v2561_v60  ;;  %v2488_v59 = vmax.f32 %v2270_v5, 0.0  ;;  %v6755_v5 = vpop.xlane.xlu1 %3110 }
 0x43c   :  { %v2272_v8 = vpop.f32.mrf.mxu0  ;;  %5286 = vmatmul.mubr.bf16.gmra.mxu1 %v2562_v63 }
 0x43d   :  { %v2273_v51 = vadd.f32 %v6692_v57, %v2272_v8  ;;  %v2491_v15 = vmax.f32 %v2281_v6, 0.0  ;;  %v6759_v8 = vpop.xlane.xlu0 %3120 }
 0x43e   :  { %v5215_v20 = vpop.f32.mrf.mxu0  ;;  %5406 = vmatmul.mubr.bf16.gmra.mxu0 %v6517_v56 }
 0x43f   :  { %v2489_v21 = vmax.f32 %v2273_v51, 0.0  ;;  %5409 = vmatprep.mubr.bf16.mxu0 %v6524_v10  ;;  %v2564_v28 = vpack.c.bf16 %v2491_v15, %v2490_v9  ;;  %v2294_v56 = vadd.f32 %v5215_v20, %v6692_v57 }
 0x440   :  { %v2285_v43 = vpop.f32.mrf.mxu0 }
 0x441   :  { %v2563_v61 = vpack.c.bf16 %v2489_v21, %v2488_v59  ;;  %v2286_v39 = vadd.f32 %v6692_v57, %v2285_v43  ;;  %v2494_v22 = vmax.f32 %v2294_v56, 0.0 }
 0x442   :  { %v5216_v19 = vpop.f32.mrf.mxu0 }
 0x443   :  { %v2297_v17 = vadd.f32 %v5216_v19, %v6692_v57  ;;  %5289 = vmatprep.mubr.bf16.mxu1 %v2563_v61  ;;  %v2492_v37 = vmax.f32 %v2286_v39, 0.0  ;;  %v6762_v61 = vpop.xlane.xlu1 %3122 }
 0x444   :  { %v2288_v27 = vpop.f32.mrf.mxu0  ;;  %5290 = vmatmul.mubr.bf16.gmra.mxu1 %v2564_v28 }
 0x445   :  { %v2289_v10 = vadd.f32 %v6692_v57, %v2288_v27  ;;  %v2495_v41 = vmax.f32 %v2297_v17, 0.0  ;;  %v6767_v17 = vpop.xlane.xlu0 %3116 }
 0x446   :  { %v5219_v46 = vpop.f32.mrf.mxu0  ;;  %5410 = vmatmul.mubr.bf16.gmra.mxu0 %v6527_v16 }
 0x447   :  { %v2493_v29 = vmax.f32 %v2289_v10, 0.0  ;;  %5413 = vmatprep.mubr.bf16.mxu0 %v6534_v42  ;;  %v2566_v54 = vpack.c.bf16 %v2495_v41, %v2494_v22  ;;  %v2310_v16 = vadd.f32 %v5219_v46, %v6692_v57 }
 0x448   :  { %v2301_v35 = vpop.f32.mrf.mxu0 }
 0x449   :  { %v2565_v40 = vpack.c.bf16 %v2493_v29, %v2492_v37  ;;  %v2302_v60 = vadd.f32 %v6692_v57, %v2301_v35  ;;  %v2498_v20 = vmax.f32 %v2310_v16, 0.0  ;;  %v6771_v29 = vpop.xlane.xlu1 %3118 }
 0x44a   :  { %v5220_v55 = vpop.f32.mrf.mxu0 }
 0x44b   :  { %v2313_v63 = vadd.f32 %v5220_v55, %v6692_v57  ;;  %5293 = vmatprep.mubr.bf16.mxu1 %v2565_v40  ;;  %v2496_v51 = vmax.f32 %v2302_v60, 0.0 }
 0x44c   :  { %v2304_v1 = vpop.f32.mrf.mxu0  ;;  %5294 = vmatmul.mubr.bf16.gmra.mxu1 %v2566_v54  ;;  %v6773_v54 = vpop.xlane.xlu0 %3128 }
 0x44d   :  { %v2305_v42 = vadd.f32 %v6692_v57, %v2304_v1  ;;  %v2499_v6 = vmax.f32 %v2313_v63, 0.0 }
 0x44e   :  { %v5223_v36 = vpop.f32.mrf.mxu0  ;;  %5414 = vmatmul.mubr.bf16.gmra.mxu0 %v6537_v44 }
 0x44f   :  { %v2497_v15 = vmax.f32 %v2305_v42, 0.0  ;;  %5417 = vmatprep.mubr.bf16.mxu0 %v6544_v62  ;;  %v2568_v9 = vpack.c.bf16 %v2499_v6, %v2498_v20  ;;  %v2326_v44 = vadd.f32 %v5223_v36, %v6692_v57  ;;  %v6779_v6 = vpop.xlane.xlu1 %3130 }
 0x450   :  { %v2317_v59 = vpop.f32.mrf.mxu0 }
 0x451   :  { %v2567_v21 = vpack.c.bf16 %v2497_v15, %v2496_v51  ;;  %v2318_v28 = vadd.f32 %v6692_v57, %v2317_v59  ;;  %v2502_v46 = vmax.f32 %v2326_v44, 0.0  ;;  %v6781_v59 = vpop.xlane.xlu0 %3124 }
 0x452   :  { %v5224_v43 = vpop.f32.mrf.mxu0 }
 0x453   :  { %v2329_v19 = vadd.f32 %v5224_v43, %v6692_v57  ;;  %5297 = vmatprep.mubr.bf16.mxu1 %v2567_v21  ;;  %v2500_v10 = vmax.f32 %v2318_v28, 0.0 }
 0x454   :  { %v2320_v39 = vpop.f32.mrf.mxu0  ;;  %5298 = vmatmul.mubr.bf16.gmra.mxu1 %v2568_v9 }
 0x455   :  { %v2321_v62 = vadd.f32 %v6692_v57, %v2320_v39  ;;  %v2503_v56 = vmax.f32 %v2329_v19, 0.0 }
 0x456   :  { %v5227_v27 = vpop.f32.mrf.mxu0  ;;  %5418 = vmatmul.mubr.bf16.gmra.mxu0 %v6546_v2 }
 0x457   :  { %v2501_v41 = vmax.f32 %v2321_v62, 0.0  ;;  %v2570_v35 = vpack.c.bf16 %v2503_v56, %v2502_v46  ;;  %v2342_v63 = vadd.f32 %v5227_v27, %v6692_v57  ;;  %v6786_v62 = vpop.xlane.xlu1 %3126 }
 0x458   :  { %v2333_v37 = vpop.f32.mrf.mxu0 }
 0x459   :  { %v2569_v22 = vpack.c.bf16 %v2501_v41, %v2500_v10  ;;  %v2334_v55 = vadd.f32 %v6692_v57, %v2333_v37  ;;  %v2506_v15 = vmax.f32 %v2342_v63, 0.0  ;;  %v6789_v41 = vpop.xlane.xlu0 %3136 }
 0x45a   :  { %v5228_v40 = vpop.f32.mrf.mxu0 }
 0x45b   :  { %v2345_v60 = vadd.f32 %v5228_v40, %v6692_v57  ;;  %5301 = vmatprep.mubr.bf16.mxu1 %v2569_v22  ;;  %v2504_v36 = vmax.f32 %v2334_v55, 0.0  ;;  %v6791_v63 = vpop.xlane.xlu1 %3138 }
 0x45c   :  { %v2336_v16 = vpop.f32.mrf.mxu0  ;;  %5302 = vmatmul.mubr.bf16.gmra.mxu1 %v2570_v35 }
 0x45d   :  { %v2337_v2 = vadd.f32 %v6692_v57, %v2336_v16  ;;  %v2507_v1 = vmax.f32 %v2345_v60, 0.0 }
 0x45e   :  { %v5231_v42 = vpop.f32.mrf.mxu0 }
 0x45f   :  { %v2505_v51 = vmax.f32 %v2337_v2, 0.0  ;;  %v2572_v9 = vpack.c.bf16 %v2507_v1, %v2506_v15  ;;  %v2358_v44 = vadd.f32 %v5231_v42, %v6692_v57 }
 0x460   :  { %v2349_v20 = vpop.f32.mrf.mxu0 }
 0x461   :  { %v2571_v21 = vpack.c.bf16 %v2505_v51, %v2504_v36  ;;  %v2350_v28 = vadd.f32 %v6692_v57, %v2349_v20  ;;  %v2510_v22 = vmax.f32 %v2358_v44, 0.0  ;;  %v6796_v36 = vpop.xlane.xlu0 %3132 }
 0x462   :  { %v5232_v43 = vpop.f32.mrf.mxu0 }
 0x463   :  { %v2361_v19 = vadd.f32 %v5232_v43, %v6692_v57  ;;  %5305 = vmatprep.mubr.bf16.mxu1 %v2571_v21  ;;  %v2508_v46 = vmax.f32 %v2350_v28, 0.0 }
 0x464   :  { %v2352_v39 = vpop.f32.mrf.mxu0  ;;  %5306 = vmatmul.mubr.bf16.gmra.mxu1 %v2572_v9 }
 0x465   :  { %v2353_v56 = vadd.f32 %v6692_v57, %v2352_v39  ;;  %v2511_v27 = vmax.f32 %v2361_v19, 0.0  ;;  %v6799_v19 = vpop.xlane.xlu1 %3134 }
 0x466   :  { %v5235_v10 = vpop.f32.mrf.mxu0 }
 0x467   :  { %v2509_v37 = vmax.f32 %v2353_v56, 0.0  ;;  %v2574_v55 = vpack.c.bf16 %v2511_v27, %v2510_v22  ;;  %v2374_v1 = vadd.f32 %v5235_v10, %v6692_v57  ;;  %v6801_v27 = vpop.xlane.xlu0 %3144 }
 0x468   :  { %v2365_v35 = vpop.f32.mrf.mxu0 }
 0x469   :  { %v2573_v40 = vpack.c.bf16 %v2509_v37, %v2508_v46  ;;  %v2366_v16 = vadd.f32 %v6692_v57, %v2365_v35  ;;  %v2514_v43 = vmax.f32 %v2374_v1, 0.0 }
 0x46a   :  { %v5236_v60 = vpop.f32.mrf.mxu0 }
 0x46b   :  { %v2377_v2 = vadd.f32 %v5236_v60, %v6692_v57  ;;  %5309 = vmatprep.mubr.bf16.mxu1 %v2573_v40  ;;  %v2512_v21 = vmax.f32 %v2366_v16, 0.0  ;;  %v6807_v60 = vpop.xlane.xlu1 %3146 }
 0x46c   :  { %v2368_v42 = vpop.f32.mrf.mxu0  ;;  %5310 = vmatmul.mubr.bf16.gmra.mxu1 %v2574_v55 }
 0x46d   :  { %v2369_v51 = vadd.f32 %v6692_v57, %v2368_v42  ;;  %v2515_v15 = vmax.f32 %v2377_v2, 0.0 }
 0x46e   :  { %v5239_v20 = vpop.f32.mrf.mxu0 }
 0x46f   :  { %v2513_v9 = vmax.f32 %v2369_v51, 0.0  ;;  %v2576_v39 = vpack.c.bf16 %v2515_v15, %v2514_v43  ;;  %v2390_v37 = vadd.f32 %v5239_v20, %v6692_v57  ;;  %v6809_v51 = vpop.xlane.xlu0 %3140 }
 0x470   :  { %v2381_v28 = vpop.f32.mrf.mxu0 }
 0x471   :  { %v2575_v44 = vpack.c.bf16 %v2513_v9, %v2512_v21  ;;  %v2382_v10 = vadd.f32 %v6692_v57, %v2381_v28  ;;  %v2518_v1 = vmax.f32 %v2390_v37, 0.0 }
 0x472   :  { %v5240_v56 = vpop.f32.mrf.mxu0 }
 0x473   :  { %v2393_v46 = vadd.f32 %v5240_v56, %v6692_v57  ;;  %5313 = vmatprep.mubr.bf16.mxu1 %v2575_v44  ;;  %v2516_v16 = vmax.f32 %v2382_v10, 0.0  ;;  %v6817_v37 = vpop.xlane.xlu0 %3152 }
 0x474   :  { %v2384_v22 = vpop.f32.mrf.mxu0  ;;  %5314 = vmatmul.mubr.bf16.gmra.mxu1 %v2576_v39  ;;  %v6814_v39 = vpop.xlane.xlu1 %3142  ;;  %7968 = vst [vmem:[#allocation14_spill] sm:$0xff] %v6817_v37 }
 0x475   :  { %v2385_v35 = vadd.f32 %v6692_v57, %v2384_v22  ;;  %v2519_v40 = vmax.f32 %v2393_v46, 0.0 }
 0x476   :  { %v5243_v55 = vpop.f32.mrf.mxu0 }
 0x477   :  { %v2517_v2 = vmax.f32 %v2385_v35, 0.0  ;;  %v2578_v21 = vpack.c.bf16 %v2519_v40, %v2518_v1  ;;  %v2406_v28 = vadd.f32 %v5243_v55, %v6692_v57 }
 0x478   :  { %v2397_v42 = vpop.f32.mrf.mxu0 }
 0x479   :  { %v2577_v15 = vpack.c.bf16 %v2517_v2, %v2516_v16  ;;  %v2398_v43 = vadd.f32 %v6692_v57, %v2397_v42  ;;  %v2522_v40 = vmax.f32 %v2406_v28, 0.0 }
 0x47a   :  { %v5244_v9 = vpop.f32.mrf.mxu0 }
 0x47b   :  { %v2409_v20 = vadd.f32 %v5244_v9, %v6692_v57  ;;  %5317 = vmatprep.mubr.bf16.mxu1 %v2577_v15  ;;  %v2520_v22 = vmax.f32 %v2398_v43, 0.0  ;;  %v6819_v15 = vpop.xlane.xlu1 %3154 }
 0x47c   :  { %v2400_v44 = vpop.f32.mrf.mxu0  ;;  %5318 = vmatmul.mubr.bf16.gmra.mxu1 %v2578_v21  ;;  %7969 = vst [vmem:[#allocation15_spill] sm:$0xff] %v6819_v15 }
 0x47d   :  { %v2401_v56 = vadd.f32 %v6692_v57, %v2400_v44  ;;  %v2523_v10 = vmax.f32 %v2409_v20, 0.0  ;;  %v6824_v44 = vpop.xlane.xlu0 %3148 }
 0x47e   :  { %v5247_v46 = vpop.f32.mrf.mxu0  ;;  %7970 = vst [vmem:[#allocation16_spill] sm:$0xff] %v6824_v44 }
 0x47f   :  { %v2521_v35 = vmax.f32 %v2401_v56, 0.0  ;;  %v2580_v1 = vpack.c.bf16 %v2523_v10, %v2522_v40  ;;  %v2422_v9 = vadd.f32 %v5247_v46, %v6692_v57  ;;  %v6827_v15 = vpop.xlane.xlu1 %3150 }
 0x480   :  { %v2413_v16 = vpop.f32.mrf.mxu0  ;;  %7971 = vst [vmem:[#allocation17_spill] sm:$0xff] %v6827_v15 }
 0x481   :  { %v2579_v2 = vpack.c.bf16 %v2521_v35, %v2520_v22  ;;  %v2414_v55 = vadd.f32 %v6692_v57, %v2413_v16  ;;  %v2526_v35 = vmax.f32 %v2422_v9, 0.0 }
 0x482   :  { %v5248_v42 = vpop.f32.mrf.mxu0 }
 0x483   :  { %v2425_v21 = vadd.f32 %v5248_v42, %v6692_v57  ;;  %5321 = vmatprep.mubr.bf16.mxu1 %v2579_v2  ;;  %v2524_v22 = vmax.f32 %v2414_v55, 0.0  ;;  %v6829_v2 = vpop.xlane.xlu0 %3160  ;;  %v6835_v44 = vpop.xlane.xlu1 %3162 }
 0x484   :  { %v2416_v20 = vpop.f32.mrf.mxu0  ;;  %5322 = vmatmul.mubr.bf16.gmra.mxu1 %v2580_v1  ;;  %7972 = vst [vmem:[#allocation18_spill] sm:$0xff] %v6829_v2 }
 0x485   :  { %v2417_v43 = vadd.f32 %v6692_v57, %v2416_v20  ;;  %v2527_v28 = vmax.f32 %v2425_v21, 0.0 }
 0x486   :  { %v5251_v56 = vpop.f32.mrf.mxu0 }
 0x487   :  { %v2525_v10 = vmax.f32 %v2417_v43, 0.0  ;;  %v2582_v37 = vpack.c.bf16 %v2527_v28, %v2526_v35  ;;  %v2438_v20 = vadd.f32 %v5251_v56, %v6692_v57  ;;  %v6837_v2 = vpop.xlane.xlu0 %3156 }
 0x488   :  { %v2429_v40 = vpop.f32.mrf.mxu0 }
 0x489   :  { %v2581_v16 = vpack.c.bf16 %v2525_v10, %v2524_v22  ;;  %v2430_v46 = vadd.f32 %v6692_v57, %v2429_v40  ;;  %v2530_v10 = vmax.f32 %v2438_v20, 0.0  ;;  %v6847_v20 = vpop.xlane.xlu1 %3158 }
 0x48a   :  { %v5252_v42 = vpop.f32.mrf.mxu0 }
 0x48b   :  { %v2441_v1 = vadd.f32 %v5252_v42, %v6692_v57  ;;  %5325 = vmatprep.mubr.bf16.mxu1 %v2581_v16  ;;  %v2528_v22 = vmax.f32 %v2430_v46, 0.0 }
 0x48c   :  { %v2432_v21 = vpop.f32.mrf.mxu0  ;;  %5326 = vmatmul.mubr.bf16.gmra.mxu1 %v2582_v37  ;;  %v6844_v37 = vld [vmem:[%s7938_s14] ss:$0 sm:$0xff] }
 0x48d   :  { %v2433_v55 = vadd.f32 %v6692_v57, %v2432_v21  ;;  %v2531_v9 = vmax.f32 %v2441_v1, 0.0 }
 0x48e   :  { %v5255_v43 = vpop.f32.mrf.mxu0 }
 0x48f   :  { %v2529_v28 = vmax.f32 %v2433_v55, 0.0  ;;  %v2584_v15 = vpack.c.bf16 %v2531_v9, %v2530_v10  ;;  %v2454_v46 = vadd.f32 %v5255_v43, %v6692_v57  ;;  %v6856_v10 = vpop.xlane.xlu0 %3168  ;;  %v6864_v43 = vadd.f32 %v6844_v37, %v6659_v52 }
 0x490   :  { %v2445_v35 = vpop.f32.mrf.mxu0 }
 0x491   :  { %v2583_v40 = vpack.c.bf16 %v2529_v28, %v2528_v22  ;;  %v2446_v16 = vadd.f32 %v6692_v57, %v2445_v35  ;;  %v3550_v22 = vadd.f32 %v6844_v37, %v6657_v38  ;;  %v6854_v28 = vadd.f32 %v6844_v37, %v6653_v23 }
 0x492   :  { %v5256_v42 = vpop.f32.mrf.mxu0  ;;  %v2534_v38 = vmax.f32 %v2454_v46, 0.0  ;;  %v6872_v23 = vadd.f32 %v6844_v37, %v6667_v0  ;;  %v6892_v0 = vadd.f32 %v6844_v37, %v6681_v33  ;;  %v6908_v33 = vadd.f32 %v6844_v37, %v6694_v48 }
 0x493   :  { %v2457_v56 = vadd.f32 %v5256_v42, %v6692_v57  ;;  %5329 = vmatprep.mubr.bf16.mxu1 %v2583_v40  ;;  %v2532_v35 = vmax.f32 %v2446_v16, 0.0  ;;  %v6868_v42 = vadd.f32 %v6844_v37, %v6664_v47  ;;  %v6876_v16 = vadd.f32 %v6844_v37, %v6669_v14 }
 0x494   :  { %v2448_v1 = vpop.f32.mrf.mxu0  ;;  %5330 = vmatmul.mubr.bf16.gmra.mxu1 %v2584_v15  ;;  %v6860_v15 = vadd.f32 %v6844_v37, %v6662_v50  ;;  %v6880_v50 = vadd.f32 %v6844_v37, %v6673_v34  ;;  %v6888_v47 = vadd.f32 %v6844_v37, %v6678_v7  ;;  %v6900_v34 = vadd.f32 %v6844_v37, %v6686_v45 }
 0x495   :  { %v2449_v21 = vadd.f32 %v6692_v57, %v2448_v1  ;;  %v2535_v55 = vmax.f32 %v2457_v56, 0.0  ;;  %v6884_v1 = vadd.f32 %v6844_v37, %v6675_v18  ;;  %v6902_v18 = vpop.xlane.xlu1 %3170  ;;  %v6925_v48 = vadd.f32 %v6844_v37, %v6713_v26 }
 0x496   :  { %v5259_v9 = vpop.f32.mrf.mxu0  ;;  %v6944_v26 = vadd.f32 %v6844_v37, %v6728_v58  ;;  %v6960_v58 = vadd.f32 %v6844_v37, %v6747_v13  ;;  %v6978_v13 = vadd.f32 %v6844_v37, %v6762_v61  ;;  %v6993_v61 = vadd.f32 %v6844_v37, %v6773_v54 }
 0x497   :  { %v2533_v40 = vmax.f32 %v2449_v21, 0.0  ;;  %v2586_v46 = vpack.c.bf16 %v2535_v55, %v2534_v38  ;;  %v6896_v21 = vadd.f32 %v6844_v37, %v6683_v4  ;;  %v6912_v55 = vadd.f32 %v6844_v37, %v6699_v53 }
 0x498   :  { %v2461_v56 = vpop.f32.mrf.mxu0  ;;  %v6916_v4 = vadd.f32 %v6844_v37, %v6704_v12  ;;  %v2470_v45 = vadd.f32 %v5259_v9, %v6692_v57  ;;  %v6921_v38 = vadd.f32 %v6844_v37, %v6706_v32  ;;  %v6929_v53 = vadd.f32 %v6844_v37, %v6716_v31  ;;  %7973 = vst [vmem:[#allocation19_spill] sm:$0xff] %v6944_v26 }
 0x499   :  { %v2585_v52 = vpack.c.bf16 %v2533_v40, %v2532_v35  ;;  %v2462_v35 = vadd.f32 %v6692_v57, %v2461_v56  ;;  %v6931_v56 = vpop.xlane.xlu0 %3164  ;;  %v6936_v9 = vadd.f32 %v6844_v37, %v6721_v3  ;;  %v6940_v32 = vadd.f32 %v6844_v37, %v6725_v49  ;;  %7975 = vst [vmem:[#allocation21_spill] sm:$0xff] %v6960_v58 }
 0x49a   :  { %v5260_v14 = vpop.f32.mrf.mxu0  ;;  %v6948_v31 = vadd.f32 %v6844_v37, %v6733_v11  ;;  %v6952_v3 = vadd.f32 %v6844_v37, %v6738_v25  ;;  %v6956_v49 = vadd.f32 %v6844_v37, %v6740_v30  ;;  %v6964_v11 = vadd.f32 %v6844_v37, %v6750_v24 }
 0x49b   :  { %v2473_v7 = vadd.f32 %v5260_v14, %v6692_v57  ;;  %5333 = vmatprep.mubr.bf16.mxu1 %v2585_v52  ;;  %v2536_v14 = vmax.f32 %v2462_v35, 0.0  ;;  %v6966_v35 = vpop.xlane.xlu1 %3166  ;;  %v6974_v30 = vadd.f32 %v6844_v37, %v6759_v8  ;;  %v6982_v58 = vadd.f32 %v6844_v37, %v6767_v17 }
 0x49c   :  { %v2464_v40 = vpop.f32.mrf.mxu0  ;;  %5334 = vmatmul.mubr.bf16.gmra.mxu1 %v2586_v46  ;;  %7974 = vst [vmem:[#allocation20_spill] sm:$0xff] %v6952_v3  ;;  %v6970_v3 = vadd.f32 %v6844_v37, %v6755_v5  ;;  %v6989_v8 = vadd.f32 %v6844_v37, %v6771_v29  ;;  %v7001_v17 = vadd.f32 %v6844_v37, %v6781_v59 }
 0x49d   :  { %v2465_v12 = vadd.f32 %v6692_v57, %v2464_v40  ;;  %v2539_v52 = vmax.f32 %v2473_v7, 0.0  ;;  %v2538_v7 = vmax.f32 %v2470_v45, 0.0  ;;  %v7008_v54 = vadd.f32 %v6844_v37, %v6786_v62 }
 0x49e   :  { %v5359_v46 = vpop.f32.mrf.mxu0  ;;  %v7016_v59 = vadd.f32 %v6844_v37, %v6791_v63  ;;  %v7034_v63 = vadd.f32 %v6844_v37, %v6801_v27  ;;  %v7049_v27 = vadd.f32 %v6844_v37, %v6814_v39  ;;  %v7982_v39 = vld [vmem:[#allocation16_spill] sm:$0xff] }
 0x49f   :  { %v2537_v57 = vmax.f32 %v2465_v12, 0.0  ;;  %v3614_v40 = vmul.f32 2.0, %v5359_v46  ;;  %v2588_v45 = vpack.c.bf16 %v2539_v52, %v2538_v7  ;;  %v6997_v52 = vadd.f32 %v6844_v37, %v6779_v6 }
 0x4a0   :  { %v3286_v26 = vpop.f32.mrf.mxu0  ;;  %v7012_v6 = vadd.f32 %v6844_v37, %v6789_v41  ;;  %v7030_v41 = vadd.f32 %v6844_v37, %v6799_v19  ;;  %v7045_v19 = vadd.f32 %v6844_v37, %v6809_v51  ;;  %7977 = vst [vmem:[#allocation23_spill] sm:$0xff] %v7049_v27  ;;  %v7980_v51 = vld [vmem:[#allocation15_spill] sm:$0xff]  ;;  %v7066_v27 = vadd.f32 %v6844_v37, %v7982_v39 }
 0x4a1   :  { %v2587_v12 = vpack.c.bf16 %v2537_v57, %v2536_v14  ;;  %v3678_v46 = vsub.f32 %v3550_v22, %v3614_v40  ;;  %v3612_v25 = vmul.f32 2.0, %v3286_v26  ;;  %v6984_v22 = vpop.xlane.xlu0 %3176  ;;  %v7080_v39 = vadd.f32 %v6844_v37, %v6835_v44 }
 0x4a2   :  { %v5360_v24 = vpop.f32.mrf.mxu0  ;;  %v7097_v44 = vadd.f32 %v6844_v37, %v6856_v10  ;;  %v7114_v10 = vadd.f32 %v6844_v37, %v6966_v35 }
 0x4a3   :  { %v3742_v26 = vmax.f32 %v3678_v46, 0.0  ;;  %v3676_v5 = vsub.f32 %v6854_v28, %v3612_v25  ;;  %v3615_v14 = vmul.f32 2.0, %v5360_v24  ;;  %5337 = vmatprep.mubr.bf16.mxu1 %v2587_v12  ;;  %v7020_v12 = vadd.f32 %v6844_v37, %v6796_v36  ;;  %v7022_v25 = vpop.xlane.xlu1 %3178 }
 0x4a4   :  { %5338 = vmatmul.mubr.bf16.gmra.mxu1 %v2588_v45  ;;  %v3289_v28 = vpop.f32.mrf.mxu0  ;;  %v7038_v36 = vadd.f32 %v6844_v37, %v6807_v60  ;;  %7988 = vst [vmem:[#allocation24_spill] sm:$0xff] %v7114_v10 }
 0x4a5   :  { %v7003_v57 = vadd.f32 1.0, %v3742_v26  ;;  %v3740_v40 = vmax.f32 %v3676_v5, 0.0  ;;  %v3679_v29 = vsub.f32 %v6860_v15, %v3615_v14  ;;  %v3613_v7 = vmul.f32 2.0, %v3289_v28  ;;  %v3173_v5 = vpop.xlane.xlu0 %3172 }
 0x4a6   :  { %v5363_v46 = vpop.f32.mrf.mxu0  ;;  %7976 = vst [vmem:[#allocation22_spill] sm:$0xff] %v7038_v36  ;;  %v7128_v35 = vadd.f32 %v6844_v37, %v3173_v5 }
 0x4a7   :  { %5515 = vrcp.f32 %v7003_v57  ;;  %v7025_v15 = vadd.f32 1.0, %v3740_v40  ;;  %v3743_v62 = vmax.f32 %v3679_v29, 0.0  ;;  %v3677_v45 = vsub.f32 %v6864_v43, %v3613_v7  ;;  %v7978_v40 = vld [vmem:[#allocation14_spill] sm:$0xff]  ;;  %v3175_v36 = vpop.xlane.xlu1 %3174 }
 0x4a8   :  { %v3618_v24 = vmul.f32 2.0, %v5363_v46  ;;  %v3302_v26 = vpop.f32.mrf.mxu0  ;;  %v7053_v60 = vadd.f32 %v6844_v37, %v7978_v40  ;;  %v7983_v40 = vld [vmem:[#allocation17_spill] sm:$0xff]  ;;  %7991 = vst [vmem:[#allocation27_spill] sm:$0xff] %v7128_v35 }
 0x4a9   :  { %5517 = vrcp.f32 %v7025_v15  ;;  %v7041_v14 = vadd.f32 1.0, %v3743_v62  ;;  %v3741_v43 = vmax.f32 %v3677_v45, 0.0  ;;  %v3616_v28 = vmul.f32 2.0, %v3302_v26 }
 0x4aa   :  { %7979 = vst [vmem:[#allocation14_spill] sm:$0xff] %v7053_v60  ;;  %v3682_v29 = vsub.f32 %v6868_v42, %v3618_v24  ;;  %v5364_v7 = vpop.f32.mrf.mxu0  ;;  %v7062_v26 = vadd.f32 %v6844_v37, %v7980_v51  ;;  %v7070_v60 = vadd.f32 %v6844_v37, %v7983_v40  ;;  %v7084_v40 = vadd.f32 %v6844_v37, %v6837_v2 }
 0x4ab   :  { %5519 = vrcp.f32 %v7041_v14  ;;  %v7057_v46 = vadd.f32 1.0, %v3741_v43  ;;  %v3680_v62 = vsub.f32 %v6876_v16, %v3616_v28  ;;  %v3619_v45 = vmul.f32 2.0, %v5364_v7  ;;  %v7985_v7 = vld [vmem:[#allocation18_spill] sm:$0xff] }
 0x4ac   :  { %7981 = vst [vmem:[#allocation15_spill] sm:$0xff] %v7062_v26  ;;  %7984 = vst [vmem:[#allocation16_spill] sm:$0xff] %v7070_v60  ;;  %v3746_v42 = vmax.f32 %v3682_v29, 0.0  ;;  %v3305_v24 = vpop.f32.mrf.mxu0  ;;  %v7076_v51 = vadd.f32 %v6844_v37, %v7985_v7  ;;  %v3185_v26 = vpop.xlane.xlu0 %3184  ;;  %v7093_v7 = vadd.f32 %v6844_v37, %v6847_v20  ;;  %v7101_v2 = vadd.f32 %v6844_v37, %v6902_v18 }
 0x4ad   :  { %5521 = vrcp.f32 %v7057_v46  ;;  %v3744_v43 = vmax.f32 %v3680_v62, 0.0  ;;  %v3683_v16 = vsub.f32 %v6872_v23, %v3619_v45  ;;  %v3617_v28 = vmul.f32 2.0, %v3305_v24 }
 0x4ae   :  { %v7086_v29 = vadd.f32 1.0, %v3746_v42  ;;  %v5367_v60 = vpop.f32.mrf.mxu0  ;;  %7986 = vst [vmem:[#allocation17_spill] sm:$0xff] %v7101_v2  ;;  %v7110_v20 = vadd.f32 %v6844_v37, %v6931_v56  ;;  %v7118_v18 = vadd.f32 %v6844_v37, %v6984_v22  ;;  %v3187_v2 = vpop.xlane.xlu1 %3186  ;;  %v7125_v56 = vadd.f32 %v6844_v37, %v7022_v25 }
 0x4af   :  { %v7088_v62 = vadd.f32 1.0, %v3744_v43  ;;  %v3747_v23 = vmax.f32 %v3683_v16, 0.0  ;;  %v3681_v45 = vsub.f32 %v6880_v50, %v3617_v28  ;;  %v3622_v24 = vmul.f32 2.0, %v5367_v60 }
 0x4b0   :  { %5523 = vrcp.f32 %v7086_v29  ;;  %v3318_v42 = vpop.f32.mrf.mxu0  ;;  %7987 = vst [vmem:[#allocation18_spill] sm:$0xff] %v7110_v20  ;;  %7989 = vst [vmem:[#allocation25_spill] sm:$0xff] %v7118_v18  ;;  %v7131_v22 = vadd.f32 %v6844_v37, %v3175_v36  ;;  %v3181_v10 = vpop.xlane.xlu0 %3180  ;;  %v7139_v25 = vadd.f32 %v6844_v37, %v3185_v26  ;;  %v7142_v5 = vadd.f32 %v6844_v37, %v3187_v2 }
 0x4b1   :  { %5525 = vrcp.f32 %v7088_v62  ;;  %v7105_v43 = vadd.f32 1.0, %v3747_v23  ;;  %v3745_v50 = vmax.f32 %v3681_v45, 0.0  ;;  %v3686_v60 = vsub.f32 %v6884_v1, %v3622_v24  ;;  %7990 = vst [vmem:[#allocation26_spill] sm:$0xff] %v7125_v56 }
 0x4b2   :  { %v3620_v16 = vmul.f32 2.0, %v3318_v42  ;;  %v5368_v28 = vpop.f32.mrf.mxu0  ;;  %7992 = vst [vmem:[#allocation28_spill] sm:$0xff] %v7131_v22  ;;  %7993 = vst [vmem:[#allocation29_spill] sm:$0xff] %v7139_v25 }
 0x4b3   :  { %5527 = vrcp.f32 %v7105_v43  ;;  %v7121_v23 = vadd.f32 1.0, %v3745_v50  ;;  %v3750_v1 = vmax.f32 %v3686_v60, 0.0  ;;  %v3623_v45 = vmul.f32 2.0, %v5368_v28  ;;  %7994 = vst [vmem:[#allocation30_spill] sm:$0xff] %v7142_v5 }
 0x4b4   :  { %v5516_v24 = vpop.eup %5515  ;;  %v3684_v42 = vsub.f32 %v6892_v0, %v3620_v16  ;;  %v3321_v18 = vpop.f32.mrf.mxu0 }
 0x4b5   :  { %5529 = vrcp.f32 %v7121_v23  ;;  %v7135_v50 = vadd.f32 1.0, %v3750_v1  ;;  %v3687_v60 = vsub.f32 %v6888_v47, %v3623_v45  ;;  %v3621_v28 = vmul.f32 2.0, %v3321_v18 }
 0x4b6   :  { %v5518_v20 = vpop.eup %5517  ;;  %v3748_v36 = vmax.f32 %v3684_v42, 0.0  ;;  %v5371_v22 = vpop.f32.mrf.mxu0  ;;  %v3934_v0 = vmul.f32 %v5516_v24, %v7003_v57  ;;  %v7148_v47 = vadd.f32 %v6844_v37, %v3181_v10 }
 0x4b7   :  { %5531 = vrcp.f32 %v7135_v50  ;;  %v3751_v16 = vmax.f32 %v3687_v60, 0.0  ;;  %v3685_v1 = vsub.f32 %v6896_v21, %v3621_v28  ;;  %v3626_v56 = vmul.f32 2.0, %v5371_v22 }
 0x4b8   :  { %v5520_v35 = vpop.eup %5519  ;;  %v7150_v18 = vadd.f32 1.0, %v3748_v36  ;;  %v3334_v26 = vpop.f32.mrf.mxu0  ;;  %v3998_v45 = vsub.f32 2.0, %v3934_v0  ;;  %v3932_v2 = vmul.f32 %v5518_v20, %v7025_v15 }
 0x4b9   :  { %v7153_v42 = vadd.f32 1.0, %v3751_v16  ;;  %v3749_v5 = vmax.f32 %v3685_v1, 0.0  ;;  %v3690_v57 = vsub.f32 %v6900_v34, %v3626_v56  ;;  %v3624_v25 = vmul.f32 2.0, %v3334_v26 }
 0x4ba   :  { %v5522_v60 = vpop.eup %5521  ;;  %5533 = vrcp.f32 %v7150_v18  ;;  %v5372_v21 = vpop.f32.mrf.mxu0  ;;  %v7157_v22 = vmul.f32 %v5516_v24, %v3998_v45  ;;  %v3996_v37 = vsub.f32 2.0, %v3932_v2  ;;  %v3935_v10 = vmul.f32 %v5520_v35, %v7041_v14 }
 0x4bb   :  { %5535 = vrcp.f32 %v7153_v42  ;;  %v7161_v28 = vadd.f32 1.0, %v3749_v5  ;;  %v3754_v15 = vmax.f32 %v3690_v57, 0.0  ;;  %v3688_v36 = vsub.f32 %v6912_v55, %v3624_v25 }
 0x4bc   :  { %v3627_v0 = vmul.f32 2.0, %v5372_v21  ;;  %4128 = vadd.xlane.f32.xlu0 %v7157_v22  ;;  %v3337_v34 = vpop.f32.mrf.mxu0  ;;  %v7165_v56 = vmul.f32 %v5518_v20, %v3996_v37  ;;  %v3999_v16 = vsub.f32 2.0, %v3935_v10  ;;  %v3933_v24 = vmul.f32 %v5522_v60, %v7057_v46 }
 0x4bd   :  { %v5524_v1 = vpop.eup %5523  ;;  %5537 = vrcp.f32 %v7161_v28  ;;  %v7169_v14 = vadd.f32 1.0, %v3754_v15  ;;  %v3752_v26 = vmax.f32 %v3688_v36, 0.0  ;;  %v3625_v5 = vmul.f32 2.0, %v3337_v34 }
 0x4be   :  { %v5526_v45 = vpop.eup %5525  ;;  %v3691_v2 = vsub.f32 %v6908_v33, %v3627_v0  ;;  %v5375_v55 = vpop.f32.mrf.mxu0  ;;  %v7172_v25 = vmul.f32 %v5520_v35, %v3999_v16  ;;  %v3997_v57 = vsub.f32 2.0, %v3933_v24  ;;  %v3938_v20 = vmul.f32 %v5524_v1, %v7086_v29 }
 0x4bf   :  { %5539 = vrcp.f32 %v7169_v14  ;;  %v7176_v21 = vadd.f32 1.0, %v3752_v26  ;;  %v3689_v46 = vsub.f32 %v6916_v4, %v3625_v5  ;;  %v3630_v37 = vmul.f32 2.0, %v5375_v55 }
 0x4c0   :  { %7995 = vst [vmem:[#allocation31_spill] sm:$0xff] %v7172_v25  ;;  %v5528_v10 = vpop.eup %5527  ;;  %v3755_v15 = vmax.f32 %v3691_v2, 0.0  ;;  %4124 = vadd.xlane.f32.xlu0 %v7165_v56  ;;  %4130 = vadd.xlane.f32.xlu1 %v7172_v25  ;;  %v3350_v33 = vpop.f32.mrf.mxu0  ;;  %v7181_v36 = vmul.f32 %v5522_v60, %v3997_v57  ;;  %v4002_v35 = vsub.f32 2.0, %v3938_v20  ;;  %v3936_v0 = vmul.f32 %v5526_v45, %v7088_v62 }
 0x4c1   :  { %5541 = vrcp.f32 %v7176_v21  ;;  %v3753_v29 = vmax.f32 %v3689_v46, 0.0  ;;  %v3694_v34 = vsub.f32 %v6921_v38, %v3630_v37  ;;  %v3628_v16 = vmul.f32 2.0, %v3350_v33 }
 0x4c2   :  { %v5530_v4 = vpop.eup %5529  ;;  %v7186_v24 = vadd.f32 1.0, %v3755_v15  ;;  %v5376_v26 = vpop.f32.mrf.mxu0  ;;  %v7188_v5 = vmul.f32 %v5524_v1, %v4002_v35  ;;  %v4000_v2 = vsub.f32 2.0, %v3936_v0  ;;  %v3939_v55 = vmul.f32 %v5528_v10, %v7105_v43 }
 0x4c3   :  { %v7191_v60 = vadd.f32 1.0, %v3753_v29  ;;  %v3758_v57 = vmax.f32 %v3694_v34, 0.0  ;;  %v3692_v62 = vsub.f32 %v6929_v53, %v3628_v16  ;;  %v3631_v20 = vmul.f32 2.0, %v5376_v26 }
 0x4c4   :  { %v5532_v25 = vpop.eup %5531  ;;  %5543 = vrcp.f32 %v7186_v24  ;;  %4126 = vadd.xlane.f32.xlu1 %v7181_v36  ;;  %4136 = vadd.xlane.f32.xlu0 %v7188_v5  ;;  %v3353_v38 = vpop.f32.mrf.mxu0  ;;  %v7197_v46 = vmul.f32 %v5526_v45, %v4000_v2  ;;  %v4003_v1 = vsub.f32 2.0, %v3939_v55  ;;  %v3937_v37 = vmul.f32 %v5530_v4, %v7121_v23 }
 0x4c5   :  { %5545 = vrcp.f32 %v7191_v60  ;;  %v7201_v43 = vadd.f32 1.0, %v3758_v57  ;;  %v3756_v15 = vmax.f32 %v3692_v62, 0.0  ;;  %v3695_v53 = vsub.f32 %v6925_v48, %v3631_v20 }
 0x4c6   :  { %v3629_v33 = vmul.f32 2.0, %v3353_v38  ;;  %v5379_v35 = vpop.f32.mrf.mxu0  ;;  %v7204_v0 = vmul.f32 %v5528_v10, %v4003_v1  ;;  %v4001_v29 = vsub.f32 2.0, %v3937_v37  ;;  %v3942_v34 = vmul.f32 %v5532_v25, %v7135_v50 }
 0x4c7   :  { %v5534_v16 = vpop.eup %5533  ;;  %5547 = vrcp.f32 %v7201_v43  ;;  %v7208_v45 = vadd.f32 1.0, %v3756_v15  ;;  %v3759_v23 = vmax.f32 %v3695_v53, 0.0  ;;  %v3634_v26 = vmul.f32 2.0, %v5379_v35 }
 0x4c8   :  { %v5536_v2 = vpop.eup %5535  ;;  %v3693_v55 = vsub.f32 %v6936_v9, %v3629_v33  ;;  %4132 = vadd.xlane.f32.xlu0 %v7197_v46  ;;  %4138 = vadd.xlane.f32.xlu1 %v7204_v0  ;;  %v3366_v48 = vpop.f32.mrf.mxu0  ;;  %v7213_v10 = vmul.f32 %v5530_v4, %v4001_v29  ;;  %v4006_v57 = vsub.f32 2.0, %v3942_v34  ;;  %v3940_v50 = vmul.f32 %v5534_v16, %v7150_v18 }
 0x4c9   :  { %5549 = vrcp.f32 %v7208_v45  ;;  %v7217_v62 = vadd.f32 1.0, %v3759_v23  ;;  %v3698_v20 = vsub.f32 %v6940_v32, %v3634_v26  ;;  %v3632_v38 = vmul.f32 2.0, %v3366_v48  ;;  %v7996_v48 = vld [vmem:[#allocation19_spill] sm:$0xff] }
 0x4ca   :  { %v5538_v1 = vpop.eup %5537  ;;  %v3757_v37 = vmax.f32 %v3693_v55, 0.0  ;;  %v5380_v9 = vpop.f32.mrf.mxu0  ;;  %v7220_v15 = vmul.f32 %v5532_v25, %v4006_v57  ;;  %v4004_v53 = vsub.f32 2.0, %v3940_v50  ;;  %v3943_v33 = vmul.f32 %v5536_v2, %v7153_v42 }
 0x4cb   :  { %5551 = vrcp.f32 %v7217_v62  ;;  %v3762_v4 = vmax.f32 %v3698_v20, 0.0  ;;  %v3696_v18 = vsub.f32 %v6948_v31, %v3632_v38  ;;  %v3635_v35 = vmul.f32 2.0, %v5380_v9 }
 0x4cc   :  { %v5540_v29 = vpop.eup %5539  ;;  %v7225_v34 = vadd.f32 1.0, %v3757_v37  ;;  %4134 = vadd.xlane.f32.xlu1 %v7213_v10  ;;  %4144 = vadd.xlane.f32.xlu0 %v7220_v15  ;;  %v3369_v32 = vpop.f32.mrf.mxu0  ;;  %v7229_v23 = vmul.f32 %v5534_v16, %v4004_v53  ;;  %v4007_v25 = vsub.f32 2.0, %v3943_v33  ;;  %v3941_v26 = vmul.f32 %v5538_v1, %v7161_v28  ;;  %v7998_v53 = vld [vmem:[#allocation20_spill] sm:$0xff] }
 0x4cd   :  { %v7232_v42 = vadd.f32 1.0, %v3762_v4  ;;  %v3760_v55 = vmax.f32 %v3696_v18, 0.0  ;;  %v3699_v57 = vsub.f32 %v7996_v48, %v3635_v35  ;;  %v3633_v31 = vmul.f32 2.0, %v3369_v32 }
 0x4ce   :  { %v5542_v50 = vpop.eup %5541  ;;  %5553 = vrcp.f32 %v7225_v34  ;;  %v5383_v20 = vpop.f32.mrf.mxu0  ;;  %v7236_v38 = vmul.f32 %v5536_v2, %v4007_v25  ;;  %v4005_v37 = vsub.f32 2.0, %v3941_v26  ;;  %v3946_v9 = vmul.f32 %v5540_v29, %v7169_v14 }
 0x4cf   :  { %5555 = vrcp.f32 %v7232_v42  ;;  %v7240_v16 = vadd.f32 1.0, %v3760_v55  ;;  %v3763_v28 = vmax.f32 %v3699_v57, 0.0  ;;  %v3697_v33 = vsub.f32 %v7998_v53, %v3633_v31 }
 0x4d0   :  { %7997 = vst [vmem:[#allocation19_spill] sm:$0xff] %v7236_v38  ;;  %v3638_v4 = vmul.f32 2.0, %v5383_v20  ;;  %4140 = vadd.xlane.f32.xlu0 %v7229_v23  ;;  %4146 = vadd.xlane.f32.xlu1 %v7236_v38  ;;  %v3382_v18 = vpop.f32.mrf.mxu0  ;;  %v7245_v35 = vmul.f32 %v5538_v1, %v4005_v37  ;;  %v4010_v2 = vsub.f32 2.0, %v3946_v9  ;;  %v3944_v32 = vmul.f32 %v5542_v50, %v7176_v21 }
 0x4d1   :  { %v5544_v25 = vpop.eup %5543  ;;  %5557 = vrcp.f32 %v7240_v16  ;;  %v7249_v14 = vadd.f32 1.0, %v3763_v28  ;;  %v3761_v26 = vmax.f32 %v3697_v33, 0.0  ;;  %v3636_v55 = vmul.f32 2.0, %v3382_v18  ;;  %v8001_v18 = vld [vmem:[#allocation21_spill] sm:$0xff] }
 0x4d2   :  { %7999 = vst [vmem:[#allocation20_spill] sm:$0xff] %v7245_v35  ;;  %v5546_v48 = vpop.eup %5545  ;;  %v3702_v57 = vsub.f32 %v6956_v49, %v3638_v4  ;;  %v5384_v31 = vpop.f32.mrf.mxu0  ;;  %v7252_v20 = vmul.f32 %v5540_v29, %v4010_v2  ;;  %v4008_v53 = vsub.f32 2.0, %v3944_v32  ;;  %v3947_v1 = vmul.f32 %v5544_v25, %v7186_v24 }
 0x4d3   :  { %5559 = vrcp.f32 %v7249_v14  ;;  %v7256_v37 = vadd.f32 1.0, %v3761_v26  ;;  %v3700_v21 = vsub.f32 %v6964_v11, %v3636_v55  ;;  %v3639_v9 = vmul.f32 2.0, %v5384_v31 }
 0x4d4   :  { %8000 = vst [vmem:[#allocation32_spill] sm:$0xff] %v7252_v20  ;;  %v5548_v28 = vpop.eup %5547  ;;  %v3766_v38 = vmax.f32 %v3702_v57, 0.0  ;;  %4142 = vadd.xlane.f32.xlu1 %v7245_v35  ;;  %4152 = vadd.xlane.f32.xlu0 %v7252_v20  ;;  %v3385_v49 = vpop.f32.mrf.mxu0  ;;  %v7261_v33 = vmul.f32 %v5542_v50, %v4008_v53  ;;  %v4011_v29 = vsub.f32 2.0, %v3947_v1  ;;  %v3945_v4 = vmul.f32 %v5546_v48, %v7191_v60 }
 0x4d5   :  { %5561 = vrcp.f32 %v7256_v37  ;;  %v3764_v24 = vmax.f32 %v3700_v21, 0.0  ;;  %v3703_v2 = vsub.f32 %v8001_v18, %v3639_v9  ;;  %v3637_v32 = vmul.f32 2.0, %v3385_v49 }
 0x4d6   :  { %v5550_v11 = vpop.eup %5549  ;;  %v7266_v26 = vadd.f32 1.0, %v3766_v38  ;;  %v5387_v55 = vpop.f32.mrf.mxu0  ;;  %v7268_v57 = vmul.f32 %v5544_v25, %v4011_v29  ;;  %v4009_v31 = vsub.f32 2.0, %v3945_v4  ;;  %v3950_v20 = vmul.f32 %v5548_v28, %v7201_v43 }
 0x4d7   :  { %v7271_v50 = vadd.f32 1.0, %v3764_v24  ;;  %v3767_v53 = vmax.f32 %v3703_v2, 0.0  ;;  %v3701_v60 = vsub.f32 %v6970_v3, %v3637_v32  ;;  %v3642_v1 = vmul.f32 2.0, %v5387_v55 }
 0x4d8   :  { %v5552_v35 = vpop.eup %5551  ;;  %5563 = vrcp.f32 %v7266_v26  ;;  %4148 = vadd.xlane.f32.xlu0 %v7261_v33  ;;  %4154 = vadd.xlane.f32.xlu1 %v7268_v57  ;;  %v3398_v38 = vpop.f32.mrf.mxu0  ;;  %v7277_v21 = vmul.f32 %v5546_v48, %v4009_v31  ;;  %v4014_v25 = vsub.f32 2.0, %v3950_v20  ;;  %v3948_v9 = vmul.f32 %v5550_v11, %v7208_v45 }
 0x4d9   :  { %5565 = vrcp.f32 %v7271_v50  ;;  %v7281_v43 = vadd.f32 1.0, %v3767_v53  ;;  %v3765_v49 = vmax.f32 %v3701_v60, 0.0  ;;  %v3706_v3 = vsub.f32 %v6974_v30, %v3642_v1 }
 0x4da   :  { %v3640_v29 = vmul.f32 2.0, %v3398_v38  ;;  %v5388_v4 = vpop.f32.mrf.mxu0  ;;  %v7284_v24 = vmul.f32 %v5548_v28, %v4014_v25  ;;  %v4012_v18 = vsub.f32 2.0, %v3948_v9  ;;  %v3951_v2 = vmul.f32 %v5552_v35, %v7217_v62 }
 0x4db   :  { %v5554_v32 = vpop.eup %5553  ;;  %5567 = vrcp.f32 %v7281_v43  ;;  %v7288_v48 = vadd.f32 1.0, %v3765_v49  ;;  %v3770_v45 = vmax.f32 %v3706_v3, 0.0  ;;  %v3643_v20 = vmul.f32 2.0, %v5388_v4 }
 0x4dc   :  { %v5556_v55 = vpop.eup %5555  ;;  %v3704_v31 = vsub.f32 %v6982_v58, %v3640_v29  ;;  %4150 = vadd.xlane.f32.xlu1 %v7277_v21  ;;  %4160 = vadd.xlane.f32.xlu0 %v7284_v24  ;;  %v3401_v30 = vpop.f32.mrf.mxu0  ;;  %v7293_v28 = vmul.f32 %v5550_v11, %v4012_v18  ;;  %v4015_v53 = vsub.f32 2.0, %v3951_v2  ;;  %v3949_v62 = vmul.f32 %v5554_v32, %v7225_v34 }
 0x4dd   :  { %5569 = vrcp.f32 %v7288_v48  ;;  %v7297_v60 = vadd.f32 1.0, %v3770_v45  ;;  %v3707_v1 = vsub.f32 %v6978_v13, %v3643_v20  ;;  %v3641_v38 = vmul.f32 2.0, %v3401_v30 }
 0x4de   :  { %v5558_v25 = vpop.eup %5557  ;;  %v3768_v9 = vmax.f32 %v3704_v31, 0.0  ;;  %v5391_v58 = vpop.f32.mrf.mxu0  ;;  %v7300_v49 = vmul.f32 %v5552_v35, %v4015_v53  ;;  %v4013_v3 = vsub.f32 2.0, %v3949_v62  ;;  %v3954_v29 = vmul.f32 %v5556_v55, %v7232_v42 }
 0x4df   :  { %5571 = vrcp.f32 %v7297_v60  ;;  %v3771_v11 = vmax.f32 %v3707_v1, 0.0  ;;  %v3705_v34 = vsub.f32 %v6989_v8, %v3641_v38  ;;  %v3646_v4 = vmul.f32 2.0, %v5391_v58 }
 0x4e0   :  { %v5560_v18 = vpop.eup %5559  ;;  %v7305_v2 = vadd.f32 1.0, %v3768_v9  ;;  %4156 = vadd.xlane.f32.xlu0 %v7293_v28  ;;  %4162 = vadd.xlane.f32.xlu1 %v7300_v49  ;;  %v3414_v13 = vpop.f32.mrf.mxu0  ;;  %v7309_v45 = vmul.f32 %v5554_v32, %v4013_v3  ;;  %v4018_v35 = vsub.f32 2.0, %v3954_v29  ;;  %v3952_v20 = vmul.f32 %v5558_v25, %v7240_v16 }
 0x4e1   :  { %v7312_v42 = vadd.f32 1.0, %v3771_v11  ;;  %v3769_v31 = vmax.f32 %v3705_v34, 0.0  ;;  %v3710_v30 = vsub.f32 %v6993_v61, %v3646_v4  ;;  %v3644_v8 = vmul.f32 2.0, %v3414_v13 }
 0x4e2   :  { %v5562_v53 = vpop.eup %5561  ;;  %5573 = vrcp.f32 %v7305_v2  ;;  %v5392_v62 = vpop.f32.mrf.mxu0  ;;  %v7316_v1 = vmul.f32 %v5556_v55, %v4018_v35  ;;  %v4016_v38 = vsub.f32 2.0, %v3952_v20  ;;  %v3955_v9 = vmul.f32 %v5560_v18, %v7249_v14 }
 0x4e3   :  { %5575 = vrcp.f32 %v7312_v42  ;;  %v7320_v32 = vadd.f32 1.0, %v3769_v31  ;;  %v3774_v16 = vmax.f32 %v3710_v30, 0.0  ;;  %v3708_v58 = vsub.f32 %v7001_v17, %v3644_v8 }
 0x4e4   :  { %v3647_v3 = vmul.f32 2.0, %v5392_v62  ;;  %4158 = vadd.xlane.f32.xlu1 %v7309_v45  ;;  %4168 = vadd.xlane.f32.xlu0 %v7316_v1  ;;  %v3417_v61 = vpop.f32.mrf.mxu0  ;;  %v7325_v29 = vmul.f32 %v5558_v25, %v4016_v38  ;;  %v4019_v55 = vsub.f32 2.0, %v3955_v9  ;;  %v3953_v11 = vmul.f32 %v5562_v53, %v7256_v37 }
 0x4e5   :  { %v5564_v34 = vpop.eup %5563  ;;  %5577 = vrcp.f32 %v7320_v32  ;;  %v7329_v14 = vadd.f32 1.0, %v3774_v16  ;;  %v3772_v4 = vmax.f32 %v3708_v58, 0.0  ;;  %v3645_v13 = vmul.f32 2.0, %v3417_v61 }
 0x4e6   :  { %v5566_v35 = vpop.eup %5565  ;;  %v3711_v17 = vsub.f32 %v6997_v52, %v3647_v3  ;;  %v5395_v20 = vpop.f32.mrf.mxu0  ;;  %v7332_v31 = vmul.f32 %v5560_v18, %v4019_v55  ;;  %v4017_v30 = vsub.f32 2.0, %v3953_v11  ;;  %v3958_v25 = vmul.f32 %v5564_v34, %v7266_v26 }
 0x4e7   :  { %5579 = vrcp.f32 %v7329_v14  ;;  %v7336_v8 = vadd.f32 1.0, %v3772_v4  ;;  %v3709_v37 = vsub.f32 %v7008_v54, %v3645_v13  ;;  %v3650_v62 = vmul.f32 2.0, %v5395_v20 }
 0x4e8   :  { %8002 = vst [vmem:[#allocation21_spill] sm:$0xff] %v7332_v31  ;;  %v5568_v38 = vpop.eup %5567  ;;  %v3775_v9 = vmax.f32 %v3711_v17, 0.0  ;;  %4164 = vadd.xlane.f32.xlu0 %v7325_v29  ;;  %4170 = vadd.xlane.f32.xlu1 %v7332_v31  ;;  %v3430_v52 = vpop.f32.mrf.mxu0  ;;  %v7341_v16 = vmul.f32 %v5562_v53, %v4017_v30  ;;  %v4022_v18 = vsub.f32 2.0, %v3958_v25  ;;  %v3956_v58 = vmul.f32 %v5566_v35, %v7271_v50 }
 0x4e9   :  { %5581 = vrcp.f32 %v7336_v8  ;;  %v3773_v26 = vmax.f32 %v3709_v37, 0.0  ;;  %v3714_v3 = vsub.f32 %v7012_v6, %v3650_v62  ;;  %v3648_v61 = vmul.f32 2.0, %v3430_v52  ;;  %v7357_v6 = vld [vmem:[%s7936_s12] ss:$0 sm:$0xff] }
 0x4ea   :  { %8003 = vst [vmem:[#allocation33_spill] sm:$0xff] %v7341_v16  ;;  %v5570_v54 = vpop.eup %5569  ;;  %v7346_v55 = vadd.f32 1.0, %v3775_v9  ;;  %v5396_v11 = vpop.f32.mrf.mxu0  ;;  %v7348_v4 = vmul.f32 %v5564_v34, %v4022_v18  ;;  %v4020_v13 = vsub.f32 2.0, %v3956_v58  ;;  %v3959_v17 = vmul.f32 %v5568_v38, %v7281_v43 }
 0x4eb   :  { %v7351_v53 = vadd.f32 1.0, %v3773_v26  ;;  %v3778_v20 = vmax.f32 %v3714_v3, 0.0  ;;  %v3712_v50 = vsub.f32 %v7020_v12, %v3648_v61  ;;  %v3651_v30 = vmul.f32 2.0, %v5396_v11 }
 0x4ec   :  { %8004 = vst [vmem:[#allocation34_spill] sm:$0xff] %v7348_v4  ;;  %v5572_v25 = vpop.eup %5571  ;;  %5583 = vrcp.f32 %v7346_v55  ;;  %4166 = vadd.xlane.f32.xlu1 %v7341_v16  ;;  %4176 = vadd.xlane.f32.xlu0 %v7348_v4  ;;  %v5279_v34 = vpop.f32.mrf.mxu1  ;;  %v7362_v37 = vmul.f32 %v5566_v35, %v4020_v13  ;;  %v4023_v62 = vsub.f32 2.0, %v3959_v17  ;;  %v3957_v12 = vmul.f32 %v5570_v54, %v7288_v48 }
 0x4ed   :  { %v3433_v43 = vpop.f32.mrf.mxu0  ;;  %5585 = vrcp.f32 %v7351_v53  ;;  %v7366_v9 = vadd.f32 1.0, %v3778_v20  ;;  %v3776_v52 = vmax.f32 %v3712_v50, 0.0  ;;  %v3715_v18 = vsub.f32 %v7016_v59, %v3651_v30 }
 0x4ee   :  { %8005 = vst [vmem:[#allocation35_spill] sm:$0xff] %v7362_v37  ;;  %v2686_v58 = vadd.f32 %v5279_v34, %v7357_v6  ;;  %v3649_v26 = vmul.f32 2.0, %v3433_v43  ;;  %v2677_v3 = vpop.f32.mrf.mxu1  ;;  %v7370_v11 = vmul.f32 %v5568_v38, %v4023_v62  ;;  %v4021_v4 = vsub.f32 2.0, %v3957_v12 }
 0x4ef   :  { %v5399_v61 = vpop.f32.mrf.mxu0  ;;  %v5574_v35 = vpop.eup %5573  ;;  %5587 = vrcp.f32 %v7366_v9  ;;  %v7373_v13 = vadd.f32 1.0, %v3776_v52  ;;  %v3779_v48 = vmax.f32 %v3715_v18, 0.0  ;;  %v2678_v17 = vadd.f32 %v7357_v6, %v2677_v3 }
 0x4f0   :  { %8006 = vst [vmem:[#allocation36_spill] sm:$0xff] %v7370_v11  ;;  %v7376_v20 = vpop.eup %5575  ;;  %2934 = vst [vmem:[#allocation8 + $0x10] sm:$0xff] %v2686_v58  ;;  %v3713_v59 = vsub.f32 %v7030_v41, %v3649_v26  ;;  %v3654_v50 = vmul.f32 2.0, %v5399_v61  ;;  %4172 = vadd.xlane.f32.xlu0 %v7362_v37  ;;  %4178 = vadd.xlane.f32.xlu1 %v7370_v11  ;;  %v5280_v38 = vpop.f32.mrf.mxu1  ;;  %v7381_v34 = vmul.f32 %v5570_v54, %v4021_v4 }
 0x4f1   :  { %v3446_v30 = vpop.f32.mrf.mxu0  ;;  %v3962_v43 = vmul.f32 %v5572_v25, %v7297_v60  ;;  %5589 = vrcp.f32 %v7373_v13  ;;  %v7385_v62 = vadd.f32 1.0, %v3779_v48  ;;  %2932 = vst [vmem:[#allocation8] sm:$0xff] %v2678_v17  ;;  %v2689_v12 = vadd.f32 %v5280_v38, %v7357_v6  ;;  %v3183_v4 = vpop.xlane.xlu1 %3182 }
 0x4f2   :  { %8007 = vst [vmem:[#allocation37_spill] sm:$0xff] %v7381_v34  ;;  %v3652_v52 = vmul.f32 2.0, %v3446_v30  ;;  %v7388_v41 = vpop.eup %5577  ;;  %v3777_v18 = vmax.f32 %v3713_v59, 0.0  ;;  %v3718_v58 = vsub.f32 %v7034_v63, %v3654_v50  ;;  %v2680_v26 = vpop.f32.mrf.mxu1  ;;  %v3960_v54 = vmul.f32 %v5574_v35, %v7305_v2 }
 0x4f3   :  { %v5400_v3 = vpop.f32.mrf.mxu0  ;;  %v4026_v61 = vsub.f32 2.0, %v3962_v43  ;;  %5591 = vrcp.f32 %v7385_v62  ;;  %2935 = vst [vmem:[#allocation8 + $0x18] sm:$0xff] %v2689_v12  ;;  %v2681_v48 = vadd.f32 %v7357_v6, %v2680_v26  ;;  %v8009_v12 = vld [vmem:[#allocation22_spill] sm:$0xff] }
 0x4f4   :  { %v3716_v60 = vsub.f32 %v7045_v19, %v3652_v52  ;;  %v3655_v17 = vmul.f32 2.0, %v5400_v3  ;;  %v7395_v38 = vpop.eup %5579  ;;  %v7397_v30 = vadd.f32 1.0, %v3777_v18  ;;  %v3782_v59 = vmax.f32 %v3718_v58, 0.0  ;;  %4174 = vadd.xlane.f32.xlu1 %v7381_v34  ;;  %v5283_v50 = vpop.f32.mrf.mxu1  ;;  %v5771_v18 = vld [vmem:[%s7938_s14] ss:$0 sm:$0xff] }
 0x4f5   :  { %v7400_v63 = vmul.f32 %v5572_v25, %v4026_v61  ;;  %v3449_v2 = vpop.f32.mrf.mxu0  ;;  %v4024_v43 = vsub.f32 2.0, %v3960_v54  ;;  %2933 = vst [vmem:[#allocation8 + $0x8] sm:$0xff] %v2681_v48  ;;  %v2702_v19 = vadd.f32 %v5283_v50, %v7357_v6  ;;  %v7409_v58 = vadd.f32 %v5771_v18, %v3183_v4 }
 0x4f6   :  { %v3780_v11 = vmax.f32 %v3716_v60, 0.0  ;;  %v3719_v37 = vsub.f32 %v8009_v12, %v3655_v17  ;;  %v3653_v52 = vmul.f32 2.0, %v3449_v2  ;;  %v7404_v26 = vpop.eup %5581  ;;  %5593 = vrcp.f32 %v7397_v30  ;;  %v2693_v3 = vpop.f32.mrf.mxu1  ;;  %v8010_v17 = vld [vmem:[#allocation23_spill] sm:$0xff] }
 0x4f7   :  { %8008 = vst [vmem:[#allocation38_spill] sm:$0xff] %v7400_v63  ;;  %v7412_v25 = vadd.f32 1.0, %v3782_v59  ;;  %4184 = vadd.xlane.f32.xlu0 %v7400_v63  ;;  %v5403_v61 = vpop.f32.mrf.mxu0  ;;  %v3963_v54 = vmul.f32 %v7376_v20, %v7312_v42  ;;  %2938 = vst [vmem:[#allocation8 + $0x30] sm:$0xff] %v2702_v19  ;;  %v7420_v2 = vmul.f32 %v5574_v35, %v4024_v43  ;;  %v8012_v35 = vld [vmem:[#allocation14_spill] sm:$0xff] }
 0x4f8   :  { %v7417_v60 = vadd.f32 1.0, %v3780_v11  ;;  %v3783_v48 = vmax.f32 %v3719_v37, 0.0  ;;  %v3717_v50 = vsub.f32 %v8010_v17, %v3653_v52  ;;  %v2694_v4 = vadd.f32 %v7357_v6, %v2693_v3  ;;  %v5284_v18 = vpop.f32.mrf.mxu1 }
 0x4f9   :  { %8011 = vst [vmem:[#allocation22_spill] sm:$0xff] %v7420_v2  ;;  %5595 = vrcp.f32 %v7412_v25  ;;  %v3658_v59 = vmul.f32 2.0, %v5403_v61  ;;  %v4027_v12 = vsub.f32 2.0, %v3963_v54  ;;  %v3462_v63 = vpop.f32.mrf.mxu0  ;;  %v7424_v34 = vpop.eup %5583  ;;  %v2705_v11 = vadd.f32 %v5284_v18, %v7357_v6 }
 0x4fa   :  { %5597 = vrcp.f32 %v7417_v60  ;;  %v7427_v42 = vadd.f32 1.0, %v3783_v48  ;;  %v3781_v37 = vmax.f32 %v3717_v50, 0.0  ;;  %v7430_v19 = vpop.eup %5585  ;;  %2936 = vst [vmem:[#allocation8 + $0x20] sm:$0xff] %v2694_v4  ;;  %v3656_v3 = vmul.f32 2.0, %v3462_v63  ;;  %v2696_v61 = vpop.f32.mrf.mxu1 }
 0x4fb   :  { %v3722_v43 = vsub.f32 %v8012_v35, %v3658_v59  ;;  %4180 = vadd.xlane.f32.xlu0 %v7420_v2  ;;  %v7435_v52 = vmul.f32 %v7376_v20, %v4027_v12  ;;  %v5404_v54 = vpop.f32.mrf.mxu0  ;;  %v3961_v48 = vmul.f32 %v7388_v41, %v7320_v32  ;;  %v3964_v17 = vmul.f32 %v7404_v26, %v7336_v8 }
 0x4fc   :  { %5599 = vrcp.f32 %v7427_v42  ;;  %v7442_v50 = vadd.f32 1.0, %v3781_v37  ;;  %2939 = vst [vmem:[#allocation8 + $0x38] sm:$0xff] %v2705_v11  ;;  %v2697_v4 = vadd.f32 %v7357_v6, %v2696_v61  ;;  %v7445_v59 = vpop.eup %5587  ;;  %v3720_v63 = vsub.f32 %v7066_v27, %v3656_v3  ;;  %v5287_v32 = vpop.f32.mrf.mxu1  ;;  %v8014_v3 = vld [vmem:[#allocation15_spill] sm:$0xff] }
 0x4fd   :  { %8013 = vst [vmem:[#allocation23_spill] sm:$0xff] %v7435_v52  ;;  %v3786_v20 = vmax.f32 %v3722_v43, 0.0  ;;  %4186 = vadd.xlane.f32.xlu1 %v7435_v52  ;;  %v3659_v12 = vmul.f32 2.0, %v5404_v54  ;;  %v4025_v18 = vsub.f32 2.0, %v3961_v48  ;;  %v3465_v35 = vpop.f32.mrf.mxu0  ;;  %v7451_v8 = vmul.f32 %v7430_v19, %v7351_v53 }
 0x4fe   :  { %5601 = vrcp.f32 %v7442_v50  ;;  %2937 = vst [vmem:[#allocation8 + $0x28] sm:$0xff] %v2697_v4  ;;  %v3966_v37 = vmul.f32 %v7395_v38, %v7329_v14  ;;  %v2718_v11 = vadd.f32 %v5287_v32, %v7357_v6  ;;  %v7457_v43 = vpop.eup %5589  ;;  %v3784_v27 = vmax.f32 %v3720_v63, 0.0  ;;  %v2709_v53 = vpop.f32.mrf.mxu1 }
 0x4ff   :  { %v7459_v61 = vadd.f32 1.0, %v3786_v20  ;;  %v3723_v54 = vsub.f32 %v8014_v3, %v3659_v12  ;;  %v7463_v48 = vmul.f32 %v7388_v41, %v4025_v18  ;;  %v5407_v52 = vpop.f32.mrf.mxu0  ;;  %v7467_v4 = vmul.f32 %v7445_v59, %v7366_v9 }
 0x500   :  { %v4030_v2 = vsub.f32 2.0, %v3966_v37  ;;  %2942 = vst [vmem:[#allocation8 + $0x50] sm:$0xff] %v2718_v11  ;;  %v3657_v14 = vmul.f32 2.0, %v3465_v35  ;;  %v2710_v32 = vadd.f32 %v7357_v6, %v2709_v53  ;;  %v7470_v16 = vpop.eup %5591  ;;  %v7473_v20 = vadd.f32 1.0, %v3784_v27  ;;  %v5288_v12 = vpop.f32.mrf.mxu1  ;;  %v8017_v37 = vld [vmem:[#allocation16_spill] sm:$0xff] }
 0x501   :  { %8015 = vst [vmem:[#allocation14_spill] sm:$0xff] %v7463_v48  ;;  %5603 = vrcp.f32 %v7459_v61  ;;  %v3787_v63 = vmax.f32 %v3723_v54, 0.0  ;;  %4182 = vadd.xlane.f32.xlu1 %v7463_v48  ;;  %v3662_v41 = vmul.f32 2.0, %v5407_v52  ;;  %v3478_v18 = vpop.f32.mrf.mxu0  ;;  %v7478_v9 = vmul.f32 %v7457_v43, %v7373_v13 }
 0x502   :  { %v7481_v35 = vmul.f32 %v7395_v38, %v4030_v2  ;;  %v3721_v11 = vsub.f32 %v8017_v37, %v3657_v14  ;;  %2940 = vst [vmem:[#allocation8 + $0x40] sm:$0xff] %v2710_v32  ;;  %v4028_v3 = vsub.f32 2.0, %v3964_v17  ;;  %5605 = vrcp.f32 %v7473_v20  ;;  %v2712_v53 = vpop.f32.mrf.mxu1 }
 0x503   :  { %v7485_v27 = vadd.f32 1.0, %v3787_v63  ;;  %v3726_v54 = vsub.f32 %v7076_v51, %v3662_v41  ;;  %v3967_v52 = vmul.f32 %v7424_v34, %v7346_v55  ;;  %v5408_v48 = vpop.f32.mrf.mxu0  ;;  %v7490_v13 = vpop.eup %5593  ;;  %v7494_v38 = vmul.f32 %v7470_v16, %v7385_v62 }
 0x504   :  { %8016 = vst [vmem:[#allocation15_spill] sm:$0xff] %v7481_v35  ;;  %4192 = vadd.xlane.f32.xlu0 %v7481_v35  ;;  %v3785_v2 = vmax.f32 %v3721_v11, 0.0  ;;  %v2721_v17 = vadd.f32 %v5288_v12, %v7357_v6  ;;  %v3660_v14 = vmul.f32 2.0, %v3478_v18  ;;  %v7500_v32 = vmul.f32 %v7404_v26, %v4028_v3  ;;  %v5291_v63 = vpop.f32.mrf.mxu1 }
 0x505   :  { %5607 = vrcp.f32 %v7485_v27  ;;  %v3790_v51 = vmax.f32 %v3726_v54, 0.0  ;;  %v4031_v55 = vsub.f32 2.0, %v3967_v52  ;;  %v3481_v41 = vpop.f32.mrf.mxu0  ;;  %v2713_v11 = vadd.f32 %v7357_v6, %v2712_v53 }
 0x506   :  { %8018 = vst [vmem:[#allocation16_spill] sm:$0xff] %v7500_v32  ;;  %v7502_v37 = vpop.eup %5595  ;;  %v7504_v31 = vadd.f32 1.0, %v3785_v2  ;;  %2943 = vst [vmem:[#allocation8 + $0x58] sm:$0xff] %v2721_v17  ;;  %v3724_v62 = vsub.f32 %v7084_v40, %v3660_v14  ;;  %v3663_v12 = vmul.f32 2.0, %v5408_v48  ;;  %v7512_v54 = vmul.f32 %v7490_v13, %v7397_v30  ;;  %v2725_v2 = vpop.f32.mrf.mxu1 }
 0x507   :  { %v7508_v18 = vpop.eup %5597  ;;  %v7514_v26 = vadd.f32 1.0, %v3790_v51  ;;  %v7517_v3 = vmul.f32 %v7424_v34, %v4031_v55  ;;  %v4029_v52 = vsub.f32 2.0, %v7451_v8  ;;  %v5411_v17 = vpop.f32.mrf.mxu0  ;;  %v7522_v40 = vmul.f32 %v7502_v37, %v7412_v25  ;;  %2941 = vst [vmem:[#allocation8 + $0x48] sm:$0xff] %v2713_v11 }
 0x508   :  { %5609 = vrcp.f32 %v7504_v31  ;;  %4188 = vadd.xlane.f32.xlu0 %v7500_v32  ;;  %v3788_v48 = vmax.f32 %v3724_v62, 0.0  ;;  %v3727_v30 = vsub.f32 %v7080_v39, %v3663_v12  ;;  %v7531_v34 = vmul.f32 %v7508_v18, %v7417_v60  ;;  %v5292_v14 = vpop.f32.mrf.mxu1 }
 0x509   :  { %8019 = vst [vmem:[#allocation39_spill] sm:$0xff] %v7517_v3  ;;  %v7527_v53 = vpop.eup %5599  ;;  %5611 = vrcp.f32 %v7514_v26  ;;  %4194 = vadd.xlane.f32.xlu1 %v7517_v3  ;;  %v4034_v25 = vsub.f32 2.0, %v7467_v4  ;;  %v2734_v8 = vadd.f32 %v5291_v63, %v7357_v6  ;;  %v3494_v51 = vpop.f32.mrf.mxu0  ;;  %v7540_v39 = vmul.f32 %v7430_v19, %v4029_v52 }
 0x50a   :  { %v7537_v55 = vadd.f32 1.0, %v3788_v48  ;;  %v3791_v62 = vmax.f32 %v3727_v30, 0.0  ;;  %v3661_v11 = vmul.f32 2.0, %v3481_v41  ;;  %v2726_v3 = vadd.f32 %v7357_v6, %v2725_v2  ;;  %v2728_v32 = vpop.f32.mrf.mxu1 }
 0x50b   :  { %v7542_v12 = vpop.eup %5601  ;;  %v7545_v60 = vmul.f32 %v7445_v59, %v4034_v25  ;;  %2946 = vst [vmem:[#allocation8 + $0x70] sm:$0xff] %v2734_v8  ;;  %v3666_v4 = vmul.f32 2.0, %v5411_v17  ;;  %v4032_v63 = vsub.f32 2.0, %v7478_v9  ;;  %v5412_v35 = vpop.f32.mrf.mxu0  ;;  %v7551_v48 = vmul.f32 %v7527_v53, %v7427_v42 }
 0x50c   :  { %5613 = vrcp.f32 %v7537_v55  ;;  %v7554_v19 = vadd.f32 1.0, %v3791_v62  ;;  %v3725_v41 = vsub.f32 %v7093_v7, %v3661_v11  ;;  %v7559_v59 = vmul.f32 %v7542_v12, %v7442_v50  ;;  %2944 = vst [vmem:[#allocation8 + $0x60] sm:$0xff] %v2726_v3  ;;  %v5295_v2 = vpop.f32.mrf.mxu1 }
 0x50d   :  { %8020 = vst [vmem:[#allocation40_spill] sm:$0xff] %v7545_v60  ;;  %4190 = vadd.xlane.f32.xlu1 %v7540_v39  ;;  %4200 = vadd.xlane.f32.xlu0 %v7545_v60  ;;  %v3730_v9 = vsub.f32 %v7097_v44, %v3666_v4  ;;  %v4035_v42 = vsub.f32 2.0, %v7494_v38  ;;  %v2737_v52 = vadd.f32 %v5292_v14, %v7357_v6  ;;  %v3497_v17 = vpop.f32.mrf.mxu0  ;;  %v3664_v50 = vmul.f32 2.0, %v3494_v51 }
 0x50e   :  { %v7566_v30 = vpop.eup %5603  ;;  %v3789_v7 = vmax.f32 %v3725_v41, 0.0  ;;  %v7569_v25 = vmul.f32 %v7457_v43, %v4032_v63  ;;  %v2729_v8 = vadd.f32 %v7357_v6, %v2728_v32  ;;  %5615 = vrcp.f32 %v7554_v19  ;;  %v2741_v14 = vpop.f32.mrf.mxu1  ;;  %v8023_v41 = vld [vmem:[#allocation18_spill] sm:$0xff] }
 0x50f   :  { %v3794_v3 = vmax.f32 %v3730_v9, 0.0  ;;  %v7574_v44 = vmul.f32 %v7470_v16, %v4035_v42  ;;  %2947 = vst [vmem:[#allocation8 + $0x78] sm:$0xff] %v2737_v52  ;;  %v3667_v38 = vmul.f32 2.0, %v5412_v35  ;;  %v5415_v62 = vpop.f32.mrf.mxu0  ;;  %v7576_v11 = vpop.eup %5605  ;;  %v3728_v43 = vsub.f32 %v8023_v41, %v3664_v50  ;;  %v8024_v35 = vld [vmem:[#allocation17_spill] sm:$0xff] }
 0x510   :  { %8021 = vst [vmem:[#allocation41_spill] sm:$0xff] %v7569_v25  ;;  %v7578_v4 = vadd.f32 1.0, %v3789_v7  ;;  %2945 = vst [vmem:[#allocation8 + $0x68] sm:$0xff] %v2729_v8  ;;  %v4033_v51 = vsub.f32 2.0, %v7512_v54  ;;  %v4038_v32 = vsub.f32 2.0, %v7522_v40  ;;  %v7585_v63 = vmul.f32 %v7566_v30, %v7459_v61  ;;  %v5296_v52 = vpop.f32.mrf.mxu1 }
 0x511   :  { %8022 = vst [vmem:[#allocation42_spill] sm:$0xff] %v7574_v44  ;;  %v7587_v16 = vadd.f32 1.0, %v3794_v3  ;;  %4196 = vadd.xlane.f32.xlu0 %v7569_v25  ;;  %4202 = vadd.xlane.f32.xlu1 %v7574_v44  ;;  %v3731_v9 = vsub.f32 %v8024_v35, %v3667_v38  ;;  %v2750_v42 = vadd.f32 %v5295_v2, %v7357_v6  ;;  %v3510_v7 = vpop.f32.mrf.mxu0  ;;  %v3792_v61 = vmax.f32 %v3728_v43, 0.0 }
 0x512   :  { %v7593_v50 = vpop.eup %5607  ;;  %v7597_v54 = vmul.f32 %v7576_v11, %v7473_v20  ;;  %5617 = vrcp.f32 %v7578_v4  ;;  %v7601_v40 = vmul.f32 %v7502_v37, %v4038_v32  ;;  %v7605_v3 = vmul.f32 %v7490_v13, %v4033_v51  ;;  %v2744_v38 = vpop.f32.mrf.mxu1  ;;  %v8027_v13 = vld [vmem:[#allocation24_spill] sm:$0xff] }
 0x513   :  { %5619 = vrcp.f32 %v7587_v16  ;;  %v3795_v8 = vmax.f32 %v3731_v9, 0.0  ;;  %2950 = vst [vmem:[#allocation8 + $0x90] sm:$0xff] %v2750_v42  ;;  %v3665_v2 = vmul.f32 2.0, %v3497_v17  ;;  %v5416_v41 = vpop.f32.mrf.mxu0  ;;  %v7607_v35 = vadd.f32 1.0, %v3792_v61  ;;  %v8028_v61 = vld [vmem:[#allocation25_spill] sm:$0xff] }
 0x514   :  { %8025 = vst [vmem:[#allocation18_spill] sm:$0xff] %v7601_v40  ;;  %8026 = vst [vmem:[#allocation17_spill] sm:$0xff] %v7605_v3  ;;  %v2742_v20 = vadd.f32 %v7357_v6, %v2741_v14  ;;  %v3670_v44 = vmul.f32 2.0, %v5415_v62  ;;  %v4036_v43 = vsub.f32 2.0, %v7531_v34  ;;  %v4039_v17 = vsub.f32 2.0, %v7551_v48  ;;  %v5299_v9 = vpop.f32.mrf.mxu1 }
 0x515   :  { %v7611_v25 = vpop.eup %5609  ;;  %v7613_v37 = vadd.f32 1.0, %v3795_v8  ;;  %4198 = vadd.xlane.f32.xlu1 %v7605_v3  ;;  %4208 = vadd.xlane.f32.xlu0 %v7601_v40  ;;  %v3729_v51 = vsub.f32 %v8027_v13, %v3665_v2  ;;  %v2753_v32 = vadd.f32 %v5296_v52, %v7357_v6  ;;  %v3513_v42 = vpop.f32.mrf.mxu0  ;;  %v7624_v34 = vmul.f32 %v7593_v50, %v7485_v27 }
 0x516   :  { %v7620_v14 = vpop.eup %5611  ;;  %v7628_v62 = vmul.f32 %v7611_v25, %v7504_v31  ;;  %5621 = vrcp.f32 %v7607_v35  ;;  %2948 = vst [vmem:[#allocation8 + $0x80] sm:$0xff] %v2742_v20  ;;  %v3734_v8 = vsub.f32 %v8028_v61, %v3670_v44  ;;  %v7634_v52 = vmul.f32 %v7508_v18, %v4036_v43  ;;  %v2757_v27 = vpop.f32.mrf.mxu1  ;;  %v8030_v61 = vld [vmem:[#allocation26_spill] sm:$0xff] }
 0x517   :  { %5623 = vrcp.f32 %v7613_v37  ;;  %v3793_v48 = vmax.f32 %v3729_v51, 0.0  ;;  %v7637_v2 = vmul.f32 %v7527_v53, %v4039_v17  ;;  %2951 = vst [vmem:[#allocation8 + $0x98] sm:$0xff] %v2753_v32  ;;  %v5419_v13 = vpop.f32.mrf.mxu0  ;;  %v3668_v31 = vmul.f32 2.0, %v3510_v7 }
 0x518   :  { %v3798_v40 = vmax.f32 %v3734_v8, 0.0  ;;  %v2745_v3 = vadd.f32 %v7357_v6, %v2744_v38  ;;  %v3671_v60 = vmul.f32 2.0, %v5416_v41  ;;  %v4037_v18 = vsub.f32 2.0, %v7559_v59  ;;  %v5300_v51 = vpop.f32.mrf.mxu1  ;;  %v8029_v41 = vld [vmem:[#allocation27_spill] sm:$0xff] }
 0x519   :  { %v7640_v20 = vpop.eup %5613  ;;  %v7642_v44 = vadd.f32 1.0, %v3793_v48  ;;  %4204 = vadd.xlane.f32.xlu0 %v7634_v52  ;;  %4210 = vadd.xlane.f32.xlu1 %v7637_v2  ;;  %v4042_v53 = vsub.f32 2.0, %v7585_v63  ;;  %v2766_v43 = vadd.f32 %v5299_v9, %v7357_v6  ;;  %v3526_v17 = vpop.f32.mrf.mxu0  ;;  %v7651_v7 = vmul.f32 %v7620_v14, %v7514_v26 }
 0x51a   :  { %v7653_v38 = vadd.f32 1.0, %v3798_v40  ;;  %v3732_v32 = vsub.f32 %v8029_v41, %v3668_v31  ;;  %2949 = vst [vmem:[#allocation8 + $0x88] sm:$0xff] %v2745_v3  ;;  %v3735_v8 = vsub.f32 %v8030_v61, %v3671_v60  ;;  %v7659_v59 = vmul.f32 %v7542_v12, %v4037_v18  ;;  %v2760_v48 = vpop.f32.mrf.mxu1  ;;  %v8033_v12 = vld [vmem:[#allocation28_spill] sm:$0xff] }
 0x51b   :  { %5625 = vrcp.f32 %v7642_v44  ;;  %v7662_v63 = vmul.f32 %v7566_v30, %v4042_v53  ;;  %2954 = vst [vmem:[#allocation8 + $0xb0] sm:$0xff] %v2766_v43  ;;  %v3669_v9 = vmul.f32 2.0, %v3513_v42  ;;  %v7664_v26 = vpop.eup %5615  ;;  %v7668_v40 = vmul.f32 %v7640_v20, %v7537_v55  ;;  %v5420_v31 = vpop.f32.mrf.mxu0 }
 0x51c   :  { %8031 = vst [vmem:[#allocation24_spill] sm:$0xff] %v7659_v59  ;;  %5627 = vrcp.f32 %v7653_v38  ;;  %v3796_v60 = vmax.f32 %v3732_v32, 0.0  ;;  %v3799_v3 = vmax.f32 %v3735_v8, 0.0  ;;  %v2758_v42 = vadd.f32 %v7357_v6, %v2757_v27  ;;  %v5303_v43 = vpop.f32.mrf.mxu1 }
 0x51d   :  { %8032 = vst [vmem:[#allocation25_spill] sm:$0xff] %v7662_v63  ;;  %4206 = vadd.xlane.f32.xlu1 %v7659_v59  ;;  %4216 = vadd.xlane.f32.xlu0 %v7662_v63  ;;  %v3733_v30 = vsub.f32 %v8033_v12, %v3669_v9  ;;  %v3674_v18 = vmul.f32 2.0, %v5419_v13  ;;  %v4040_v53 = vsub.f32 2.0, %v7597_v54  ;;  %v4043_v32 = vsub.f32 2.0, %v7624_v34  ;;  %v8034_v63 = vld [vmem:[#allocation29_spill] sm:$0xff] }
 0x51e   :  { %v7676_v41 = vadd.f32 1.0, %v3796_v60  ;;  %v7678_v55 = vadd.f32 1.0, %v3799_v3  ;;  %v2769_v61 = vadd.f32 %v5300_v51, %v7357_v6  ;;  %2952 = vst [vmem:[#allocation8 + $0xa0] sm:$0xff] %v2758_v42  ;;  %v3672_v13 = vmul.f32 2.0, %v3526_v17  ;;  %v2773_v54 = vpop.f32.mrf.mxu1  ;;  %v3529_v3 = vpop.f32.mrf.mxu0 }
 0x51f   :  { %v7682_v8 = vpop.eup %5617  ;;  %v3797_v59 = vmax.f32 %v3733_v30, 0.0  ;;  %v3738_v9 = vsub.f32 %v8034_v63, %v3674_v18  ;;  %v7686_v27 = vmul.f32 %v7576_v11, %v4040_v53  ;;  %v3983_v60 = vmul.f32 %v7664_v26, %v7554_v19 }
 0x520   :  { %v7688_v12 = vpop.eup %5619  ;;  %5629 = vrcp.f32 %v7676_v41  ;;  %v7694_v34 = vmul.f32 %v7593_v50, %v4043_v32  ;;  %2955 = vst [vmem:[#allocation8 + $0xb8] sm:$0xff] %v2769_v61  ;;  %v2761_v51 = vadd.f32 %v7357_v6, %v2760_v48  ;;  %v7699_v11 = vmul.f32 %v7682_v8, %v7578_v4  ;;  %v5304_v19 = vpop.f32.mrf.mxu1 }
 0x521   :  { %5631 = vrcp.f32 %v7678_v55  ;;  %v7702_v17 = vadd.f32 1.0, %v3797_v59  ;;  %v3802_v63 = vmax.f32 %v3738_v9, 0.0  ;;  %4212 = vadd.xlane.f32.xlu0 %v7686_v27  ;;  %v3736_v50 = vsub.f32 %v7148_v47, %v3672_v13 }
 0x522   :  { %4218 = vadd.xlane.f32.xlu1 %v7694_v34  ;;  %2953 = vst [vmem:[#allocation8 + $0xa8] sm:$0xff] %v2761_v51  ;;  %v3675_v30 = vmul.f32 2.0, %v5420_v31  ;;  %v4041_v48 = vsub.f32 2.0, %v7628_v62  ;;  %v4046_v42 = vsub.f32 2.0, %v7651_v7  ;;  %v3986_v59 = vmul.f32 %v7688_v12, %v7587_v16  ;;  %v2776_v61 = vpop.f32.mrf.mxu1  ;;  %v8035_v31 = vld [vmem:[#allocation30_spill] sm:$0xff] }
 0x523   :  { %v7709_v4 = vpop.eup %5621  ;;  %v7713_v18 = vadd.f32 1.0, %v3802_v63  ;;  %v2782_v53 = vadd.f32 %v5303_v43, %v7357_v6  ;;  %v3673_v32 = vmul.f32 2.0, %v3529_v3  ;;  %5633 = vrcp.f32 %v7702_v17 }
 0x524   :  { %v5624_v9 = vpop.eup %5623  ;;  %v3800_v47 = vmax.f32 %v3736_v50, 0.0  ;;  %v3739_v13 = vsub.f32 %v8035_v31, %v3675_v30  ;;  %v7719_v62 = vmul.f32 %v7611_v25, %v4041_v48  ;;  %v7723_v7 = vmul.f32 %v7709_v4, %v7607_v35  ;;  %v5307_v51 = vpop.f32.mrf.mxu1 }
 0x525   :  { %5635 = vrcp.f32 %v7713_v18  ;;  %v7727_v16 = vmul.f32 %v7620_v14, %v4046_v42  ;;  %2958 = vst [vmem:[#allocation8 + $0xd0] sm:$0xff] %v2782_v53  ;;  %v3737_v43 = vsub.f32 %v7409_v58, %v3673_v32  ;;  %v2774_v25 = vadd.f32 %v7357_v6, %v2773_v54 }
 0x526   :  { %v7730_v3 = vadd.f32 1.0, %v3800_v47  ;;  %v3803_v63 = vmax.f32 %v3739_v13, 0.0  ;;  %4214 = vadd.xlane.f32.xlu1 %v7719_v62  ;;  %v4044_v50 = vsub.f32 2.0, %v7668_v40  ;;  %v4047_v30 = vsub.f32 2.0, %v3983_v60  ;;  %v2789_v42 = vpop.f32.mrf.mxu1 }
 0x527   :  { %4224 = vadd.xlane.f32.xlu0 %v7727_v16  ;;  %v3801_v35 = vmax.f32 %v3737_v43, 0.0  ;;  %v2785_v14 = vadd.f32 %v5304_v19, %v7357_v6  ;;  %v2777_v48 = vadd.f32 %v7357_v6, %v2776_v61  ;;  %v3987_v53 = vmul.f32 %v5624_v9, %v7613_v37  ;;  %2956 = vst [vmem:[#allocation8 + $0xc0] sm:$0xff] %v2774_v25 }
 0x528   :  { %v5626_v58 = vpop.eup %5625  ;;  %5637 = vrcp.f32 %v7730_v3  ;;  %v7740_v32 = vadd.f32 1.0, %v3803_v63  ;;  %v7743_v54 = vmul.f32 %v7640_v20, %v4044_v50  ;;  %v7748_v60 = vmul.f32 %v7664_v26, %v4047_v30  ;;  %v5308_v37 = vpop.f32.mrf.mxu1 }
 0x529   :  { %v5628_v40 = vpop.eup %5627  ;;  %v7745_v47 = vadd.f32 1.0, %v3801_v35  ;;  %2959 = vst [vmem:[#allocation8 + $0xd8] sm:$0xff] %v2785_v14  ;;  %2957 = vst [vmem:[#allocation8 + $0xc8] sm:$0xff] %v2777_v48  ;;  %v4045_v19 = vsub.f32 2.0, %v7699_v11  ;;  %v4050_v61 = vsub.f32 2.0, %v3986_v59  ;;  %v2798_v31 = vadd.f32 %v5307_v51, %v7357_v6 }
 0x52a   :  { %v3990_v13 = vmul.f32 %v5628_v40, %v7653_v38  ;;  %4226 = vadd.xlane.f32.xlu1 %v7748_v60  ;;  %v2790_v26 = vadd.f32 %v7357_v6, %v2789_v42  ;;  %v2792_v43 = vpop.f32.mrf.mxu1  ;;  %v4051_v11 = vsub.f32 2.0, %v3987_v53  ;;  %v2801_v59 = vadd.f32 %v5308_v37, %v7357_v6 }
 0x52b   :  { %5639 = vrcp.f32 %v7745_v47  ;;  %4220 = vadd.xlane.f32.xlu0 %v7743_v54  ;;  %v7757_v20 = vmul.f32 %v7688_v12, %v4050_v61  ;;  %2962 = vst [vmem:[#allocation8 + $0xf0] sm:$0xff] %v2798_v31  ;;  %v2793_v51 = vadd.f32 %v7357_v6, %v2792_v43  ;;  %v3985_v38 = vmul.f32 %v5626_v58, %v7642_v44 }
 0x52c   :  { %5641 = vrcp.f32 %v7740_v32  ;;  %v7765_v25 = vmul.f32 %v7682_v8, %v4045_v19  ;;  %2960 = vst [vmem:[#allocation8 + $0xe0] sm:$0xff] %v2790_v26  ;;  %v4048_v12 = vsub.f32 2.0, %v7723_v7  ;;  %v5311_v50 = vpop.f32.mrf.mxu1  ;;  %2963 = vst [vmem:[#allocation8 + $0xf8] sm:$0xff] %v2801_v59  ;;  %v7772_v44 = vmul.f32 %v5624_v9, %v4051_v11 }
 0x52d   :  { %v5630_v63 = vpop.eup %5629  ;;  %2961 = vst [vmem:[#allocation8 + $0xe8] sm:$0xff] %v2793_v51  ;;  %v2814_v30 = vadd.f32 %v5311_v50, %v7357_v6  ;;  %v4054_v48 = vsub.f32 2.0, %v3990_v13  ;;  %v4049_v61 = vsub.f32 2.0, %v3985_v38 }
 0x52e   :  { %v5632_v35 = vpop.eup %5631  ;;  %4222 = vadd.xlane.f32.xlu1 %v7765_v25  ;;  %v2805_v8 = vpop.f32.mrf.mxu1  ;;  %v3988_v53 = vmul.f32 %v5630_v63, %v7676_v41  ;;  %v7777_v19 = vmul.f32 %v7709_v4, %v4048_v12 }
 0x52f   :  { %v3991_v14 = vmul.f32 %v5632_v35, %v7678_v55  ;;  %4232 = vadd.xlane.f32.xlu0 %v7757_v20  ;;  %2966 = vst [vmem:[#allocation8 + $0x110] sm:$0xff] %v2814_v30  ;;  %v2806_v42 = vadd.f32 %v7357_v6, %v2805_v8  ;;  %v7782_v9 = vmul.f32 %v5628_v40, %v4054_v48 }
 0x530   :  { %v5634_v7 = vpop.eup %5633  ;;  %v5312_v37 = vpop.f32.mrf.mxu1  ;;  %v7786_v11 = vmul.f32 %v5626_v58, %v4049_v61  ;;  %v4052_v59 = vsub.f32 2.0, %v3988_v53 }
 0x531   :  { %2964 = vst [vmem:[#allocation8 + $0x100] sm:$0xff] %v2806_v42  ;;  %v2817_v31 = vadd.f32 %v5312_v37, %v7357_v6  ;;  %v4055_v13 = vsub.f32 2.0, %v3991_v14  ;;  %v3989_v4 = vmul.f32 %v5634_v7, %v7702_v17 }
 0x532   :  { %v5636_v55 = vpop.eup %5635  ;;  %4234 = vadd.xlane.f32.xlu1 %v7772_v44  ;;  %v2808_v26 = vpop.f32.mrf.mxu1 }
 0x533   :  { %4228 = vadd.xlane.f32.xlu0 %v7777_v19  ;;  %2967 = vst [vmem:[#allocation8 + $0x118] sm:$0xff] %v2817_v31  ;;  %v2809_v41 = vadd.f32 %v7357_v6, %v2808_v26  ;;  %v7792_v40 = vmul.f32 %v5632_v35, %v4055_v13  ;;  %v3994_v58 = vmul.f32 %v5636_v55, %v7713_v18  ;;  %v4053_v8 = vsub.f32 2.0, %v3989_v4 }
 0x534   :  { %v5315_v51 = vpop.f32.mrf.mxu1 }
 0x535   :  { %v5638_v43 = vpop.eup %5637  ;;  %2965 = vst [vmem:[#allocation8 + $0x108] sm:$0xff] %v2809_v41  ;;  %v2830_v12 = vadd.f32 %v5315_v51, %v7357_v6  ;;  %v4058_v13 = vsub.f32 2.0, %v3994_v58 }
 0x536   :  { %v3992_v38 = vmul.f32 %v5638_v43, %v7730_v3  ;;  %4230 = vadd.xlane.f32.xlu1 %v7786_v11  ;;  %v2821_v50 = vpop.f32.mrf.mxu1  ;;  %v7797_v3 = vmul.f32 %v5630_v63, %v4052_v59  ;;  %v7806_v63 = vmul.f32 %v5634_v7, %v4053_v8 }
 0x537   :  { %4240 = vadd.xlane.f32.xlu0 %v7782_v9  ;;  %2970 = vst [vmem:[#allocation8 + $0x130] sm:$0xff] %v2830_v12  ;;  %v2822_v17 = vadd.f32 %v7357_v6, %v2821_v50  ;;  %v7814_v51 = vmul.f32 %v5636_v55, %v4058_v13 }
 0x538   :  { %v5640_v30 = vpop.eup %5639  ;;  %v4056_v14 = vsub.f32 2.0, %v3992_v38  ;;  %v5316_v42 = vpop.f32.mrf.mxu1 }
 0x539   :  { %v3993_v48 = vmul.f32 %v5640_v30, %v7745_v47  ;;  %v5642_v53 = vpop.eup %5641  ;;  %2968 = vst [vmem:[#allocation8 + $0x120] sm:$0xff] %v2822_v17  ;;  %v2833_v61 = vadd.f32 %v5316_v42, %v7357_v6 }
 0x53a   :  { %4242 = vadd.xlane.f32.xlu1 %v7792_v40  ;;  %v7802_v37 = vmul.f32 %v5638_v43, %v4056_v14  ;;  %v2824_v31 = vpop.f32.mrf.mxu1  ;;  %v3995_v47 = vmul.f32 %v5642_v53, %v7740_v32 }
 0x53b   :  { %v4057_v35 = vsub.f32 2.0, %v3993_v48  ;;  %4236 = vadd.xlane.f32.xlu0 %v7797_v3  ;;  %2971 = vst [vmem:[#allocation8 + $0x138] sm:$0xff] %v2833_v61  ;;  %v2825_v18 = vadd.f32 %v7357_v6, %v2824_v31 }
 0x53c   :  { %v5319_v26 = vpop.f32.mrf.mxu1  ;;  %v4059_v32 = vsub.f32 2.0, %v3995_v47 }
 0x53d   :  { %2969 = vst [vmem:[#allocation8 + $0x128] sm:$0xff] %v2825_v18  ;;  %v2846_v41 = vadd.f32 %v5319_v26, %v7357_v6  ;;  %v7811_v4 = vmul.f32 %v5640_v30, %v4057_v35 }
 0x53e   :  { %4238 = vadd.xlane.f32.xlu1 %v7806_v63  ;;  %v2837_v43 = vpop.f32.mrf.mxu1  ;;  %v7820_v30 = vmul.f32 %v5642_v53, %v4059_v32 }
 0x53f   :  { %4244 = vadd.xlane.f32.xlu0 %v7802_v37  ;;  %2974 = vst [vmem:[#allocation8 + $0x150] sm:$0xff] %v2846_v41  ;;  %v2838_v59 = vadd.f32 %v7357_v6, %v2837_v43  ;;  %v7831_v43 = vld [vmem:[%s7936_s12] ss:$0 sm:$0xff]  ;;  %s5865_s12 = smov [#allocation8]  }
 0x540   :  { %v5320_v7 = vpop.f32.mrf.mxu1  ;;  %s4461_s9 = sshll.u32 %s5865_s12, 4  ;;  %s4462_s9 = int_to_ptr.vmem [resolvable:$true] %s4461_s9 }
 0x541   :  { %2972 = vst [vmem:[#allocation8 + $0x140] sm:$0xff] %v2838_v59  ;;  %v2849_v38 = vadd.f32 %v5320_v7, %v7357_v6  ;;  %s5813_s24 = scalar_lea.vmem %s4462_s9, 8192  ;;  %p5818_p11 = scmp.lt.s32.totalorder %s4462_s9, %s4462_s9 }
 0x542   :  { %4246 = vadd.xlane.f32.xlu1 %v7811_v4  ;;  %v2840_v12 = vpop.f32.mrf.mxu1  ;;  %p5814_p10 = scmp.ne.s32.totalorder %s4462_s9, %s5813_s24  ;;  %p5819_p12 = scmp.lt.s32.totalorder %s5813_s24, %s5813_s24 }
 0x543   :  { %4248 = vadd.xlane.f32.xlu0 %v7814_v51  ;;  %2975 = vst [vmem:[#allocation8 + $0x158] sm:$0xff] %v2849_v38  ;;  %v2841_v50 = vadd.f32 %v7357_v6, %v2840_v12 }
 0x544   :  { %v5323_v14 = vpop.f32.mrf.mxu1  ;;  %p5820_p13 = por %p5819_p12, %p5818_p11 }
 0x545   :  { %2973 = vst [vmem:[#allocation8 + $0x148] sm:$0xff] %v2841_v50  ;;  %v4129_v17 = vpop.xlane.xlu0 %4128  ;;  %v2862_v55 = vadd.f32 %v5323_v14, %v7357_v6 }
 0x546   :  { %4250 = vadd.xlane.f32.xlu1 %v7820_v30  ;;  %5643 = vrcp.f32 %v4129_v17  ;;  %v2853_v58 = vpop.f32.mrf.mxu1  ;;  %p5821_p0 = pnand %p5820_p13, %p5814_p10 }
 0x547   :  { %2978 = vst [vmem:[#allocation8 + $0x170] sm:$0xff] %v2862_v55  ;;  %v2854_v48 = vadd.f32 %v7357_v6, %v2853_v58 }
 0x548   :  { %v5324_v8 = vpop.f32.mrf.mxu1 }
 0x549   :  { %2976 = vst [vmem:[#allocation8 + $0x160] sm:$0xff] %v2854_v48  ;;  %v4125_v42 = vpop.xlane.xlu0 %4124  ;;  %v4131_v61 = vpop.xlane.xlu1 %4130  ;;  %v2865_v35 = vadd.f32 %v5324_v8, %v7357_v6 }
 0x54a   :  { %5645 = vrcp.f32 %v4125_v42  ;;  %v2856_v53 = vpop.f32.mrf.mxu1 }
 0x54b   :  { %5647 = vrcp.f32 %v4131_v61  ;;  %2979 = vst [vmem:[#allocation8 + $0x178] sm:$0xff] %v2865_v35  ;;  %v2857_v31 = vadd.f32 %v7357_v6, %v2856_v53 }
 0x54c   :  { %v5327_v18 = vpop.f32.mrf.mxu1 }
 0x54d   :  { %2977 = vst [vmem:[#allocation8 + $0x168] sm:$0xff] %v2857_v31  ;;  %v4127_v47 = vpop.xlane.xlu1 %4126  ;;  %v4137_v13 = vpop.xlane.xlu0 %4136  ;;  %v2878_v26 = vadd.f32 %v5327_v18, %v7357_v6 }
 0x54e   :  { %5649 = vrcp.f32 %v4127_v47  ;;  %v2869_v41 = vpop.f32.mrf.mxu1  ;;  %v8036_v47 = vld [vmem:[#allocation31_spill] sm:$0xff] }
 0x54f   :  { %5651 = vrcp.f32 %v4137_v13  ;;  %2982 = vst [vmem:[#allocation8 + $0x190] sm:$0xff] %v2878_v26  ;;  %v2870_v59 = vadd.f32 %v7831_v43, %v2869_v41 }
 0x550   :  { %v5328_v32 = vpop.f32.mrf.mxu1 }
 0x551   :  { %2980 = vst [vmem:[#allocation8 + $0x180] sm:$0xff] %v2870_v59  ;;  %v4133_v7 = vpop.xlane.xlu0 %4132  ;;  %v4139_v38 = vpop.xlane.xlu1 %4138  ;;  %v2881_v12 = vadd.f32 %v7831_v43, %v5328_v32 }
 0x552   :  { %5653 = vrcp.f32 %v4133_v7  ;;  %v2872_v50 = vpop.f32.mrf.mxu1 }
 0x553   :  { %v5644_v6 = vpop.eup %5643  ;;  %5655 = vrcp.f32 %v4139_v38  ;;  %2983 = vst [vmem:[#allocation8 + $0x198] sm:$0xff] %v2881_v12  ;;  %v2873_v14 = vadd.f32 %v7831_v43, %v2872_v50 }
 0x554   :  { %v4318_v17 = vmul.f32 %v5644_v6, %v7157_v22  ;;  %v5331_v55 = vpop.f32.mrf.mxu1 }
 0x555   :  { %2981 = vst [vmem:[#allocation8 + $0x188] sm:$0xff] %v2873_v14  ;;  %v4135_v58 = vpop.xlane.xlu1 %4134  ;;  %v4145_v48 = vpop.xlane.xlu0 %4144  ;;  %v2894_v8 = vadd.f32 %v7831_v43, %v5331_v55 }
 0x556   :  { %4382 = vst [vmem:[#allocation7 + $0x10] sm:$0xff] %v4318_v17  ;;  %5657 = vrcp.f32 %v4135_v58  ;;  %v2885_v42 = vpop.f32.mrf.mxu1 }
 0x557   :  { %v5646_v61 = vpop.eup %5645  ;;  %5659 = vrcp.f32 %v4145_v48  ;;  %2986 = vst [vmem:[#allocation8 + $0x1b0] sm:$0xff] %v2894_v8  ;;  %v2886_v35 = vadd.f32 %v7831_v43, %v2885_v42 }
 0x558   :  { %v5648_v53 = vpop.eup %5647  ;;  %v4316_v31 = vmul.f32 %v5646_v61, %v7165_v56  ;;  %v5332_v18 = vpop.f32.mrf.mxu1 }
 0x559   :  { %v4319_v22 = vmul.f32 %v5648_v53, %v8036_v47  ;;  %2984 = vst [vmem:[#allocation8 + $0x1a0] sm:$0xff] %v2886_v35  ;;  %v4141_v13 = vpop.xlane.xlu0 %4140  ;;  %v4147_v26 = vpop.xlane.xlu1 %4146  ;;  %v2897_v41 = vadd.f32 %v7831_v43, %v5332_v18 }
 0x55a   :  { %4380 = vst [vmem:[#allocation7] sm:$0xff] %v4316_v31  ;;  %5661 = vrcp.f32 %v4141_v13  ;;  %v2888_v59 = vpop.f32.mrf.mxu1 }
 0x55b   :  { %v5650_v32 = vpop.eup %5649  ;;  %4383 = vst [vmem:[#allocation7 + $0x18] sm:$0xff] %v4319_v22  ;;  %5663 = vrcp.f32 %v4147_v26  ;;  %2987 = vst [vmem:[#allocation8 + $0x1b8] sm:$0xff] %v2897_v41  ;;  %v2889_v7 = vadd.f32 %v7831_v43, %v2888_v59 }
 0x55c   :  { %v5652_v38 = vpop.eup %5651  ;;  %v4317_v56 = vmul.f32 %v5650_v32, %v7181_v36  ;;  %v5335_v12 = vpop.f32.mrf.mxu1 }
 0x55d   :  { %v4322_v50 = vmul.f32 %v5652_v38, %v7188_v5  ;;  %2985 = vst [vmem:[#allocation8 + $0x1a8] sm:$0xff] %v2889_v7  ;;  %v4143_v6 = vpop.xlane.xlu1 %4142  ;;  %v4153_v14 = vpop.xlane.xlu0 %4152  ;;  %v2910_v17 = vadd.f32 %v7831_v43, %v5335_v12 }
 0x55e   :  { %4381 = vst [vmem:[#allocation7 + $0x8] sm:$0xff] %v4317_v56  ;;  %5665 = vrcp.f32 %v4143_v6  ;;  %v2901_v55 = vpop.f32.mrf.mxu1 }
 0x55f   :  { %v5654_v58 = vpop.eup %5653  ;;  %4386 = vst [vmem:[#allocation7 + $0x30] sm:$0xff] %v4322_v50  ;;  %5667 = vrcp.f32 %v4153_v14  ;;  %2990 = vst [vmem:[#allocation8 + $0x1d0] sm:$0xff] %v2910_v17  ;;  %v2902_v48 = vadd.f32 %v7831_v43, %v2901_v55 }
 0x560   :  { %v5656_v8 = vpop.eup %5655  ;;  %v4320_v36 = vmul.f32 %v5654_v58, %v7197_v46  ;;  %v5336_v42 = vpop.f32.mrf.mxu1 }
 0x561   :  { %v4323_v5 = vmul.f32 %v5656_v8, %v7204_v0  ;;  %2988 = vst [vmem:[#allocation8 + $0x1c0] sm:$0xff] %v2902_v48  ;;  %v4149_v61 = vpop.xlane.xlu0 %4148  ;;  %v4155_v35 = vpop.xlane.xlu1 %4154  ;;  %v2913_v53 = vadd.f32 %v7831_v43, %v5336_v42  ;;  %v8038_v8 = vld [vmem:[#allocation20_spill] sm:$0xff] }
 0x562   :  { %4384 = vst [vmem:[#allocation7 + $0x20] sm:$0xff] %v4320_v36  ;;  %5669 = vrcp.f32 %v4149_v61  ;;  %v2904_v31 = vpop.f32.mrf.mxu1  ;;  %v8039_v42 = vld [vmem:[#allocation32_spill] sm:$0xff] }
 0x563   :  { %v5658_v18 = vpop.eup %5657  ;;  %4387 = vst [vmem:[#allocation7 + $0x38] sm:$0xff] %v4323_v5  ;;  %5671 = vrcp.f32 %v4155_v35  ;;  %2991 = vst [vmem:[#allocation8 + $0x1d8] sm:$0xff] %v2913_v53  ;;  %v2905_v47 = vadd.f32 %v7831_v43, %v2904_v31 }
 0x564   :  { %v5660_v22 = vpop.eup %5659  ;;  %v4321_v46 = vmul.f32 %v5658_v18, %v7213_v10  ;;  %v5339_v13 = vpop.f32.mrf.mxu1 }
 0x565   :  { %v4326_v0 = vmul.f32 %v5660_v22, %v7220_v15  ;;  %2989 = vst [vmem:[#allocation8 + $0x1c8] sm:$0xff] %v2905_v47  ;;  %v4151_v26 = vpop.xlane.xlu1 %4150  ;;  %v4161_v41 = vpop.xlane.xlu0 %4160  ;;  %v2926_v59 = vadd.f32 %v7831_v43, %v5339_v13  ;;  %v8037_v15 = vld [vmem:[#allocation19_spill] sm:$0xff] }
 0x566   :  { %4385 = vst [vmem:[#allocation7 + $0x28] sm:$0xff] %v4321_v46  ;;  %5673 = vrcp.f32 %v4151_v26  ;;  %v2917_v32 = vpop.f32.mrf.mxu1 }
 0x567   :  { %v5662_v7 = vpop.eup %5661  ;;  %4390 = vst [vmem:[#allocation7 + $0x50] sm:$0xff] %v4326_v0  ;;  %5675 = vrcp.f32 %v4161_v41  ;;  %2994 = vst [vmem:[#allocation8 + $0x1f0] sm:$0xff] %v2926_v59  ;;  %v2918_v38 = vadd.f32 %v7831_v43, %v2917_v32 }
 0x568   :  { %v5664_v56 = vpop.eup %5663  ;;  %v4324_v10 = vmul.f32 %v5662_v7, %v7229_v23  ;;  %v5340_v12 = vpop.f32.mrf.mxu1 }
 0x569   :  { %v4327_v50 = vmul.f32 %v5664_v56, %v8037_v15  ;;  %2992 = vst [vmem:[#allocation8 + $0x1e0] sm:$0xff] %v2918_v38  ;;  %v4157_v6 = vpop.xlane.xlu0 %4156  ;;  %v4163_v14 = vpop.xlane.xlu1 %4162  ;;  %v2929_v17 = vadd.f32 %v7831_v43, %v5340_v12 }
 0x56a   :  { %4388 = vst [vmem:[#allocation7 + $0x40] sm:$0xff] %v4324_v10  ;;  %5677 = vrcp.f32 %v4157_v6  ;;  %v2920_v55 = vpop.f32.mrf.mxu1 }
 0x56b   :  { %v5666_v58 = vpop.eup %5665  ;;  %4391 = vst [vmem:[#allocation7 + $0x58] sm:$0xff] %v4327_v50  ;;  %5679 = vrcp.f32 %v4163_v14  ;;  %2995 = vst [vmem:[#allocation8 + $0x1f8] sm:$0xff] %v2929_v17  ;;  %v2921_v48 = vadd.f32 %v7831_v43, %v2920_v55 }
 0x56c   :  { %v5668_v23 = vpop.eup %5667  ;;  %v4325_v36 = vmul.f32 %v5666_v58, %v8038_v8 }
 0x56d   :  { %v4330_v5 = vmul.f32 %v5668_v23, %v8039_v42  ;;  %2993 = vst [vmem:[#allocation8 + $0x1e8] sm:$0xff] %v2921_v48  ;;  %v4159_v61 = vpop.xlane.xlu1 %4158  ;;  %v4169_v35 = vpop.xlane.xlu0 %4168 }
 0x56e   :  { %4389 = vst [vmem:[#allocation7 + $0x48] sm:$0xff] %v4325_v36  ;;  %5681 = vrcp.f32 %v4159_v61 }
 0x56f   :  { %5824 = shalt.err (!%p5821_p0)
}
 0x570   :  { %s5866_s8 = smov 128   ;;  %s5867_s25 = smov 8   ;;  %v5670_v43 = vpop.eup %5669  ;;  %4394 = vst [vmem:[#allocation7 + $0x70] sm:$0xff] %v4330_v5  ;;  %5683 = vrcp.f32 %v4169_v35  ;;  %v8040_v14 = vld [vmem:[#allocation21_spill] sm:$0xff]  ;;  %v8044_v35 = vld [vmem:[#allocation36_spill] sm:$0xff] }
 0x571   :  { %4467 = dma.vmem_to_hbm [thread:$0]  %s4462_s9, 8192, %s7940_s16, [#allocation9], %s5866_s8, %s5866_s8, %s5867_s25   ;;  %v5672_v53 = vpop.eup %5671  ;;  %v4328_v31 = vmul.f32 %v5670_v43, %v7261_v33  ;;  %v4165_v47 = vpop.xlane.xlu0 %4164 }
 0x572   :  { %v4331_v18 = vmul.f32 %v5672_v53, %v7268_v57  ;;  %v4171_v22 = vpop.xlane.xlu1 %4170  ;;  %5685 = vrcp.f32 %v4165_v47  ;;  %s5868_s16 = smov [#allocation7]  }
 0x573   :  { %4392 = vst [vmem:[#allocation7 + $0x60] sm:$0xff] %v4328_v31  ;;  %v5674_v46 = vpop.eup %5673  ;;  %5687 = vrcp.f32 %v4171_v22  ;;  %s4449_s28 = sshll.u32 %s5868_s16, 4  ;;  %s4450_s28 = int_to_ptr.vmem [resolvable:$true] %s4449_s28 }
 0x574   :  { %4395 = vst [vmem:[#allocation7 + $0x78] sm:$0xff] %v4331_v18  ;;  %v5676_v13 = vpop.eup %5675  ;;  %v4329_v0 = vmul.f32 %v5674_v46, %v7277_v21  ;;  %v8045_v18 = vld [vmem:[#allocation37_spill] sm:$0xff]  ;;  %s5833_s7 = scalar_lea.vmem %s4450_s28, 8192  ;;  %p5838_p2 = scmp.lt.s32.totalorder %s4450_s28, %s4450_s28 }
 0x575   :  { %v4334_v26 = vmul.f32 %v5676_v13, %v7284_v24  ;;  %v4177_v59 = vpop.xlane.xlu0 %4176  ;;  %v8046_v13 = vld [vmem:[#allocation38_spill] sm:$0xff]  ;;  %p5834_p1 = scmp.ne.s32.totalorder %s4450_s28, %s5833_s7  ;;  %p5839_p3 = scmp.lt.s32.totalorder %s5833_s7, %s5833_s7 }
 0x576   :  { %v4167_v41 = vpop.xlane.xlu1 %4166  ;;  %4393 = vst [vmem:[#allocation7 + $0x68] sm:$0xff] %v4329_v0 }
 0x577   :  { %5689 = vrcp.f32 %v4167_v41  ;;  %v5678_v32 = vpop.eup %5677  ;;  %4398 = vst [vmem:[#allocation7 + $0x90] sm:$0xff] %v4334_v26  ;;  %p5840_p4 = por %p5839_p3, %p5838_p2 }
 0x578   :  { %5691 = vrcp.f32 %v4177_v59  ;;  %v5680_v33 = vpop.eup %5679  ;;  %v4332_v57 = vmul.f32 %v5678_v32, %v7293_v28  ;;  %v8047_v32 = vld [vmem:[#allocation22_spill] sm:$0xff] }
 0x579   :  { %v4335_v7 = vmul.f32 %v5680_v33, %v7300_v49  ;;  %v4173_v38 = vpop.xlane.xlu0 %4172  ;;  %p5841_p5 = pnand %p5840_p4, %p5834_p1 }
 0x57a   :  { %v4179_v56 = vpop.xlane.xlu1 %4178  ;;  %4396 = vst [vmem:[#allocation7 + $0x80] sm:$0xff] %v4332_v57  ;;  %5693 = vrcp.f32 %v4173_v38 }
 0x57b   :  { %v5682_v10 = vpop.eup %5681  ;;  %4399 = vst [vmem:[#allocation7 + $0x98] sm:$0xff] %v4335_v7  ;;  %5695 = vrcp.f32 %v4179_v56  ;;  %v8048_v7 = vld [vmem:[#allocation23_spill] sm:$0xff] }
 0x57c   :  { %v4333_v24 = vmul.f32 %v5682_v10, %v7309_v45  ;;  %v8041_v45 = vld [vmem:[#allocation33_spill] sm:$0xff] }
 0x57d   :  { %v5684_v21 = vpop.eup %5683 }
 0x57e   :  { %v4338_v12 = vmul.f32 %v5684_v21, %v7316_v1  ;;  %v4175_v15 = vpop.xlane.xlu1 %4174  ;;  %4397 = vst [vmem:[#allocation7 + $0x88] sm:$0xff] %v4333_v24  ;;  %v8042_v1 = vld [vmem:[#allocation34_spill] sm:$0xff] }
 0x57f   :  { %5697 = vrcp.f32 %v4175_v15  ;;  %v5686_v50 = vpop.eup %5685  ;;  %v8049_v24 = vld [vmem:[#allocation14_spill] sm:$0xff] }
 0x580   :  { %4402 = vst [vmem:[#allocation7 + $0xb0] sm:$0xff] %v4338_v12  ;;  %v4185_v28 = vpop.xlane.xlu0 %4184  ;;  %v5688_v6 = vpop.eup %5687  ;;  %v4336_v49 = vmul.f32 %v5686_v50, %v7325_v29  ;;  %v8043_v29 = vld [vmem:[#allocation35_spill] sm:$0xff] }
 0x581   :  { %5699 = vrcp.f32 %v4185_v28  ;;  %v4339_v17 = vmul.f32 %v5688_v6, %v8040_v14  ;;  %v8050_v6 = vld [vmem:[#allocation15_spill] sm:$0xff] }
 0x582   :  { %4400 = vst [vmem:[#allocation7 + $0xa0] sm:$0xff] %v4336_v49 }
 0x583   :  { %4403 = vst [vmem:[#allocation7 + $0xb8] sm:$0xff] %v4339_v17 }
 0x584   :  { %v5690_v55 = vpop.eup %5689  ;;  %v4181_v58 = vpop.xlane.xlu0 %4180 }
 0x585   :  { %v5692_v48 = vpop.eup %5691  ;;  %v4337_v23 = vmul.f32 %v5690_v55, %v8041_v45  ;;  %5701 = vrcp.f32 %v4181_v58 }
 0x586   :  { %v4342_v8 = vmul.f32 %v5692_v48, %v8042_v1  ;;  %v4187_v36 = vpop.xlane.xlu1 %4186  ;;  %v8051_v48 = vld [vmem:[#allocation16_spill] sm:$0xff] }
 0x587   :  { %4401 = vst [vmem:[#allocation7 + $0xa8] sm:$0xff] %v4337_v23  ;;  %5703 = vrcp.f32 %v4187_v36  ;;  %v5694_v42 = vpop.eup %5693  ;;  %v8052_v23 = vld [vmem:[#allocation39_spill] sm:$0xff] }
 0x588   :  { %4406 = vst [vmem:[#allocation7 + $0xd0] sm:$0xff] %v4342_v8  ;;  %v5696_v5 = vpop.eup %5695  ;;  %v4340_v61 = vmul.f32 %v5694_v42, %v8043_v29 }
 0x589   :  { %v4343_v43 = vmul.f32 %v5696_v5, %v8044_v35 }
 0x58a   :  { %v4183_v53 = vpop.xlane.xlu1 %4182  ;;  %4404 = vst [vmem:[#allocation7 + $0xc0] sm:$0xff] %v4340_v61  ;;  %v8053_v61 = vld [vmem:[#allocation40_spill] sm:$0xff] }
 0x58b   :  { %5705 = vrcp.f32 %v4183_v53  ;;  %4407 = vst [vmem:[#allocation7 + $0xd8] sm:$0xff] %v4343_v43 }
 0x58c   :  { %v5698_v31 = vpop.eup %5697 }
 0x58d   :  { %v4341_v47 = vmul.f32 %v5698_v31, %v8045_v18  ;;  %v4193_v22 = vpop.xlane.xlu0 %4192 }
 0x58e   :  { %v5700_v46 = vpop.eup %5699  ;;  %5707 = vrcp.f32 %v4193_v22 }
 0x58f   :  { %4405 = vst [vmem:[#allocation7 + $0xc8] sm:$0xff] %v4341_v47  ;;  %v4346_v0 = vmul.f32 %v5700_v46, %v8046_v13  ;;  %v8054_v47 = vld [vmem:[#allocation41_spill] sm:$0xff]  ;;  %v8055_v46 = vld [vmem:[#allocation42_spill] sm:$0xff] }
 0x591   :  { %4410 = vst [vmem:[#allocation7 + $0xf0] sm:$0xff] %v4346_v0  ;;  %v4189_v26 = vpop.xlane.xlu0 %4188 }
 0x592   :  { %v5702_v41 = vpop.eup %5701  ;;  %5709 = vrcp.f32 %v4189_v26  ;;  %v4195_v59 = vpop.xlane.xlu1 %4194 }
 0x593   :  { %v4344_v33 = vmul.f32 %v5702_v41, %v8047_v32  ;;  %5711 = vrcp.f32 %v4195_v59  ;;  %v8056_v59 = vld [vmem:[#allocation17_spill] sm:$0xff] }
 0x594   :  { %v5704_v57 = vpop.eup %5703 }
 0x595   :  { %4408 = vst [vmem:[#allocation7 + $0xe0] sm:$0xff] %v4344_v33  ;;  %v4347_v38 = vmul.f32 %v5704_v57, %v8048_v7  ;;  %v8057_v33 = vld [vmem:[#allocation18_spill] sm:$0xff] }
 0x596   :  { %v4191_v56 = vpop.xlane.xlu1 %4190  ;;  %v4201_v10 = vpop.xlane.xlu0 %4200 }
 0x597   :  { %4411 = vst [vmem:[#allocation7 + $0xf8] sm:$0xff] %v4347_v38  ;;  %5713 = vrcp.f32 %v4191_v56 }
 0x598   :  { %v5706_v21 = vpop.eup %5705  ;;  %5715 = vrcp.f32 %v4201_v10 }
 0x599   :  { %v4345_v12 = vmul.f32 %v5706_v21, %v8049_v24 }
 0x59a   :  { %v4197_v15 = vpop.xlane.xlu0 %4196  ;;  %v4203_v50 = vpop.xlane.xlu1 %4202 }
 0x59b   :  { %v5708_v28 = vpop.eup %5707  ;;  %4409 = vst [vmem:[#allocation7 + $0xe8] sm:$0xff] %v4345_v12  ;;  %5717 = vrcp.f32 %v4197_v15 }
 0x59c   :  { %v4350_v49 = vmul.f32 %v5708_v28, %v8050_v6  ;;  %5719 = vrcp.f32 %v4203_v50  ;;  %v8058_v6 = vld [vmem:[#allocation24_spill] sm:$0xff] }
 0x59e   :  { %4414 = vst [vmem:[#allocation7 + $0x110] sm:$0xff] %v4350_v49  ;;  %v4199_v14 = vpop.xlane.xlu1 %4198  ;;  %v4209_v17 = vpop.xlane.xlu0 %4208 }
 0x59f   :  { %v5710_v55 = vpop.eup %5709  ;;  %5721 = vrcp.f32 %v4199_v14  ;;  %v8059_v14 = vld [vmem:[#allocation25_spill] sm:$0xff] }
 0x5a0   :  { %v5712_v58 = vpop.eup %5711  ;;  %v4348_v45 = vmul.f32 %v5710_v55, %v8051_v48  ;;  %5723 = vrcp.f32 %v4209_v17 }
 0x5a1   :  { %v4351_v1 = vmul.f32 %v5712_v58, %v8052_v23 }
 0x5a2   :  { %4412 = vst [vmem:[#allocation7 + $0x100] sm:$0xff] %v4348_v45  ;;  %v4205_v8 = vpop.xlane.xlu0 %4204  ;;  %v4211_v36 = vpop.xlane.xlu1 %4210 }
 0x5a3   :  { %4415 = vst [vmem:[#allocation7 + $0x118] sm:$0xff] %v4351_v1  ;;  %5725 = vrcp.f32 %v4205_v8 }
 0x5a4   :  { %v5714_v42 = vpop.eup %5713  ;;  %5727 = vrcp.f32 %v4211_v36 }
 0x5a5   :  { %v5716_v5 = vpop.eup %5715  ;;  %v4349_v29 = vmul.f32 %v5714_v42, %v7540_v39 }
 0x5a6   :  { %v4354_v35 = vmul.f32 %v5716_v5, %v8053_v61  ;;  %v4207_v43 = vpop.xlane.xlu1 %4206  ;;  %v4217_v53 = vpop.xlane.xlu0 %4216 }
 0x5a7   :  { %4413 = vst [vmem:[#allocation7 + $0x108] sm:$0xff] %v4349_v29  ;;  %5729 = vrcp.f32 %v4207_v43 }
 0x5a8   :  { %v5718_v31 = vpop.eup %5717  ;;  %4418 = vst [vmem:[#allocation7 + $0x130] sm:$0xff] %v4354_v35  ;;  %5731 = vrcp.f32 %v4217_v53 }
 0x5a9   :  { %v5720_v18 = vpop.eup %5719  ;;  %v4352_v22 = vmul.f32 %v5718_v31, %v8054_v47 }
 0x5aa   :  { %v4355_v13 = vmul.f32 %v5720_v18, %v8055_v46  ;;  %v4213_v0 = vpop.xlane.xlu0 %4212 }
 0x5ab   :  { %4416 = vst [vmem:[#allocation7 + $0x120] sm:$0xff] %v4352_v22  ;;  %5733 = vrcp.f32 %v4213_v0  ;;  %v4219_v26 = vpop.xlane.xlu1 %4218 }
 0x5ac   :  { %v5722_v41 = vpop.eup %5721  ;;  %4419 = vst [vmem:[#allocation7 + $0x138] sm:$0xff] %v4355_v13  ;;  %5735 = vrcp.f32 %v4219_v26 }
 0x5ad   :  { %v5724_v39 = vpop.eup %5723  ;;  %v4353_v32 = vmul.f32 %v5722_v41, %v8056_v59 }
 0x5ae   :  { %v4358_v57 = vmul.f32 %v5724_v39, %v8057_v33 }
 0x5af   :  { %4417 = vst [vmem:[#allocation7 + $0x128] sm:$0xff] %v4353_v32  ;;  %v4215_v7 = vpop.xlane.xlu1 %4214 }
 0x5b0   :  { %v5726_v38 = vpop.eup %5725  ;;  %4422 = vst [vmem:[#allocation7 + $0x150] sm:$0xff] %v4358_v57  ;;  %5737 = vrcp.f32 %v4215_v7  ;;  %v4225_v56 = vpop.xlane.xlu0 %4224 }
 0x5b1   :  { %v5728_v10 = vpop.eup %5727  ;;  %v4356_v21 = vmul.f32 %v5726_v38, %v7634_v52  ;;  %5739 = vrcp.f32 %v4225_v56 }
 0x5b2   :  { %v4359_v24 = vmul.f32 %v5728_v10, %v7637_v2 }
 0x5b3   :  { %4420 = vst [vmem:[#allocation7 + $0x140] sm:$0xff] %v4356_v21  ;;  %v4227_v50 = vpop.xlane.xlu1 %4226 }
 0x5b4   :  { %v5730_v12 = vpop.eup %5729  ;;  %4423 = vst [vmem:[#allocation7 + $0x158] sm:$0xff] %v4359_v24  ;;  %v4221_v15 = vpop.xlane.xlu0 %4220 }
 0x5b5   :  { %v5732_v28 = vpop.eup %5731  ;;  %v4357_v49 = vmul.f32 %v5730_v12, %v8058_v6  ;;  %5741 = vrcp.f32 %v4221_v15 }
 0x5b6   :  { %v4362_v17 = vmul.f32 %v5732_v28, %v8059_v14  ;;  %5743 = vrcp.f32 %v4227_v50 }
 0x5b7   :  { %4421 = vst [vmem:[#allocation7 + $0x148] sm:$0xff] %v4357_v49  ;;  %v4223_v58 = vpop.xlane.xlu1 %4222 }
 0x5b8   :  { %v5734_v55 = vpop.eup %5733  ;;  %4426 = vst [vmem:[#allocation7 + $0x170] sm:$0xff] %v4362_v17  ;;  %v4233_v52 = vpop.xlane.xlu0 %4232  ;;  %5745 = vrcp.f32 %v4223_v58 }
 0x5b9   :  { %v5736_v48 = vpop.eup %5735  ;;  %v4360_v2 = vmul.f32 %v5734_v55, %v7686_v27  ;;  %5747 = vrcp.f32 %v4233_v52 }
 0x5ba   :  { %v4363_v45 = vmul.f32 %v5736_v48, %v7694_v34 }
 0x5bb   :  { %4424 = vst [vmem:[#allocation7 + $0x160] sm:$0xff] %v4360_v2  ;;  %v4235_v1 = vpop.xlane.xlu1 %4234 }
 0x5bc   :  { %4427 = vst [vmem:[#allocation7 + $0x178] sm:$0xff] %v4363_v45  ;;  %v4229_v23 = vpop.xlane.xlu0 %4228 }
 0x5bd   :  { %v5738_v8 = vpop.eup %5737  ;;  %5749 = vrcp.f32 %v4229_v23 }
 0x5be   :  { %v5740_v36 = vpop.eup %5739  ;;  %v4361_v42 = vmul.f32 %v5738_v8, %v7719_v62  ;;  %5751 = vrcp.f32 %v4235_v1 }
 0x5bf   :  { %v4366_v5 = vmul.f32 %v5740_v36, %v7727_v16  ;;  %v4231_v29 = vpop.xlane.xlu1 %4230 }
 0x5c0   :  { %4425 = vst [vmem:[#allocation7 + $0x168] sm:$0xff] %v4361_v42  ;;  %v4241_v61 = vpop.xlane.xlu0 %4240  ;;  %5753 = vrcp.f32 %v4231_v29 }
 0x5c1   :  { %4430 = vst [vmem:[#allocation7 + $0x190] sm:$0xff] %v4366_v5  ;;  %5755 = vrcp.f32 %v4241_v61 }
 0x5c2   :  { %v5742_v27 = vpop.eup %5741 }
 0x5c3   :  { %v5744_v34 = vpop.eup %5743  ;;  %v4364_v35 = vmul.f32 %v5742_v27, %v7743_v54  ;;  %v4243_v31 = vpop.xlane.xlu1 %4242 }
 0x5c4   :  { %v4367_v43 = vmul.f32 %v5744_v34, %v7748_v60  ;;  %v4237_v53 = vpop.xlane.xlu0 %4236 }
 0x5c5   :  { %4428 = vst [vmem:[#allocation7 + $0x180] sm:$0xff] %v4364_v35  ;;  %5757 = vrcp.f32 %v4237_v53  ;;  %v5746_v62 = vpop.eup %5745 }
 0x5c6   :  { %4431 = vst [vmem:[#allocation7 + $0x198] sm:$0xff] %v4367_v43  ;;  %5759 = vrcp.f32 %v4243_v31  ;;  %v5748_v16 = vpop.eup %5747  ;;  %v4365_v18 = vmul.f32 %v5746_v62, %v7765_v25 }
 0x5c7   :  { %v4370_v47 = vmul.f32 %v5748_v16, %v7757_v20  ;;  %v4239_v22 = vpop.xlane.xlu1 %4238 }
 0x5c8   :  { %v4245_v46 = vpop.xlane.xlu0 %4244  ;;  %4429 = vst [vmem:[#allocation7 + $0x188] sm:$0xff] %v4365_v18  ;;  %5761 = vrcp.f32 %v4239_v22 }
 0x5c9   :  { %4434 = vst [vmem:[#allocation7 + $0x1b0] sm:$0xff] %v4370_v47  ;;  %5763 = vrcp.f32 %v4245_v46 }
 0x5ca   :  { %v5750_v13 = vpop.eup %5749 }
 0x5cb   :  { %v5752_v54 = vpop.eup %5751  ;;  %v4368_v60 = vmul.f32 %v5750_v13, %v7777_v19  ;;  %v4247_v41 = vpop.xlane.xlu1 %4246 }
 0x5cc   :  { %v4371_v0 = vmul.f32 %v5752_v54, %v7772_v44  ;;  %v4249_v26 = vpop.xlane.xlu0 %4248 }
 0x5cd   :  { %4432 = vst [vmem:[#allocation7 + $0x1a0] sm:$0xff] %v4368_v60  ;;  %5765 = vrcp.f32 %v4249_v26  ;;  %v5754_v39 = vpop.eup %5753 }
 0x5ce   :  { %4435 = vst [vmem:[#allocation7 + $0x1b8] sm:$0xff] %v4371_v0  ;;  %5767 = vrcp.f32 %v4247_v41  ;;  %v5756_v20 = vpop.eup %5755  ;;  %v4369_v25 = vmul.f32 %v5754_v39, %v7786_v11 }
 0x5cf   :  { %v4374_v59 = vmul.f32 %v5756_v20, %v7782_v9  ;;  %v4251_v32 = vpop.xlane.xlu1 %4250 }
 0x5d0   :  { %4433 = vst [vmem:[#allocation7 + $0x1a8] sm:$0xff] %v4369_v25  ;;  %5769 = vrcp.f32 %v4251_v32 }
 0x5d1   :  { %4438 = vst [vmem:[#allocation7 + $0x1d0] sm:$0xff] %v4374_v59 }
 0x5d2   :  { %v5758_v33 = vpop.eup %5757 }
 0x5d3   :  { %v5760_v19 = vpop.eup %5759  ;;  %v4372_v44 = vmul.f32 %v5758_v33, %v7797_v3 }
 0x5d4   :  { %v4375_v57 = vmul.f32 %v5760_v19, %v7792_v40 }
 0x5d5   :  { %4436 = vst [vmem:[#allocation7 + $0x1c0] sm:$0xff] %v4372_v44  ;;  %v5762_v7 = vpop.eup %5761 }
 0x5d6   :  { %4439 = vst [vmem:[#allocation7 + $0x1d8] sm:$0xff] %v4375_v57  ;;  %v5764_v38 = vpop.eup %5763  ;;  %v4373_v56 = vmul.f32 %v5762_v7, %v7806_v63 }
 0x5d7   :  { %v4376_v11 = vmul.f32 %v5764_v38, %v7802_v37 }
 0x5d8   :  { %4437 = vst [vmem:[#allocation7 + $0x1c8] sm:$0xff] %v4373_v56 }
 0x5d9   :  { %4440 = vst [vmem:[#allocation7 + $0x1e0] sm:$0xff] %v4376_v11 }
 0x5da   :  { %v5766_v9 = vpop.eup %5765 }
 0x5db   :  { %v5768_v10 = vpop.eup %5767  ;;  %v4378_v21 = vmul.f32 %v5766_v9, %v7814_v51 }
 0x5dc   :  { %v4377_v24 = vmul.f32 %v5768_v10, %v7811_v4 }
 0x5dd   :  { %4442 = vst [vmem:[#allocation7 + $0x1f0] sm:$0xff] %v4378_v21  ;;  %v5770_v40 = vpop.eup %5769 }
 0x5de   :  { %4441 = vst [vmem:[#allocation7 + $0x1e8] sm:$0xff] %v4377_v24  ;;  %v4379_v3 = vmul.f32 %v5770_v40, %v7820_v30 }
 0x5e0   :  { %4443 = vst [vmem:[#allocation7 + $0x1f8] sm:$0xff] %v4379_v3 }
 0x5e1   :  { %5844 = shalt.err (!%p5841_p5)
}
 0x5e2   :  { %4455 = dma.vmem_to_hbm [thread:$0]  %s4450_s28, 8192, %s7939_s15, [#allocation4], %s5866_s8, %s5866_s8, %s5867_s25  }
 0x5e3   :  { %5857 = dma.done.wait [#allocation4], 8192  }
 0x5e4   :  { %5858 = vsyncadd [#allocation4], 4294959104 }
 0x5e5   :  { %5859 = dma.done.wait [#allocation9], 8192  }
 0x5e6   :  { %5860 = vsyncadd [#allocation9], 4294959104 }
 0x5e7   :  { %4474 = vsyncpa [#allocation3], 1 }
 0x5e8   :  { %4475 = vsyncpa [#allocation6], 1 }
 0x5e9   :  { %4476 = vsyncpa [#allocation4], 1 }
 0x5ea   :  { %4477 = vsyncpa [#allocation9], 1 }

// kernel: tpu_custom_call.1
= control target key start
LH: loop header
LB: loop body
LE: loop exit
PB: predicated region body
PF: predicated region fallthrough
CT: control target
= control target key end

     0   :  { %s7924_s0 = inlined_call_operand.vmem [shape: bf16[512,32], index: 0, kind: input, shape index: {}]   ;;  %s7925_s1 = inlined_call_operand.hbm [shape: bf16[32,128], index: 1, kind: input, shape index: {}]   ;;  %s7926_s2 = inlined_call_operand.vmem [shape: f32[1,128], index: 2, kind: input, shape index: {}]   ;;  %s7927_s3 = inlined_call_operand.vmem [shape: bf16[128,128], index: 3, kind: input, shape index: {}]   ;;  %s7928_s4 = inlined_call_operand.vmem [shape: f32[1,128], index: 4, kind: input, shape index: {}]   ;;  %s7929_s5 = inlined_call_operand.vmem [shape: bf16[128,128], index: 5, kind: input, shape index: {}]   ;;  %s7930_s6 = inlined_call_operand.vmem [shape: f32[1,128], index: 6, kind: input, shape index: {}]   ;;  %s7931_s7 = inlined_call_operand.vmem [shape: bf16[128,128], index: 7, kind: input, shape index: {}]   ;;  %s7932_s8 = inlined_call_operand.vmem [shape: f32[1,128], index: 8, kind: input, shape index: {}]   ;;  %s7933_s9 = inlined_call_operand.vmem [shape: bf16[128,128], index: 9, kind: input, shape index: {}]   ;;  %s7934_s10 = inlined_call_operand.vmem [shape: f32[1,128], index: 10, kind: input, shape index: {}]   ;;  %s7935_s11 = inlined_call_operand.vmem [shape: bf16[128,128], index: 11, kind: input, shape index: {}]   ;;  %s7936_s12 = inlined_call_operand.vmem [shape: f32[1,128], index: 12, kind: input, shape index: {}]   ;;  %s7937_s13 = inlined_call_operand.hbm [shape: bf16[128,128], index: 13, kind: input, shape index: {}]   ;;  %s7938_s14 = inlined_call_operand.vmem [shape: f32[1,128], index: 14, kind: input, shape index: {}]   ;;  %s7939_s15 = inlined_call_operand.hbm [shape: f32[512,128], index: 15, kind: output, shape index: {0}]   ;;  %s7940_s16 = inlined_call_operand.hbm [shape: f32[512,128], index: 16, kind: output, shape index: {1}]  }
   0x1   :  { %7966 = sst [smem:[#allocation43_spill]] %s7924_s0 }
   0x2   :  { %22 = vsyncpa [#allocation3], 0 }
   0x3   :  { %23 = vsyncpa [#allocation6], 0 }
   0x4   :  { %24 = vsyncpa [#allocation4], 0 }
   0x5   :  { %25 = vsyncpa [#allocation9], 0  ;;  %s5861_s21 = smov [#allocation2]  }
   0x6   :  { %s33_s22 = sshll.u32 %s5861_s21, 4  ;;  %s34_s22 = int_to_ptr.vmem [resolvable:$true] %s33_s22 }
   0x7   :  { %s5781_s23 = scalar_lea.vmem %s34_s22, 256  ;;  %p5786_p1 = scmp.lt.s32.totalorder %s34_s22, %s34_s22 }
   0x8   :  { %p5782_p0 = scmp.ne.s32.totalorder %s34_s22, %s5781_s23  ;;  %p5787_p2 = scmp.lt.s32.totalorder %s5781_s23, %s5781_s23 }
   0xa   :  { %p5788_p3 = por %p5787_p2, %p5786_p1 }
   0xc   :  { %p5789_p4 = pnand %p5788_p3, %p5782_p0 }
   0xe   :  { %5792 = shalt.err (!%p5789_p4)
}
   0xf   :  { %s5862_s24 = smov 64   ;;  %s5863_s25 = smov 4  }
  0x10   :  { %39 = dma.hbm_to_vmem [thread:$0]  %s7925_s1, 256, %s34_s22, [#allocation3], %s5862_s24, %s5862_s24, %s5863_s25  }
  0x11   :  { %s5864_s28 = smov [#allocation5]  }
  0x12   :  { %s67_s29 = sshll.u32 %s5864_s28, 4  ;;  %s68_s29 = int_to_ptr.vmem [resolvable:$true] %s67_s29 }
  0x13   :  { %s5801_s30 = scalar_lea.vmem %s68_s29, 1024  ;;  %p5806_p6 = scmp.lt.s32.totalorder %s68_s29, %s68_s29 }
  0x14   :  { %p5802_p5 = scmp.ne.s32.totalorder %s68_s29, %s5801_s30  ;;  %p5807_p7 = scmp.lt.s32.totalorder %s5801_s30, %s5801_s30 }
  0x16   :  { %p5808_p8 = por %p5807_p7, %p5806_p6 }
  0x18   :  { %p5809_p9 = pnand %p5808_p8, %p5802_p5 }
  0x1a   :  { %5812 = shalt.err (!%p5809_p9)
}
  0x1b   :  { %73 = dma.hbm_to_vmem [thread:$0]  %s7937_s13, 1024, %s68_s29, [#allocation6], %s5862_s24, %s5862_s24, %s5863_s25  }
  0x1c   :  { %5853 = dma.done.wait [#allocation3], 256  }
  0x1d   :  { %5854 = vsyncadd [#allocation3], 4294967040 }
  0x1e   :  { %5855 = dma.done.wait [#allocation6], 1024  }
  0x1f   :  { %5856 = vsyncadd [#allocation6], 4294966272  ;;  %v5433_v0 = vld [vmem:[#allocation2 + $0x8] sm:$0xff]   ;;  %v5434_v1 = vld [vmem:[#allocation2] sm:$0xff]   ;;  %vm330_vm0 = vcmask 261120   ;;  %s7967_s19 = sld [smem:[#allocation43_spill]] }
  0x20   :  { %4873 = vmatprep.subr.bf16.mxu0 %v5433_v0  ;;  %5421 = vmatprep.subr.bf16.mxu1 %v5433_v0  ;;  %v5467_v18 = vld [vmem:[%s7927_s3 + $0x38] sm:$0xff]   ;;  %v5468_v19 = vld [vmem:[%s7927_s3 + $0x30] sm:$0xff]   ;;  %v5469_v23 = vld [vmem:[%s7927_s3 + $0x28] sm:$0xff]  }
  0x21   :  { %4874 = vmatpush3.bf16.msra.mxu0 %v5433_v0  ;;  %5423 = vmatpush3.bf16.msra.mxu1 %v5433_v0  ;;  %v5470_v25 = vld [vmem:[%s7927_s3 + $0x20] sm:$0xff]   ;;  %v5471_v28 = vld [vmem:[%s7927_s3 + $0x18] sm:$0xff]   ;;  %v5472_v31 = vld [vmem:[%s7927_s3 + $0x10] sm:$0xff]  }
  0x22   :  { %4875 = vmatprep.subr.bf16.mxu0 %v5434_v1  ;;  %5422 = vmatprep.subr.bf16.mxu1 %v5434_v1  ;;  %v5473_v34 = vld [vmem:[%s7927_s3 + $0x8] sm:$0xff]   ;;  %v5474_v41 = vld [vmem:[%s7927_s3] sm:$0xff]   ;;  %v5475_v50 = vld [vmem:[%s7929_s5 + $0x38] sm:$0xff]  }
  0x23   :  { %v6115_v44 = vld [vmem:[%s7926_s2] ss:$0 sm:$0xff]  ;;  %v5476_v51 = vld [vmem:[%s7929_s5 + $0x30] sm:$0xff]   ;;  %v5477_v59 = vld [vmem:[%s7929_s5 + $0x28] sm:$0xff]  }
  0x25   :  { %v5435_v2 = vld [vmem:[%s7967_s19] sm:$0xff]   ;;  %v5436_v3 = vld [vmem:[%s7967_s19 + $0x8] sm:$0xff]   ;;  %4876 = vmatpush3.bf16.msra.mxu0 %v5434_v1  ;;  %v5437_v4 = vld [vmem:[%s7967_s19 + $0x10] sm:$0xff]   ;;  %5424 = vmatpush3.bf16.msra.mxu1 %v5434_v1 }
  0x26   :  { %4877 = vmatprep.mubr.msk.bf16.mxu0 %vm330_vm0, %v5435_v2  ;;  %v5438_v5 = vld [vmem:[%s7967_s19 + $0x18] sm:$0xff]   ;;  %v5439_v6 = vld [vmem:[%s7967_s19 + $0x20] sm:$0xff]   ;;  %v5452_v8 = vld [vmem:[%s7967_s19 + $0x88] sm:$0xff]   ;;  %4941 = vmatprep.subr.bf16.mxu1 %v5467_v18 }
  0x27   :  { %v5451_v7 = vld [vmem:[%s7967_s19 + $0x80] sm:$0xff]   ;;  %v5453_v9 = vld [vmem:[%s7967_s19 + $0x90] sm:$0xff]   ;;  %v5440_v10 = vld [vmem:[%s7967_s19 + $0x28] sm:$0xff]   ;;  %5021 = vmatprep.subr.bf16.mxu0 %v5475_v50 }
  0x28   :  { %4878 = vmatmul.mubr.msk.bf16.vlgmr.msra.gmra.mxu0 %vm330_vm0, %v5436_v3  ;;  %4909 = vmatprep.mubr.msk.bf16.mxu1 %vm330_vm0, %v5451_v7  ;;  %v5441_v11 = vld [vmem:[%s7967_s19 + $0x30] sm:$0xff]   ;;  %v5454_v12 = vld [vmem:[%s7967_s19 + $0x98] sm:$0xff]   ;;  %v5455_v13 = vld [vmem:[%s7967_s19 + $0xa0] sm:$0xff]  }
  0x29   :  { %4881 = vmatprep.mubr.msk.bf16.mxu0 %vm330_vm0, %v5437_v4  ;;  %4910 = vmatmul.mubr.msk.bf16.vlgmr.msra.gmra.mxu1 %vm330_vm0, %v5452_v8  ;;  %v5442_v14 = vld [vmem:[%s7967_s19 + $0x38] sm:$0xff]   ;;  %v5443_v15 = vld [vmem:[%s7967_s19 + $0x40] sm:$0xff]   ;;  %v5456_v16 = vld [vmem:[%s7967_s19 + $0xa8] sm:$0xff]  }
  0x2a   :  { %4913 = vmatprep.mubr.msk.bf16.mxu1 %vm330_vm0, %v5453_v9  ;;  %v5457_v17 = vld [vmem:[%s7967_s19 + $0xb0] sm:$0xff]   ;;  %v5444_v20 = vld [vmem:[%s7967_s19 + $0x48] sm:$0xff]   ;;  %4942 = vmatpush3.bf16.msra.mxu1 %v5467_v18  ;;  %v5458_v22 = vld [vmem:[%s7967_s19 + $0xb8] sm:$0xff]  }
  0x2b   :  { %v5445_v21 = vld [vmem:[%s7967_s19 + $0x50] sm:$0xff]   ;;  %4943 = vmatprep.subr.bf16.mxu1 %v5468_v19  ;;  %v5459_v24 = vld [vmem:[%s7967_s19 + $0xc0] sm:$0xff]   ;;  %v5446_v26 = vld [vmem:[%s7967_s19 + $0x58] sm:$0xff]   ;;  %5022 = vmatpush3.bf16.msra.mxu0 %v5475_v50 }
  0x2c   :  { %v5447_v27 = vld [vmem:[%s7967_s19 + $0x60] sm:$0xff]   ;;  %v5460_v29 = vld [vmem:[%s7967_s19 + $0xc8] sm:$0xff]   ;;  %v5461_v30 = vld [vmem:[%s7967_s19 + $0xd0] sm:$0xff]   ;;  %5023 = vmatprep.subr.bf16.mxu0 %v5476_v51 }
  0x2d   :  { %v5448_v32 = vld [vmem:[%s7967_s19 + $0x68] sm:$0xff]   ;;  %v5449_v33 = vld [vmem:[%s7967_s19 + $0x70] sm:$0xff]   ;;  %v5462_v35 = vld [vmem:[%s7967_s19 + $0xd8] sm:$0xff]  }
  0x2e   :  { %4944 = vmatpush3.bf16.msra.mxu1 %v5468_v19  ;;  %v5463_v36 = vld [vmem:[%s7967_s19 + $0xe0] sm:$0xff]   ;;  %v5450_v37 = vld [vmem:[%s7967_s19 + $0x78] sm:$0xff]   ;;  %v5464_v38 = vld [vmem:[%s7967_s19 + $0xe8] sm:$0xff]  }
  0x2f   :  { %4945 = vmatprep.subr.bf16.mxu1 %v5469_v23  ;;  %v5465_v39 = vld [vmem:[%s7967_s19 + $0xf0] sm:$0xff]   ;;  %v5466_v40 = vld [vmem:[%s7967_s19 + $0xf8] sm:$0xff]   ;;  %5024 = vmatpush3.bf16.msra.mxu0 %v5476_v51 }
  0x30   :  { %4882 = vmatmul.mubr.msk.bf16.gmra.mxu0 %vm330_vm0, %v5438_v5  ;;  %5025 = vmatprep.subr.bf16.mxu0 %v5477_v59  ;;  %v5478_v5 = vld [vmem:[%s7929_s5 + $0x20] sm:$0xff]  }
  0x31   :  { %4885 = vmatprep.mubr.msk.bf16.mxu0 %vm330_vm0, %v5439_v6  ;;  %4914 = vmatmul.mubr.msk.bf16.gmra.mxu1 %vm330_vm0, %v5454_v12 }
  0x32   :  { %4917 = vmatprep.mubr.msk.bf16.mxu1 %vm330_vm0, %v5455_v13  ;;  %4946 = vmatpush3.bf16.msra.mxu1 %v5469_v23 }
  0x33   :  { %4947 = vmatprep.subr.bf16.mxu1 %v5470_v25  ;;  %5026 = vmatpush3.bf16.msra.mxu0 %v5477_v59 }
  0x34   :  { %5027 = vmatprep.subr.bf16.mxu0 %v5478_v5 }
  0x36   :  { %4948 = vmatpush3.bf16.msra.mxu1 %v5470_v25  ;;  %v5480_v25 = vld [vmem:[%s7929_s5 + $0x10] sm:$0xff]  }
  0x37   :  { %4949 = vmatprep.subr.bf16.mxu1 %v5471_v28  ;;  %5028 = vmatpush3.bf16.msra.mxu0 %v5478_v5 }
  0x38   :  { %4886 = vmatmul.mubr.msk.bf16.gmra.mxu0 %vm330_vm0, %v5440_v10 }
  0x39   :  { %4889 = vmatprep.mubr.msk.bf16.mxu0 %vm330_vm0, %v5441_v11  ;;  %4918 = vmatmul.mubr.msk.bf16.gmra.mxu1 %vm330_vm0, %v5456_v16 }
  0x3a   :  { %4921 = vmatprep.mubr.msk.bf16.mxu1 %vm330_vm0, %v5457_v17  ;;  %4950 = vmatpush3.bf16.msra.mxu1 %v5471_v28 }
  0x3b   :  { %4951 = vmatprep.subr.bf16.mxu1 %v5472_v31 }
  0x3e   :  { %4952 = vmatpush3.bf16.msra.mxu1 %v5472_v31 }
  0x3f   :  { %4953 = vmatprep.subr.bf16.mxu1 %v5473_v34 }
  0x40   :  { %4890 = vmatmul.mubr.msk.bf16.gmra.mxu0 %vm330_vm0, %v5442_v14 }
  0x41   :  { %4893 = vmatprep.mubr.msk.bf16.mxu0 %vm330_vm0, %v5443_v15  ;;  %4922 = vmatmul.mubr.msk.bf16.gmra.mxu1 %vm330_vm0, %v5458_v22  ;;  %v5479_v15 = vld [vmem:[%s7929_s5 + $0x18] sm:$0xff]  }
  0x42   :  { %4925 = vmatprep.mubr.msk.bf16.mxu1 %vm330_vm0, %v5459_v24  ;;  %4954 = vmatpush3.bf16.msra.mxu1 %v5473_v34 }
  0x43   :  { %4955 = vmatprep.subr.bf16.mxu1 %v5474_v41  ;;  %5029 = vmatprep.subr.bf16.mxu0 %v5479_v15 }
  0x44   :  { %5030 = vmatpush3.bf16.msra.mxu0 %v5479_v15 }
  0x45   :  { %5031 = vmatprep.subr.bf16.mxu0 %v5480_v25 }
  0x46   :  { %4956 = vmatpush3.bf16.msra.mxu1 %v5474_v41 }
  0x48   :  { %4894 = vmatmul.mubr.msk.bf16.gmra.mxu0 %vm330_vm0, %v5444_v20 }
  0x49   :  { %4897 = vmatprep.mubr.msk.bf16.mxu0 %vm330_vm0, %v5445_v21  ;;  %4926 = vmatmul.mubr.msk.bf16.gmra.mxu1 %vm330_vm0, %v5460_v29 }
  0x4a   :  { %4929 = vmatprep.mubr.msk.bf16.mxu1 %vm330_vm0, %v5461_v30  ;;  %5032 = vmatpush3.bf16.msra.mxu0 %v5480_v25 }
  0x50   :  { %4898 = vmatmul.mubr.msk.bf16.gmra.mxu0 %vm330_vm0, %v5446_v26 }
  0x51   :  { %4901 = vmatprep.mubr.msk.bf16.mxu0 %vm330_vm0, %v5447_v27  ;;  %4930 = vmatmul.mubr.msk.bf16.gmra.mxu1 %vm330_vm0, %v5462_v35  ;;  %v5481_v35 = vld [vmem:[%s7929_s5 + $0x8] sm:$0xff]  }
  0x52   :  { %4933 = vmatprep.mubr.msk.bf16.mxu1 %vm330_vm0, %v5463_v36  ;;  %5033 = vmatprep.subr.bf16.mxu0 %v5481_v35 }
  0x53   :  { %5034 = vmatpush3.bf16.msra.mxu0 %v5481_v35 }
  0x58   :  { %4902 = vmatmul.mubr.msk.bf16.gmra.mxu0 %vm330_vm0, %v5448_v32 }
  0x59   :  { %4905 = vmatprep.mubr.msk.bf16.mxu0 %vm330_vm0, %v5449_v33  ;;  %4934 = vmatmul.mubr.msk.bf16.gmra.mxu1 %vm330_vm0, %v5464_v38 }
  0x5a   :  { %4937 = vmatprep.mubr.msk.bf16.mxu1 %vm330_vm0, %v5465_v39 }
  0x60   :  { %4906 = vmatmul.mubr.msk.bf16.gmra.mxu0 %vm330_vm0, %v5450_v37 }
  0x61   :  { %4938 = vmatmul.mubr.msk.bf16.gmra.mxu1 %vm330_vm0, %v5466_v40 }
  0xe8   :  { %v4879_v42 = vpop.f32.mrf.mxu0 }
  0xe9   :  { %v470_v48 = vadd.f32 %v4879_v42, %v6115_v44  ;;  %v6130_v61 = vpop.f32.mrf.mxu1 }
  0xea   :  { %v461_v43 = vpop.f32.mrf.mxu0 }
  0xeb   :  { %v462_v46 = vadd.f32 %v6115_v44, %v461_v43  ;;  %v718_v57 = vmax.f32 %v470_v48, 0.0  ;;  %v6134_v2 = vpop.f32.mrf.mxu1 }
  0xec   :  { %v4880_v45 = vpop.f32.mrf.mxu0 }
  0xed   :  { %v473_v47 = vadd.f32 %v4880_v45, %v6115_v44  ;;  %v716_v55 = vmax.f32 %v462_v46, 0.0  ;;  %v6141_v7 = vpop.f32.mrf.mxu1 }
  0xee   :  { %v464_v49 = vpop.f32.mrf.mxu0 }
  0xef   :  { %v465_v52 = vadd.f32 %v6115_v44, %v464_v49  ;;  %v719_v53 = vmax.f32 %v473_v47, 0.0  ;;  %v6143_v12 = vpop.f32.mrf.mxu1 }
  0xf0   :  { %v4883_v54 = vpop.f32.mrf.mxu0 }
  0xf1   :  { %v717_v56 = vmax.f32 %v465_v52, 0.0  ;;  %v798_v62 = vpack.c.bf16 %v719_v53, %v718_v57  ;;  %v486_v3 = vadd.f32 %v4883_v54, %v6115_v44  ;;  %v6148_v17 = vpop.f32.mrf.mxu1 }
  0xf2   :  { %v477_v58 = vpop.f32.mrf.mxu0 }
  0xf3   :  { %v797_v60 = vpack.c.bf16 %v717_v56, %v716_v55  ;;  %v478_v0 = vadd.f32 %v6115_v44, %v477_v58  ;;  %v722_v13 = vmax.f32 %v486_v3, 0.0  ;;  %v6152_v22 = vpop.f32.mrf.mxu1 }
  0xf4   :  { %v4884_v63 = vpop.f32.mrf.mxu0 }
  0xf5   :  { %v489_v1 = vadd.f32 %v4884_v63, %v6115_v44  ;;  %4957 = vmatprep.mubr.bf16.mxu1 %v797_v60  ;;  %v720_v10 = vmax.f32 %v478_v0, 0.0  ;;  %v6159_v27 = vpop.f32.mrf.mxu1 }
  0xf6   :  { %v480_v4 = vpop.f32.mrf.mxu0  ;;  %4958 = vmatmul.mubr.bf16.vlgmr.msra.gmra.mxu1 %v798_v62 }
  0xf7   :  { %v481_v6 = vadd.f32 %v6115_v44, %v480_v4  ;;  %v723_v8 = vmax.f32 %v489_v1, 0.0  ;;  %v6161_v32 = vpop.f32.mrf.mxu1 }
  0xf8   :  { %v4887_v9 = vpop.f32.mrf.mxu0 }
  0xf9   :  { %v721_v11 = vmax.f32 %v481_v6, 0.0  ;;  %v800_v18 = vpack.c.bf16 %v723_v8, %v722_v13  ;;  %v502_v23 = vadd.f32 %v4887_v9, %v6115_v44  ;;  %v6166_v37 = vpop.f32.mrf.mxu1 }
  0xfa   :  { %v493_v14 = vpop.f32.mrf.mxu0 }
  0xfb   :  { %v799_v16 = vpack.c.bf16 %v721_v11, %v720_v10  ;;  %v494_v20 = vadd.f32 %v6115_v44, %v493_v14  ;;  %v726_v33 = vmax.f32 %v502_v23, 0.0  ;;  %v6170_v42 = vpop.f32.mrf.mxu1 }
  0xfc   :  { %v4888_v19 = vpop.f32.mrf.mxu0 }
  0xfd   :  { %v505_v21 = vadd.f32 %v4888_v19, %v6115_v44  ;;  %4961 = vmatprep.mubr.bf16.mxu1 %v799_v16  ;;  %v724_v30 = vmax.f32 %v494_v20, 0.0  ;;  %v6174_v47 = vpop.f32.mrf.mxu1 }
  0xfe   :  { %v496_v24 = vpop.f32.mrf.mxu0  ;;  %4962 = vmatmul.mubr.bf16.gmra.mxu1 %v800_v18 }
  0xff   :  { %v497_v26 = vadd.f32 %v6115_v44, %v496_v24  ;;  %v727_v28 = vmax.f32 %v505_v21, 0.0  ;;  %v6176_v52 = vpop.f32.mrf.mxu1 }
 0x100   :  { %v4891_v29 = vpop.f32.mrf.mxu0 }
 0x101   :  { %v725_v31 = vmax.f32 %v497_v26, 0.0  ;;  %v802_v38 = vpack.c.bf16 %v727_v28, %v726_v33  ;;  %v518_v43 = vadd.f32 %v4891_v29, %v6115_v44  ;;  %v6178_v58 = vpop.f32.mrf.mxu1 }
 0x102   :  { %v509_v34 = vpop.f32.mrf.mxu0 }
 0x103   :  { %v801_v36 = vpack.c.bf16 %v725_v31, %v724_v30  ;;  %v510_v40 = vadd.f32 %v6115_v44, %v509_v34  ;;  %v730_v53 = vmax.f32 %v518_v43, 0.0  ;;  %v6184_v4 = vpop.f32.mrf.mxu1 }
 0x104   :  { %v4892_v39 = vpop.f32.mrf.mxu0 }
 0x105   :  { %v521_v41 = vadd.f32 %v4892_v39, %v6115_v44  ;;  %4965 = vmatprep.mubr.bf16.mxu1 %v801_v36  ;;  %v728_v50 = vmax.f32 %v510_v40, 0.0  ;;  %v6186_v14 = vpop.f32.mrf.mxu1 }
 0x106   :  { %v512_v45 = vpop.f32.mrf.mxu0  ;;  %4966 = vmatmul.mubr.bf16.gmra.mxu1 %v802_v38 }
 0x107   :  { %v513_v46 = vadd.f32 %v6115_v44, %v512_v45  ;;  %v731_v48 = vmax.f32 %v521_v41, 0.0  ;;  %v6192_v24 = vpop.f32.mrf.mxu1 }
 0x108   :  { %v4895_v49 = vpop.f32.mrf.mxu0 }
 0x109   :  { %v729_v51 = vmax.f32 %v513_v46, 0.0  ;;  %v804_v56 = vpack.c.bf16 %v731_v48, %v730_v53  ;;  %v534_v62 = vadd.f32 %v4895_v49, %v6115_v44  ;;  %v6194_v34 = vpop.f32.mrf.mxu1 }
 0x10a   :  { %v525_v54 = vpop.f32.mrf.mxu0 }
 0x10b   :  { %v803_v55 = vpack.c.bf16 %v729_v51, %v728_v50  ;;  %v526_v59 = vadd.f32 %v6115_v44, %v525_v54  ;;  %v734_v8 = vmax.f32 %v534_v62, 0.0  ;;  %v6200_v45 = vpop.f32.mrf.mxu1  ;;  %v590_v51 = vadd.f32 %v6115_v44, %v6134_v2 }
 0x10c   :  { %v4896_v57 = vpop.f32.mrf.mxu0  ;;  %v593_v54 = vadd.f32 %v6115_v44, %v6143_v12 }
 0x10d   :  { %v537_v60 = vadd.f32 %v4896_v57, %v6115_v44  ;;  %4969 = vmatprep.mubr.bf16.mxu1 %v803_v55  ;;  %v732_v5 = vmax.f32 %v526_v59, 0.0  ;;  %v6206_v57 = vpop.f32.mrf.mxu1 }
 0x10e   :  { %v528_v63 = vpop.f32.mrf.mxu0  ;;  %4970 = vmatmul.mubr.bf16.gmra.mxu1 %v804_v56 }
 0x10f   :  { %v529_v0 = vadd.f32 %v6115_v44, %v528_v63  ;;  %v735_v1 = vmax.f32 %v537_v60, 0.0 }
 0x110   :  { %v4899_v3 = vpop.f32.mrf.mxu0 }
 0x111   :  { %v733_v6 = vmax.f32 %v529_v0, 0.0  ;;  %v806_v11 = vpack.c.bf16 %v735_v1, %v734_v8  ;;  %v550_v18 = vadd.f32 %v4899_v3, %v6115_v44  ;;  %v748_v0 = vmax.f32 %v590_v51, 0.0 }
 0x112   :  { %v541_v9 = vpop.f32.mrf.mxu0  ;;  %v749_v1 = vmax.f32 %v593_v54, 0.0  ;;  %v649_v54 = vadd.f32 %v6186_v14, %v6115_v44  ;;  %v665_v14 = vadd.f32 %v6206_v57, %v6115_v44 }
 0x113   :  { %v805_v10 = vpack.c.bf16 %v733_v6, %v732_v5  ;;  %v542_v15 = vadd.f32 %v6115_v44, %v541_v9  ;;  %v738_v28 = vmax.f32 %v550_v18, 0.0  ;;  %v656_v5 = vpop.f32.mrf.mxu1  ;;  %v606_v9 = vadd.f32 %v6115_v44, %v6152_v22 }
 0x114   :  { %v4900_v13 = vpop.f32.mrf.mxu0  ;;  %v601_v18 = vadd.f32 %v6141_v7, %v6115_v44  ;;  %v614_v7 = vadd.f32 %v6148_v17, %v6115_v44  ;;  %v630_v17 = vadd.f32 %v6166_v37, %v6115_v44  ;;  %v654_v37 = vadd.f32 %v6115_v44, %v6200_v45 }
 0x115   :  { %v553_v16 = vadd.f32 %v4900_v13, %v6115_v44  ;;  %4973 = vmatprep.mubr.bf16.mxu1 %v805_v10  ;;  %v736_v25 = vmax.f32 %v542_v15, 0.0  ;;  %v609_v13 = vadd.f32 %v6115_v44, %v6161_v32  ;;  %v598_v15 = vadd.f32 %v6130_v61, %v6115_v44 }
 0x116   :  { %v544_v19 = vpop.f32.mrf.mxu0  ;;  %4974 = vmatmul.mubr.bf16.gmra.mxu1 %v806_v11  ;;  %v813_v11 = vpack.c.bf16 %v749_v1, %v748_v0  ;;  %v622_v32 = vadd.f32 %v6115_v44, %v6170_v42  ;;  %v625_v61 = vadd.f32 %v6115_v44, %v6176_v52  ;;  %v638_v42 = vadd.f32 %v6115_v44, %v6184_v4 }
 0x117   :  { %v545_v20 = vadd.f32 %v6115_v44, %v544_v19  ;;  %v739_v21 = vmax.f32 %v553_v16, 0.0  ;;  %v6220_v19 = vpop.f32.mrf.mxu1  ;;  %v750_v22 = vmax.f32 %v598_v15, 0.0  ;;  %v641_v52 = vadd.f32 %v6115_v44, %v6192_v24 }
 0x118   :  { %v4903_v23 = vpop.f32.mrf.mxu0 }
 0x119   :  { %v737_v26 = vmax.f32 %v545_v20, 0.0  ;;  %v808_v31 = vpack.c.bf16 %v739_v21, %v738_v28  ;;  %v566_v38 = vadd.f32 %v4903_v23, %v6115_v44  ;;  %v752_v20 = vmax.f32 %v606_v9, 0.0 }
 0x11a   :  { %v557_v29 = vpop.f32.mrf.mxu0  ;;  %v753_v21 = vmax.f32 %v609_v13, 0.0  ;;  %v751_v23 = vmax.f32 %v601_v18, 0.0  ;;  %v761_v4 = vmax.f32 %v641_v52, 0.0 }
 0x11b   :  { %v807_v30 = vpack.c.bf16 %v737_v26, %v736_v25  ;;  %v558_v35 = vadd.f32 %v6115_v44, %v557_v29  ;;  %v742_v49 = vmax.f32 %v566_v38, 0.0  ;;  %v669_v25 = vpop.f32.mrf.mxu1  ;;  %v617_v29 = vadd.f32 %v6159_v27, %v6115_v44 }
 0x11c   :  { %v4904_v33 = vpop.f32.mrf.mxu0  ;;  %v815_v26 = vpack.c.bf16 %v753_v21, %v752_v20  ;;  %v814_v28 = vpack.c.bf16 %v751_v23, %v750_v22  ;;  %v633_v27 = vadd.f32 %v6174_v47, %v6115_v44  ;;  %v657_v47 = vadd.f32 %v6115_v44, %v656_v5 }
 0x11d   :  { %v569_v36 = vadd.f32 %v4904_v33, %v6115_v44  ;;  %4977 = vmatprep.mubr.bf16.mxu1 %v807_v30  ;;  %v740_v46 = vmax.f32 %v558_v35, 0.0  ;;  %v4932_v30 = vpop.f32.mrf.mxu1  ;;  %v757_v33 = vmax.f32 %v625_v61, 0.0  ;;  %v754_v35 = vmax.f32 %v614_v7, 0.0 }
 0x11e   :  { %v560_v39 = vpop.f32.mrf.mxu0  ;;  %4978 = vmatmul.mubr.bf16.gmra.mxu1 %v808_v31  ;;  %v756_v31 = vmax.f32 %v622_v32, 0.0  ;;  %v670_v45 = vadd.f32 %v6115_v44, %v669_v25 }
 0x11f   :  { %v561_v40 = vadd.f32 %v6115_v44, %v560_v39  ;;  %v743_v41 = vmax.f32 %v569_v36, 0.0  ;;  %v755_v36 = vmax.f32 %v617_v29, 0.0  ;;  %v672_v38 = vpop.f32.mrf.mxu1 }
 0x120   :  { %v4907_v43 = vpop.f32.mrf.mxu0  ;;  %v817_v39 = vpack.c.bf16 %v757_v33, %v756_v31  ;;  %v768_v5 = vmax.f32 %v670_v45, 0.0 }
 0x121   :  { %v741_v48 = vmax.f32 %v561_v40, 0.0  ;;  %v810_v55 = vpack.c.bf16 %v743_v41, %v742_v49  ;;  %v582_v62 = vadd.f32 %v4907_v43, %v6115_v44  ;;  %v816_v40 = vpack.c.bf16 %v755_v36, %v754_v35  ;;  %v4935_v41 = vpop.f32.mrf.mxu1  ;;  %v5482_v43 = vld [vmem:[%s7929_s5] sm:$0xff]  }
 0x122   :  { %v573_v50 = vpop.f32.mrf.mxu0  ;;  %v759_v49 = vmax.f32 %v633_v27, 0.0  ;;  %5035 = vmatprep.subr.bf16.mxu0 %v5482_v43 }
 0x123   :  { %v809_v53 = vpack.c.bf16 %v741_v48, %v740_v46  ;;  %v574_v59 = vadd.f32 %v6115_v44, %v573_v50  ;;  %v746_v8 = vmax.f32 %v582_v62, 0.0  ;;  %v760_v46 = vmax.f32 %v638_v42, 0.0  ;;  %v685_v50 = vpop.f32.mrf.mxu1  ;;  %5036 = vmatpush3.bf16.msra.mxu0 %v5482_v43  ;;  %v6277_v43 = vld [vmem:[%s7928_s4] ss:$0 sm:$0xff] }
 0x124   :  { %v4908_v56 = vpop.f32.mrf.mxu0  ;;  %v758_v48 = vmax.f32 %v630_v17, 0.0  ;;  %v763_v62 = vmax.f32 %v649_v54, 0.0  ;;  %v5484_v17 = vld [vmem:[%s7931_s7 + $0x30] sm:$0xff]  }
 0x125   :  { %v585_v60 = vadd.f32 %v4908_v56, %v6115_v44  ;;  %4981 = vmatprep.mubr.bf16.mxu1 %v809_v53  ;;  %v744_v12 = vmax.f32 %v574_v59, 0.0  ;;  %v819_v24 = vpack.c.bf16 %v761_v4, %v760_v46  ;;  %v646_v53 = vadd.f32 %v6178_v58, %v6115_v44 }
 0x126   :  { %v576_v63 = vpop.f32.mrf.mxu0  ;;  %4982 = vmatmul.mubr.bf16.gmra.mxu1 %v810_v55  ;;  %v818_v51 = vpack.c.bf16 %v759_v49, %v758_v48  ;;  %v4936_v55 = vpop.f32.mrf.mxu1  ;;  %v764_v56 = vmax.f32 %v654_v37, 0.0  ;;  %v765_v59 = vmax.f32 %v657_v47, 0.0  ;;  %v662_v58 = vadd.f32 %v6194_v34, %v6115_v44  ;;  %v5486_v37 = vld [vmem:[%s7931_s7 + $0x20] sm:$0xff]  }
 0x127   :  { %v577_v2 = vadd.f32 %v6115_v44, %v576_v63  ;;  %v747_v3 = vmax.f32 %v585_v60, 0.0  ;;  %v762_v60 = vmax.f32 %v646_v53, 0.0  ;;  %v678_v34 = vadd.f32 %v6220_v19, %v6115_v44 }
 0x128   :  { %v688_v63 = vpop.f32.mrf.mxu1  ;;  %v821_v0 = vpack.c.bf16 %v765_v59, %v764_v56  ;;  %v697_v19 = vadd.f32 %v4936_v55, %v6115_v44 }
 0x129   :  { %v745_v6 = vmax.f32 %v577_v2, 0.0  ;;  %v812_v16 = vpack.c.bf16 %v747_v3, %v746_v8  ;;  %v673_v2 = vadd.f32 %v6115_v44, %v672_v38  ;;  %v820_v1 = vpack.c.bf16 %v763_v62, %v762_v60  ;;  %v5488_v60 = vld [vmem:[%s7931_s7 + $0x10] sm:$0xff]  }
 0x12a   :  { %v4939_v3 = vpop.f32.mrf.mxu1  ;;  %v767_v8 = vmax.f32 %v665_v14, 0.0  ;;  %v689_v13 = vadd.f32 %v6115_v44, %v688_v63  ;;  %v770_v21 = vmax.f32 %v678_v34, 0.0  ;;  %v775_v31 = vmax.f32 %v697_v19, 0.0  ;;  %v5489_v14 = vld [vmem:[%s7931_s7 + $0x8] sm:$0xff]  }
 0x12b   :  { %v811_v10 = vpack.c.bf16 %v745_v6, %v744_v12  ;;  %v769_v12 = vmax.f32 %v673_v2, 0.0  ;;  %v766_v6 = vmax.f32 %v662_v58, 0.0  ;;  %v710_v36 = vadd.f32 %v4939_v3, %v6115_v44 }
 0x12c   :  { %v701_v9 = vpop.f32.mrf.mxu1  ;;  %v773_v20 = vmax.f32 %v689_v13, 0.0 }
 0x12d   :  { %4985 = vmatprep.mubr.bf16.mxu1 %v811_v10  ;;  %v686_v10 = vadd.f32 %v6115_v44, %v685_v50  ;;  %v822_v15 = vpack.c.bf16 %v767_v8, %v766_v6  ;;  %v702_v25 = vadd.f32 %v6115_v44, %v701_v9  ;;  %v778_v42 = vmax.f32 %v710_v36, 0.0 }
 0x12e   :  { %4986 = vmatmul.mubr.bf16.gmra.mxu1 %v812_v16  ;;  %v681_v16 = vadd.f32 %v4932_v30, %v6115_v44  ;;  %v4940_v57 = vpop.f32.mrf.mxu1 }
 0x12f   :  { %4989 = vmatprep.mubr.bf16.mxu1 %v813_v11  ;;  %v823_v11 = vpack.c.bf16 %v769_v12, %v768_v5  ;;  %v772_v18 = vmax.f32 %v686_v10, 0.0  ;;  %v776_v7 = vmax.f32 %v702_v25, 0.0  ;;  %v713_v38 = vadd.f32 %v4940_v57, %v6115_v44 }
 0x130   :  { %v771_v22 = vmax.f32 %v681_v16, 0.0  ;;  %v704_v23 = vpop.f32.mrf.mxu1 }
 0x131   :  { %v825_v32 = vpack.c.bf16 %v773_v20, %v772_v18 }
 0x132   :  { %v824_v61 = vpack.c.bf16 %v771_v22, %v770_v21 }
 0x136   :  { %4990 = vmatmul.mubr.bf16.gmra.mxu1 %v814_v28  ;;  %v694_v28 = vadd.f32 %v4935_v41, %v6115_v44 }
 0x137   :  { %4993 = vmatprep.mubr.bf16.mxu1 %v815_v26  ;;  %v705_v26 = vadd.f32 %v6115_v44, %v704_v23  ;;  %v5485_v44 = vld [vmem:[%s7931_s7 + $0x28] sm:$0xff]  }
 0x138   :  { %v774_v30 = vmax.f32 %v694_v28, 0.0 }
 0x139   :  { %v777_v29 = vmax.f32 %v705_v26, 0.0 }
 0x13a   :  { %v826_v35 = vpack.c.bf16 %v775_v31, %v774_v30 }
 0x13b   :  { %v827_v33 = vpack.c.bf16 %v777_v29, %v776_v7 }
 0x13e   :  { %4994 = vmatmul.mubr.bf16.gmra.mxu1 %v816_v40  ;;  %v5483_v40 = vld [vmem:[%s7931_s7 + $0x38] sm:$0xff]  }
 0x13f   :  { %4997 = vmatprep.mubr.bf16.mxu1 %v817_v39  ;;  %v779_v39 = vmax.f32 %v713_v38, 0.0  ;;  %5101 = vmatprep.subr.bf16.mxu1 %v5483_v40 }
 0x140   :  { %5102 = vmatpush3.bf16.msra.mxu1 %v5483_v40 }
 0x141   :  { %v828_v52 = vpack.c.bf16 %v779_v39, %v778_v42  ;;  %5103 = vmatprep.subr.bf16.mxu1 %v5484_v17 }
 0x144   :  { %5104 = vmatpush3.bf16.msra.mxu1 %v5484_v17 }
 0x145   :  { %5105 = vmatprep.subr.bf16.mxu1 %v5485_v44 }
 0x146   :  { %4998 = vmatmul.mubr.bf16.gmra.mxu1 %v818_v51 }
 0x147   :  { %5001 = vmatprep.mubr.bf16.mxu1 %v819_v24  ;;  %v5487_v24 = vld [vmem:[%s7931_s7 + $0x18] sm:$0xff]  }
 0x148   :  { %5106 = vmatpush3.bf16.msra.mxu1 %v5485_v44 }
 0x149   :  { %5107 = vmatprep.subr.bf16.mxu1 %v5486_v37 }
 0x14c   :  { %5108 = vmatpush3.bf16.msra.mxu1 %v5486_v37 }
 0x14d   :  { %5109 = vmatprep.subr.bf16.mxu1 %v5487_v24 }
 0x14e   :  { %5002 = vmatmul.mubr.bf16.gmra.mxu1 %v820_v1 }
 0x14f   :  { %5005 = vmatprep.mubr.bf16.mxu1 %v821_v0 }
 0x150   :  { %5110 = vmatpush3.bf16.msra.mxu1 %v5487_v24 }
 0x151   :  { %5111 = vmatprep.subr.bf16.mxu1 %v5488_v60 }
 0x154   :  { %5112 = vmatpush3.bf16.msra.mxu1 %v5488_v60 }
 0x155   :  { %5113 = vmatprep.subr.bf16.mxu1 %v5489_v14 }
 0x156   :  { %5006 = vmatmul.mubr.bf16.gmra.mxu1 %v822_v15 }
 0x157   :  { %5009 = vmatprep.mubr.bf16.mxu1 %v823_v11  ;;  %v5490_v11 = vld [vmem:[%s7931_s7] sm:$0xff]  }
 0x158   :  { %5114 = vmatpush3.bf16.msra.mxu1 %v5489_v14 }
 0x159   :  { %5115 = vmatprep.subr.bf16.mxu1 %v5490_v11 }
 0x15c   :  { %5116 = vmatpush3.bf16.msra.mxu1 %v5490_v11 }
 0x15e   :  { %5010 = vmatmul.mubr.bf16.gmra.mxu1 %v824_v61 }
 0x15f   :  { %5013 = vmatprep.mubr.bf16.mxu1 %v825_v32 }
 0x166   :  { %5014 = vmatmul.mubr.bf16.gmra.mxu1 %v826_v35 }
 0x167   :  { %5017 = vmatprep.mubr.bf16.mxu1 %v827_v33 }
 0x16e   :  { %5018 = vmatmul.mubr.bf16.gmra.mxu1 %v828_v52 }
 0x1b6   :  { %v4959_v27 = vpop.f32.mrf.mxu1 }
 0x1b7   :  { %v926_v49 = vadd.f32 %v4959_v27, %v6277_v43 }
 0x1b8   :  { %v917_v41 = vpop.f32.mrf.mxu1 }
 0x1b9   :  { %v918_v4 = vadd.f32 %v6277_v43, %v917_v41  ;;  %v1174_v56 = vmax.f32 %v926_v49, 0.0 }
 0x1ba   :  { %v4960_v46 = vpop.f32.mrf.mxu1 }
 0x1bb   :  { %v929_v48 = vadd.f32 %v4960_v46, %v6277_v43  ;;  %v1172_v54 = vmax.f32 %v918_v4, 0.0 }
 0x1bc   :  { %v920_v50 = vpop.f32.mrf.mxu1 }
 0x1bd   :  { %v921_v47 = vadd.f32 %v6277_v43, %v920_v50  ;;  %v1175_v51 = vmax.f32 %v929_v48, 0.0 }
 0x1be   :  { %v4963_v53 = vpop.f32.mrf.mxu1 }
 0x1bf   :  { %v1173_v55 = vmax.f32 %v921_v47, 0.0  ;;  %v1254_v63 = vpack.c.bf16 %v1175_v51, %v1174_v56  ;;  %v942_v1 = vadd.f32 %v4963_v53, %v6277_v43 }
 0x1c0   :  { %v933_v59 = vpop.f32.mrf.mxu1 }
 0x1c1   :  { %v1253_v62 = vpack.c.bf16 %v1173_v55, %v1172_v54  ;;  %v934_v0 = vadd.f32 %v6277_v43, %v933_v59  ;;  %v1178_v9 = vmax.f32 %v942_v1, 0.0 }
 0x1c2   :  { %v4964_v45 = vpop.f32.mrf.mxu1 }
 0x1c3   :  { %v945_v2 = vadd.f32 %v4964_v45, %v6277_v43  ;;  %5037 = vmatprep.mubr.bf16.mxu0 %v1253_v62  ;;  %v1176_v6 = vmax.f32 %v934_v0, 0.0 }
 0x1c4   :  { %v936_v58 = vpop.f32.mrf.mxu1  ;;  %5038 = vmatmul.mubr.bf16.vlgmr.msra.gmra.mxu0 %v1254_v63 }
 0x1c5   :  { %v937_v3 = vadd.f32 %v6277_v43, %v936_v58  ;;  %v1179_v5 = vmax.f32 %v945_v2, 0.0 }
 0x1c6   :  { %v4967_v12 = vpop.f32.mrf.mxu1 }
 0x1c7   :  { %v1177_v8 = vmax.f32 %v937_v3, 0.0  ;;  %v1256_v15 = vpack.c.bf16 %v1179_v5, %v1178_v9  ;;  %v958_v18 = vadd.f32 %v4967_v12, %v6277_v43 }
 0x1c8   :  { %v949_v10 = vpop.f32.mrf.mxu1 }
 0x1c9   :  { %v1255_v13 = vpack.c.bf16 %v1177_v8, %v1176_v6  ;;  %v950_v16 = vadd.f32 %v6277_v43, %v949_v10  ;;  %v1182_v26 = vmax.f32 %v958_v18, 0.0 }
 0x1ca   :  { %v4968_v34 = vpop.f32.mrf.mxu1 }
 0x1cb   :  { %v961_v57 = vadd.f32 %v4968_v34, %v6277_v43  ;;  %5041 = vmatprep.mubr.bf16.mxu0 %v1255_v13  ;;  %v1180_v25 = vmax.f32 %v950_v16, 0.0 }
 0x1cc   :  { %v952_v20 = vpop.f32.mrf.mxu1  ;;  %5042 = vmatmul.mubr.bf16.gmra.mxu0 %v1256_v15 }
 0x1cd   :  { %v953_v21 = vadd.f32 %v6277_v43, %v952_v20  ;;  %v1183_v22 = vmax.f32 %v961_v57, 0.0 }
 0x1ce   :  { %v4971_v23 = vpop.f32.mrf.mxu1 }
 0x1cf   :  { %v1181_v32 = vmax.f32 %v953_v21, 0.0  ;;  %v1258_v19 = vpack.c.bf16 %v1183_v22, %v1182_v26  ;;  %v974_v31 = vadd.f32 %v4971_v23, %v6277_v43 }
 0x1d0   :  { %v965_v61 = vpop.f32.mrf.mxu1 }
 0x1d1   :  { %v1257_v28 = vpack.c.bf16 %v1181_v32, %v1180_v25  ;;  %v966_v29 = vadd.f32 %v6277_v43, %v965_v61  ;;  %v1186_v52 = vmax.f32 %v974_v31, 0.0 }
 0x1d2   :  { %v4972_v7 = vpop.f32.mrf.mxu1 }
 0x1d3   :  { %v977_v30 = vadd.f32 %v4972_v7, %v6277_v43  ;;  %5045 = vmatprep.mubr.bf16.mxu0 %v1257_v28  ;;  %v1184_v42 = vmax.f32 %v966_v29, 0.0 }
 0x1d4   :  { %v968_v33 = vpop.f32.mrf.mxu1  ;;  %5046 = vmatmul.mubr.bf16.gmra.mxu0 %v1258_v19 }
 0x1d5   :  { %v969_v35 = vadd.f32 %v6277_v43, %v968_v33  ;;  %v1187_v36 = vmax.f32 %v977_v30, 0.0 }
 0x1d6   :  { %v4975_v38 = vpop.f32.mrf.mxu1 }
 0x1d7   :  { %v1185_v39 = vmax.f32 %v969_v35, 0.0  ;;  %v1260_v44 = vpack.c.bf16 %v1187_v36, %v1186_v52  ;;  %v990_v4 = vadd.f32 %v4975_v38, %v6277_v43 }
 0x1d8   :  { %v981_v40 = vpop.f32.mrf.mxu1 }
 0x1d9   :  { %v1259_v17 = vpack.c.bf16 %v1185_v39, %v1184_v42  ;;  %v982_v41 = vadd.f32 %v6277_v43, %v981_v40  ;;  %v1190_v51 = vmax.f32 %v990_v4, 0.0 }
 0x1da   :  { %v4976_v27 = vpop.f32.mrf.mxu1 }
 0x1db   :  { %v993_v46 = vadd.f32 %v4976_v27, %v6277_v43  ;;  %5049 = vmatprep.mubr.bf16.mxu0 %v1259_v17  ;;  %v1188_v24 = vmax.f32 %v982_v41, 0.0 }
 0x1dc   :  { %v984_v48 = vpop.f32.mrf.mxu1  ;;  %5050 = vmatmul.mubr.bf16.gmra.mxu0 %v1260_v44 }
 0x1dd   :  { %v985_v49 = vadd.f32 %v6277_v43, %v984_v48  ;;  %v1191_v50 = vmax.f32 %v993_v46, 0.0 }
 0x1de   :  { %v4979_v37 = vpop.f32.mrf.mxu1 }
 0x1df   :  { %v1189_v47 = vmax.f32 %v985_v49, 0.0  ;;  %v1262_v55 = vpack.c.bf16 %v1191_v50, %v1190_v51  ;;  %v1006_v62 = vadd.f32 %v4979_v37, %v6277_v43 }
 0x1e0   :  { %v997_v53 = vpop.f32.mrf.mxu1 }
 0x1e1   :  { %v1261_v54 = vpack.c.bf16 %v1189_v47, %v1188_v24  ;;  %v998_v59 = vadd.f32 %v6277_v43, %v997_v53  ;;  %v1194_v14 = vmax.f32 %v1006_v62, 0.0 }
 0x1e2   :  { %v4980_v56 = vpop.f32.mrf.mxu1 }
 0x1e3   :  { %v1009_v60 = vadd.f32 %v4980_v56, %v6277_v43  ;;  %5053 = vmatprep.mubr.bf16.mxu0 %v1261_v54  ;;  %v1192_v1 = vmax.f32 %v998_v59, 0.0 }
 0x1e4   :  { %v1000_v63 = vpop.f32.mrf.mxu1  ;;  %5054 = vmatmul.mubr.bf16.gmra.mxu0 %v1262_v55 }
 0x1e5   :  { %v1001_v45 = vadd.f32 %v6277_v43, %v1000_v63  ;;  %v1195_v0 = vmax.f32 %v1009_v60, 0.0 }
 0x1e6   :  { %v4983_v2 = vpop.f32.mrf.mxu1 }
 0x1e7   :  { %v1193_v58 = vmax.f32 %v1001_v45, 0.0  ;;  %v1264_v12 = vpack.c.bf16 %v1195_v0, %v1194_v14  ;;  %v1022_v10 = vadd.f32 %v4983_v2, %v6277_v43 }
 0x1e8   :  { %v1013_v3 = vpop.f32.mrf.mxu1 }
 0x1e9   :  { %v1263_v5 = vpack.c.bf16 %v1193_v58, %v1192_v1  ;;  %v1014_v8 = vadd.f32 %v6277_v43, %v1013_v3  ;;  %v1198_v18 = vmax.f32 %v1022_v10, 0.0 }
 0x1ea   :  { %v4984_v6 = vpop.f32.mrf.mxu1 }
 0x1eb   :  { %v1025_v9 = vadd.f32 %v4984_v6, %v6277_v43  ;;  %5057 = vmatprep.mubr.bf16.mxu0 %v1263_v5  ;;  %v1196_v16 = vmax.f32 %v1014_v8, 0.0 }
 0x1ec   :  { %v1016_v11 = vpop.f32.mrf.mxu1  ;;  %5058 = vmatmul.mubr.bf16.gmra.mxu0 %v1264_v12 }
 0x1ed   :  { %v1017_v13 = vadd.f32 %v6277_v43, %v1016_v11  ;;  %v1199_v15 = vmax.f32 %v1025_v9, 0.0 }
 0x1ee   :  { %v4987_v34 = vpop.f32.mrf.mxu1 }
 0x1ef   :  { %v1197_v57 = vmax.f32 %v1017_v13, 0.0  ;;  %v1266_v22 = vpack.c.bf16 %v1199_v15, %v1198_v18  ;;  %v1038_v26 = vadd.f32 %v4987_v34, %v6277_v43 }
 0x1f0   :  { %v1029_v20 = vpop.f32.mrf.mxu1 }
 0x1f1   :  { %v1265_v21 = vpack.c.bf16 %v1197_v57, %v1196_v16  ;;  %v1030_v25 = vadd.f32 %v6277_v43, %v1029_v20  ;;  %v1202_v31 = vmax.f32 %v1038_v26, 0.0 }
 0x1f2   :  { %v4988_v23 = vpop.f32.mrf.mxu1 }
 0x1f3   :  { %v1041_v32 = vadd.f32 %v4988_v23, %v6277_v43  ;;  %5061 = vmatprep.mubr.bf16.mxu0 %v1265_v21  ;;  %v1200_v29 = vmax.f32 %v1030_v25, 0.0 }
 0x1f4   :  { %v1032_v61 = vpop.f32.mrf.mxu1  ;;  %5062 = vmatmul.mubr.bf16.gmra.mxu0 %v1266_v22 }
 0x1f5   :  { %v1033_v28 = vadd.f32 %v6277_v43, %v1032_v61  ;;  %v1203_v19 = vmax.f32 %v1041_v32, 0.0 }
 0x1f6   :  { %v4991_v7 = vpop.f32.mrf.mxu1 }
 0x1f7   :  { %v1201_v30 = vmax.f32 %v1033_v28, 0.0  ;;  %v1268_v36 = vpack.c.bf16 %v1203_v19, %v1202_v31  ;;  %v1054_v52 = vadd.f32 %v4991_v7, %v6277_v43 }
 0x1f8   :  { %v1045_v33 = vpop.f32.mrf.mxu1 }
 0x1f9   :  { %v1267_v35 = vpack.c.bf16 %v1201_v30, %v1200_v29  ;;  %v1046_v42 = vadd.f32 %v6277_v43, %v1045_v33  ;;  %v1206_v4 = vmax.f32 %v1054_v52, 0.0 }
 0x1fa   :  { %v4992_v38 = vpop.f32.mrf.mxu1 }
 0x1fb   :  { %v1057_v39 = vadd.f32 %v4992_v38, %v6277_v43  ;;  %5065 = vmatprep.mubr.bf16.mxu0 %v1267_v35  ;;  %v1204_v41 = vmax.f32 %v1046_v42, 0.0 }
 0x1fc   :  { %v1048_v40 = vpop.f32.mrf.mxu1  ;;  %5066 = vmatmul.mubr.bf16.gmra.mxu0 %v1268_v36 }
 0x1fd   :  { %v1049_v17 = vadd.f32 %v6277_v43, %v1048_v40  ;;  %v1207_v44 = vmax.f32 %v1057_v39, 0.0 }
 0x1fe   :  { %v4995_v27 = vpop.f32.mrf.mxu1 }
 0x1ff   :  { %v1205_v46 = vmax.f32 %v1049_v17, 0.0  ;;  %v1270_v50 = vpack.c.bf16 %v1207_v44, %v1206_v4  ;;  %v1070_v51 = vadd.f32 %v4995_v27, %v6277_v43 }
 0x200   :  { %v1061_v48 = vpop.f32.mrf.mxu1 }
 0x201   :  { %v1269_v49 = vpack.c.bf16 %v1205_v46, %v1204_v41  ;;  %v1062_v24 = vadd.f32 %v6277_v43, %v1061_v48  ;;  %v1210_v62 = vmax.f32 %v1070_v51, 0.0 }
 0x202   :  { %v4996_v37 = vpop.f32.mrf.mxu1 }
 0x203   :  { %v1073_v47 = vadd.f32 %v4996_v37, %v6277_v43  ;;  %5069 = vmatprep.mubr.bf16.mxu0 %v1269_v49  ;;  %v1208_v59 = vmax.f32 %v1062_v24, 0.0 }
 0x204   :  { %v1064_v53 = vpop.f32.mrf.mxu1  ;;  %5070 = vmatmul.mubr.bf16.gmra.mxu0 %v1270_v50 }
 0x205   :  { %v1065_v54 = vadd.f32 %v6277_v43, %v1064_v53  ;;  %v1211_v55 = vmax.f32 %v1073_v47, 0.0 }
 0x206   :  { %v4999_v56 = vpop.f32.mrf.mxu1 }
 0x207   :  { %v1209_v60 = vmax.f32 %v1065_v54, 0.0  ;;  %v1272_v0 = vpack.c.bf16 %v1211_v55, %v1210_v62  ;;  %v1086_v14 = vadd.f32 %v4999_v56, %v6277_v43 }
 0x208   :  { %v1077_v63 = vpop.f32.mrf.mxu1 }
 0x209   :  { %v1271_v45 = vpack.c.bf16 %v1209_v60, %v1208_v59  ;;  %v1078_v1 = vadd.f32 %v6277_v43, %v1077_v63  ;;  %v1214_v10 = vmax.f32 %v1086_v14, 0.0 }
 0x20a   :  { %v5000_v2 = vpop.f32.mrf.mxu1 }
 0x20b   :  { %v1089_v58 = vadd.f32 %v5000_v2, %v6277_v43  ;;  %5073 = vmatprep.mubr.bf16.mxu0 %v1271_v45  ;;  %v1212_v8 = vmax.f32 %v1078_v1, 0.0 }
 0x20c   :  { %v1080_v3 = vpop.f32.mrf.mxu1  ;;  %5074 = vmatmul.mubr.bf16.gmra.mxu0 %v1272_v0 }
 0x20d   :  { %v1081_v5 = vadd.f32 %v6277_v43, %v1080_v3  ;;  %v1215_v12 = vmax.f32 %v1089_v58, 0.0 }
 0x20e   :  { %v5003_v6 = vpop.f32.mrf.mxu1 }
 0x20f   :  { %v1213_v9 = vmax.f32 %v1081_v5, 0.0  ;;  %v1274_v15 = vpack.c.bf16 %v1215_v12, %v1214_v10  ;;  %v1102_v18 = vadd.f32 %v5003_v6, %v6277_v43 }
 0x210   :  { %v1093_v11 = vpop.f32.mrf.mxu1 }
 0x211   :  { %v1273_v13 = vpack.c.bf16 %v1213_v9, %v1212_v8  ;;  %v1094_v16 = vadd.f32 %v6277_v43, %v1093_v11  ;;  %v1218_v26 = vmax.f32 %v1102_v18, 0.0 }
 0x212   :  { %v5004_v34 = vpop.f32.mrf.mxu1 }
 0x213   :  { %v1105_v57 = vadd.f32 %v5004_v34, %v6277_v43  ;;  %5077 = vmatprep.mubr.bf16.mxu0 %v1273_v13  ;;  %v1216_v25 = vmax.f32 %v1094_v16, 0.0 }
 0x214   :  { %v1096_v20 = vpop.f32.mrf.mxu1  ;;  %5078 = vmatmul.mubr.bf16.gmra.mxu0 %v1274_v15 }
 0x215   :  { %v1097_v21 = vadd.f32 %v6277_v43, %v1096_v20  ;;  %v1219_v22 = vmax.f32 %v1105_v57, 0.0 }
 0x216   :  { %v5007_v23 = vpop.f32.mrf.mxu1 }
 0x217   :  { %v1217_v32 = vmax.f32 %v1097_v21, 0.0  ;;  %v1276_v19 = vpack.c.bf16 %v1219_v22, %v1218_v26  ;;  %v1118_v31 = vadd.f32 %v5007_v23, %v6277_v43  ;;  %v5491_v21 = vld [vmem:[%s7933_s9 + $0x38] sm:$0xff]   ;;  %v5492_v22 = vld [vmem:[%s7933_s9 + $0x30] sm:$0xff]   ;;  %v6370_v23 = vld [vmem:[%s7930_s6] ss:$0 sm:$0xff] }
 0x218   :  { %v1109_v61 = vpop.f32.mrf.mxu1  ;;  %5181 = vmatprep.subr.bf16.mxu0 %v5491_v21 }
 0x219   :  { %v1275_v28 = vpack.c.bf16 %v1217_v32, %v1216_v25  ;;  %v1110_v29 = vadd.f32 %v6277_v43, %v1109_v61  ;;  %v1222_v52 = vmax.f32 %v1118_v31, 0.0  ;;  %5182 = vmatpush3.bf16.msra.mxu0 %v5491_v21 }
 0x21a   :  { %v5008_v7 = vpop.f32.mrf.mxu1  ;;  %5183 = vmatprep.subr.bf16.mxu0 %v5492_v22 }
 0x21b   :  { %v1121_v30 = vadd.f32 %v5008_v7, %v6277_v43  ;;  %5081 = vmatprep.mubr.bf16.mxu0 %v1275_v28  ;;  %v1220_v42 = vmax.f32 %v1110_v29, 0.0 }
 0x21c   :  { %v1112_v33 = vpop.f32.mrf.mxu1  ;;  %5082 = vmatmul.mubr.bf16.gmra.mxu0 %v1276_v19 }
 0x21d   :  { %v1113_v35 = vadd.f32 %v6277_v43, %v1112_v33  ;;  %v1223_v36 = vmax.f32 %v1121_v30, 0.0  ;;  %5184 = vmatpush3.bf16.msra.mxu0 %v5492_v22  ;;  %v5494_v30 = vld [vmem:[%s7933_s9 + $0x20] sm:$0xff]  }
 0x21e   :  { %v5011_v38 = vpop.f32.mrf.mxu1 }
 0x21f   :  { %v1221_v39 = vmax.f32 %v1113_v35, 0.0  ;;  %v1278_v44 = vpack.c.bf16 %v1223_v36, %v1222_v52  ;;  %v1134_v4 = vadd.f32 %v5011_v38, %v6277_v43 }
 0x220   :  { %v1125_v40 = vpop.f32.mrf.mxu1 }
 0x221   :  { %v1277_v17 = vpack.c.bf16 %v1221_v39, %v1220_v42  ;;  %v1126_v41 = vadd.f32 %v6277_v43, %v1125_v40  ;;  %v1226_v51 = vmax.f32 %v1134_v4, 0.0 }
 0x222   :  { %v5012_v27 = vpop.f32.mrf.mxu1 }
 0x223   :  { %v1137_v46 = vadd.f32 %v5012_v27, %v6277_v43  ;;  %5085 = vmatprep.mubr.bf16.mxu0 %v1277_v17  ;;  %v1224_v24 = vmax.f32 %v1126_v41, 0.0 }
 0x224   :  { %v1128_v48 = vpop.f32.mrf.mxu1  ;;  %5086 = vmatmul.mubr.bf16.gmra.mxu0 %v1278_v44 }
 0x225   :  { %v1129_v49 = vadd.f32 %v6277_v43, %v1128_v48  ;;  %v1227_v50 = vmax.f32 %v1137_v46, 0.0 }
 0x226   :  { %v5015_v37 = vpop.f32.mrf.mxu1 }
 0x227   :  { %v1225_v47 = vmax.f32 %v1129_v49, 0.0  ;;  %v1280_v55 = vpack.c.bf16 %v1227_v50, %v1226_v51  ;;  %v1150_v62 = vadd.f32 %v5015_v37, %v6277_v43 }
 0x228   :  { %v1141_v53 = vpop.f32.mrf.mxu1 }
 0x229   :  { %v1279_v54 = vpack.c.bf16 %v1225_v47, %v1224_v24  ;;  %v1142_v59 = vadd.f32 %v6277_v43, %v1141_v53  ;;  %v1230_v14 = vmax.f32 %v1150_v62, 0.0 }
 0x22a   :  { %v5016_v56 = vpop.f32.mrf.mxu1 }
 0x22b   :  { %v1153_v60 = vadd.f32 %v5016_v56, %v6277_v43  ;;  %5089 = vmatprep.mubr.bf16.mxu0 %v1279_v54  ;;  %v1228_v1 = vmax.f32 %v1142_v59, 0.0 }
 0x22c   :  { %v1144_v63 = vpop.f32.mrf.mxu1  ;;  %5090 = vmatmul.mubr.bf16.gmra.mxu0 %v1280_v55 }
 0x22d   :  { %v1145_v45 = vadd.f32 %v6277_v43, %v1144_v63  ;;  %v1231_v0 = vmax.f32 %v1153_v60, 0.0 }
 0x22e   :  { %v5019_v2 = vpop.f32.mrf.mxu1 }
 0x22f   :  { %v1229_v58 = vmax.f32 %v1145_v45, 0.0  ;;  %v1282_v12 = vpack.c.bf16 %v1231_v0, %v1230_v14  ;;  %v1166_v10 = vadd.f32 %v5019_v2, %v6277_v43 }
 0x230   :  { %v1157_v3 = vpop.f32.mrf.mxu1 }
 0x231   :  { %v1281_v5 = vpack.c.bf16 %v1229_v58, %v1228_v1  ;;  %v1158_v8 = vadd.f32 %v6277_v43, %v1157_v3  ;;  %v1234_v57 = vmax.f32 %v1166_v10, 0.0  ;;  %v5495_v58 = vld [vmem:[%s7933_s9 + $0x18] sm:$0xff]  }
 0x232   :  { %v5020_v6 = vpop.f32.mrf.mxu1 }
 0x233   :  { %v1169_v9 = vadd.f32 %v5020_v6, %v6277_v43  ;;  %5093 = vmatprep.mubr.bf16.mxu0 %v1281_v5  ;;  %v1232_v34 = vmax.f32 %v1158_v8, 0.0 }
 0x234   :  { %v1160_v11 = vpop.f32.mrf.mxu1  ;;  %5094 = vmatmul.mubr.bf16.gmra.mxu0 %v1282_v12 }
 0x235   :  { %v1161_v13 = vadd.f32 %v6277_v43, %v1160_v11  ;;  %v1235_v15 = vmax.f32 %v1169_v9, 0.0  ;;  %v5493_v43 = vld [vmem:[%s7933_s9 + $0x28] sm:$0xff]  }
 0x236   :  { %5185 = vmatprep.subr.bf16.mxu0 %v5493_v43 }
 0x237   :  { %v1233_v16 = vmax.f32 %v1161_v13, 0.0  ;;  %v1284_v20 = vpack.c.bf16 %v1235_v15, %v1234_v57  ;;  %5186 = vmatpush3.bf16.msra.mxu0 %v5493_v43 }
 0x238   :  { %5187 = vmatprep.subr.bf16.mxu0 %v5494_v30 }
 0x239   :  { %v1283_v18 = vpack.c.bf16 %v1233_v16, %v1232_v34 }
 0x23b   :  { %5097 = vmatprep.mubr.bf16.mxu0 %v1283_v18  ;;  %5188 = vmatpush3.bf16.msra.mxu0 %v5494_v30 }
 0x23c   :  { %5098 = vmatmul.mubr.bf16.gmra.mxu0 %v1284_v20  ;;  %5189 = vmatprep.subr.bf16.mxu0 %v5495_v58 }
 0x23f   :  { %5190 = vmatpush3.bf16.msra.mxu0 %v5495_v58  ;;  %v5497_v58 = vld [vmem:[%s7933_s9 + $0x8] sm:$0xff]  }
 0x284   :  { %v5039_v25 = vpop.f32.mrf.mxu0 }
 0x285   :  { %v1382_v32 = vadd.f32 %v5039_v25, %v6370_v23 }
 0x286   :  { %v1373_v26 = vpop.f32.mrf.mxu0 }
 0x287   :  { %v1374_v61 = vadd.f32 %v6370_v23, %v1373_v26  ;;  %v2998_v28 = vmul.f32 %v1382_v32, %v1382_v32 }
 0x288   :  { %v5040_v19 = vpop.f32.mrf.mxu0 }
 0x289   :  { %v1385_v7 = vadd.f32 %v5040_v19, %v6370_v23  ;;  %3064 = vadd.xlane.f32.xlu1 %v2998_v28  ;;  %v2996_v29 = vmul.f32 %v1374_v61, %v1374_v61 }
 0x28a   :  { %v1376_v31 = vpop.f32.mrf.mxu0 }
 0x28b   :  { %v1377_v33 = vadd.f32 %v6370_v23, %v1376_v31  ;;  %3060 = vadd.xlane.f32.xlu0 %v2996_v29  ;;  %v2999_v35 = vmul.f32 %v1385_v7, %v1385_v7  ;;  %v6382_v52 = vpack.c.bf16 %v1385_v7, %v1382_v32  ;;  %v5496_v31 = vld [vmem:[%s7933_s9 + $0x10] sm:$0xff]  }
 0x28c   :  { %v5043_v36 = vpop.f32.mrf.mxu0  ;;  %5191 = vmatprep.subr.bf16.mxu0 %v5496_v31 }
 0x28d   :  { %v6379_v38 = vpack.c.bf16 %v1377_v33, %v1374_v61  ;;  %v1398_v42 = vadd.f32 %v5043_v36, %v6370_v23  ;;  %3066 = vadd.xlane.f32.xlu1 %v2999_v35  ;;  %v2997_v39 = vmul.f32 %v1377_v33, %v1377_v33  ;;  %5192 = vmatpush3.bf16.msra.mxu0 %v5496_v31 }
 0x28e   :  { %v1389_v40 = vpop.f32.mrf.mxu0  ;;  %5193 = vmatprep.subr.bf16.mxu0 %v5497_v58 }
 0x28f   :  { %3062 = vadd.xlane.f32.xlu0 %v2997_v39  ;;  %5117 = vmatprep.mubr.bf16.mxu1 %v6379_v38  ;;  %v1390_v44 = vadd.f32 %v6370_v23, %v1389_v40  ;;  %v3002_v41 = vmul.f32 %v1398_v42, %v1398_v42 }
 0x290   :  { %v5044_v17 = vpop.f32.mrf.mxu0  ;;  %5118 = vmatmul.mubr.bf16.vlgmr.msra.gmra.mxu1 %v6382_v52 }
 0x291   :  { %v1401_v27 = vadd.f32 %v5044_v17, %v6370_v23  ;;  %v3000_v24 = vmul.f32 %v1390_v44, %v1390_v44  ;;  %5194 = vmatpush3.bf16.msra.mxu0 %v5497_v58 }
 0x292   :  { %v1392_v46 = vpop.f32.mrf.mxu0 }
 0x293   :  { %v1393_v4 = vadd.f32 %v6370_v23, %v1392_v46  ;;  %3072 = vadd.xlane.f32.xlu0 %v3002_v41  ;;  %v3003_v48 = vmul.f32 %v1401_v27, %v1401_v27  ;;  %v6392_v47 = vpack.c.bf16 %v1401_v27, %v1398_v42 }
 0x294   :  { %v5047_v49 = vpop.f32.mrf.mxu0 }
 0x295   :  { %v6389_v50 = vpack.c.bf16 %v1393_v4, %v1390_v44  ;;  %v1414_v37 = vadd.f32 %v5047_v49, %v6370_v23  ;;  %3074 = vadd.xlane.f32.xlu1 %v3003_v48  ;;  %v3001_v53 = vmul.f32 %v1393_v4, %v1393_v4 }
 0x296   :  { %v1405_v51 = vpop.f32.mrf.mxu0 }
 0x297   :  { %3068 = vadd.xlane.f32.xlu0 %v3000_v24  ;;  %5121 = vmatprep.mubr.bf16.mxu1 %v6389_v50  ;;  %v1406_v55 = vadd.f32 %v6370_v23, %v1405_v51  ;;  %v3006_v59 = vmul.f32 %v1414_v37, %v1414_v37 }
 0x298   :  { %v5048_v54 = vpop.f32.mrf.mxu0  ;;  %5122 = vmatmul.mubr.bf16.gmra.mxu1 %v6392_v47 }
 0x299   :  { %v1417_v56 = vadd.f32 %v5048_v54, %v6370_v23  ;;  %3070 = vadd.xlane.f32.xlu1 %v3001_v53  ;;  %v3004_v1 = vmul.f32 %v1406_v55, %v1406_v55 }
 0x29a   :  { %v1408_v60 = vpop.f32.mrf.mxu0 }
 0x29b   :  { %v1409_v62 = vadd.f32 %v6370_v23, %v1408_v60  ;;  %3080 = vadd.xlane.f32.xlu0 %v3006_v59  ;;  %v3007_v63 = vmul.f32 %v1417_v56, %v1417_v56  ;;  %v6405_v14 = vpack.c.bf16 %v1417_v56, %v1414_v37 }
 0x29c   :  { %v5051_v45 = vpop.f32.mrf.mxu0 }
 0x29d   :  { %v6399_v0 = vpack.c.bf16 %v1409_v62, %v1406_v55  ;;  %v1430_v2 = vadd.f32 %v5051_v45, %v6370_v23  ;;  %3082 = vadd.xlane.f32.xlu1 %v3007_v63  ;;  %v3005_v5 = vmul.f32 %v1409_v62, %v1409_v62 }
 0x29e   :  { %v1421_v3 = vpop.f32.mrf.mxu0 }
 0x29f   :  { %3076 = vadd.xlane.f32.xlu0 %v3004_v1  ;;  %5125 = vmatprep.mubr.bf16.mxu1 %v6399_v0  ;;  %v1422_v6 = vadd.f32 %v6370_v23, %v1421_v3  ;;  %v3010_v9 = vmul.f32 %v1430_v2, %v1430_v2 }
 0x2a0   :  { %v5052_v12 = vpop.f32.mrf.mxu0  ;;  %5126 = vmatmul.mubr.bf16.gmra.mxu1 %v6405_v14 }
 0x2a1   :  { %v1433_v8 = vadd.f32 %v5052_v12, %v6370_v23  ;;  %3078 = vadd.xlane.f32.xlu1 %v3005_v5  ;;  %v3008_v57 = vmul.f32 %v1422_v6, %v1422_v6 }
 0x2a2   :  { %v1424_v10 = vpop.f32.mrf.mxu0 }
 0x2a3   :  { %v1425_v11 = vadd.f32 %v6370_v23, %v1424_v10  ;;  %3088 = vadd.xlane.f32.xlu0 %v3010_v9  ;;  %v3011_v13 = vmul.f32 %v1433_v8, %v1433_v8  ;;  %v6415_v18 = vpack.c.bf16 %v1433_v8, %v1430_v2 }
 0x2a4   :  { %v5055_v15 = vpop.f32.mrf.mxu0 }
 0x2a5   :  { %v6412_v34 = vpack.c.bf16 %v1425_v11, %v1422_v6  ;;  %v1446_v16 = vadd.f32 %v5055_v15, %v6370_v23  ;;  %3090 = vadd.xlane.f32.xlu1 %v3011_v13  ;;  %v3009_v21 = vmul.f32 %v1425_v11, %v1425_v11 }
 0x2a6   :  { %v1437_v20 = vpop.f32.mrf.mxu0 }
 0x2a7   :  { %3084 = vadd.xlane.f32.xlu0 %v3008_v57  ;;  %5129 = vmatprep.mubr.bf16.mxu1 %v6412_v34  ;;  %v1438_v43 = vadd.f32 %v6370_v23, %v1437_v20  ;;  %v3014_v32 = vmul.f32 %v1446_v16, %v1446_v16 }
 0x2a8   :  { %v5056_v22 = vpop.f32.mrf.mxu0  ;;  %5130 = vmatmul.mubr.bf16.gmra.mxu1 %v6415_v18 }
 0x2a9   :  { %v1449_v25 = vadd.f32 %v5056_v22, %v6370_v23  ;;  %3086 = vadd.xlane.f32.xlu1 %v3009_v21  ;;  %v3012_v30 = vmul.f32 %v1438_v43, %v1438_v43 }
 0x2aa   :  { %v1440_v26 = vpop.f32.mrf.mxu0 }
 0x2ab   :  { %v1441_v61 = vadd.f32 %v6370_v23, %v1440_v26  ;;  %3096 = vadd.xlane.f32.xlu0 %v3014_v32  ;;  %v3015_v28 = vmul.f32 %v1449_v25, %v1449_v25  ;;  %v6428_v33 = vpack.c.bf16 %v1449_v25, %v1446_v16 }
 0x2ac   :  { %v5059_v19 = vpop.f32.mrf.mxu0 }
 0x2ad   :  { %v6422_v7 = vpack.c.bf16 %v1441_v61, %v1438_v43  ;;  %v1462_v29 = vadd.f32 %v5059_v19, %v6370_v23  ;;  %3098 = vadd.xlane.f32.xlu1 %v3015_v28  ;;  %v3013_v36 = vmul.f32 %v1441_v61, %v1441_v61 }
 0x2ae   :  { %v1453_v35 = vpop.f32.mrf.mxu0 }
 0x2af   :  { %3092 = vadd.xlane.f32.xlu0 %v3012_v30  ;;  %5133 = vmatprep.mubr.bf16.mxu1 %v6422_v7  ;;  %v1454_v39 = vadd.f32 %v6370_v23, %v1453_v35  ;;  %v3018_v17 = vmul.f32 %v1462_v29, %v1462_v29 }
 0x2b0   :  { %v5060_v42 = vpop.f32.mrf.mxu0  ;;  %5134 = vmatmul.mubr.bf16.gmra.mxu1 %v6428_v33 }
 0x2b1   :  { %v1465_v40 = vadd.f32 %v5060_v42, %v6370_v23  ;;  %3094 = vadd.xlane.f32.xlu1 %v3013_v36  ;;  %v3016_v49 = vmul.f32 %v1454_v39, %v1454_v39 }
 0x2b2   :  { %v1456_v44 = vpop.f32.mrf.mxu0 }
 0x2b3   :  { %v1457_v27 = vadd.f32 %v6370_v23, %v1456_v44  ;;  %3104 = vadd.xlane.f32.xlu0 %v3018_v17  ;;  %v3019_v41 = vmul.f32 %v1465_v40, %v1465_v40  ;;  %v6438_v37 = vpack.c.bf16 %v1465_v40, %v1462_v29 }
 0x2b4   :  { %v5063_v46 = vpop.f32.mrf.mxu0 }
 0x2b5   :  { %v6435_v4 = vpack.c.bf16 %v1457_v27, %v1454_v39  ;;  %v1478_v48 = vadd.f32 %v5063_v46, %v6370_v23  ;;  %3106 = vadd.xlane.f32.xlu1 %v3019_v41  ;;  %v3017_v51 = vmul.f32 %v1457_v27, %v1457_v27  ;;  %v5498_v39 = vld [vmem:[%s7933_s9] sm:$0xff]  }
 0x2b6   :  { %v1469_v24 = vpop.f32.mrf.mxu0  ;;  %5195 = vmatprep.subr.bf16.mxu0 %v5498_v39 }
 0x2b7   :  { %3100 = vadd.xlane.f32.xlu0 %v3016_v49  ;;  %5137 = vmatprep.mubr.bf16.mxu1 %v6435_v4  ;;  %v1470_v54 = vadd.f32 %v6370_v23, %v1469_v24  ;;  %v3022_v56 = vmul.f32 %v1478_v48, %v1478_v48 }
 0x2b8   :  { %v5064_v53 = vpop.f32.mrf.mxu0  ;;  %5138 = vmatmul.mubr.bf16.gmra.mxu1 %v6438_v37  ;;  %5196 = vmatpush3.bf16.msra.mxu0 %v5498_v39 }
 0x2b9   :  { %v1481_v55 = vadd.f32 %v5064_v53, %v6370_v23  ;;  %3102 = vadd.xlane.f32.xlu1 %v3017_v51  ;;  %v3020_v1 = vmul.f32 %v1470_v54, %v1470_v54 }
 0x2ba   :  { %v1472_v59 = vpop.f32.mrf.mxu0 }
 0x2bb   :  { %v1473_v60 = vadd.f32 %v6370_v23, %v1472_v59  ;;  %3112 = vadd.xlane.f32.xlu0 %v3022_v56  ;;  %v3023_v62 = vmul.f32 %v1481_v55, %v1481_v55  ;;  %v6451_v3 = vpack.c.bf16 %v1481_v55, %v1478_v48 }
 0x2bc   :  { %v5067_v63 = vpop.f32.mrf.mxu0 }
 0x2bd   :  { %v6445_v45 = vpack.c.bf16 %v1473_v60, %v1470_v54  ;;  %v1494_v2 = vadd.f32 %v5067_v63, %v6370_v23  ;;  %3114 = vadd.xlane.f32.xlu1 %v3023_v62  ;;  %v3021_v12 = vmul.f32 %v1473_v60, %v1473_v60 }
 0x2be   :  { %v1485_v5 = vpop.f32.mrf.mxu0 }
 0x2bf   :  { %3108 = vadd.xlane.f32.xlu0 %v3020_v1  ;;  %5141 = vmatprep.mubr.bf16.mxu1 %v6445_v45  ;;  %v1486_v8 = vadd.f32 %v6370_v23, %v1485_v5  ;;  %v3026_v10 = vmul.f32 %v1494_v2, %v1494_v2 }
 0x2c0   :  { %v5068_v6 = vpop.f32.mrf.mxu0  ;;  %5142 = vmatmul.mubr.bf16.gmra.mxu1 %v6451_v3 }
 0x2c1   :  { %v1497_v9 = vadd.f32 %v5068_v6, %v6370_v23  ;;  %3110 = vadd.xlane.f32.xlu1 %v3021_v12  ;;  %v3024_v21 = vmul.f32 %v1486_v8, %v1486_v8 }
 0x2c2   :  { %v1488_v11 = vpop.f32.mrf.mxu0 }
 0x2c3   :  { %v1489_v13 = vadd.f32 %v6370_v23, %v1488_v11  ;;  %3120 = vadd.xlane.f32.xlu0 %v3026_v10  ;;  %v3027_v15 = vmul.f32 %v1497_v9, %v1497_v9  ;;  %v6461_v22 = vpack.c.bf16 %v1497_v9, %v1494_v2 }
 0x2c4   :  { %v5071_v16 = vpop.f32.mrf.mxu0 }
 0x2c5   :  { %v6458_v57 = vpack.c.bf16 %v1489_v13, %v1486_v8  ;;  %v1510_v20 = vadd.f32 %v5071_v16, %v6370_v23  ;;  %3122 = vadd.xlane.f32.xlu1 %v3027_v15  ;;  %v3025_v25 = vmul.f32 %v1489_v13, %v1489_v13 }
 0x2c6   :  { %v1501_v43 = vpop.f32.mrf.mxu0 }
 0x2c7   :  { %3116 = vadd.xlane.f32.xlu0 %v3024_v21  ;;  %5145 = vmatprep.mubr.bf16.mxu1 %v6458_v57  ;;  %v1502_v26 = vadd.f32 %v6370_v23, %v1501_v43  ;;  %v3030_v28 = vmul.f32 %v1510_v20, %v1510_v20 }
 0x2c8   :  { %v5072_v32 = vpop.f32.mrf.mxu0  ;;  %5146 = vmatmul.mubr.bf16.gmra.mxu1 %v6461_v22 }
 0x2c9   :  { %v1513_v61 = vadd.f32 %v5072_v32, %v6370_v23  ;;  %3118 = vadd.xlane.f32.xlu1 %v3025_v25  ;;  %v3028_v42 = vmul.f32 %v1502_v26, %v1502_v26  ;;  %v6500_v32 = vld [vmem:[#allocation5 + $0x38] sm:$0xff]  }
 0x2ca   :  { %v1504_v19 = vpop.f32.mrf.mxu0  ;;  %5341 = vmatprep.subr.bf16.mxu0 %v6500_v32 }
 0x2cb   :  { %v1505_v29 = vadd.f32 %v6370_v23, %v1504_v19  ;;  %3128 = vadd.xlane.f32.xlu0 %v3030_v28  ;;  %v3031_v30 = vmul.f32 %v1513_v61, %v1513_v61  ;;  %v6474_v40 = vpack.c.bf16 %v1513_v61, %v1510_v20 }
 0x2cc   :  { %v5075_v31 = vpop.f32.mrf.mxu0 }
 0x2cd   :  { %v6468_v35 = vpack.c.bf16 %v1505_v29, %v1502_v26  ;;  %v1526_v36 = vadd.f32 %v5075_v31, %v6370_v23  ;;  %3130 = vadd.xlane.f32.xlu1 %v3031_v30  ;;  %v3029_v44 = vmul.f32 %v1505_v29, %v1505_v29 }
 0x2ce   :  { %v1517_v17 = vpop.f32.mrf.mxu0 }
 0x2cf   :  { %3124 = vadd.xlane.f32.xlu0 %v3028_v42  ;;  %5149 = vmatprep.mubr.bf16.mxu1 %v6468_v35  ;;  %v1518_v41 = vadd.f32 %v6370_v23, %v1517_v17  ;;  %v3034_v48 = vmul.f32 %v1526_v36, %v1526_v36 }
 0x2d0   :  { %v5076_v27 = vpop.f32.mrf.mxu0  ;;  %5150 = vmatmul.mubr.bf16.gmra.mxu1 %v6474_v40 }
 0x2d1   :  { %v1529_v46 = vadd.f32 %v5076_v27, %v6370_v23  ;;  %3126 = vadd.xlane.f32.xlu1 %v3029_v44  ;;  %v3032_v56 = vmul.f32 %v1518_v41, %v1518_v41 }
 0x2d2   :  { %v1520_v49 = vpop.f32.mrf.mxu0 }
 0x2d3   :  { %v1521_v24 = vadd.f32 %v6370_v23, %v1520_v49  ;;  %3136 = vadd.xlane.f32.xlu0 %v3034_v48  ;;  %v3035_v51 = vmul.f32 %v1529_v46, %v1529_v46  ;;  %v6484_v59 = vpack.c.bf16 %v1529_v46, %v1526_v36 }
 0x2d4   :  { %v5079_v53 = vpop.f32.mrf.mxu0 }
 0x2d5   :  { %v6481_v54 = vpack.c.bf16 %v1521_v24, %v1518_v41  ;;  %v1542_v55 = vadd.f32 %v5079_v53, %v6370_v23  ;;  %3138 = vadd.xlane.f32.xlu1 %v3035_v51  ;;  %v3033_v62 = vmul.f32 %v1521_v24, %v1521_v24 }
 0x2d6   :  { %v1533_v60 = vpop.f32.mrf.mxu0 }
 0x2d7   :  { %3132 = vadd.xlane.f32.xlu0 %v3032_v56  ;;  %5153 = vmatprep.mubr.bf16.mxu1 %v6481_v54  ;;  %v1534_v2 = vadd.f32 %v6370_v23, %v1533_v60  ;;  %v3038_v58 = vmul.f32 %v1542_v55, %v1542_v55 }
 0x2d8   :  { %v5080_v63 = vpop.f32.mrf.mxu0  ;;  %5154 = vmatmul.mubr.bf16.gmra.mxu1 %v6484_v59 }
 0x2d9   :  { %v1545_v1 = vadd.f32 %v5080_v63, %v6370_v23  ;;  %3134 = vadd.xlane.f32.xlu1 %v3033_v62  ;;  %v3036_v11 = vmul.f32 %v1534_v2, %v1534_v2 }
 0x2da   :  { %v1536_v5 = vpop.f32.mrf.mxu0 }
 0x2db   :  { %v1537_v12 = vadd.f32 %v6370_v23, %v1536_v5  ;;  %3144 = vadd.xlane.f32.xlu0 %v3038_v58  ;;  %v3039_v6 = vmul.f32 %v1545_v1, %v1545_v1  ;;  %v6494_v13 = vpack.c.bf16 %v1545_v1, %v1542_v55 }
 0x2dc   :  { %v5083_v8 = vpop.f32.mrf.mxu0 }
 0x2dd   :  { %v6491_v9 = vpack.c.bf16 %v1537_v12, %v1534_v2  ;;  %v1558_v10 = vadd.f32 %v5083_v8, %v6370_v23  ;;  %3146 = vadd.xlane.f32.xlu1 %v3039_v6  ;;  %v3037_v16 = vmul.f32 %v1537_v12, %v1537_v12 }
 0x2de   :  { %v1549_v15 = vpop.f32.mrf.mxu0 }
 0x2df   :  { %3140 = vadd.xlane.f32.xlu0 %v3036_v11  ;;  %5157 = vmatprep.mubr.bf16.mxu1 %v6491_v9  ;;  %v1550_v21 = vadd.f32 %v6370_v23, %v1549_v15  ;;  %v3042_v25 = vmul.f32 %v1558_v10, %v1558_v10 }
 0x2e0   :  { %v5084_v20 = vpop.f32.mrf.mxu0  ;;  %5158 = vmatmul.mubr.bf16.gmra.mxu1 %v6494_v13 }
 0x2e1   :  { %v1561_v43 = vadd.f32 %v5084_v20, %v6370_v23  ;;  %3142 = vadd.xlane.f32.xlu1 %v3037_v16  ;;  %v3040_v31 = vmul.f32 %v1550_v21, %v1550_v21 }
 0x2e2   :  { %v1552_v26 = vpop.f32.mrf.mxu0 }
 0x2e3   :  { %v1553_v61 = vadd.f32 %v6370_v23, %v1552_v26  ;;  %3152 = vadd.xlane.f32.xlu0 %v3042_v25  ;;  %v3043_v28 = vmul.f32 %v1561_v43, %v1561_v43  ;;  %v6507_v36 = vpack.c.bf16 %v1561_v43, %v1558_v10 }
 0x2e4   :  { %v5087_v19 = vpop.f32.mrf.mxu0 }
 0x2e5   :  { %v6504_v29 = vpack.c.bf16 %v1553_v61, %v1550_v21  ;;  %v1574_v30 = vadd.f32 %v5087_v19, %v6370_v23  ;;  %3154 = vadd.xlane.f32.xlu1 %v3043_v28  ;;  %v3041_v39 = vmul.f32 %v1553_v61, %v1553_v61 }
 0x2e6   :  { %v1565_v42 = vpop.f32.mrf.mxu0 }
 0x2e7   :  { %3148 = vadd.xlane.f32.xlu0 %v3040_v31  ;;  %5161 = vmatprep.mubr.bf16.mxu1 %v6504_v29  ;;  %v1566_v44 = vadd.f32 %v6370_v23, %v1565_v42  ;;  %v3046_v41 = vmul.f32 %v1574_v30, %v1574_v30 }
 0x2e8   :  { %v5088_v17 = vpop.f32.mrf.mxu0  ;;  %5162 = vmatmul.mubr.bf16.gmra.mxu1 %v6507_v36 }
 0x2e9   :  { %v1577_v27 = vadd.f32 %v5088_v17, %v6370_v23  ;;  %3150 = vadd.xlane.f32.xlu1 %v3041_v39  ;;  %v3044_v55 = vmul.f32 %v1566_v44, %v1566_v44 }
 0x2ea   :  { %v1568_v46 = vpop.f32.mrf.mxu0 }
 0x2eb   :  { %v1569_v48 = vadd.f32 %v6370_v23, %v1568_v46  ;;  %3160 = vadd.xlane.f32.xlu0 %v3046_v41  ;;  %v3047_v49 = vmul.f32 %v1577_v27, %v1577_v27  ;;  %v6517_v56 = vpack.c.bf16 %v1577_v27, %v1574_v30 }
 0x2ec   :  { %v5091_v24 = vpop.f32.mrf.mxu0 }
 0x2ed   :  { %v6514_v51 = vpack.c.bf16 %v1569_v48, %v1566_v44  ;;  %v1590_v53 = vadd.f32 %v5091_v24, %v6370_v23  ;;  %3162 = vadd.xlane.f32.xlu1 %v3047_v49  ;;  %v3045_v62 = vmul.f32 %v1569_v48, %v1569_v48 }
 0x2ee   :  { %v1581_v60 = vpop.f32.mrf.mxu0 }
 0x2ef   :  { %3156 = vadd.xlane.f32.xlu0 %v3044_v55  ;;  %5165 = vmatprep.mubr.bf16.mxu1 %v6514_v51  ;;  %v1582_v2 = vadd.f32 %v6370_v23, %v1581_v60  ;;  %v3050_v58 = vmul.f32 %v1590_v53, %v1590_v53 }
 0x2f0   :  { %v5092_v63 = vpop.f32.mrf.mxu0  ;;  %5166 = vmatmul.mubr.bf16.gmra.mxu1 %v6517_v56 }
 0x2f1   :  { %v1593_v1 = vadd.f32 %v5092_v63, %v6370_v23  ;;  %3158 = vadd.xlane.f32.xlu1 %v3045_v62  ;;  %v3048_v15 = vmul.f32 %v1582_v2, %v1582_v2 }
 0x2f2   :  { %v1584_v5 = vpop.f32.mrf.mxu0 }
 0x2f3   :  { %v1585_v12 = vadd.f32 %v6370_v23, %v1584_v5  ;;  %3168 = vadd.xlane.f32.xlu0 %v3050_v58  ;;  %v3051_v6 = vmul.f32 %v1593_v1, %v1593_v1  ;;  %v6527_v16 = vpack.c.bf16 %v1593_v1, %v1590_v53 }
 0x2f4   :  { %v5095_v8 = vpop.f32.mrf.mxu0 }
 0x2f5   :  { %v6524_v10 = vpack.c.bf16 %v1585_v12, %v1582_v2  ;;  %v1606_v11 = vadd.f32 %v5095_v8, %v6370_v23  ;;  %3170 = vadd.xlane.f32.xlu1 %v3051_v6  ;;  %v3049_v21 = vmul.f32 %v1585_v12, %v1585_v12 }
 0x2f6   :  { %v1597_v20 = vpop.f32.mrf.mxu0 }
 0x2f7   :  { %3164 = vadd.xlane.f32.xlu0 %v3048_v15  ;;  %5169 = vmatprep.mubr.bf16.mxu1 %v6524_v10  ;;  %v1598_v25 = vadd.f32 %v6370_v23, %v1597_v20  ;;  %v3054_v61 = vmul.f32 %v1606_v11, %v1606_v11 }
 0x2f8   :  { %v5096_v43 = vpop.f32.mrf.mxu0  ;;  %5170 = vmatmul.mubr.bf16.gmra.mxu1 %v6527_v16 }
 0x2f9   :  { %v1609_v26 = vadd.f32 %v5096_v43, %v6370_v23  ;;  %3166 = vadd.xlane.f32.xlu1 %v3049_v21  ;;  %v3052_v17 = vmul.f32 %v1598_v25, %v1598_v25 }
 0x2fa   :  { %v1600_v28 = vpop.f32.mrf.mxu0 }
 0x2fb   :  { %v1601_v19 = vadd.f32 %v6370_v23, %v1600_v28  ;;  %3176 = vadd.xlane.f32.xlu0 %v3054_v61  ;;  %v3055_v30 = vmul.f32 %v1609_v26, %v1609_v26  ;;  %v6537_v44 = vpack.c.bf16 %v1609_v26, %v1606_v11 }
 0x2fc   :  { %v5099_v31 = vpop.f32.mrf.mxu0 }
 0x2fd   :  { %v6534_v42 = vpack.c.bf16 %v1601_v19, %v1598_v25  ;;  %v1622_v39 = vadd.f32 %v5099_v31, %v6370_v23  ;;  %3178 = vadd.xlane.f32.xlu1 %v3055_v30  ;;  %v3053_v41 = vmul.f32 %v1601_v19, %v1601_v19 }
 0x2fe   :  { %v1613_v27 = vpop.f32.mrf.mxu0 }
 0x2ff   :  { %3172 = vadd.xlane.f32.xlu0 %v3052_v17  ;;  %5173 = vmatprep.mubr.bf16.mxu1 %v6534_v42  ;;  %v1614_v48 = vadd.f32 %v6370_v23, %v1613_v27  ;;  %v3058_v24 = vmul.f32 %v1622_v39, %v1622_v39 }
 0x300   :  { %v5100_v46 = vpop.f32.mrf.mxu0  ;;  %5174 = vmatmul.mubr.bf16.gmra.mxu1 %v6537_v44 }
 0x301   :  { %v1625_v49 = vadd.f32 %v5100_v46, %v6370_v23  ;;  %3174 = vadd.xlane.f32.xlu1 %v3053_v41  ;;  %v3056_v63 = vmul.f32 %v1614_v48, %v1614_v48 }
 0x302   :  { %v1616_v53 = vpop.f32.mrf.mxu0 }
 0x303   :  { %v1617_v55 = vadd.f32 %v6370_v23, %v1616_v53  ;;  %3184 = vadd.xlane.f32.xlu0 %v3058_v24  ;;  %v3059_v60 = vmul.f32 %v1625_v49, %v1625_v49  ;;  %v6546_v2 = vpack.c.bf16 %v1625_v49, %v1622_v39  ;;  %v6553_v23 = vld [vmem:[%s7932_s8] ss:$0 sm:$0xff]  ;;  %v5501_v53 = vld [vmem:[#allocation5 + $0x28] sm:$0xff]  }
 0x304   :  { %v5500_v39 = vld [vmem:[#allocation5 + $0x30] sm:$0xff]  }
 0x305   :  { %v6544_v62 = vpack.c.bf16 %v1617_v55, %v1614_v48  ;;  %3186 = vadd.xlane.f32.xlu1 %v3059_v60  ;;  %v3057_v1 = vmul.f32 %v1617_v55, %v1617_v55 }
 0x307   :  { %3180 = vadd.xlane.f32.xlu0 %v3056_v63  ;;  %5177 = vmatprep.mubr.bf16.mxu1 %v6544_v62 }
 0x308   :  { %5178 = vmatmul.mubr.bf16.gmra.mxu1 %v6546_v2 }
 0x309   :  { %3182 = vadd.xlane.f32.xlu1 %v3057_v1 }
 0x350   :  { %v5119_v58 = vpop.f32.mrf.mxu1 }
 0x351   :  { %v1774_v11 = vadd.f32 %v5119_v58, %v6553_v23 }
 0x352   :  { %v1765_v5 = vpop.f32.mrf.mxu1 }
 0x353   :  { %v1766_v6 = vadd.f32 %v6553_v23, %v1765_v5  ;;  %v2022_v61 = vmax.f32 %v1774_v11, 0.0 }
 0x354   :  { %v5120_v12 = vpop.f32.mrf.mxu1 }
 0x355   :  { %v1777_v8 = vadd.f32 %v5120_v12, %v6553_v23  ;;  %v2020_v25 = vmax.f32 %v1766_v6, 0.0  ;;  %v5502_v6 = vld [vmem:[#allocation5 + $0x20] sm:$0xff]  }
 0x356   :  { %v1768_v15 = vpop.f32.mrf.mxu1 }
 0x357   :  { %v1769_v20 = vadd.f32 %v6553_v23, %v1768_v15  ;;  %v2023_v21 = vmax.f32 %v1777_v8, 0.0 }
 0x358   :  { %v5123_v43 = vpop.f32.mrf.mxu1 }
 0x359   :  { %v2021_v26 = vmax.f32 %v1769_v20, 0.0  ;;  %v2102_v30 = vpack.c.bf16 %v2023_v21, %v2022_v61  ;;  %v1790_v41 = vadd.f32 %v5123_v43, %v6553_v23 }
 0x35a   :  { %v1781_v28 = vpop.f32.mrf.mxu1 }
 0x35b   :  { %v2101_v19 = vpack.c.bf16 %v2021_v26, %v2020_v25  ;;  %v1782_v17 = vadd.f32 %v6553_v23, %v1781_v28  ;;  %v2026_v63 = vmax.f32 %v1790_v41, 0.0  ;;  %v5503_v25 = vld [vmem:[#allocation5 + $0x18] sm:$0xff]  }
 0x35c   :  { %v5124_v31 = vpop.f32.mrf.mxu1 }
 0x35d   :  { %v1793_v27 = vadd.f32 %v5124_v31, %v6553_v23  ;;  %5197 = vmatprep.mubr.bf16.mxu0 %v2101_v19  ;;  %v2024_v55 = vmax.f32 %v1782_v17, 0.0  ;;  %v5504_v17 = vld [vmem:[#allocation5 + $0x10] sm:$0xff]  }
 0x35e   :  { %v1784_v46 = vpop.f32.mrf.mxu1  ;;  %5198 = vmatmul.mubr.bf16.vlgmr.msra.gmra.mxu0 %v2102_v30 }
 0x35f   :  { %v1785_v48 = vadd.f32 %v6553_v23, %v1784_v46  ;;  %5342 = vmatpush3.bf16.msra.mxu0 %v6500_v32  ;;  %v2027_v49 = vmax.f32 %v1793_v27, 0.0 }
 0x360   :  { %v5127_v24 = vpop.f32.mrf.mxu1  ;;  %5343 = vmatprep.subr.bf16.mxu0 %v5500_v39 }
 0x361   :  { %v2025_v60 = vmax.f32 %v1785_v48, 0.0  ;;  %v2104_v5 = vpack.c.bf16 %v2027_v49, %v2026_v63  ;;  %v1806_v32 = vadd.f32 %v5127_v24, %v6553_v23 }
 0x362   :  { %v1797_v1 = vpop.f32.mrf.mxu1 }
 0x363   :  { %v2103_v58 = vpack.c.bf16 %v2025_v60, %v2024_v55  ;;  %5344 = vmatpush3.bf16.msra.mxu0 %v5500_v39  ;;  %v1798_v8 = vadd.f32 %v6553_v23, %v1797_v1  ;;  %v2030_v28 = vmax.f32 %v1806_v32, 0.0  ;;  %v5505_v55 = vld [vmem:[#allocation5 + $0x8] sm:$0xff]  }
 0x364   :  { %v5128_v12 = vpop.f32.mrf.mxu1  ;;  %5345 = vmatprep.subr.bf16.mxu0 %v5501_v53 }
 0x365   :  { %v1809_v11 = vadd.f32 %v5128_v12, %v6553_v23  ;;  %5201 = vmatprep.mubr.bf16.mxu0 %v2103_v58  ;;  %v2028_v26 = vmax.f32 %v1798_v8, 0.0  ;;  %v5506_v8 = vld [vmem:[#allocation5] sm:$0xff]  }
 0x366   :  { %v1800_v15 = vpop.f32.mrf.mxu1  ;;  %5202 = vmatmul.mubr.bf16.gmra.mxu0 %v2104_v5 }
 0x367   :  { %v1801_v20 = vadd.f32 %v6553_v23, %v1800_v15  ;;  %5346 = vmatpush3.bf16.msra.mxu0 %v5501_v53  ;;  %v2031_v21 = vmax.f32 %v1809_v11, 0.0 }
 0x368   :  { %v5131_v43 = vpop.f32.mrf.mxu1  ;;  %5347 = vmatprep.subr.bf16.mxu0 %v5502_v6 }
 0x369   :  { %v2029_v61 = vmax.f32 %v1801_v20, 0.0  ;;  %v2106_v31 = vpack.c.bf16 %v2031_v21, %v2030_v28  ;;  %v1822_v46 = vadd.f32 %v5131_v43, %v6553_v23 }
 0x36a   :  { %v1813_v19 = vpop.f32.mrf.mxu1 }
 0x36b   :  { %v2105_v30 = vpack.c.bf16 %v2029_v61, %v2028_v26  ;;  %5348 = vmatpush3.bf16.msra.mxu0 %v5502_v6  ;;  %v1814_v27 = vadd.f32 %v6553_v23, %v1813_v19  ;;  %v2034_v1 = vmax.f32 %v1822_v46, 0.0 }
 0x36c   :  { %v5132_v39 = vpop.f32.mrf.mxu1  ;;  %5349 = vmatprep.subr.bf16.mxu0 %v5503_v25 }
 0x36d   :  { %v1825_v41 = vadd.f32 %v5132_v39, %v6553_v23  ;;  %5205 = vmatprep.mubr.bf16.mxu0 %v2105_v30  ;;  %v2032_v60 = vmax.f32 %v1814_v27, 0.0 }
 0x36e   :  { %v1816_v48 = vpop.f32.mrf.mxu1  ;;  %5206 = vmatmul.mubr.bf16.gmra.mxu0 %v2106_v31 }
 0x36f   :  { %v1817_v49 = vadd.f32 %v6553_v23, %v1816_v48  ;;  %5350 = vmatpush3.bf16.msra.mxu0 %v5503_v25  ;;  %v2035_v24 = vmax.f32 %v1825_v41, 0.0 }
 0x370   :  { %v5135_v53 = vpop.f32.mrf.mxu1  ;;  %5351 = vmatprep.subr.bf16.mxu0 %v5504_v17 }
 0x371   :  { %v2033_v63 = vmax.f32 %v1817_v49, 0.0  ;;  %v2108_v12 = vpack.c.bf16 %v2035_v24, %v2034_v1  ;;  %v1838_v15 = vadd.f32 %v5135_v53, %v6553_v23 }
 0x372   :  { %v1829_v58 = vpop.f32.mrf.mxu1 }
 0x373   :  { %v2107_v5 = vpack.c.bf16 %v2033_v63, %v2032_v60  ;;  %5352 = vmatpush3.bf16.msra.mxu0 %v5504_v17  ;;  %v1830_v11 = vadd.f32 %v6553_v23, %v1829_v58  ;;  %v2038_v28 = vmax.f32 %v1838_v15, 0.0  ;;  %v5507_v15 = vld [vmem:[%s7935_s11 + $0x38] sm:$0xff]  }
 0x374   :  { %v5136_v6 = vpop.f32.mrf.mxu1  ;;  %5353 = vmatprep.subr.bf16.mxu0 %v5505_v55  ;;  %5261 = vmatprep.subr.bf16.mxu1 %v5507_v15 }
 0x375   :  { %v1841_v32 = vadd.f32 %v5136_v6, %v6553_v23  ;;  %5209 = vmatprep.mubr.bf16.mxu0 %v2107_v5  ;;  %v2036_v26 = vmax.f32 %v1830_v11, 0.0  ;;  %5262 = vmatpush3.bf16.msra.mxu1 %v5507_v15 }
 0x376   :  { %v1832_v20 = vpop.f32.mrf.mxu1  ;;  %5210 = vmatmul.mubr.bf16.gmra.mxu0 %v2108_v12 }
 0x377   :  { %v1833_v21 = vadd.f32 %v6553_v23, %v1832_v20  ;;  %5354 = vmatpush3.bf16.msra.mxu0 %v5505_v55  ;;  %v2039_v43 = vmax.f32 %v1841_v32, 0.0 }
 0x378   :  { %v5139_v25 = vpop.f32.mrf.mxu1  ;;  %5355 = vmatprep.subr.bf16.mxu0 %v5506_v8 }
 0x379   :  { %v2037_v61 = vmax.f32 %v1833_v21, 0.0  ;;  %v2110_v31 = vpack.c.bf16 %v2039_v43, %v2038_v28  ;;  %v1854_v41 = vadd.f32 %v5139_v25, %v6553_v23 }
 0x37a   :  { %v1845_v19 = vpop.f32.mrf.mxu1 }
 0x37b   :  { %v2109_v30 = vpack.c.bf16 %v2037_v61, %v2036_v26  ;;  %5356 = vmatpush3.bf16.msra.mxu0 %v5506_v8  ;;  %v1846_v17 = vadd.f32 %v6553_v23, %v1845_v19  ;;  %v2042_v60 = vmax.f32 %v1854_v41, 0.0  ;;  %v5508_v41 = vld [vmem:[%s7935_s11 + $0x30] sm:$0xff]  }
 0x37c   :  { %v5140_v39 = vpop.f32.mrf.mxu1  ;;  %5263 = vmatprep.subr.bf16.mxu1 %v5508_v41 }
 0x37d   :  { %v1857_v27 = vadd.f32 %v5140_v39, %v6553_v23  ;;  %5213 = vmatprep.mubr.bf16.mxu0 %v2109_v30  ;;  %v2040_v53 = vmax.f32 %v1846_v17, 0.0  ;;  %5264 = vmatpush3.bf16.msra.mxu1 %v5508_v41 }
 0x37e   :  { %v1848_v46 = vpop.f32.mrf.mxu1  ;;  %5214 = vmatmul.mubr.bf16.gmra.mxu0 %v2110_v31 }
 0x37f   :  { %v1849_v48 = vadd.f32 %v6553_v23, %v1848_v46  ;;  %v2043_v49 = vmax.f32 %v1857_v27, 0.0 }
 0x380   :  { %v5143_v24 = vpop.f32.mrf.mxu1 }
 0x381   :  { %v2041_v55 = vmax.f32 %v1849_v48, 0.0  ;;  %v2112_v58 = vpack.c.bf16 %v2043_v49, %v2042_v60  ;;  %v1870_v8 = vadd.f32 %v5143_v24, %v6553_v23  ;;  %v5509_v48 = vld [vmem:[%s7935_s11 + $0x28] sm:$0xff]  }
 0x382   :  { %v1861_v63 = vpop.f32.mrf.mxu1  ;;  %5265 = vmatprep.subr.bf16.mxu1 %v5509_v48 }
 0x383   :  { %v2111_v1 = vpack.c.bf16 %v2041_v55, %v2040_v53  ;;  %v1862_v12 = vadd.f32 %v6553_v23, %v1861_v63  ;;  %v2046_v26 = vmax.f32 %v1870_v8, 0.0  ;;  %5266 = vmatpush3.bf16.msra.mxu1 %v5509_v48 }
 0x384   :  { %v5144_v5 = vpop.f32.mrf.mxu1 }
 0x385   :  { %v1873_v6 = vadd.f32 %v5144_v5, %v6553_v23  ;;  %5217 = vmatprep.mubr.bf16.mxu0 %v2111_v1  ;;  %v2044_v43 = vmax.f32 %v1862_v12, 0.0 }
 0x386   :  { %v1864_v11 = vpop.f32.mrf.mxu1  ;;  %5218 = vmatmul.mubr.bf16.gmra.mxu0 %v2112_v58 }
 0x387   :  { %v1865_v32 = vadd.f32 %v6553_v23, %v1864_v11  ;;  %v2047_v20 = vmax.f32 %v1873_v6, 0.0 }
 0x388   :  { %v5147_v21 = vpop.f32.mrf.mxu1 }
 0x389   :  { %v2045_v25 = vmax.f32 %v1865_v32, 0.0  ;;  %v2114_v19 = vpack.c.bf16 %v2047_v20, %v2046_v26  ;;  %v1886_v17 = vadd.f32 %v5147_v21, %v6553_v23  ;;  %v5510_v32 = vld [vmem:[%s7935_s11 + $0x20] sm:$0xff]   ;;  %v5511_v20 = vld [vmem:[%s7935_s11 + $0x18] sm:$0xff]  }
 0x38a   :  { %v1877_v61 = vpop.f32.mrf.mxu1  ;;  %5267 = vmatprep.subr.bf16.mxu1 %v5510_v32 }
 0x38b   :  { %v2113_v28 = vpack.c.bf16 %v2045_v25, %v2044_v43  ;;  %v1878_v31 = vadd.f32 %v6553_v23, %v1877_v61  ;;  %v2050_v60 = vmax.f32 %v1886_v17, 0.0  ;;  %5268 = vmatpush3.bf16.msra.mxu1 %v5510_v32 }
 0x38c   :  { %v5148_v30 = vpop.f32.mrf.mxu1  ;;  %5269 = vmatprep.subr.bf16.mxu1 %v5511_v20 }
 0x38d   :  { %v1889_v39 = vadd.f32 %v5148_v30, %v6553_v23  ;;  %5221 = vmatprep.mubr.bf16.mxu0 %v2113_v28  ;;  %v2048_v53 = vmax.f32 %v1878_v31, 0.0 }
 0x38e   :  { %v1880_v27 = vpop.f32.mrf.mxu1  ;;  %5222 = vmatmul.mubr.bf16.gmra.mxu0 %v2114_v19 }
 0x38f   :  { %v1881_v46 = vadd.f32 %v6553_v23, %v1880_v27  ;;  %v2051_v49 = vmax.f32 %v1889_v39, 0.0  ;;  %5270 = vmatpush3.bf16.msra.mxu1 %v5511_v20 }
 0x390   :  { %v5151_v24 = vpop.f32.mrf.mxu1 }
 0x391   :  { %v2049_v55 = vmax.f32 %v1881_v46, 0.0  ;;  %v2116_v58 = vpack.c.bf16 %v2051_v49, %v2050_v60  ;;  %v1902_v8 = vadd.f32 %v5151_v24, %v6553_v23  ;;  %v5512_v46 = vld [vmem:[%s7935_s11 + $0x10] sm:$0xff]  }
 0x392   :  { %v1893_v63 = vpop.f32.mrf.mxu1  ;;  %5271 = vmatprep.subr.bf16.mxu1 %v5512_v46 }
 0x393   :  { %v2115_v1 = vpack.c.bf16 %v2049_v55, %v2048_v53  ;;  %v1894_v12 = vadd.f32 %v6553_v23, %v1893_v63  ;;  %v2054_v61 = vmax.f32 %v1902_v8, 0.0  ;;  %5272 = vmatpush3.bf16.msra.mxu1 %v5512_v46 }
 0x394   :  { %v5152_v5 = vpop.f32.mrf.mxu1 }
 0x395   :  { %v1905_v6 = vadd.f32 %v5152_v5, %v6553_v23  ;;  %5225 = vmatprep.mubr.bf16.mxu0 %v2115_v1  ;;  %v2052_v25 = vmax.f32 %v1894_v12, 0.0  ;;  %v5513_v1 = vld [vmem:[%s7935_s11 + $0x8] sm:$0xff]  }
 0x396   :  { %v1896_v11 = vpop.f32.mrf.mxu1  ;;  %5226 = vmatmul.mubr.bf16.gmra.mxu0 %v2116_v58  ;;  %5273 = vmatprep.subr.bf16.mxu1 %v5513_v1 }
 0x397   :  { %v1897_v15 = vadd.f32 %v6553_v23, %v1896_v11  ;;  %v2055_v21 = vmax.f32 %v1905_v6, 0.0  ;;  %5274 = vmatpush3.bf16.msra.mxu1 %v5513_v1 }
 0x398   :  { %v5155_v43 = vpop.f32.mrf.mxu1 }
 0x399   :  { %v2053_v26 = vmax.f32 %v1897_v15, 0.0  ;;  %v2118_v30 = vpack.c.bf16 %v2055_v21, %v2054_v61  ;;  %v1918_v27 = vadd.f32 %v5155_v43, %v6553_v23  ;;  %v5514_v15 = vld [vmem:[%s7935_s11] sm:$0xff]  }
 0x39a   :  { %v1909_v28 = vpop.f32.mrf.mxu1  ;;  %5275 = vmatprep.subr.bf16.mxu1 %v5514_v15 }
 0x39b   :  { %v2117_v19 = vpack.c.bf16 %v2053_v26, %v2052_v25  ;;  %v1910_v39 = vadd.f32 %v6553_v23, %v1909_v28  ;;  %v2058_v60 = vmax.f32 %v1918_v27, 0.0  ;;  %5276 = vmatpush3.bf16.msra.mxu1 %v5514_v15 }
 0x39c   :  { %v5156_v31 = vpop.f32.mrf.mxu1 }
 0x39d   :  { %v1921_v17 = vadd.f32 %v5156_v31, %v6553_v23  ;;  %5229 = vmatprep.mubr.bf16.mxu0 %v2117_v19  ;;  %v2056_v53 = vmax.f32 %v1910_v39, 0.0 }
 0x39e   :  { %v1912_v41 = vpop.f32.mrf.mxu1  ;;  %5230 = vmatmul.mubr.bf16.gmra.mxu0 %v2118_v30 }
 0x39f   :  { %v1913_v48 = vadd.f32 %v6553_v23, %v1912_v41  ;;  %v2059_v49 = vmax.f32 %v1921_v17, 0.0 }
 0x3a0   :  { %v5159_v24 = vpop.f32.mrf.mxu1 }
 0x3a1   :  { %v2057_v55 = vmax.f32 %v1913_v48, 0.0  ;;  %v2120_v5 = vpack.c.bf16 %v2059_v49, %v2058_v60  ;;  %v1934_v11 = vadd.f32 %v5159_v24, %v6553_v23 }
 0x3a2   :  { %v1925_v63 = vpop.f32.mrf.mxu1 }
 0x3a3   :  { %v2119_v58 = vpack.c.bf16 %v2057_v55, %v2056_v53  ;;  %v1926_v6 = vadd.f32 %v6553_v23, %v1925_v63  ;;  %v2062_v61 = vmax.f32 %v1934_v11, 0.0 }
 0x3a4   :  { %v5160_v12 = vpop.f32.mrf.mxu1 }
 0x3a5   :  { %v1937_v8 = vadd.f32 %v5160_v12, %v6553_v23  ;;  %5233 = vmatprep.mubr.bf16.mxu0 %v2119_v58  ;;  %v2060_v25 = vmax.f32 %v1926_v6, 0.0 }
 0x3a6   :  { %v1928_v32 = vpop.f32.mrf.mxu1  ;;  %5234 = vmatmul.mubr.bf16.gmra.mxu0 %v2120_v5 }
 0x3a7   :  { %v1929_v20 = vadd.f32 %v6553_v23, %v1928_v32  ;;  %v2063_v21 = vmax.f32 %v1937_v8, 0.0 }
 0x3a8   :  { %v5163_v43 = vpop.f32.mrf.mxu1 }
 0x3a9   :  { %v2061_v26 = vmax.f32 %v1929_v20, 0.0  ;;  %v2122_v30 = vpack.c.bf16 %v2063_v21, %v2062_v61  ;;  %v1950_v27 = vadd.f32 %v5163_v43, %v6553_v23 }
 0x3aa   :  { %v1941_v28 = vpop.f32.mrf.mxu1 }
 0x3ab   :  { %v2121_v19 = vpack.c.bf16 %v2061_v26, %v2060_v25  ;;  %v1942_v39 = vadd.f32 %v6553_v23, %v1941_v28  ;;  %v2066_v55 = vmax.f32 %v1950_v27, 0.0 }
 0x3ac   :  { %v5164_v31 = vpop.f32.mrf.mxu1 }
 0x3ad   :  { %v1953_v17 = vadd.f32 %v5164_v31, %v6553_v23  ;;  %5237 = vmatprep.mubr.bf16.mxu0 %v2121_v19  ;;  %v2064_v24 = vmax.f32 %v1942_v39, 0.0 }
 0x3ae   :  { %v1944_v41 = vpop.f32.mrf.mxu1  ;;  %5238 = vmatmul.mubr.bf16.gmra.mxu0 %v2122_v30 }
 0x3af   :  { %v1945_v46 = vadd.f32 %v6553_v23, %v1944_v41  ;;  %v2067_v48 = vmax.f32 %v1953_v17, 0.0 }
 0x3b0   :  { %v5167_v49 = vpop.f32.mrf.mxu1 }
 0x3b1   :  { %v2065_v53 = vmax.f32 %v1945_v46, 0.0  ;;  %v2124_v1 = vpack.c.bf16 %v2067_v48, %v2066_v55  ;;  %v1966_v6 = vadd.f32 %v5167_v49, %v6553_v23 }
 0x3b2   :  { %v1957_v60 = vpop.f32.mrf.mxu1 }
 0x3b3   :  { %v2123_v63 = vpack.c.bf16 %v2065_v53, %v2064_v24  ;;  %v1958_v5 = vadd.f32 %v6553_v23, %v1957_v60  ;;  %v2070_v43 = vmax.f32 %v1966_v6, 0.0 }
 0x3b4   :  { %v5168_v58 = vpop.f32.mrf.mxu1 }
 0x3b5   :  { %v1969_v12 = vadd.f32 %v5168_v58, %v6553_v23  ;;  %5241 = vmatprep.mubr.bf16.mxu0 %v2123_v63  ;;  %v2068_v20 = vmax.f32 %v1958_v5, 0.0 }
 0x3b6   :  { %v1960_v8 = vpop.f32.mrf.mxu1  ;;  %5242 = vmatmul.mubr.bf16.gmra.mxu0 %v2124_v1 }
 0x3b7   :  { %v1961_v11 = vadd.f32 %v6553_v23, %v1960_v8  ;;  %v2071_v32 = vmax.f32 %v1969_v12, 0.0 }
 0x3b8   :  { %v5171_v15 = vpop.f32.mrf.mxu1 }
 0x3b9   :  { %v2069_v21 = vmax.f32 %v1961_v11, 0.0  ;;  %v2126_v61 = vpack.c.bf16 %v2071_v32, %v2070_v43  ;;  %v1982_v31 = vadd.f32 %v5171_v15, %v6553_v23 }
 0x3ba   :  { %v1973_v25 = vpop.f32.mrf.mxu1 }
 0x3bb   :  { %v2125_v26 = vpack.c.bf16 %v2069_v21, %v2068_v20  ;;  %v1974_v19 = vadd.f32 %v6553_v23, %v1973_v25  ;;  %v2074_v49 = vmax.f32 %v1982_v31, 0.0 }
 0x3bc   :  { %v5172_v28 = vpop.f32.mrf.mxu1 }
 0x3bd   :  { %v1985_v30 = vadd.f32 %v5172_v28, %v6553_v23  ;;  %5245 = vmatprep.mubr.bf16.mxu0 %v2125_v26  ;;  %v2072_v46 = vmax.f32 %v1974_v19, 0.0 }
 0x3be   :  { %v1976_v39 = vpop.f32.mrf.mxu1  ;;  %5246 = vmatmul.mubr.bf16.gmra.mxu0 %v2126_v61 }
 0x3bf   :  { %v1977_v17 = vadd.f32 %v6553_v23, %v1976_v39  ;;  %v2075_v27 = vmax.f32 %v1985_v30, 0.0 }
 0x3c0   :  { %v5175_v41 = vpop.f32.mrf.mxu1 }
 0x3c1   :  { %v2073_v48 = vmax.f32 %v1977_v17, 0.0  ;;  %v2128_v55 = vpack.c.bf16 %v2075_v27, %v2074_v49  ;;  %v1998_v58 = vadd.f32 %v5175_v41, %v6553_v23 }
 0x3c2   :  { %v1989_v24 = vpop.f32.mrf.mxu1 }
 0x3c3   :  { %v2127_v53 = vpack.c.bf16 %v2073_v48, %v2072_v46  ;;  %v1990_v63 = vadd.f32 %v6553_v23, %v1989_v24  ;;  %v2078_v15 = vmax.f32 %v1998_v58, 0.0 }
 0x3c4   :  { %v5176_v60 = vpop.f32.mrf.mxu1 }
 0x3c5   :  { %v2001_v1 = vadd.f32 %v5176_v60, %v6553_v23  ;;  %5249 = vmatprep.mubr.bf16.mxu0 %v2127_v53  ;;  %v2076_v11 = vmax.f32 %v1990_v63, 0.0 }
 0x3c6   :  { %v1992_v5 = vpop.f32.mrf.mxu1  ;;  %5250 = vmatmul.mubr.bf16.gmra.mxu0 %v2128_v55 }
 0x3c7   :  { %v1993_v12 = vadd.f32 %v6553_v23, %v1992_v5  ;;  %v2079_v6 = vmax.f32 %v2001_v1, 0.0 }
 0x3c8   :  { %v5179_v8 = vpop.f32.mrf.mxu1 }
 0x3c9   :  { %v2077_v32 = vmax.f32 %v1993_v12, 0.0  ;;  %v2130_v43 = vpack.c.bf16 %v2079_v6, %v2078_v15  ;;  %v2014_v28 = vadd.f32 %v5179_v8, %v6553_v23 }
 0x3ca   :  { %v2005_v20 = vpop.f32.mrf.mxu1 }
 0x3cb   :  { %v2129_v21 = vpack.c.bf16 %v2077_v32, %v2076_v11  ;;  %v2006_v26 = vadd.f32 %v6553_v23, %v2005_v20  ;;  %v2082_v27 = vmax.f32 %v2014_v28, 0.0 }
 0x3cc   :  { %v5180_v25 = vpop.f32.mrf.mxu1 }
 0x3cd   :  { %v2017_v61 = vadd.f32 %v5180_v25, %v6553_v23  ;;  %5253 = vmatprep.mubr.bf16.mxu0 %v2129_v21  ;;  %v2080_v39 = vmax.f32 %v2006_v26, 0.0 }
 0x3ce   :  { %v2008_v19 = vpop.f32.mrf.mxu1  ;;  %5254 = vmatmul.mubr.bf16.gmra.mxu0 %v2130_v43 }
 0x3cf   :  { %v2009_v30 = vadd.f32 %v6553_v23, %v2008_v19  ;;  %v2083_v31 = vmax.f32 %v2017_v61, 0.0  ;;  %v6653_v23 = vpop.xlane.xlu0 %3060 }
 0x3d1   :  { %v2081_v17 = vmax.f32 %v2009_v30, 0.0  ;;  %v2132_v46 = vpack.c.bf16 %v2083_v31, %v2082_v27 }
 0x3d3   :  { %v2131_v41 = vpack.c.bf16 %v2081_v17, %v2080_v39 }
 0x3d5   :  { %5257 = vmatprep.mubr.bf16.mxu0 %v2131_v41 }
 0x3d6   :  { %5258 = vmatmul.mubr.bf16.gmra.mxu0 %v2132_v46 }
 0x3d7   :  { %5357 = vmatprep.mubr.bf16.mxu0 %v6379_v38  ;;  %v6657_v38 = vpop.xlane.xlu1 %3064 }
 0x3de   :  { %5358 = vmatmul.mubr.bf16.vlgmr.msra.gmra.mxu0 %v6382_v52  ;;  %v6659_v52 = vpop.xlane.xlu0 %3062 }
 0x3df   :  { %5361 = vmatprep.mubr.bf16.mxu0 %v6389_v50  ;;  %v6662_v50 = vpop.xlane.xlu1 %3066 }
 0x3e6   :  { %5362 = vmatmul.mubr.bf16.gmra.mxu0 %v6392_v47  ;;  %v6664_v47 = vpop.xlane.xlu0 %3072 }
 0x3e7   :  { %5365 = vmatprep.mubr.bf16.mxu0 %v6399_v0  ;;  %v6667_v0 = vpop.xlane.xlu1 %3074 }
 0x3ee   :  { %5366 = vmatmul.mubr.bf16.gmra.mxu0 %v6405_v14  ;;  %v6669_v14 = vpop.xlane.xlu0 %3068 }
 0x3ef   :  { %5369 = vmatprep.mubr.bf16.mxu0 %v6412_v34  ;;  %v6673_v34 = vpop.xlane.xlu1 %3070 }
 0x3f6   :  { %5370 = vmatmul.mubr.bf16.gmra.mxu0 %v6415_v18  ;;  %v6675_v18 = vpop.xlane.xlu0 %3080 }
 0x3f7   :  { %5373 = vmatprep.mubr.bf16.mxu0 %v6422_v7  ;;  %v6678_v7 = vpop.xlane.xlu1 %3082 }
 0x3fe   :  { %5374 = vmatmul.mubr.bf16.gmra.mxu0 %v6428_v33  ;;  %v6681_v33 = vpop.xlane.xlu0 %3076 }
 0x3ff   :  { %5377 = vmatprep.mubr.bf16.mxu0 %v6435_v4  ;;  %v6683_v4 = vpop.xlane.xlu1 %3078 }
 0x403   :  { %v6694_v48 = vpop.xlane.xlu1 %3090 }
 0x406   :  { %5378 = vmatmul.mubr.bf16.gmra.mxu0 %v6438_v37 }
 0x407   :  { %5381 = vmatprep.mubr.bf16.mxu0 %v6445_v45  ;;  %v6686_v45 = vpop.xlane.xlu0 %3088  ;;  %v6704_v12 = vpop.xlane.xlu1 %3086 }
 0x40b   :  { %v6699_v53 = vpop.xlane.xlu0 %3084  ;;  %v6713_v26 = vpop.xlane.xlu1 %3098 }
 0x40e   :  { %5382 = vmatmul.mubr.bf16.gmra.mxu0 %v6451_v3 }
 0x40f   :  { %5385 = vmatprep.mubr.bf16.mxu0 %v6458_v57  ;;  %v6692_v57 = vld [vmem:[%s7934_s10] ss:$0 sm:$0xff]  ;;  %v6706_v32 = vpop.xlane.xlu0 %3096 }
 0x413   :  { %v6716_v31 = vpop.xlane.xlu0 %3092 }
 0x416   :  { %5386 = vmatmul.mubr.bf16.gmra.mxu0 %v6461_v22 }
 0x417   :  { %5389 = vmatprep.mubr.bf16.mxu0 %v6468_v35 }
 0x41e   :  { %v5199_v37 = vpop.f32.mrf.mxu0  ;;  %5390 = vmatmul.mubr.bf16.gmra.mxu0 %v6474_v40 }
 0x41f   :  { %5393 = vmatprep.mubr.bf16.mxu0 %v6481_v54  ;;  %v2230_v24 = vadd.f32 %v5199_v37, %v6692_v57 }
 0x420   :  { %v2221_v3 = vpop.f32.mrf.mxu0 }
 0x421   :  { %v2222_v35 = vadd.f32 %v6692_v57, %v2221_v3  ;;  %v2478_v58 = vmax.f32 %v2230_v24, 0.0  ;;  %v6721_v3 = vpop.xlane.xlu1 %3094 }
 0x422   :  { %v5200_v22 = vpop.f32.mrf.mxu0 }
 0x423   :  { %v2233_v49 = vadd.f32 %v5200_v22, %v6692_v57  ;;  %v2476_v63 = vmax.f32 %v2222_v35, 0.0 }
 0x424   :  { %v2224_v40 = vpop.f32.mrf.mxu0 }
 0x425   :  { %v2225_v54 = vadd.f32 %v6692_v57, %v2224_v40  ;;  %v2479_v55 = vmax.f32 %v2233_v49, 0.0  ;;  %v6725_v49 = vpop.xlane.xlu0 %3104 }
 0x426   :  { %v5203_v60 = vpop.f32.mrf.mxu0  ;;  %5394 = vmatmul.mubr.bf16.gmra.mxu0 %v6484_v59 }
 0x427   :  { %v2477_v1 = vmax.f32 %v2225_v54, 0.0  ;;  %5397 = vmatprep.mubr.bf16.mxu0 %v6491_v9  ;;  %v2558_v8 = vpack.c.bf16 %v2479_v55, %v2478_v58  ;;  %v2246_v59 = vadd.f32 %v5203_v60, %v6692_v57  ;;  %v6728_v58 = vpop.xlane.xlu1 %3106 }
 0x428   :  { %v2237_v5 = vpop.f32.mrf.mxu0 }
 0x429   :  { %v2557_v6 = vpack.c.bf16 %v2477_v1, %v2476_v63  ;;  %v2238_v15 = vadd.f32 %v6692_v57, %v2237_v5  ;;  %v2482_v19 = vmax.f32 %v2246_v59, 0.0 }
 0x42a   :  { %v5204_v11 = vpop.f32.mrf.mxu0 }
 0x42b   :  { %v2249_v20 = vadd.f32 %v5204_v11, %v6692_v57  ;;  %5277 = vmatprep.mubr.bf16.mxu1 %v2557_v6  ;;  %v2480_v61 = vmax.f32 %v2238_v15, 0.0  ;;  %v6733_v11 = vpop.xlane.xlu0 %3100 }
 0x42c   :  { %v2240_v21 = vpop.f32.mrf.mxu0  ;;  %5278 = vmatmul.mubr.bf16.vlgmr.msra.gmra.mxu1 %v2558_v8 }
 0x42d   :  { %v2241_v9 = vadd.f32 %v6692_v57, %v2240_v21  ;;  %v2483_v43 = vmax.f32 %v2249_v20, 0.0 }
 0x42e   :  { %v5207_v25 = vpop.f32.mrf.mxu0  ;;  %5398 = vmatmul.mubr.bf16.gmra.mxu0 %v6494_v13 }
 0x42f   :  { %v2481_v28 = vmax.f32 %v2241_v9, 0.0  ;;  %5401 = vmatprep.mubr.bf16.mxu0 %v6504_v29  ;;  %v2560_v17 = vpack.c.bf16 %v2483_v43, %v2482_v19  ;;  %v2262_v13 = vadd.f32 %v5207_v25, %v6692_v57  ;;  %v6738_v25 = vpop.xlane.xlu1 %3102 }
 0x430   :  { %v2253_v30 = vpop.f32.mrf.mxu0 }
 0x431   :  { %v2559_v39 = vpack.c.bf16 %v2481_v28, %v2480_v61  ;;  %v2254_v41 = vadd.f32 %v6692_v57, %v2253_v30  ;;  %v2486_v54 = vmax.f32 %v2262_v13, 0.0  ;;  %v6740_v30 = vpop.xlane.xlu0 %3112 }
 0x432   :  { %v5208_v27 = vpop.f32.mrf.mxu0 }
 0x433   :  { %v2265_v46 = vadd.f32 %v5208_v27, %v6692_v57  ;;  %5281 = vmatprep.mubr.bf16.mxu1 %v2559_v39  ;;  %v2484_v24 = vmax.f32 %v2254_v41, 0.0  ;;  %v6747_v13 = vpop.xlane.xlu1 %3114 }
 0x434   :  { %v2256_v37 = vpop.f32.mrf.mxu0  ;;  %5282 = vmatmul.mubr.bf16.gmra.mxu1 %v2560_v17 }
 0x435   :  { %v2257_v29 = vadd.f32 %v6692_v57, %v2256_v37  ;;  %v2487_v22 = vmax.f32 %v2265_v46, 0.0 }
 0x436   :  { %v5211_v35 = vpop.f32.mrf.mxu0  ;;  %5402 = vmatmul.mubr.bf16.gmra.mxu0 %v6507_v36 }
 0x437   :  { %v2485_v40 = vmax.f32 %v2257_v29, 0.0  ;;  %5405 = vmatprep.mubr.bf16.mxu0 %v6514_v51  ;;  %v2562_v63 = vpack.c.bf16 %v2487_v22, %v2486_v54  ;;  %v2278_v36 = vadd.f32 %v5211_v35, %v6692_v57 }
 0x438   :  { %v2269_v55 = vpop.f32.mrf.mxu0 }
 0x439   :  { %v2561_v60 = vpack.c.bf16 %v2485_v40, %v2484_v24  ;;  %v2270_v5 = vadd.f32 %v6692_v57, %v2269_v55  ;;  %v2490_v9 = vmax.f32 %v2278_v36, 0.0  ;;  %v6750_v24 = vpop.xlane.xlu0 %3108 }
 0x43a   :  { %v5212_v1 = vpop.f32.mrf.mxu0 }
 0x43b   :  { %v2281_v6 = vadd.f32 %v5212_v1, %v6692_v57  ;;  %5285 = vmatprep.mubr.bf16.mxu1 %v2561_v60  ;;  %v2488_v59 = vmax.f32 %v2270_v5, 0.0  ;;  %v6755_v5 = vpop.xlane.xlu1 %3110 }
 0x43c   :  { %v2272_v8 = vpop.f32.mrf.mxu0  ;;  %5286 = vmatmul.mubr.bf16.gmra.mxu1 %v2562_v63 }
 0x43d   :  { %v2273_v51 = vadd.f32 %v6692_v57, %v2272_v8  ;;  %v2491_v15 = vmax.f32 %v2281_v6, 0.0  ;;  %v6759_v8 = vpop.xlane.xlu0 %3120 }
 0x43e   :  { %v5215_v20 = vpop.f32.mrf.mxu0  ;;  %5406 = vmatmul.mubr.bf16.gmra.mxu0 %v6517_v56 }
 0x43f   :  { %v2489_v21 = vmax.f32 %v2273_v51, 0.0  ;;  %5409 = vmatprep.mubr.bf16.mxu0 %v6524_v10  ;;  %v2564_v28 = vpack.c.bf16 %v2491_v15, %v2490_v9  ;;  %v2294_v56 = vadd.f32 %v5215_v20, %v6692_v57 }
 0x440   :  { %v2285_v43 = vpop.f32.mrf.mxu0 }
 0x441   :  { %v2563_v61 = vpack.c.bf16 %v2489_v21, %v2488_v59  ;;  %v2286_v39 = vadd.f32 %v6692_v57, %v2285_v43  ;;  %v2494_v22 = vmax.f32 %v2294_v56, 0.0 }
 0x442   :  { %v5216_v19 = vpop.f32.mrf.mxu0 }
 0x443   :  { %v2297_v17 = vadd.f32 %v5216_v19, %v6692_v57  ;;  %5289 = vmatprep.mubr.bf16.mxu1 %v2563_v61  ;;  %v2492_v37 = vmax.f32 %v2286_v39, 0.0  ;;  %v6762_v61 = vpop.xlane.xlu1 %3122 }
 0x444   :  { %v2288_v27 = vpop.f32.mrf.mxu0  ;;  %5290 = vmatmul.mubr.bf16.gmra.mxu1 %v2564_v28 }
 0x445   :  { %v2289_v10 = vadd.f32 %v6692_v57, %v2288_v27  ;;  %v2495_v41 = vmax.f32 %v2297_v17, 0.0  ;;  %v6767_v17 = vpop.xlane.xlu0 %3116 }
 0x446   :  { %v5219_v46 = vpop.f32.mrf.mxu0  ;;  %5410 = vmatmul.mubr.bf16.gmra.mxu0 %v6527_v16 }
 0x447   :  { %v2493_v29 = vmax.f32 %v2289_v10, 0.0  ;;  %5413 = vmatprep.mubr.bf16.mxu0 %v6534_v42  ;;  %v2566_v54 = vpack.c.bf16 %v2495_v41, %v2494_v22  ;;  %v2310_v16 = vadd.f32 %v5219_v46, %v6692_v57 }
 0x448   :  { %v2301_v35 = vpop.f32.mrf.mxu0 }
 0x449   :  { %v2565_v40 = vpack.c.bf16 %v2493_v29, %v2492_v37  ;;  %v2302_v60 = vadd.f32 %v6692_v57, %v2301_v35  ;;  %v2498_v20 = vmax.f32 %v2310_v16, 0.0  ;;  %v6771_v29 = vpop.xlane.xlu1 %3118 }
 0x44a   :  { %v5220_v55 = vpop.f32.mrf.mxu0 }
 0x44b   :  { %v2313_v63 = vadd.f32 %v5220_v55, %v6692_v57  ;;  %5293 = vmatprep.mubr.bf16.mxu1 %v2565_v40  ;;  %v2496_v51 = vmax.f32 %v2302_v60, 0.0 }
 0x44c   :  { %v2304_v1 = vpop.f32.mrf.mxu0  ;;  %5294 = vmatmul.mubr.bf16.gmra.mxu1 %v2566_v54  ;;  %v6773_v54 = vpop.xlane.xlu0 %3128 }
 0x44d   :  { %v2305_v42 = vadd.f32 %v6692_v57, %v2304_v1  ;;  %v2499_v6 = vmax.f32 %v2313_v63, 0.0 }
 0x44e   :  { %v5223_v36 = vpop.f32.mrf.mxu0  ;;  %5414 = vmatmul.mubr.bf16.gmra.mxu0 %v6537_v44 }
 0x44f   :  { %v2497_v15 = vmax.f32 %v2305_v42, 0.0  ;;  %5417 = vmatprep.mubr.bf16.mxu0 %v6544_v62  ;;  %v2568_v9 = vpack.c.bf16 %v2499_v6, %v2498_v20  ;;  %v2326_v44 = vadd.f32 %v5223_v36, %v6692_v57  ;;  %v6779_v6 = vpop.xlane.xlu1 %3130 }
 0x450   :  { %v2317_v59 = vpop.f32.mrf.mxu0 }
 0x451   :  { %v2567_v21 = vpack.c.bf16 %v2497_v15, %v2496_v51  ;;  %v2318_v28 = vadd.f32 %v6692_v57, %v2317_v59  ;;  %v2502_v46 = vmax.f32 %v2326_v44, 0.0  ;;  %v6781_v59 = vpop.xlane.xlu0 %3124 }
 0x452   :  { %v5224_v43 = vpop.f32.mrf.mxu0 }
 0x453   :  { %v2329_v19 = vadd.f32 %v5224_v43, %v6692_v57  ;;  %5297 = vmatprep.mubr.bf16.mxu1 %v2567_v21  ;;  %v2500_v10 = vmax.f32 %v2318_v28, 0.0 }
 0x454   :  { %v2320_v39 = vpop.f32.mrf.mxu0  ;;  %5298 = vmatmul.mubr.bf16.gmra.mxu1 %v2568_v9 }
 0x455   :  { %v2321_v62 = vadd.f32 %v6692_v57, %v2320_v39  ;;  %v2503_v56 = vmax.f32 %v2329_v19, 0.0 }
 0x456   :  { %v5227_v27 = vpop.f32.mrf.mxu0  ;;  %5418 = vmatmul.mubr.bf16.gmra.mxu0 %v6546_v2 }
 0x457   :  { %v2501_v41 = vmax.f32 %v2321_v62, 0.0  ;;  %v2570_v35 = vpack.c.bf16 %v2503_v56, %v2502_v46  ;;  %v2342_v63 = vadd.f32 %v5227_v27, %v6692_v57  ;;  %v6786_v62 = vpop.xlane.xlu1 %3126 }
 0x458   :  { %v2333_v37 = vpop.f32.mrf.mxu0 }
 0x459   :  { %v2569_v22 = vpack.c.bf16 %v2501_v41, %v2500_v10  ;;  %v2334_v55 = vadd.f32 %v6692_v57, %v2333_v37  ;;  %v2506_v15 = vmax.f32 %v2342_v63, 0.0  ;;  %v6789_v41 = vpop.xlane.xlu0 %3136 }
 0x45a   :  { %v5228_v40 = vpop.f32.mrf.mxu0 }
 0x45b   :  { %v2345_v60 = vadd.f32 %v5228_v40, %v6692_v57  ;;  %5301 = vmatprep.mubr.bf16.mxu1 %v2569_v22  ;;  %v2504_v36 = vmax.f32 %v2334_v55, 0.0  ;;  %v6791_v63 = vpop.xlane.xlu1 %3138 }
 0x45c   :  { %v2336_v16 = vpop.f32.mrf.mxu0  ;;  %5302 = vmatmul.mubr.bf16.gmra.mxu1 %v2570_v35 }
 0x45d   :  { %v2337_v2 = vadd.f32 %v6692_v57, %v2336_v16  ;;  %v2507_v1 = vmax.f32 %v2345_v60, 0.0 }
 0x45e   :  { %v5231_v42 = vpop.f32.mrf.mxu0 }
 0x45f   :  { %v2505_v51 = vmax.f32 %v2337_v2, 0.0  ;;  %v2572_v9 = vpack.c.bf16 %v2507_v1, %v2506_v15  ;;  %v2358_v44 = vadd.f32 %v5231_v42, %v6692_v57 }
 0x460   :  { %v2349_v20 = vpop.f32.mrf.mxu0 }
 0x461   :  { %v2571_v21 = vpack.c.bf16 %v2505_v51, %v2504_v36  ;;  %v2350_v28 = vadd.f32 %v6692_v57, %v2349_v20  ;;  %v2510_v22 = vmax.f32 %v2358_v44, 0.0  ;;  %v6796_v36 = vpop.xlane.xlu0 %3132 }
 0x462   :  { %v5232_v43 = vpop.f32.mrf.mxu0 }
 0x463   :  { %v2361_v19 = vadd.f32 %v5232_v43, %v6692_v57  ;;  %5305 = vmatprep.mubr.bf16.mxu1 %v2571_v21  ;;  %v2508_v46 = vmax.f32 %v2350_v28, 0.0 }
 0x464   :  { %v2352_v39 = vpop.f32.mrf.mxu0  ;;  %5306 = vmatmul.mubr.bf16.gmra.mxu1 %v2572_v9 }
 0x465   :  { %v2353_v56 = vadd.f32 %v6692_v57, %v2352_v39  ;;  %v2511_v27 = vmax.f32 %v2361_v19, 0.0  ;;  %v6799_v19 = vpop.xlane.xlu1 %3134 }
 0x466   :  { %v5235_v10 = vpop.f32.mrf.mxu0 }
 0x467   :  { %v2509_v37 = vmax.f32 %v2353_v56, 0.0  ;;  %v2574_v55 = vpack.c.bf16 %v2511_v27, %v2510_v22  ;;  %v2374_v1 = vadd.f32 %v5235_v10, %v6692_v57  ;;  %v6801_v27 = vpop.xlane.xlu0 %3144 }
 0x468   :  { %v2365_v35 = vpop.f32.mrf.mxu0 }
 0x469   :  { %v2573_v40 = vpack.c.bf16 %v2509_v37, %v2508_v46  ;;  %v2366_v16 = vadd.f32 %v6692_v57, %v2365_v35  ;;  %v2514_v43 = vmax.f32 %v2374_v1, 0.0 }
 0x46a   :  { %v5236_v60 = vpop.f32.mrf.mxu0 }
 0x46b   :  { %v2377_v2 = vadd.f32 %v5236_v60, %v6692_v57  ;;  %5309 = vmatprep.mubr.bf16.mxu1 %v2573_v40  ;;  %v2512_v21 = vmax.f32 %v2366_v16, 0.0  ;;  %v6807_v60 = vpop.xlane.xlu1 %3146 }
 0x46c   :  { %v2368_v42 = vpop.f32.mrf.mxu0  ;;  %5310 = vmatmul.mubr.bf16.gmra.mxu1 %v2574_v55 }
 0x46d   :  { %v2369_v51 = vadd.f32 %v6692_v57, %v2368_v42  ;;  %v2515_v15 = vmax.f32 %v2377_v2, 0.0 }
 0x46e   :  { %v5239_v20 = vpop.f32.mrf.mxu0 }
 0x46f   :  { %v2513_v9 = vmax.f32 %v2369_v51, 0.0  ;;  %v2576_v39 = vpack.c.bf16 %v2515_v15, %v2514_v43  ;;  %v2390_v37 = vadd.f32 %v5239_v20, %v6692_v57  ;;  %v6809_v51 = vpop.xlane.xlu0 %3140 }
 0x470   :  { %v2381_v28 = vpop.f32.mrf.mxu0 }
 0x471   :  { %v2575_v44 = vpack.c.bf16 %v2513_v9, %v2512_v21  ;;  %v2382_v10 = vadd.f32 %v6692_v57, %v2381_v28  ;;  %v2518_v1 = vmax.f32 %v2390_v37, 0.0 }
 0x472   :  { %v5240_v56 = vpop.f32.mrf.mxu0 }
 0x473   :  { %v2393_v46 = vadd.f32 %v5240_v56, %v6692_v57  ;;  %5313 = vmatprep.mubr.bf16.mxu1 %v2575_v44  ;;  %v2516_v16 = vmax.f32 %v2382_v10, 0.0  ;;  %v6817_v37 = vpop.xlane.xlu0 %3152 }
 0x474   :  { %v2384_v22 = vpop.f32.mrf.mxu0  ;;  %5314 = vmatmul.mubr.bf16.gmra.mxu1 %v2576_v39  ;;  %v6814_v39 = vpop.xlane.xlu1 %3142  ;;  %7968 = vst [vmem:[#allocation14_spill] sm:$0xff] %v6817_v37 }
 0x475   :  { %v2385_v35 = vadd.f32 %v6692_v57, %v2384_v22  ;;  %v2519_v40 = vmax.f32 %v2393_v46, 0.0 }
 0x476   :  { %v5243_v55 = vpop.f32.mrf.mxu0 }
 0x477   :  { %v2517_v2 = vmax.f32 %v2385_v35, 0.0  ;;  %v2578_v21 = vpack.c.bf16 %v2519_v40, %v2518_v1  ;;  %v2406_v28 = vadd.f32 %v5243_v55, %v6692_v57 }
 0x478   :  { %v2397_v42 = vpop.f32.mrf.mxu0 }
 0x479   :  { %v2577_v15 = vpack.c.bf16 %v2517_v2, %v2516_v16  ;;  %v2398_v43 = vadd.f32 %v6692_v57, %v2397_v42  ;;  %v2522_v40 = vmax.f32 %v2406_v28, 0.0 }
 0x47a   :  { %v5244_v9 = vpop.f32.mrf.mxu0 }
 0x47b   :  { %v2409_v20 = vadd.f32 %v5244_v9, %v6692_v57  ;;  %5317 = vmatprep.mubr.bf16.mxu1 %v2577_v15  ;;  %v2520_v22 = vmax.f32 %v2398_v43, 0.0  ;;  %v6819_v15 = vpop.xlane.xlu1 %3154 }
 0x47c   :  { %v2400_v44 = vpop.f32.mrf.mxu0  ;;  %5318 = vmatmul.mubr.bf16.gmra.mxu1 %v2578_v21  ;;  %7969 = vst [vmem:[#allocation15_spill] sm:$0xff] %v6819_v15 }
 0x47d   :  { %v2401_v56 = vadd.f32 %v6692_v57, %v2400_v44  ;;  %v2523_v10 = vmax.f32 %v2409_v20, 0.0  ;;  %v6824_v44 = vpop.xlane.xlu0 %3148 }
 0x47e   :  { %v5247_v46 = vpop.f32.mrf.mxu0  ;;  %7970 = vst [vmem:[#allocation16_spill] sm:$0xff] %v6824_v44 }
 0x47f   :  { %v2521_v35 = vmax.f32 %v2401_v56, 0.0  ;;  %v2580_v1 = vpack.c.bf16 %v2523_v10, %v2522_v40  ;;  %v2422_v9 = vadd.f32 %v5247_v46, %v6692_v57  ;;  %v6827_v15 = vpop.xlane.xlu1 %3150 }
 0x480   :  { %v2413_v16 = vpop.f32.mrf.mxu0  ;;  %7971 = vst [vmem:[#allocation17_spill] sm:$0xff] %v6827_v15 }
 0x481   :  { %v2579_v2 = vpack.c.bf16 %v2521_v35, %v2520_v22  ;;  %v2414_v55 = vadd.f32 %v6692_v57, %v2413_v16  ;;  %v2526_v35 = vmax.f32 %v2422_v9, 0.0 }
 0x482   :  { %v5248_v42 = vpop.f32.mrf.mxu0 }
 0x483   :  { %v2425_v21 = vadd.f32 %v5248_v42, %v6692_v57  ;;  %5321 = vmatprep.mubr.bf16.mxu1 %v2579_v2  ;;  %v2524_v22 = vmax.f32 %v2414_v55, 0.0  ;;  %v6829_v2 = vpop.xlane.xlu0 %3160  ;;  %v6835_v44 = vpop.xlane.xlu1 %3162 }
 0x484   :  { %v2416_v20 = vpop.f32.mrf.mxu0  ;;  %5322 = vmatmul.mubr.bf16.gmra.mxu1 %v2580_v1  ;;  %7972 = vst [vmem:[#allocation18_spill] sm:$0xff] %v6829_v2 }
 0x485   :  { %v2417_v43 = vadd.f32 %v6692_v57, %v2416_v20  ;;  %v2527_v28 = vmax.f32 %v2425_v21, 0.0 }
 0x486   :  { %v5251_v56 = vpop.f32.mrf.mxu0 }
 0x487   :  { %v2525_v10 = vmax.f32 %v2417_v43, 0.0  ;;  %v2582_v37 = vpack.c.bf16 %v2527_v28, %v2526_v35  ;;  %v2438_v20 = vadd.f32 %v5251_v56, %v6692_v57  ;;  %v6837_v2 = vpop.xlane.xlu0 %3156 }
 0x488   :  { %v2429_v40 = vpop.f32.mrf.mxu0 }
 0x489   :  { %v2581_v16 = vpack.c.bf16 %v2525_v10, %v2524_v22  ;;  %v2430_v46 = vadd.f32 %v6692_v57, %v2429_v40  ;;  %v2530_v10 = vmax.f32 %v2438_v20, 0.0  ;;  %v6847_v20 = vpop.xlane.xlu1 %3158 }
 0x48a   :  { %v5252_v42 = vpop.f32.mrf.mxu0 }
 0x48b   :  { %v2441_v1 = vadd.f32 %v5252_v42, %v6692_v57  ;;  %5325 = vmatprep.mubr.bf16.mxu1 %v2581_v16  ;;  %v2528_v22 = vmax.f32 %v2430_v46, 0.0 }
 0x48c   :  { %v2432_v21 = vpop.f32.mrf.mxu0  ;;  %5326 = vmatmul.mubr.bf16.gmra.mxu1 %v2582_v37  ;;  %v6844_v37 = vld [vmem:[%s7938_s14] ss:$0 sm:$0xff] }
 0x48d   :  { %v2433_v55 = vadd.f32 %v6692_v57, %v2432_v21  ;;  %v2531_v9 = vmax.f32 %v2441_v1, 0.0 }
 0x48e   :  { %v5255_v43 = vpop.f32.mrf.mxu0 }
 0x48f   :  { %v2529_v28 = vmax.f32 %v2433_v55, 0.0  ;;  %v2584_v15 = vpack.c.bf16 %v2531_v9, %v2530_v10  ;;  %v2454_v46 = vadd.f32 %v5255_v43, %v6692_v57  ;;  %v6856_v10 = vpop.xlane.xlu0 %3168  ;;  %v6864_v43 = vadd.f32 %v6844_v37, %v6659_v52 }
 0x490   :  { %v2445_v35 = vpop.f32.mrf.mxu0 }
 0x491   :  { %v2583_v40 = vpack.c.bf16 %v2529_v28, %v2528_v22  ;;  %v2446_v16 = vadd.f32 %v6692_v57, %v2445_v35  ;;  %v3550_v22 = vadd.f32 %v6844_v37, %v6657_v38  ;;  %v6854_v28 = vadd.f32 %v6844_v37, %v6653_v23 }
 0x492   :  { %v5256_v42 = vpop.f32.mrf.mxu0  ;;  %v2534_v38 = vmax.f32 %v2454_v46, 0.0  ;;  %v6872_v23 = vadd.f32 %v6844_v37, %v6667_v0  ;;  %v6892_v0 = vadd.f32 %v6844_v37, %v6681_v33  ;;  %v6908_v33 = vadd.f32 %v6844_v37, %v6694_v48 }
 0x493   :  { %v2457_v56 = vadd.f32 %v5256_v42, %v6692_v57  ;;  %5329 = vmatprep.mubr.bf16.mxu1 %v2583_v40  ;;  %v2532_v35 = vmax.f32 %v2446_v16, 0.0  ;;  %v6868_v42 = vadd.f32 %v6844_v37, %v6664_v47  ;;  %v6876_v16 = vadd.f32 %v6844_v37, %v6669_v14 }
 0x494   :  { %v2448_v1 = vpop.f32.mrf.mxu0  ;;  %5330 = vmatmul.mubr.bf16.gmra.mxu1 %v2584_v15  ;;  %v6860_v15 = vadd.f32 %v6844_v37, %v6662_v50  ;;  %v6880_v50 = vadd.f32 %v6844_v37, %v6673_v34  ;;  %v6888_v47 = vadd.f32 %v6844_v37, %v6678_v7  ;;  %v6900_v34 = vadd.f32 %v6844_v37, %v6686_v45 }
 0x495   :  { %v2449_v21 = vadd.f32 %v6692_v57, %v2448_v1  ;;  %v2535_v55 = vmax.f32 %v2457_v56, 0.0  ;;  %v6884_v1 = vadd.f32 %v6844_v37, %v6675_v18  ;;  %v6902_v18 = vpop.xlane.xlu1 %3170  ;;  %v6925_v48 = vadd.f32 %v6844_v37, %v6713_v26 }
 0x496   :  { %v5259_v9 = vpop.f32.mrf.mxu0  ;;  %v6944_v26 = vadd.f32 %v6844_v37, %v6728_v58  ;;  %v6960_v58 = vadd.f32 %v6844_v37, %v6747_v13  ;;  %v6978_v13 = vadd.f32 %v6844_v37, %v6762_v61  ;;  %v6993_v61 = vadd.f32 %v6844_v37, %v6773_v54 }
 0x497   :  { %v2533_v40 = vmax.f32 %v2449_v21, 0.0  ;;  %v2586_v46 = vpack.c.bf16 %v2535_v55, %v2534_v38  ;;  %v6896_v21 = vadd.f32 %v6844_v37, %v6683_v4  ;;  %v6912_v55 = vadd.f32 %v6844_v37, %v6699_v53 }
 0x498   :  { %v2461_v56 = vpop.f32.mrf.mxu0  ;;  %v6916_v4 = vadd.f32 %v6844_v37, %v6704_v12  ;;  %v2470_v45 = vadd.f32 %v5259_v9, %v6692_v57  ;;  %v6921_v38 = vadd.f32 %v6844_v37, %v6706_v32  ;;  %v6929_v53 = vadd.f32 %v6844_v37, %v6716_v31  ;;  %7973 = vst [vmem:[#allocation19_spill] sm:$0xff] %v6944_v26 }
 0x499   :  { %v2585_v52 = vpack.c.bf16 %v2533_v40, %v2532_v35  ;;  %v2462_v35 = vadd.f32 %v6692_v57, %v2461_v56  ;;  %v6931_v56 = vpop.xlane.xlu0 %3164  ;;  %v6936_v9 = vadd.f32 %v6844_v37, %v6721_v3  ;;  %v6940_v32 = vadd.f32 %v6844_v37, %v6725_v49  ;;  %7975 = vst [vmem:[#allocation21_spill] sm:$0xff] %v6960_v58 }
 0x49a   :  { %v5260_v14 = vpop.f32.mrf.mxu0  ;;  %v6948_v31 = vadd.f32 %v6844_v37, %v6733_v11  ;;  %v6952_v3 = vadd.f32 %v6844_v37, %v6738_v25  ;;  %v6956_v49 = vadd.f32 %v6844_v37, %v6740_v30  ;;  %v6964_v11 = vadd.f32 %v6844_v37, %v6750_v24 }
 0x49b   :  { %v2473_v7 = vadd.f32 %v5260_v14, %v6692_v57  ;;  %5333 = vmatprep.mubr.bf16.mxu1 %v2585_v52  ;;  %v2536_v14 = vmax.f32 %v2462_v35, 0.0  ;;  %v6966_v35 = vpop.xlane.xlu1 %3166  ;;  %v6974_v30 = vadd.f32 %v6844_v37, %v6759_v8  ;;  %v6982_v58 = vadd.f32 %v6844_v37, %v6767_v17 }
 0x49c   :  { %v2464_v40 = vpop.f32.mrf.mxu0  ;;  %5334 = vmatmul.mubr.bf16.gmra.mxu1 %v2586_v46  ;;  %7974 = vst [vmem:[#allocation20_spill] sm:$0xff] %v6952_v3  ;;  %v6970_v3 = vadd.f32 %v6844_v37, %v6755_v5  ;;  %v6989_v8 = vadd.f32 %v6844_v37, %v6771_v29  ;;  %v7001_v17 = vadd.f32 %v6844_v37, %v6781_v59 }
 0x49d   :  { %v2465_v12 = vadd.f32 %v6692_v57, %v2464_v40  ;;  %v2539_v52 = vmax.f32 %v2473_v7, 0.0  ;;  %v2538_v7 = vmax.f32 %v2470_v45, 0.0  ;;  %v7008_v54 = vadd.f32 %v6844_v37, %v6786_v62 }
 0x49e   :  { %v5359_v46 = vpop.f32.mrf.mxu0  ;;  %v7016_v59 = vadd.f32 %v6844_v37, %v6791_v63  ;;  %v7034_v63 = vadd.f32 %v6844_v37, %v6801_v27  ;;  %v7049_v27 = vadd.f32 %v6844_v37, %v6814_v39  ;;  %v7982_v39 = vld [vmem:[#allocation16_spill] sm:$0xff] }
 0x49f   :  { %v2537_v57 = vmax.f32 %v2465_v12, 0.0  ;;  %v3614_v40 = vmul.f32 2.0, %v5359_v46  ;;  %v2588_v45 = vpack.c.bf16 %v2539_v52, %v2538_v7  ;;  %v6997_v52 = vadd.f32 %v6844_v37, %v6779_v6 }
 0x4a0   :  { %v3286_v26 = vpop.f32.mrf.mxu0  ;;  %v7012_v6 = vadd.f32 %v6844_v37, %v6789_v41  ;;  %v7030_v41 = vadd.f32 %v6844_v37, %v6799_v19  ;;  %v7045_v19 = vadd.f32 %v6844_v37, %v6809_v51  ;;  %7977 = vst [vmem:[#allocation23_spill] sm:$0xff] %v7049_v27  ;;  %v7980_v51 = vld [vmem:[#allocation15_spill] sm:$0xff]  ;;  %v7066_v27 = vadd.f32 %v6844_v37, %v7982_v39 }
 0x4a1   :  { %v2587_v12 = vpack.c.bf16 %v2537_v57, %v2536_v14  ;;  %v3678_v46 = vsub.f32 %v3550_v22, %v3614_v40  ;;  %v3612_v25 = vmul.f32 2.0, %v3286_v26  ;;  %v6984_v22 = vpop.xlane.xlu0 %3176  ;;  %v7080_v39 = vadd.f32 %v6844_v37, %v6835_v44 }
 0x4a2   :  { %v5360_v24 = vpop.f32.mrf.mxu0  ;;  %v7097_v44 = vadd.f32 %v6844_v37, %v6856_v10  ;;  %v7114_v10 = vadd.f32 %v6844_v37, %v6966_v35 }
 0x4a3   :  { %v3742_v26 = vmax.f32 %v3678_v46, 0.0  ;;  %v3676_v5 = vsub.f32 %v6854_v28, %v3612_v25  ;;  %v3615_v14 = vmul.f32 2.0, %v5360_v24  ;;  %5337 = vmatprep.mubr.bf16.mxu1 %v2587_v12  ;;  %v7020_v12 = vadd.f32 %v6844_v37, %v6796_v36  ;;  %v7022_v25 = vpop.xlane.xlu1 %3178 }
 0x4a4   :  { %5338 = vmatmul.mubr.bf16.gmra.mxu1 %v2588_v45  ;;  %v3289_v28 = vpop.f32.mrf.mxu0  ;;  %v7038_v36 = vadd.f32 %v6844_v37, %v6807_v60  ;;  %7988 = vst [vmem:[#allocation24_spill] sm:$0xff] %v7114_v10 }
 0x4a5   :  { %v7003_v57 = vadd.f32 1.0, %v3742_v26  ;;  %v3740_v40 = vmax.f32 %v3676_v5, 0.0  ;;  %v3679_v29 = vsub.f32 %v6860_v15, %v3615_v14  ;;  %v3613_v7 = vmul.f32 2.0, %v3289_v28  ;;  %v3173_v5 = vpop.xlane.xlu0 %3172 }
 0x4a6   :  { %v5363_v46 = vpop.f32.mrf.mxu0  ;;  %7976 = vst [vmem:[#allocation22_spill] sm:$0xff] %v7038_v36  ;;  %v7128_v35 = vadd.f32 %v6844_v37, %v3173_v5 }
 0x4a7   :  { %5515 = vrcp.f32 %v7003_v57  ;;  %v7025_v15 = vadd.f32 1.0, %v3740_v40  ;;  %v3743_v62 = vmax.f32 %v3679_v29, 0.0  ;;  %v3677_v45 = vsub.f32 %v6864_v43, %v3613_v7  ;;  %v7978_v40 = vld [vmem:[#allocation14_spill] sm:$0xff]  ;;  %v3175_v36 = vpop.xlane.xlu1 %3174 }
 0x4a8   :  { %v3618_v24 = vmul.f32 2.0, %v5363_v46  ;;  %v3302_v26 = vpop.f32.mrf.mxu0  ;;  %v7053_v60 = vadd.f32 %v6844_v37, %v7978_v40  ;;  %v7983_v40 = vld [vmem:[#allocation17_spill] sm:$0xff]  ;;  %7991 = vst [vmem:[#allocation27_spill] sm:$0xff] %v7128_v35 }
 0x4a9   :  { %5517 = vrcp.f32 %v7025_v15  ;;  %v7041_v14 = vadd.f32 1.0, %v3743_v62  ;;  %v3741_v43 = vmax.f32 %v3677_v45, 0.0  ;;  %v3616_v28 = vmul.f32 2.0, %v3302_v26 }
 0x4aa   :  { %7979 = vst [vmem:[#allocation14_spill] sm:$0xff] %v7053_v60  ;;  %v3682_v29 = vsub.f32 %v6868_v42, %v3618_v24  ;;  %v5364_v7 = vpop.f32.mrf.mxu0  ;;  %v7062_v26 = vadd.f32 %v6844_v37, %v7980_v51  ;;  %v7070_v60 = vadd.f32 %v6844_v37, %v7983_v40  ;;  %v7084_v40 = vadd.f32 %v6844_v37, %v6837_v2 }
 0x4ab   :  { %5519 = vrcp.f32 %v7041_v14  ;;  %v7057_v46 = vadd.f32 1.0, %v3741_v43  ;;  %v3680_v62 = vsub.f32 %v6876_v16, %v3616_v28  ;;  %v3619_v45 = vmul.f32 2.0, %v5364_v7  ;;  %v7985_v7 = vld [vmem:[#allocation18_spill] sm:$0xff] }
 0x4ac   :  { %7981 = vst [vmem:[#allocation15_spill] sm:$0xff] %v7062_v26  ;;  %7984 = vst [vmem:[#allocation16_spill] sm:$0xff] %v7070_v60  ;;  %v3746_v42 = vmax.f32 %v3682_v29, 0.0  ;;  %v3305_v24 = vpop.f32.mrf.mxu0  ;;  %v7076_v51 = vadd.f32 %v6844_v37, %v7985_v7  ;;  %v3185_v26 = vpop.xlane.xlu0 %3184  ;;  %v7093_v7 = vadd.f32 %v6844_v37, %v6847_v20  ;;  %v7101_v2 = vadd.f32 %v6844_v37, %v6902_v18 }
 0x4ad   :  { %5521 = vrcp.f32 %v7057_v46  ;;  %v3744_v43 = vmax.f32 %v3680_v62, 0.0  ;;  %v3683_v16 = vsub.f32 %v6872_v23, %v3619_v45  ;;  %v3617_v28 = vmul.f32 2.0, %v3305_v24 }
 0x4ae   :  { %v7086_v29 = vadd.f32 1.0, %v3746_v42  ;;  %v5367_v60 = vpop.f32.mrf.mxu0  ;;  %7986 = vst [vmem:[#allocation17_spill] sm:$0xff] %v7101_v2  ;;  %v7110_v20 = vadd.f32 %v6844_v37, %v6931_v56  ;;  %v7118_v18 = vadd.f32 %v6844_v37, %v6984_v22  ;;  %v3187_v2 = vpop.xlane.xlu1 %3186  ;;  %v7125_v56 = vadd.f32 %v6844_v37, %v7022_v25 }
 0x4af   :  { %v7088_v62 = vadd.f32 1.0, %v3744_v43  ;;  %v3747_v23 = vmax.f32 %v3683_v16, 0.0  ;;  %v3681_v45 = vsub.f32 %v6880_v50, %v3617_v28  ;;  %v3622_v24 = vmul.f32 2.0, %v5367_v60 }
 0x4b0   :  { %5523 = vrcp.f32 %v7086_v29  ;;  %v3318_v42 = vpop.f32.mrf.mxu0  ;;  %7987 = vst [vmem:[#allocation18_spill] sm:$0xff] %v7110_v20  ;;  %7989 = vst [vmem:[#allocation25_spill] sm:$0xff] %v7118_v18  ;;  %v7131_v22 = vadd.f32 %v6844_v37, %v3175_v36  ;;  %v3181_v10 = vpop.xlane.xlu0 %3180  ;;  %v7139_v25 = vadd.f32 %v6844_v37, %v3185_v26  ;;  %v7142_v5 = vadd.f32 %v6844_v37, %v3187_v2 }
 0x4b1   :  { %5525 = vrcp.f32 %v7088_v62  ;;  %v7105_v43 = vadd.f32 1.0, %v3747_v23  ;;  %v3745_v50 = vmax.f32 %v3681_v45, 0.0  ;;  %v3686_v60 = vsub.f32 %v6884_v1, %v3622_v24  ;;  %7990 = vst [vmem:[#allocation26_spill] sm:$0xff] %v7125_v56 }
 0x4b2   :  { %v3620_v16 = vmul.f32 2.0, %v3318_v42  ;;  %v5368_v28 = vpop.f32.mrf.mxu0  ;;  %7992 = vst [vmem:[#allocation28_spill] sm:$0xff] %v7131_v22  ;;  %7993 = vst [vmem:[#allocation29_spill] sm:$0xff] %v7139_v25 }
 0x4b3   :  { %5527 = vrcp.f32 %v7105_v43  ;;  %v7121_v23 = vadd.f32 1.0, %v3745_v50  ;;  %v3750_v1 = vmax.f32 %v3686_v60, 0.0  ;;  %v3623_v45 = vmul.f32 2.0, %v5368_v28  ;;  %7994 = vst [vmem:[#allocation30_spill] sm:$0xff] %v7142_v5 }
 0x4b4   :  { %v5516_v24 = vpop.eup %5515  ;;  %v3684_v42 = vsub.f32 %v6892_v0, %v3620_v16  ;;  %v3321_v18 = vpop.f32.mrf.mxu0 }
 0x4b5   :  { %5529 = vrcp.f32 %v7121_v23  ;;  %v7135_v50 = vadd.f32 1.0, %v3750_v1  ;;  %v3687_v60 = vsub.f32 %v6888_v47, %v3623_v45  ;;  %v3621_v28 = vmul.f32 2.0, %v3321_v18 }
 0x4b6   :  { %v5518_v20 = vpop.eup %5517  ;;  %v3748_v36 = vmax.f32 %v3684_v42, 0.0  ;;  %v5371_v22 = vpop.f32.mrf.mxu0  ;;  %v3934_v0 = vmul.f32 %v5516_v24, %v7003_v57  ;;  %v7148_v47 = vadd.f32 %v6844_v37, %v3181_v10 }
 0x4b7   :  { %5531 = vrcp.f32 %v7135_v50  ;;  %v3751_v16 = vmax.f32 %v3687_v60, 0.0  ;;  %v3685_v1 = vsub.f32 %v6896_v21, %v3621_v28  ;;  %v3626_v56 = vmul.f32 2.0, %v5371_v22 }
 0x4b8   :  { %v5520_v35 = vpop.eup %5519  ;;  %v7150_v18 = vadd.f32 1.0, %v3748_v36  ;;  %v3334_v26 = vpop.f32.mrf.mxu0  ;;  %v3998_v45 = vsub.f32 2.0, %v3934_v0  ;;  %v3932_v2 = vmul.f32 %v5518_v20, %v7025_v15 }
 0x4b9   :  { %v7153_v42 = vadd.f32 1.0, %v3751_v16  ;;  %v3749_v5 = vmax.f32 %v3685_v1, 0.0  ;;  %v3690_v57 = vsub.f32 %v6900_v34, %v3626_v56  ;;  %v3624_v25 = vmul.f32 2.0, %v3334_v26 }
 0x4ba   :  { %v5522_v60 = vpop.eup %5521  ;;  %5533 = vrcp.f32 %v7150_v18  ;;  %v5372_v21 = vpop.f32.mrf.mxu0  ;;  %v7157_v22 = vmul.f32 %v5516_v24, %v3998_v45  ;;  %v3996_v37 = vsub.f32 2.0, %v3932_v2  ;;  %v3935_v10 = vmul.f32 %v5520_v35, %v7041_v14 }
 0x4bb   :  { %5535 = vrcp.f32 %v7153_v42  ;;  %v7161_v28 = vadd.f32 1.0, %v3749_v5  ;;  %v3754_v15 = vmax.f32 %v3690_v57, 0.0  ;;  %v3688_v36 = vsub.f32 %v6912_v55, %v3624_v25 }
 0x4bc   :  { %v3627_v0 = vmul.f32 2.0, %v5372_v21  ;;  %4128 = vadd.xlane.f32.xlu0 %v7157_v22  ;;  %v3337_v34 = vpop.f32.mrf.mxu0  ;;  %v7165_v56 = vmul.f32 %v5518_v20, %v3996_v37  ;;  %v3999_v16 = vsub.f32 2.0, %v3935_v10  ;;  %v3933_v24 = vmul.f32 %v5522_v60, %v7057_v46 }
 0x4bd   :  { %v5524_v1 = vpop.eup %5523  ;;  %5537 = vrcp.f32 %v7161_v28  ;;  %v7169_v14 = vadd.f32 1.0, %v3754_v15  ;;  %v3752_v26 = vmax.f32 %v3688_v36, 0.0  ;;  %v3625_v5 = vmul.f32 2.0, %v3337_v34 }
 0x4be   :  { %v5526_v45 = vpop.eup %5525  ;;  %v3691_v2 = vsub.f32 %v6908_v33, %v3627_v0  ;;  %v5375_v55 = vpop.f32.mrf.mxu0  ;;  %v7172_v25 = vmul.f32 %v5520_v35, %v3999_v16  ;;  %v3997_v57 = vsub.f32 2.0, %v3933_v24  ;;  %v3938_v20 = vmul.f32 %v5524_v1, %v7086_v29 }
 0x4bf   :  { %5539 = vrcp.f32 %v7169_v14  ;;  %v7176_v21 = vadd.f32 1.0, %v3752_v26  ;;  %v3689_v46 = vsub.f32 %v6916_v4, %v3625_v5  ;;  %v3630_v37 = vmul.f32 2.0, %v5375_v55 }
 0x4c0   :  { %7995 = vst [vmem:[#allocation31_spill] sm:$0xff] %v7172_v25  ;;  %v5528_v10 = vpop.eup %5527  ;;  %v3755_v15 = vmax.f32 %v3691_v2, 0.0  ;;  %4124 = vadd.xlane.f32.xlu0 %v7165_v56  ;;  %4130 = vadd.xlane.f32.xlu1 %v7172_v25  ;;  %v3350_v33 = vpop.f32.mrf.mxu0  ;;  %v7181_v36 = vmul.f32 %v5522_v60, %v3997_v57  ;;  %v4002_v35 = vsub.f32 2.0, %v3938_v20  ;;  %v3936_v0 = vmul.f32 %v5526_v45, %v7088_v62 }
 0x4c1   :  { %5541 = vrcp.f32 %v7176_v21  ;;  %v3753_v29 = vmax.f32 %v3689_v46, 0.0  ;;  %v3694_v34 = vsub.f32 %v6921_v38, %v3630_v37  ;;  %v3628_v16 = vmul.f32 2.0, %v3350_v33 }
 0x4c2   :  { %v5530_v4 = vpop.eup %5529  ;;  %v7186_v24 = vadd.f32 1.0, %v3755_v15  ;;  %v5376_v26 = vpop.f32.mrf.mxu0  ;;  %v7188_v5 = vmul.f32 %v5524_v1, %v4002_v35  ;;  %v4000_v2 = vsub.f32 2.0, %v3936_v0  ;;  %v3939_v55 = vmul.f32 %v5528_v10, %v7105_v43 }
 0x4c3   :  { %v7191_v60 = vadd.f32 1.0, %v3753_v29  ;;  %v3758_v57 = vmax.f32 %v3694_v34, 0.0  ;;  %v3692_v62 = vsub.f32 %v6929_v53, %v3628_v16  ;;  %v3631_v20 = vmul.f32 2.0, %v5376_v26 }
 0x4c4   :  { %v5532_v25 = vpop.eup %5531  ;;  %5543 = vrcp.f32 %v7186_v24  ;;  %4126 = vadd.xlane.f32.xlu1 %v7181_v36  ;;  %4136 = vadd.xlane.f32.xlu0 %v7188_v5  ;;  %v3353_v38 = vpop.f32.mrf.mxu0  ;;  %v7197_v46 = vmul.f32 %v5526_v45, %v4000_v2  ;;  %v4003_v1 = vsub.f32 2.0, %v3939_v55  ;;  %v3937_v37 = vmul.f32 %v5530_v4, %v7121_v23 }
 0x4c5   :  { %5545 = vrcp.f32 %v7191_v60  ;;  %v7201_v43 = vadd.f32 1.0, %v3758_v57  ;;  %v3756_v15 = vmax.f32 %v3692_v62, 0.0  ;;  %v3695_v53 = vsub.f32 %v6925_v48, %v3631_v20 }
 0x4c6   :  { %v3629_v33 = vmul.f32 2.0, %v3353_v38  ;;  %v5379_v35 = vpop.f32.mrf.mxu0  ;;  %v7204_v0 = vmul.f32 %v5528_v10, %v4003_v1  ;;  %v4001_v29 = vsub.f32 2.0, %v3937_v37  ;;  %v3942_v34 = vmul.f32 %v5532_v25, %v7135_v50 }
 0x4c7   :  { %v5534_v16 = vpop.eup %5533  ;;  %5547 = vrcp.f32 %v7201_v43  ;;  %v7208_v45 = vadd.f32 1.0, %v3756_v15  ;;  %v3759_v23 = vmax.f32 %v3695_v53, 0.0  ;;  %v3634_v26 = vmul.f32 2.0, %v5379_v35 }
 0x4c8   :  { %v5536_v2 = vpop.eup %5535  ;;  %v3693_v55 = vsub.f32 %v6936_v9, %v3629_v33  ;;  %4132 = vadd.xlane.f32.xlu0 %v7197_v46  ;;  %4138 = vadd.xlane.f32.xlu1 %v7204_v0  ;;  %v3366_v48 = vpop.f32.mrf.mxu0  ;;  %v7213_v10 = vmul.f32 %v5530_v4, %v4001_v29  ;;  %v4006_v57 = vsub.f32 2.0, %v3942_v34  ;;  %v3940_v50 = vmul.f32 %v5534_v16, %v7150_v18 }
 0x4c9   :  { %5549 = vrcp.f32 %v7208_v45  ;;  %v7217_v62 = vadd.f32 1.0, %v3759_v23  ;;  %v3698_v20 = vsub.f32 %v6940_v32, %v3634_v26  ;;  %v3632_v38 = vmul.f32 2.0, %v3366_v48  ;;  %v7996_v48 = vld [vmem:[#allocation19_spill] sm:$0xff] }
 0x4ca   :  { %v5538_v1 = vpop.eup %5537  ;;  %v3757_v37 = vmax.f32 %v3693_v55, 0.0  ;;  %v5380_v9 = vpop.f32.mrf.mxu0  ;;  %v7220_v15 = vmul.f32 %v5532_v25, %v4006_v57  ;;  %v4004_v53 = vsub.f32 2.0, %v3940_v50  ;;  %v3943_v33 = vmul.f32 %v5536_v2, %v7153_v42 }
 0x4cb   :  { %5551 = vrcp.f32 %v7217_v62  ;;  %v3762_v4 = vmax.f32 %v3698_v20, 0.0  ;;  %v3696_v18 = vsub.f32 %v6948_v31, %v3632_v38  ;;  %v3635_v35 = vmul.f32 2.0, %v5380_v9 }
 0x4cc   :  { %v5540_v29 = vpop.eup %5539  ;;  %v7225_v34 = vadd.f32 1.0, %v3757_v37  ;;  %4134 = vadd.xlane.f32.xlu1 %v7213_v10  ;;  %4144 = vadd.xlane.f32.xlu0 %v7220_v15  ;;  %v3369_v32 = vpop.f32.mrf.mxu0  ;;  %v7229_v23 = vmul.f32 %v5534_v16, %v4004_v53  ;;  %v4007_v25 = vsub.f32 2.0, %v3943_v33  ;;  %v3941_v26 = vmul.f32 %v5538_v1, %v7161_v28  ;;  %v7998_v53 = vld [vmem:[#allocation20_spill] sm:$0xff] }
 0x4cd   :  { %v7232_v42 = vadd.f32 1.0, %v3762_v4  ;;  %v3760_v55 = vmax.f32 %v3696_v18, 0.0  ;;  %v3699_v57 = vsub.f32 %v7996_v48, %v3635_v35  ;;  %v3633_v31 = vmul.f32 2.0, %v3369_v32 }
 0x4ce   :  { %v5542_v50 = vpop.eup %5541  ;;  %5553 = vrcp.f32 %v7225_v34  ;;  %v5383_v20 = vpop.f32.mrf.mxu0  ;;  %v7236_v38 = vmul.f32 %v5536_v2, %v4007_v25  ;;  %v4005_v37 = vsub.f32 2.0, %v3941_v26  ;;  %v3946_v9 = vmul.f32 %v5540_v29, %v7169_v14 }
 0x4cf   :  { %5555 = vrcp.f32 %v7232_v42  ;;  %v7240_v16 = vadd.f32 1.0, %v3760_v55  ;;  %v3763_v28 = vmax.f32 %v3699_v57, 0.0  ;;  %v3697_v33 = vsub.f32 %v7998_v53, %v3633_v31 }
 0x4d0   :  { %7997 = vst [vmem:[#allocation19_spill] sm:$0xff] %v7236_v38  ;;  %v3638_v4 = vmul.f32 2.0, %v5383_v20  ;;  %4140 = vadd.xlane.f32.xlu0 %v7229_v23  ;;  %4146 = vadd.xlane.f32.xlu1 %v7236_v38  ;;  %v3382_v18 = vpop.f32.mrf.mxu0  ;;  %v7245_v35 = vmul.f32 %v5538_v1, %v4005_v37  ;;  %v4010_v2 = vsub.f32 2.0, %v3946_v9  ;;  %v3944_v32 = vmul.f32 %v5542_v50, %v7176_v21 }
 0x4d1   :  { %v5544_v25 = vpop.eup %5543  ;;  %5557 = vrcp.f32 %v7240_v16  ;;  %v7249_v14 = vadd.f32 1.0, %v3763_v28  ;;  %v3761_v26 = vmax.f32 %v3697_v33, 0.0  ;;  %v3636_v55 = vmul.f32 2.0, %v3382_v18  ;;  %v8001_v18 = vld [vmem:[#allocation21_spill] sm:$0xff] }
 0x4d2   :  { %7999 = vst [vmem:[#allocation20_spill] sm:$0xff] %v7245_v35  ;;  %v5546_v48 = vpop.eup %5545  ;;  %v3702_v57 = vsub.f32 %v6956_v49, %v3638_v4  ;;  %v5384_v31 = vpop.f32.mrf.mxu0  ;;  %v7252_v20 = vmul.f32 %v5540_v29, %v4010_v2  ;;  %v4008_v53 = vsub.f32 2.0, %v3944_v32  ;;  %v3947_v1 = vmul.f32 %v5544_v25, %v7186_v24 }
 0x4d3   :  { %5559 = vrcp.f32 %v7249_v14  ;;  %v7256_v37 = vadd.f32 1.0, %v3761_v26  ;;  %v3700_v21 = vsub.f32 %v6964_v11, %v3636_v55  ;;  %v3639_v9 = vmul.f32 2.0, %v5384_v31 }
 0x4d4   :  { %8000 = vst [vmem:[#allocation32_spill] sm:$0xff] %v7252_v20  ;;  %v5548_v28 = vpop.eup %5547  ;;  %v3766_v38 = vmax.f32 %v3702_v57, 0.0  ;;  %4142 = vadd.xlane.f32.xlu1 %v7245_v35  ;;  %4152 = vadd.xlane.f32.xlu0 %v7252_v20  ;;  %v3385_v49 = vpop.f32.mrf.mxu0  ;;  %v7261_v33 = vmul.f32 %v5542_v50, %v4008_v53  ;;  %v4011_v29 = vsub.f32 2.0, %v3947_v1  ;;  %v3945_v4 = vmul.f32 %v5546_v48, %v7191_v60 }
 0x4d5   :  { %5561 = vrcp.f32 %v7256_v37  ;;  %v3764_v24 = vmax.f32 %v3700_v21, 0.0  ;;  %v3703_v2 = vsub.f32 %v8001_v18, %v3639_v9  ;;  %v3637_v32 = vmul.f32 2.0, %v3385_v49 }
 0x4d6   :  { %v5550_v11 = vpop.eup %5549  ;;  %v7266_v26 = vadd.f32 1.0, %v3766_v38  ;;  %v5387_v55 = vpop.f32.mrf.mxu0  ;;  %v7268_v57 = vmul.f32 %v5544_v25, %v4011_v29  ;;  %v4009_v31 = vsub.f32 2.0, %v3945_v4  ;;  %v3950_v20 = vmul.f32 %v5548_v28, %v7201_v43 }
 0x4d7   :  { %v7271_v50 = vadd.f32 1.0, %v3764_v24  ;;  %v3767_v53 = vmax.f32 %v3703_v2, 0.0  ;;  %v3701_v60 = vsub.f32 %v6970_v3, %v3637_v32  ;;  %v3642_v1 = vmul.f32 2.0, %v5387_v55 }
 0x4d8   :  { %v5552_v35 = vpop.eup %5551  ;;  %5563 = vrcp.f32 %v7266_v26  ;;  %4148 = vadd.xlane.f32.xlu0 %v7261_v33  ;;  %4154 = vadd.xlane.f32.xlu1 %v7268_v57  ;;  %v3398_v38 = vpop.f32.mrf.mxu0  ;;  %v7277_v21 = vmul.f32 %v5546_v48, %v4009_v31  ;;  %v4014_v25 = vsub.f32 2.0, %v3950_v20  ;;  %v3948_v9 = vmul.f32 %v5550_v11, %v7208_v45 }
 0x4d9   :  { %5565 = vrcp.f32 %v7271_v50  ;;  %v7281_v43 = vadd.f32 1.0, %v3767_v53  ;;  %v3765_v49 = vmax.f32 %v3701_v60, 0.0  ;;  %v3706_v3 = vsub.f32 %v6974_v30, %v3642_v1 }
 0x4da   :  { %v3640_v29 = vmul.f32 2.0, %v3398_v38  ;;  %v5388_v4 = vpop.f32.mrf.mxu0  ;;  %v7284_v24 = vmul.f32 %v5548_v28, %v4014_v25  ;;  %v4012_v18 = vsub.f32 2.0, %v3948_v9  ;;  %v3951_v2 = vmul.f32 %v5552_v35, %v7217_v62 }
 0x4db   :  { %v5554_v32 = vpop.eup %5553  ;;  %5567 = vrcp.f32 %v7281_v43  ;;  %v7288_v48 = vadd.f32 1.0, %v3765_v49  ;;  %v3770_v45 = vmax.f32 %v3706_v3, 0.0  ;;  %v3643_v20 = vmul.f32 2.0, %v5388_v4 }
 0x4dc   :  { %v5556_v55 = vpop.eup %5555  ;;  %v3704_v31 = vsub.f32 %v6982_v58, %v3640_v29  ;;  %4150 = vadd.xlane.f32.xlu1 %v7277_v21  ;;  %4160 = vadd.xlane.f32.xlu0 %v7284_v24  ;;  %v3401_v30 = vpop.f32.mrf.mxu0  ;;  %v7293_v28 = vmul.f32 %v5550_v11, %v4012_v18  ;;  %v4015_v53 = vsub.f32 2.0, %v3951_v2  ;;  %v3949_v62 = vmul.f32 %v5554_v32, %v7225_v34 }
 0x4dd   :  { %5569 = vrcp.f32 %v7288_v48  ;;  %v7297_v60 = vadd.f32 1.0, %v3770_v45  ;;  %v3707_v1 = vsub.f32 %v6978_v13, %v3643_v20  ;;  %v3641_v38 = vmul.f32 2.0, %v3401_v30 }
 0x4de   :  { %v5558_v25 = vpop.eup %5557  ;;  %v3768_v9 = vmax.f32 %v3704_v31, 0.0  ;;  %v5391_v58 = vpop.f32.mrf.mxu0  ;;  %v7300_v49 = vmul.f32 %v5552_v35, %v4015_v53  ;;  %v4013_v3 = vsub.f32 2.0, %v3949_v62  ;;  %v3954_v29 = vmul.f32 %v5556_v55, %v7232_v42 }
 0x4df   :  { %5571 = vrcp.f32 %v7297_v60  ;;  %v3771_v11 = vmax.f32 %v3707_v1, 0.0  ;;  %v3705_v34 = vsub.f32 %v6989_v8, %v3641_v38  ;;  %v3646_v4 = vmul.f32 2.0, %v5391_v58 }
 0x4e0   :  { %v5560_v18 = vpop.eup %5559  ;;  %v7305_v2 = vadd.f32 1.0, %v3768_v9  ;;  %4156 = vadd.xlane.f32.xlu0 %v7293_v28  ;;  %4162 = vadd.xlane.f32.xlu1 %v7300_v49  ;;  %v3414_v13 = vpop.f32.mrf.mxu0  ;;  %v7309_v45 = vmul.f32 %v5554_v32, %v4013_v3  ;;  %v4018_v35 = vsub.f32 2.0, %v3954_v29  ;;  %v3952_v20 = vmul.f32 %v5558_v25, %v7240_v16 }
 0x4e1   :  { %v7312_v42 = vadd.f32 1.0, %v3771_v11  ;;  %v3769_v31 = vmax.f32 %v3705_v34, 0.0  ;;  %v3710_v30 = vsub.f32 %v6993_v61, %v3646_v4  ;;  %v3644_v8 = vmul.f32 2.0, %v3414_v13 }
 0x4e2   :  { %v5562_v53 = vpop.eup %5561  ;;  %5573 = vrcp.f32 %v7305_v2  ;;  %v5392_v62 = vpop.f32.mrf.mxu0  ;;  %v7316_v1 = vmul.f32 %v5556_v55, %v4018_v35  ;;  %v4016_v38 = vsub.f32 2.0, %v3952_v20  ;;  %v3955_v9 = vmul.f32 %v5560_v18, %v7249_v14 }
 0x4e3   :  { %5575 = vrcp.f32 %v7312_v42  ;;  %v7320_v32 = vadd.f32 1.0, %v3769_v31  ;;  %v3774_v16 = vmax.f32 %v3710_v30, 0.0  ;;  %v3708_v58 = vsub.f32 %v7001_v17, %v3644_v8 }
 0x4e4   :  { %v3647_v3 = vmul.f32 2.0, %v5392_v62  ;;  %4158 = vadd.xlane.f32.xlu1 %v7309_v45  ;;  %4168 = vadd.xlane.f32.xlu0 %v7316_v1  ;;  %v3417_v61 = vpop.f32.mrf.mxu0  ;;  %v7325_v29 = vmul.f32 %v5558_v25, %v4016_v38  ;;  %v4019_v55 = vsub.f32 2.0, %v3955_v9  ;;  %v3953_v11 = vmul.f32 %v5562_v53, %v7256_v37 }
 0x4e5   :  { %v5564_v34 = vpop.eup %5563  ;;  %5577 = vrcp.f32 %v7320_v32  ;;  %v7329_v14 = vadd.f32 1.0, %v3774_v16  ;;  %v3772_v4 = vmax.f32 %v3708_v58, 0.0  ;;  %v3645_v13 = vmul.f32 2.0, %v3417_v61 }
 0x4e6   :  { %v5566_v35 = vpop.eup %5565  ;;  %v3711_v17 = vsub.f32 %v6997_v52, %v3647_v3  ;;  %v5395_v20 = vpop.f32.mrf.mxu0  ;;  %v7332_v31 = vmul.f32 %v5560_v18, %v4019_v55  ;;  %v4017_v30 = vsub.f32 2.0, %v3953_v11  ;;  %v3958_v25 = vmul.f32 %v5564_v34, %v7266_v26 }
 0x4e7   :  { %5579 = vrcp.f32 %v7329_v14  ;;  %v7336_v8 = vadd.f32 1.0, %v3772_v4  ;;  %v3709_v37 = vsub.f32 %v7008_v54, %v3645_v13  ;;  %v3650_v62 = vmul.f32 2.0, %v5395_v20 }
 0x4e8   :  { %8002 = vst [vmem:[#allocation21_spill] sm:$0xff] %v7332_v31  ;;  %v5568_v38 = vpop.eup %5567  ;;  %v3775_v9 = vmax.f32 %v3711_v17, 0.0  ;;  %4164 = vadd.xlane.f32.xlu0 %v7325_v29  ;;  %4170 = vadd.xlane.f32.xlu1 %v7332_v31  ;;  %v3430_v52 = vpop.f32.mrf.mxu0  ;;  %v7341_v16 = vmul.f32 %v5562_v53, %v4017_v30  ;;  %v4022_v18 = vsub.f32 2.0, %v3958_v25  ;;  %v3956_v58 = vmul.f32 %v5566_v35, %v7271_v50 }
 0x4e9   :  { %5581 = vrcp.f32 %v7336_v8  ;;  %v3773_v26 = vmax.f32 %v3709_v37, 0.0  ;;  %v3714_v3 = vsub.f32 %v7012_v6, %v3650_v62  ;;  %v3648_v61 = vmul.f32 2.0, %v3430_v52  ;;  %v7357_v6 = vld [vmem:[%s7936_s12] ss:$0 sm:$0xff] }
 0x4ea   :  { %8003 = vst [vmem:[#allocation33_spill] sm:$0xff] %v7341_v16  ;;  %v5570_v54 = vpop.eup %5569  ;;  %v7346_v55 = vadd.f32 1.0, %v3775_v9  ;;  %v5396_v11 = vpop.f32.mrf.mxu0  ;;  %v7348_v4 = vmul.f32 %v5564_v34, %v4022_v18  ;;  %v4020_v13 = vsub.f32 2.0, %v3956_v58  ;;  %v3959_v17 = vmul.f32 %v5568_v38, %v7281_v43 }
 0x4eb   :  { %v7351_v53 = vadd.f32 1.0, %v3773_v26  ;;  %v3778_v20 = vmax.f32 %v3714_v3, 0.0  ;;  %v3712_v50 = vsub.f32 %v7020_v12, %v3648_v61  ;;  %v3651_v30 = vmul.f32 2.0, %v5396_v11 }
 0x4ec   :  { %8004 = vst [vmem:[#allocation34_spill] sm:$0xff] %v7348_v4  ;;  %v5572_v25 = vpop.eup %5571  ;;  %5583 = vrcp.f32 %v7346_v55  ;;  %4166 = vadd.xlane.f32.xlu1 %v7341_v16  ;;  %4176 = vadd.xlane.f32.xlu0 %v7348_v4  ;;  %v5279_v34 = vpop.f32.mrf.mxu1  ;;  %v7362_v37 = vmul.f32 %v5566_v35, %v4020_v13  ;;  %v4023_v62 = vsub.f32 2.0, %v3959_v17  ;;  %v3957_v12 = vmul.f32 %v5570_v54, %v7288_v48 }
 0x4ed   :  { %v3433_v43 = vpop.f32.mrf.mxu0  ;;  %5585 = vrcp.f32 %v7351_v53  ;;  %v7366_v9 = vadd.f32 1.0, %v3778_v20  ;;  %v3776_v52 = vmax.f32 %v3712_v50, 0.0  ;;  %v3715_v18 = vsub.f32 %v7016_v59, %v3651_v30 }
 0x4ee   :  { %8005 = vst [vmem:[#allocation35_spill] sm:$0xff] %v7362_v37  ;;  %v2686_v58 = vadd.f32 %v5279_v34, %v7357_v6  ;;  %v3649_v26 = vmul.f32 2.0, %v3433_v43  ;;  %v2677_v3 = vpop.f32.mrf.mxu1  ;;  %v7370_v11 = vmul.f32 %v5568_v38, %v4023_v62  ;;  %v4021_v4 = vsub.f32 2.0, %v3957_v12 }
 0x4ef   :  { %v5399_v61 = vpop.f32.mrf.mxu0  ;;  %v5574_v35 = vpop.eup %5573  ;;  %5587 = vrcp.f32 %v7366_v9  ;;  %v7373_v13 = vadd.f32 1.0, %v3776_v52  ;;  %v3779_v48 = vmax.f32 %v3715_v18, 0.0  ;;  %v2678_v17 = vadd.f32 %v7357_v6, %v2677_v3 }
 0x4f0   :  { %8006 = vst [vmem:[#allocation36_spill] sm:$0xff] %v7370_v11  ;;  %v7376_v20 = vpop.eup %5575  ;;  %2934 = vst [vmem:[#allocation8 + $0x10] sm:$0xff] %v2686_v58  ;;  %v3713_v59 = vsub.f32 %v7030_v41, %v3649_v26  ;;  %v3654_v50 = vmul.f32 2.0, %v5399_v61  ;;  %4172 = vadd.xlane.f32.xlu0 %v7362_v37  ;;  %4178 = vadd.xlane.f32.xlu1 %v7370_v11  ;;  %v5280_v38 = vpop.f32.mrf.mxu1  ;;  %v7381_v34 = vmul.f32 %v5570_v54, %v4021_v4 }
 0x4f1   :  { %v3446_v30 = vpop.f32.mrf.mxu0  ;;  %v3962_v43 = vmul.f32 %v5572_v25, %v7297_v60  ;;  %5589 = vrcp.f32 %v7373_v13  ;;  %v7385_v62 = vadd.f32 1.0, %v3779_v48  ;;  %2932 = vst [vmem:[#allocation8] sm:$0xff] %v2678_v17  ;;  %v2689_v12 = vadd.f32 %v5280_v38, %v7357_v6  ;;  %v3183_v4 = vpop.xlane.xlu1 %3182 }
 0x4f2   :  { %8007 = vst [vmem:[#allocation37_spill] sm:$0xff] %v7381_v34  ;;  %v3652_v52 = vmul.f32 2.0, %v3446_v30  ;;  %v7388_v41 = vpop.eup %5577  ;;  %v3777_v18 = vmax.f32 %v3713_v59, 0.0  ;;  %v3718_v58 = vsub.f32 %v7034_v63, %v3654_v50  ;;  %v2680_v26 = vpop.f32.mrf.mxu1  ;;  %v3960_v54 = vmul.f32 %v5574_v35, %v7305_v2 }
 0x4f3   :  { %v5400_v3 = vpop.f32.mrf.mxu0  ;;  %v4026_v61 = vsub.f32 2.0, %v3962_v43  ;;  %5591 = vrcp.f32 %v7385_v62  ;;  %2935 = vst [vmem:[#allocation8 + $0x18] sm:$0xff] %v2689_v12  ;;  %v2681_v48 = vadd.f32 %v7357_v6, %v2680_v26  ;;  %v8009_v12 = vld [vmem:[#allocation22_spill] sm:$0xff] }
 0x4f4   :  { %v3716_v60 = vsub.f32 %v7045_v19, %v3652_v52  ;;  %v3655_v17 = vmul.f32 2.0, %v5400_v3  ;;  %v7395_v38 = vpop.eup %5579  ;;  %v7397_v30 = vadd.f32 1.0, %v3777_v18  ;;  %v3782_v59 = vmax.f32 %v3718_v58, 0.0  ;;  %4174 = vadd.xlane.f32.xlu1 %v7381_v34  ;;  %v5283_v50 = vpop.f32.mrf.mxu1  ;;  %v5771_v18 = vld [vmem:[%s7938_s14] ss:$0 sm:$0xff] }
 0x4f5   :  { %v7400_v63 = vmul.f32 %v5572_v25, %v4026_v61  ;;  %v3449_v2 = vpop.f32.mrf.mxu0  ;;  %v4024_v43 = vsub.f32 2.0, %v3960_v54  ;;  %2933 = vst [vmem:[#allocation8 + $0x8] sm:$0xff] %v2681_v48  ;;  %v2702_v19 = vadd.f32 %v5283_v50, %v7357_v6  ;;  %v7409_v58 = vadd.f32 %v5771_v18, %v3183_v4 }
 0x4f6   :  { %v3780_v11 = vmax.f32 %v3716_v60, 0.0  ;;  %v3719_v37 = vsub.f32 %v8009_v12, %v3655_v17  ;;  %v3653_v52 = vmul.f32 2.0, %v3449_v2  ;;  %v7404_v26 = vpop.eup %5581  ;;  %5593 = vrcp.f32 %v7397_v30  ;;  %v2693_v3 = vpop.f32.mrf.mxu1  ;;  %v8010_v17 = vld [vmem:[#allocation23_spill] sm:$0xff] }
 0x4f7   :  { %8008 = vst [vmem:[#allocation38_spill] sm:$0xff] %v7400_v63  ;;  %v7412_v25 = vadd.f32 1.0, %v3782_v59  ;;  %4184 = vadd.xlane.f32.xlu0 %v7400_v63  ;;  %v5403_v61 = vpop.f32.mrf.mxu0  ;;  %v3963_v54 = vmul.f32 %v7376_v20, %v7312_v42  ;;  %2938 = vst [vmem:[#allocation8 + $0x30] sm:$0xff] %v2702_v19  ;;  %v7420_v2 = vmul.f32 %v5574_v35, %v4024_v43  ;;  %v8012_v35 = vld [vmem:[#allocation14_spill] sm:$0xff] }
 0x4f8   :  { %v7417_v60 = vadd.f32 1.0, %v3780_v11  ;;  %v3783_v48 = vmax.f32 %v3719_v37, 0.0  ;;  %v3717_v50 = vsub.f32 %v8010_v17, %v3653_v52  ;;  %v2694_v4 = vadd.f32 %v7357_v6, %v2693_v3  ;;  %v5284_v18 = vpop.f32.mrf.mxu1 }
 0x4f9   :  { %8011 = vst [vmem:[#allocation22_spill] sm:$0xff] %v7420_v2  ;;  %5595 = vrcp.f32 %v7412_v25  ;;  %v3658_v59 = vmul.f32 2.0, %v5403_v61  ;;  %v4027_v12 = vsub.f32 2.0, %v3963_v54  ;;  %v3462_v63 = vpop.f32.mrf.mxu0  ;;  %v7424_v34 = vpop.eup %5583  ;;  %v2705_v11 = vadd.f32 %v5284_v18, %v7357_v6 }
 0x4fa   :  { %5597 = vrcp.f32 %v7417_v60  ;;  %v7427_v42 = vadd.f32 1.0, %v3783_v48  ;;  %v3781_v37 = vmax.f32 %v3717_v50, 0.0  ;;  %v7430_v19 = vpop.eup %5585  ;;  %2936 = vst [vmem:[#allocation8 + $0x20] sm:$0xff] %v2694_v4  ;;  %v3656_v3 = vmul.f32 2.0, %v3462_v63  ;;  %v2696_v61 = vpop.f32.mrf.mxu1 }
 0x4fb   :  { %v3722_v43 = vsub.f32 %v8012_v35, %v3658_v59  ;;  %4180 = vadd.xlane.f32.xlu0 %v7420_v2  ;;  %v7435_v52 = vmul.f32 %v7376_v20, %v4027_v12  ;;  %v5404_v54 = vpop.f32.mrf.mxu0  ;;  %v3961_v48 = vmul.f32 %v7388_v41, %v7320_v32  ;;  %v3964_v17 = vmul.f32 %v7404_v26, %v7336_v8 }
 0x4fc   :  { %5599 = vrcp.f32 %v7427_v42  ;;  %v7442_v50 = vadd.f32 1.0, %v3781_v37  ;;  %2939 = vst [vmem:[#allocation8 + $0x38] sm:$0xff] %v2705_v11  ;;  %v2697_v4 = vadd.f32 %v7357_v6, %v2696_v61  ;;  %v7445_v59 = vpop.eup %5587  ;;  %v3720_v63 = vsub.f32 %v7066_v27, %v3656_v3  ;;  %v5287_v32 = vpop.f32.mrf.mxu1  ;;  %v8014_v3 = vld [vmem:[#allocation15_spill] sm:$0xff] }
 0x4fd   :  { %8013 = vst [vmem:[#allocation23_spill] sm:$0xff] %v7435_v52  ;;  %v3786_v20 = vmax.f32 %v3722_v43, 0.0  ;;  %4186 = vadd.xlane.f32.xlu1 %v7435_v52  ;;  %v3659_v12 = vmul.f32 2.0, %v5404_v54  ;;  %v4025_v18 = vsub.f32 2.0, %v3961_v48  ;;  %v3465_v35 = vpop.f32.mrf.mxu0  ;;  %v7451_v8 = vmul.f32 %v7430_v19, %v7351_v53 }
 0x4fe   :  { %5601 = vrcp.f32 %v7442_v50  ;;  %2937 = vst [vmem:[#allocation8 + $0x28] sm:$0xff] %v2697_v4  ;;  %v3966_v37 = vmul.f32 %v7395_v38, %v7329_v14  ;;  %v2718_v11 = vadd.f32 %v5287_v32, %v7357_v6  ;;  %v7457_v43 = vpop.eup %5589  ;;  %v3784_v27 = vmax.f32 %v3720_v63, 0.0  ;;  %v2709_v53 = vpop.f32.mrf.mxu1 }
 0x4ff   :  { %v7459_v61 = vadd.f32 1.0, %v3786_v20  ;;  %v3723_v54 = vsub.f32 %v8014_v3, %v3659_v12  ;;  %v7463_v48 = vmul.f32 %v7388_v41, %v4025_v18  ;;  %v5407_v52 = vpop.f32.mrf.mxu0  ;;  %v7467_v4 = vmul.f32 %v7445_v59, %v7366_v9 }
 0x500   :  { %v4030_v2 = vsub.f32 2.0, %v3966_v37  ;;  %2942 = vst [vmem:[#allocation8 + $0x50] sm:$0xff] %v2718_v11  ;;  %v3657_v14 = vmul.f32 2.0, %v3465_v35  ;;  %v2710_v32 = vadd.f32 %v7357_v6, %v2709_v53  ;;  %v7470_v16 = vpop.eup %5591  ;;  %v7473_v20 = vadd.f32 1.0, %v3784_v27  ;;  %v5288_v12 = vpop.f32.mrf.mxu1  ;;  %v8017_v37 = vld [vmem:[#allocation16_spill] sm:$0xff] }
 0x501   :  { %8015 = vst [vmem:[#allocation14_spill] sm:$0xff] %v7463_v48  ;;  %5603 = vrcp.f32 %v7459_v61  ;;  %v3787_v63 = vmax.f32 %v3723_v54, 0.0  ;;  %4182 = vadd.xlane.f32.xlu1 %v7463_v48  ;;  %v3662_v41 = vmul.f32 2.0, %v5407_v52  ;;  %v3478_v18 = vpop.f32.mrf.mxu0  ;;  %v7478_v9 = vmul.f32 %v7457_v43, %v7373_v13 }
 0x502   :  { %v7481_v35 = vmul.f32 %v7395_v38, %v4030_v2  ;;  %v3721_v11 = vsub.f32 %v8017_v37, %v3657_v14  ;;  %2940 = vst [vmem:[#allocation8 + $0x40] sm:$0xff] %v2710_v32  ;;  %v4028_v3 = vsub.f32 2.0, %v3964_v17  ;;  %5605 = vrcp.f32 %v7473_v20  ;;  %v2712_v53 = vpop.f32.mrf.mxu1 }
 0x503   :  { %v7485_v27 = vadd.f32 1.0, %v3787_v63  ;;  %v3726_v54 = vsub.f32 %v7076_v51, %v3662_v41  ;;  %v3967_v52 = vmul.f32 %v7424_v34, %v7346_v55  ;;  %v5408_v48 = vpop.f32.mrf.mxu0  ;;  %v7490_v13 = vpop.eup %5593  ;;  %v7494_v38 = vmul.f32 %v7470_v16, %v7385_v62 }
 0x504   :  { %8016 = vst [vmem:[#allocation15_spill] sm:$0xff] %v7481_v35  ;;  %4192 = vadd.xlane.f32.xlu0 %v7481_v35  ;;  %v3785_v2 = vmax.f32 %v3721_v11, 0.0  ;;  %v2721_v17 = vadd.f32 %v5288_v12, %v7357_v6  ;;  %v3660_v14 = vmul.f32 2.0, %v3478_v18  ;;  %v7500_v32 = vmul.f32 %v7404_v26, %v4028_v3  ;;  %v5291_v63 = vpop.f32.mrf.mxu1 }
 0x505   :  { %5607 = vrcp.f32 %v7485_v27  ;;  %v3790_v51 = vmax.f32 %v3726_v54, 0.0  ;;  %v4031_v55 = vsub.f32 2.0, %v3967_v52  ;;  %v3481_v41 = vpop.f32.mrf.mxu0  ;;  %v2713_v11 = vadd.f32 %v7357_v6, %v2712_v53 }
 0x506   :  { %8018 = vst [vmem:[#allocation16_spill] sm:$0xff] %v7500_v32  ;;  %v7502_v37 = vpop.eup %5595  ;;  %v7504_v31 = vadd.f32 1.0, %v3785_v2  ;;  %2943 = vst [vmem:[#allocation8 + $0x58] sm:$0xff] %v2721_v17  ;;  %v3724_v62 = vsub.f32 %v7084_v40, %v3660_v14  ;;  %v3663_v12 = vmul.f32 2.0, %v5408_v48  ;;  %v7512_v54 = vmul.f32 %v7490_v13, %v7397_v30  ;;  %v2725_v2 = vpop.f32.mrf.mxu1 }
 0x507   :  { %v7508_v18 = vpop.eup %5597  ;;  %v7514_v26 = vadd.f32 1.0, %v3790_v51  ;;  %v7517_v3 = vmul.f32 %v7424_v34, %v4031_v55  ;;  %v4029_v52 = vsub.f32 2.0, %v7451_v8  ;;  %v5411_v17 = vpop.f32.mrf.mxu0  ;;  %v7522_v40 = vmul.f32 %v7502_v37, %v7412_v25  ;;  %2941 = vst [vmem:[#allocation8 + $0x48] sm:$0xff] %v2713_v11 }
 0x508   :  { %5609 = vrcp.f32 %v7504_v31  ;;  %4188 = vadd.xlane.f32.xlu0 %v7500_v32  ;;  %v3788_v48 = vmax.f32 %v3724_v62, 0.0  ;;  %v3727_v30 = vsub.f32 %v7080_v39, %v3663_v12  ;;  %v7531_v34 = vmul.f32 %v7508_v18, %v7417_v60  ;;  %v5292_v14 = vpop.f32.mrf.mxu1 }
 0x509   :  { %8019 = vst [vmem:[#allocation39_spill] sm:$0xff] %v7517_v3  ;;  %v7527_v53 = vpop.eup %5599  ;;  %5611 = vrcp.f32 %v7514_v26  ;;  %4194 = vadd.xlane.f32.xlu1 %v7517_v3  ;;  %v4034_v25 = vsub.f32 2.0, %v7467_v4  ;;  %v2734_v8 = vadd.f32 %v5291_v63, %v7357_v6  ;;  %v3494_v51 = vpop.f32.mrf.mxu0  ;;  %v7540_v39 = vmul.f32 %v7430_v19, %v4029_v52 }
 0x50a   :  { %v7537_v55 = vadd.f32 1.0, %v3788_v48  ;;  %v3791_v62 = vmax.f32 %v3727_v30, 0.0  ;;  %v3661_v11 = vmul.f32 2.0, %v3481_v41  ;;  %v2726_v3 = vadd.f32 %v7357_v6, %v2725_v2  ;;  %v2728_v32 = vpop.f32.mrf.mxu1 }
 0x50b   :  { %v7542_v12 = vpop.eup %5601  ;;  %v7545_v60 = vmul.f32 %v7445_v59, %v4034_v25  ;;  %2946 = vst [vmem:[#allocation8 + $0x70] sm:$0xff] %v2734_v8  ;;  %v3666_v4 = vmul.f32 2.0, %v5411_v17  ;;  %v4032_v63 = vsub.f32 2.0, %v7478_v9  ;;  %v5412_v35 = vpop.f32.mrf.mxu0  ;;  %v7551_v48 = vmul.f32 %v7527_v53, %v7427_v42 }
 0x50c   :  { %5613 = vrcp.f32 %v7537_v55  ;;  %v7554_v19 = vadd.f32 1.0, %v3791_v62  ;;  %v3725_v41 = vsub.f32 %v7093_v7, %v3661_v11  ;;  %v7559_v59 = vmul.f32 %v7542_v12, %v7442_v50  ;;  %2944 = vst [vmem:[#allocation8 + $0x60] sm:$0xff] %v2726_v3  ;;  %v5295_v2 = vpop.f32.mrf.mxu1 }
 0x50d   :  { %8020 = vst [vmem:[#allocation40_spill] sm:$0xff] %v7545_v60  ;;  %4190 = vadd.xlane.f32.xlu1 %v7540_v39  ;;  %4200 = vadd.xlane.f32.xlu0 %v7545_v60  ;;  %v3730_v9 = vsub.f32 %v7097_v44, %v3666_v4  ;;  %v4035_v42 = vsub.f32 2.0, %v7494_v38  ;;  %v2737_v52 = vadd.f32 %v5292_v14, %v7357_v6  ;;  %v3497_v17 = vpop.f32.mrf.mxu0  ;;  %v3664_v50 = vmul.f32 2.0, %v3494_v51 }
 0x50e   :  { %v7566_v30 = vpop.eup %5603  ;;  %v3789_v7 = vmax.f32 %v3725_v41, 0.0  ;;  %v7569_v25 = vmul.f32 %v7457_v43, %v4032_v63  ;;  %v2729_v8 = vadd.f32 %v7357_v6, %v2728_v32  ;;  %5615 = vrcp.f32 %v7554_v19  ;;  %v2741_v14 = vpop.f32.mrf.mxu1  ;;  %v8023_v41 = vld [vmem:[#allocation18_spill] sm:$0xff] }
 0x50f   :  { %v3794_v3 = vmax.f32 %v3730_v9, 0.0  ;;  %v7574_v44 = vmul.f32 %v7470_v16, %v4035_v42  ;;  %2947 = vst [vmem:[#allocation8 + $0x78] sm:$0xff] %v2737_v52  ;;  %v3667_v38 = vmul.f32 2.0, %v5412_v35  ;;  %v5415_v62 = vpop.f32.mrf.mxu0  ;;  %v7576_v11 = vpop.eup %5605  ;;  %v3728_v43 = vsub.f32 %v8023_v41, %v3664_v50  ;;  %v8024_v35 = vld [vmem:[#allocation17_spill] sm:$0xff] }
 0x510   :  { %8021 = vst [vmem:[#allocation41_spill] sm:$0xff] %v7569_v25  ;;  %v7578_v4 = vadd.f32 1.0, %v3789_v7  ;;  %2945 = vst [vmem:[#allocation8 + $0x68] sm:$0xff] %v2729_v8  ;;  %v4033_v51 = vsub.f32 2.0, %v7512_v54  ;;  %v4038_v32 = vsub.f32 2.0, %v7522_v40  ;;  %v7585_v63 = vmul.f32 %v7566_v30, %v7459_v61  ;;  %v5296_v52 = vpop.f32.mrf.mxu1 }
 0x511   :  { %8022 = vst [vmem:[#allocation42_spill] sm:$0xff] %v7574_v44  ;;  %v7587_v16 = vadd.f32 1.0, %v3794_v3  ;;  %4196 = vadd.xlane.f32.xlu0 %v7569_v25  ;;  %4202 = vadd.xlane.f32.xlu1 %v7574_v44  ;;  %v3731_v9 = vsub.f32 %v8024_v35, %v3667_v38  ;;  %v2750_v42 = vadd.f32 %v5295_v2, %v7357_v6  ;;  %v3510_v7 = vpop.f32.mrf.mxu0  ;;  %v3792_v61 = vmax.f32 %v3728_v43, 0.0 }
 0x512   :  { %v7593_v50 = vpop.eup %5607  ;;  %v7597_v54 = vmul.f32 %v7576_v11, %v7473_v20  ;;  %5617 = vrcp.f32 %v7578_v4  ;;  %v7601_v40 = vmul.f32 %v7502_v37, %v4038_v32  ;;  %v7605_v3 = vmul.f32 %v7490_v13, %v4033_v51  ;;  %v2744_v38 = vpop.f32.mrf.mxu1  ;;  %v8027_v13 = vld [vmem:[#allocation24_spill] sm:$0xff] }
 0x513   :  { %5619 = vrcp.f32 %v7587_v16  ;;  %v3795_v8 = vmax.f32 %v3731_v9, 0.0  ;;  %2950 = vst [vmem:[#allocation8 + $0x90] sm:$0xff] %v2750_v42  ;;  %v3665_v2 = vmul.f32 2.0, %v3497_v17  ;;  %v5416_v41 = vpop.f32.mrf.mxu0  ;;  %v7607_v35 = vadd.f32 1.0, %v3792_v61  ;;  %v8028_v61 = vld [vmem:[#allocation25_spill] sm:$0xff] }
 0x514   :  { %8025 = vst [vmem:[#allocation18_spill] sm:$0xff] %v7601_v40  ;;  %8026 = vst [vmem:[#allocation17_spill] sm:$0xff] %v7605_v3  ;;  %v2742_v20 = vadd.f32 %v7357_v6, %v2741_v14  ;;  %v3670_v44 = vmul.f32 2.0, %v5415_v62  ;;  %v4036_v43 = vsub.f32 2.0, %v7531_v34  ;;  %v4039_v17 = vsub.f32 2.0, %v7551_v48  ;;  %v5299_v9 = vpop.f32.mrf.mxu1 }
 0x515   :  { %v7611_v25 = vpop.eup %5609  ;;  %v7613_v37 = vadd.f32 1.0, %v3795_v8  ;;  %4198 = vadd.xlane.f32.xlu1 %v7605_v3  ;;  %4208 = vadd.xlane.f32.xlu0 %v7601_v40  ;;  %v3729_v51 = vsub.f32 %v8027_v13, %v3665_v2  ;;  %v2753_v32 = vadd.f32 %v5296_v52, %v7357_v6  ;;  %v3513_v42 = vpop.f32.mrf.mxu0  ;;  %v7624_v34 = vmul.f32 %v7593_v50, %v7485_v27 }
 0x516   :  { %v7620_v14 = vpop.eup %5611  ;;  %v7628_v62 = vmul.f32 %v7611_v25, %v7504_v31  ;;  %5621 = vrcp.f32 %v7607_v35  ;;  %2948 = vst [vmem:[#allocation8 + $0x80] sm:$0xff] %v2742_v20  ;;  %v3734_v8 = vsub.f32 %v8028_v61, %v3670_v44  ;;  %v7634_v52 = vmul.f32 %v7508_v18, %v4036_v43  ;;  %v2757_v27 = vpop.f32.mrf.mxu1  ;;  %v8030_v61 = vld [vmem:[#allocation26_spill] sm:$0xff] }
 0x517   :  { %5623 = vrcp.f32 %v7613_v37  ;;  %v3793_v48 = vmax.f32 %v3729_v51, 0.0  ;;  %v7637_v2 = vmul.f32 %v7527_v53, %v4039_v17  ;;  %2951 = vst [vmem:[#allocation8 + $0x98] sm:$0xff] %v2753_v32  ;;  %v5419_v13 = vpop.f32.mrf.mxu0  ;;  %v3668_v31 = vmul.f32 2.0, %v3510_v7 }
 0x518   :  { %v3798_v40 = vmax.f32 %v3734_v8, 0.0  ;;  %v2745_v3 = vadd.f32 %v7357_v6, %v2744_v38  ;;  %v3671_v60 = vmul.f32 2.0, %v5416_v41  ;;  %v4037_v18 = vsub.f32 2.0, %v7559_v59  ;;  %v5300_v51 = vpop.f32.mrf.mxu1  ;;  %v8029_v41 = vld [vmem:[#allocation27_spill] sm:$0xff] }
 0x519   :  { %v7640_v20 = vpop.eup %5613  ;;  %v7642_v44 = vadd.f32 1.0, %v3793_v48  ;;  %4204 = vadd.xlane.f32.xlu0 %v7634_v52  ;;  %4210 = vadd.xlane.f32.xlu1 %v7637_v2  ;;  %v4042_v53 = vsub.f32 2.0, %v7585_v63  ;;  %v2766_v43 = vadd.f32 %v5299_v9, %v7357_v6  ;;  %v3526_v17 = vpop.f32.mrf.mxu0  ;;  %v7651_v7 = vmul.f32 %v7620_v14, %v7514_v26 }
 0x51a   :  { %v7653_v38 = vadd.f32 1.0, %v3798_v40  ;;  %v3732_v32 = vsub.f32 %v8029_v41, %v3668_v31  ;;  %2949 = vst [vmem:[#allocation8 + $0x88] sm:$0xff] %v2745_v3  ;;  %v3735_v8 = vsub.f32 %v8030_v61, %v3671_v60  ;;  %v7659_v59 = vmul.f32 %v7542_v12, %v4037_v18  ;;  %v2760_v48 = vpop.f32.mrf.mxu1  ;;  %v8033_v12 = vld [vmem:[#allocation28_spill] sm:$0xff] }
 0x51b   :  { %5625 = vrcp.f32 %v7642_v44  ;;  %v7662_v63 = vmul.f32 %v7566_v30, %v4042_v53  ;;  %2954 = vst [vmem:[#allocation8 + $0xb0] sm:$0xff] %v2766_v43  ;;  %v3669_v9 = vmul.f32 2.0, %v3513_v42  ;;  %v7664_v26 = vpop.eup %5615  ;;  %v7668_v40 = vmul.f32 %v7640_v20, %v7537_v55  ;;  %v5420_v31 = vpop.f32.mrf.mxu0 }
 0x51c   :  { %8031 = vst [vmem:[#allocation24_spill] sm:$0xff] %v7659_v59  ;;  %5627 = vrcp.f32 %v7653_v38  ;;  %v3796_v60 = vmax.f32 %v3732_v32, 0.0  ;;  %v3799_v3 = vmax.f32 %v3735_v8, 0.0  ;;  %v2758_v42 = vadd.f32 %v7357_v6, %v2757_v27  ;;  %v5303_v43 = vpop.f32.mrf.mxu1 }
 0x51d   :  { %8032 = vst [vmem:[#allocation25_spill] sm:$0xff] %v7662_v63  ;;  %4206 = vadd.xlane.f32.xlu1 %v7659_v59  ;;  %4216 = vadd.xlane.f32.xlu0 %v7662_v63  ;;  %v3733_v30 = vsub.f32 %v8033_v12, %v3669_v9  ;;  %v3674_v18 = vmul.f32 2.0, %v5419_v13  ;;  %v4040_v53 = vsub.f32 2.0, %v7597_v54  ;;  %v4043_v32 = vsub.f32 2.0, %v7624_v34  ;;  %v8034_v63 = vld [vmem:[#allocation29_spill] sm:$0xff] }
 0x51e   :  { %v7676_v41 = vadd.f32 1.0, %v3796_v60  ;;  %v7678_v55 = vadd.f32 1.0, %v3799_v3  ;;  %v2769_v61 = vadd.f32 %v5300_v51, %v7357_v6  ;;  %2952 = vst [vmem:[#allocation8 + $0xa0] sm:$0xff] %v2758_v42  ;;  %v3672_v13 = vmul.f32 2.0, %v3526_v17  ;;  %v2773_v54 = vpop.f32.mrf.mxu1  ;;  %v3529_v3 = vpop.f32.mrf.mxu0 }
 0x51f   :  { %v7682_v8 = vpop.eup %5617  ;;  %v3797_v59 = vmax.f32 %v3733_v30, 0.0  ;;  %v3738_v9 = vsub.f32 %v8034_v63, %v3674_v18  ;;  %v7686_v27 = vmul.f32 %v7576_v11, %v4040_v53  ;;  %v3983_v60 = vmul.f32 %v7664_v26, %v7554_v19 }
 0x520   :  { %v7688_v12 = vpop.eup %5619  ;;  %5629 = vrcp.f32 %v7676_v41  ;;  %v7694_v34 = vmul.f32 %v7593_v50, %v4043_v32  ;;  %2955 = vst [vmem:[#allocation8 + $0xb8] sm:$0xff] %v2769_v61  ;;  %v2761_v51 = vadd.f32 %v7357_v6, %v2760_v48  ;;  %v7699_v11 = vmul.f32 %v7682_v8, %v7578_v4  ;;  %v5304_v19 = vpop.f32.mrf.mxu1 }
 0x521   :  { %5631 = vrcp.f32 %v7678_v55  ;;  %v7702_v17 = vadd.f32 1.0, %v3797_v59  ;;  %v3802_v63 = vmax.f32 %v3738_v9, 0.0  ;;  %4212 = vadd.xlane.f32.xlu0 %v7686_v27  ;;  %v3736_v50 = vsub.f32 %v7148_v47, %v3672_v13 }
 0x522   :  { %4218 = vadd.xlane.f32.xlu1 %v7694_v34  ;;  %2953 = vst [vmem:[#allocation8 + $0xa8] sm:$0xff] %v2761_v51  ;;  %v3675_v30 = vmul.f32 2.0, %v5420_v31  ;;  %v4041_v48 = vsub.f32 2.0, %v7628_v62  ;;  %v4046_v42 = vsub.f32 2.0, %v7651_v7  ;;  %v3986_v59 = vmul.f32 %v7688_v12, %v7587_v16  ;;  %v2776_v61 = vpop.f32.mrf.mxu1  ;;  %v8035_v31 = vld [vmem:[#allocation30_spill] sm:$0xff] }
 0x523   :  { %v7709_v4 = vpop.eup %5621  ;;  %v7713_v18 = vadd.f32 1.0, %v3802_v63  ;;  %v2782_v53 = vadd.f32 %v5303_v43, %v7357_v6  ;;  %v3673_v32 = vmul.f32 2.0, %v3529_v3  ;;  %5633 = vrcp.f32 %v7702_v17 }
 0x524   :  { %v5624_v9 = vpop.eup %5623  ;;  %v3800_v47 = vmax.f32 %v3736_v50, 0.0  ;;  %v3739_v13 = vsub.f32 %v8035_v31, %v3675_v30  ;;  %v7719_v62 = vmul.f32 %v7611_v25, %v4041_v48  ;;  %v7723_v7 = vmul.f32 %v7709_v4, %v7607_v35  ;;  %v5307_v51 = vpop.f32.mrf.mxu1 }
 0x525   :  { %5635 = vrcp.f32 %v7713_v18  ;;  %v7727_v16 = vmul.f32 %v7620_v14, %v4046_v42  ;;  %2958 = vst [vmem:[#allocation8 + $0xd0] sm:$0xff] %v2782_v53  ;;  %v3737_v43 = vsub.f32 %v7409_v58, %v3673_v32  ;;  %v2774_v25 = vadd.f32 %v7357_v6, %v2773_v54 }
 0x526   :  { %v7730_v3 = vadd.f32 1.0, %v3800_v47  ;;  %v3803_v63 = vmax.f32 %v3739_v13, 0.0  ;;  %4214 = vadd.xlane.f32.xlu1 %v7719_v62  ;;  %v4044_v50 = vsub.f32 2.0, %v7668_v40  ;;  %v4047_v30 = vsub.f32 2.0, %v3983_v60  ;;  %v2789_v42 = vpop.f32.mrf.mxu1 }
 0x527   :  { %4224 = vadd.xlane.f32.xlu0 %v7727_v16  ;;  %v3801_v35 = vmax.f32 %v3737_v43, 0.0  ;;  %v2785_v14 = vadd.f32 %v5304_v19, %v7357_v6  ;;  %v2777_v48 = vadd.f32 %v7357_v6, %v2776_v61  ;;  %v3987_v53 = vmul.f32 %v5624_v9, %v7613_v37  ;;  %2956 = vst [vmem:[#allocation8 + $0xc0] sm:$0xff] %v2774_v25 }
 0x528   :  { %v5626_v58 = vpop.eup %5625  ;;  %5637 = vrcp.f32 %v7730_v3  ;;  %v7740_v32 = vadd.f32 1.0, %v3803_v63  ;;  %v7743_v54 = vmul.f32 %v7640_v20, %v4044_v50  ;;  %v7748_v60 = vmul.f32 %v7664_v26, %v4047_v30  ;;  %v5308_v37 = vpop.f32.mrf.mxu1 }
 0x529   :  { %v5628_v40 = vpop.eup %5627  ;;  %v7745_v47 = vadd.f32 1.0, %v3801_v35  ;;  %2959 = vst [vmem:[#allocation8 + $0xd8] sm:$0xff] %v2785_v14  ;;  %2957 = vst [vmem:[#allocation8 + $0xc8] sm:$0xff] %v2777_v48  ;;  %v4045_v19 = vsub.f32 2.0, %v7699_v11  ;;  %v4050_v61 = vsub.f32 2.0, %v3986_v59  ;;  %v2798_v31 = vadd.f32 %v5307_v51, %v7357_v6 }
 0x52a   :  { %v3990_v13 = vmul.f32 %v5628_v40, %v7653_v38  ;;  %4226 = vadd.xlane.f32.xlu1 %v7748_v60  ;;  %v2790_v26 = vadd.f32 %v7357_v6, %v2789_v42  ;;  %v2792_v43 = vpop.f32.mrf.mxu1  ;;  %v4051_v11 = vsub.f32 2.0, %v3987_v53  ;;  %v2801_v59 = vadd.f32 %v5308_v37, %v7357_v6 }
 0x52b   :  { %5639 = vrcp.f32 %v7745_v47  ;;  %4220 = vadd.xlane.f32.xlu0 %v7743_v54  ;;  %v7757_v20 = vmul.f32 %v7688_v12, %v4050_v61  ;;  %2962 = vst [vmem:[#allocation8 + $0xf0] sm:$0xff] %v2798_v31  ;;  %v2793_v51 = vadd.f32 %v7357_v6, %v2792_v43  ;;  %v3985_v38 = vmul.f32 %v5626_v58, %v7642_v44 }
 0x52c   :  { %5641 = vrcp.f32 %v7740_v32  ;;  %v7765_v25 = vmul.f32 %v7682_v8, %v4045_v19  ;;  %2960 = vst [vmem:[#allocation8 + $0xe0] sm:$0xff] %v2790_v26  ;;  %v4048_v12 = vsub.f32 2.0, %v7723_v7  ;;  %v5311_v50 = vpop.f32.mrf.mxu1  ;;  %2963 = vst [vmem:[#allocation8 + $0xf8] sm:$0xff] %v2801_v59  ;;  %v7772_v44 = vmul.f32 %v5624_v9, %v4051_v11 }
 0x52d   :  { %v5630_v63 = vpop.eup %5629  ;;  %2961 = vst [vmem:[#allocation8 + $0xe8] sm:$0xff] %v2793_v51  ;;  %v2814_v30 = vadd.f32 %v5311_v50, %v7357_v6  ;;  %v4054_v48 = vsub.f32 2.0, %v3990_v13  ;;  %v4049_v61 = vsub.f32 2.0, %v3985_v38 }
 0x52e   :  { %v5632_v35 = vpop.eup %5631  ;;  %4222 = vadd.xlane.f32.xlu1 %v7765_v25  ;;  %v2805_v8 = vpop.f32.mrf.mxu1  ;;  %v3988_v53 = vmul.f32 %v5630_v63, %v7676_v41  ;;  %v7777_v19 = vmul.f32 %v7709_v4, %v4048_v12 }
 0x52f   :  { %v3991_v14 = vmul.f32 %v5632_v35, %v7678_v55  ;;  %4232 = vadd.xlane.f32.xlu0 %v7757_v20  ;;  %2966 = vst [vmem:[#allocation8 + $0x110] sm:$0xff] %v2814_v30  ;;  %v2806_v42 = vadd.f32 %v7357_v6, %v2805_v8  ;;  %v7782_v9 = vmul.f32 %v5628_v40, %v4054_v48 }
 0x530   :  { %v5634_v7 = vpop.eup %5633  ;;  %v5312_v37 = vpop.f32.mrf.mxu1  ;;  %v7786_v11 = vmul.f32 %v5626_v58, %v4049_v61  ;;  %v4052_v59 = vsub.f32 2.0, %v3988_v53 }
 0x531   :  { %2964 = vst [vmem:[#allocation8 + $0x100] sm:$0xff] %v2806_v42  ;;  %v2817_v31 = vadd.f32 %v5312_v37, %v7357_v6  ;;  %v4055_v13 = vsub.f32 2.0, %v3991_v14  ;;  %v3989_v4 = vmul.f32 %v5634_v7, %v7702_v17 }
 0x532   :  { %v5636_v55 = vpop.eup %5635  ;;  %4234 = vadd.xlane.f32.xlu1 %v7772_v44  ;;  %v2808_v26 = vpop.f32.mrf.mxu1 }
 0x533   :  { %4228 = vadd.xlane.f32.xlu0 %v7777_v19  ;;  %2967 = vst [vmem:[#allocation8 + $0x118] sm:$0xff] %v2817_v31  ;;  %v2809_v41 = vadd.f32 %v7357_v6, %v2808_v26  ;;  %v7792_v40 = vmul.f32 %v5632_v35, %v4055_v13  ;;  %v3994_v58 = vmul.f32 %v5636_v55, %v7713_v18  ;;  %v4053_v8 = vsub.f32 2.0, %v3989_v4 }
 0x534   :  { %v5315_v51 = vpop.f32.mrf.mxu1 }
 0x535   :  { %v5638_v43 = vpop.eup %5637  ;;  %2965 = vst [vmem:[#allocation8 + $0x108] sm:$0xff] %v2809_v41  ;;  %v2830_v12 = vadd.f32 %v5315_v51, %v7357_v6  ;;  %v4058_v13 = vsub.f32 2.0, %v3994_v58 }
 0x536   :  { %v3992_v38 = vmul.f32 %v5638_v43, %v7730_v3  ;;  %4230 = vadd.xlane.f32.xlu1 %v7786_v11  ;;  %v2821_v50 = vpop.f32.mrf.mxu1  ;;  %v7797_v3 = vmul.f32 %v5630_v63, %v4052_v59  ;;  %v7806_v63 = vmul.f32 %v5634_v7, %v4053_v8 }
 0x537   :  { %4240 = vadd.xlane.f32.xlu0 %v7782_v9  ;;  %2970 = vst [vmem:[#allocation8 + $0x130] sm:$0xff] %v2830_v12  ;;  %v2822_v17 = vadd.f32 %v7357_v6, %v2821_v50  ;;  %v7814_v51 = vmul.f32 %v5636_v55, %v4058_v13 }
 0x538   :  { %v5640_v30 = vpop.eup %5639  ;;  %v4056_v14 = vsub.f32 2.0, %v3992_v38  ;;  %v5316_v42 = vpop.f32.mrf.mxu1 }
 0x539   :  { %v3993_v48 = vmul.f32 %v5640_v30, %v7745_v47  ;;  %v5642_v53 = vpop.eup %5641  ;;  %2968 = vst [vmem:[#allocation8 + $0x120] sm:$0xff] %v2822_v17  ;;  %v2833_v61 = vadd.f32 %v5316_v42, %v7357_v6 }
 0x53a   :  { %4242 = vadd.xlane.f32.xlu1 %v7792_v40  ;;  %v7802_v37 = vmul.f32 %v5638_v43, %v4056_v14  ;;  %v2824_v31 = vpop.f32.mrf.mxu1  ;;  %v3995_v47 = vmul.f32 %v5642_v53, %v7740_v32 }
 0x53b   :  { %v4057_v35 = vsub.f32 2.0, %v3993_v48  ;;  %4236 = vadd.xlane.f32.xlu0 %v7797_v3  ;;  %2971 = vst [vmem:[#allocation8 + $0x138] sm:$0xff] %v2833_v61  ;;  %v2825_v18 = vadd.f32 %v7357_v6, %v2824_v31 }
 0x53c   :  { %v5319_v26 = vpop.f32.mrf.mxu1  ;;  %v4059_v32 = vsub.f32 2.0, %v3995_v47 }
 0x53d   :  { %2969 = vst [vmem:[#allocation8 + $0x128] sm:$0xff] %v2825_v18  ;;  %v2846_v41 = vadd.f32 %v5319_v26, %v7357_v6  ;;  %v7811_v4 = vmul.f32 %v5640_v30, %v4057_v35 }
 0x53e   :  { %4238 = vadd.xlane.f32.xlu1 %v7806_v63  ;;  %v2837_v43 = vpop.f32.mrf.mxu1  ;;  %v7820_v30 = vmul.f32 %v5642_v53, %v4059_v32 }
 0x53f   :  { %4244 = vadd.xlane.f32.xlu0 %v7802_v37  ;;  %2974 = vst [vmem:[#allocation8 + $0x150] sm:$0xff] %v2846_v41  ;;  %v2838_v59 = vadd.f32 %v7357_v6, %v2837_v43  ;;  %v7831_v43 = vld [vmem:[%s7936_s12] ss:$0 sm:$0xff]  ;;  %s5865_s12 = smov [#allocation8]  }
 0x540   :  { %v5320_v7 = vpop.f32.mrf.mxu1  ;;  %s4461_s9 = sshll.u32 %s5865_s12, 4  ;;  %s4462_s9 = int_to_ptr.vmem [resolvable:$true] %s4461_s9 }
 0x541   :  { %2972 = vst [vmem:[#allocation8 + $0x140] sm:$0xff] %v2838_v59  ;;  %v2849_v38 = vadd.f32 %v5320_v7, %v7357_v6  ;;  %s5813_s24 = scalar_lea.vmem %s4462_s9, 8192  ;;  %p5818_p11 = scmp.lt.s32.totalorder %s4462_s9, %s4462_s9 }
 0x542   :  { %4246 = vadd.xlane.f32.xlu1 %v7811_v4  ;;  %v2840_v12 = vpop.f32.mrf.mxu1  ;;  %p5814_p10 = scmp.ne.s32.totalorder %s4462_s9, %s5813_s24  ;;  %p5819_p12 = scmp.lt.s32.totalorder %s5813_s24, %s5813_s24 }
 0x543   :  { %4248 = vadd.xlane.f32.xlu0 %v7814_v51  ;;  %2975 = vst [vmem:[#allocation8 + $0x158] sm:$0xff] %v2849_v38  ;;  %v2841_v50 = vadd.f32 %v7357_v6, %v2840_v12 }
 0x544   :  { %v5323_v14 = vpop.f32.mrf.mxu1  ;;  %p5820_p13 = por %p5819_p12, %p5818_p11 }
 0x545   :  { %2973 = vst [vmem:[#allocation8 + $0x148] sm:$0xff] %v2841_v50  ;;  %v4129_v17 = vpop.xlane.xlu0 %4128  ;;  %v2862_v55 = vadd.f32 %v5323_v14, %v7357_v6 }
 0x546   :  { %4250 = vadd.xlane.f32.xlu1 %v7820_v30  ;;  %5643 = vrcp.f32 %v4129_v17  ;;  %v2853_v58 = vpop.f32.mrf.mxu1  ;;  %p5821_p0 = pnand %p5820_p13, %p5814_p10 }
 0x547   :  { %2978 = vst [vmem:[#allocation8 + $0x170] sm:$0xff] %v2862_v55  ;;  %v2854_v48 = vadd.f32 %v7357_v6, %v2853_v58 }
 0x548   :  { %v5324_v8 = vpop.f32.mrf.mxu1 }
 0x549   :  { %2976 = vst [vmem:[#allocation8 + $0x160] sm:$0xff] %v2854_v48  ;;  %v4125_v42 = vpop.xlane.xlu0 %4124  ;;  %v4131_v61 = vpop.xlane.xlu1 %4130  ;;  %v2865_v35 = vadd.f32 %v5324_v8, %v7357_v6 }
 0x54a   :  { %5645 = vrcp.f32 %v4125_v42  ;;  %v2856_v53 = vpop.f32.mrf.mxu1 }
 0x54b   :  { %5647 = vrcp.f32 %v4131_v61  ;;  %2979 = vst [vmem:[#allocation8 + $0x178] sm:$0xff] %v2865_v35  ;;  %v2857_v31 = vadd.f32 %v7357_v6, %v2856_v53 }
 0x54c   :  { %v5327_v18 = vpop.f32.mrf.mxu1 }
 0x54d   :  { %2977 = vst [vmem:[#allocation8 + $0x168] sm:$0xff] %v2857_v31  ;;  %v4127_v47 = vpop.xlane.xlu1 %4126  ;;  %v4137_v13 = vpop.xlane.xlu0 %4136  ;;  %v2878_v26 = vadd.f32 %v5327_v18, %v7357_v6 }
 0x54e   :  { %5649 = vrcp.f32 %v4127_v47  ;;  %v2869_v41 = vpop.f32.mrf.mxu1  ;;  %v8036_v47 = vld [vmem:[#allocation31_spill] sm:$0xff] }
 0x54f   :  { %5651 = vrcp.f32 %v4137_v13  ;;  %2982 = vst [vmem:[#allocation8 + $0x190] sm:$0xff] %v2878_v26  ;;  %v2870_v59 = vadd.f32 %v7831_v43, %v2869_v41 }
 0x550   :  { %v5328_v32 = vpop.f32.mrf.mxu1 }
 0x551   :  { %2980 = vst [vmem:[#allocation8 + $0x180] sm:$0xff] %v2870_v59  ;;  %v4133_v7 = vpop.xlane.xlu0 %4132  ;;  %v4139_v38 = vpop.xlane.xlu1 %4138  ;;  %v2881_v12 = vadd.f32 %v7831_v43, %v5328_v32 }
 0x552   :  { %5653 = vrcp.f32 %v4133_v7  ;;  %v2872_v50 = vpop.f32.mrf.mxu1 }
 0x553   :  { %v5644_v6 = vpop.eup %5643  ;;  %5655 = vrcp.f32 %v4139_v38  ;;  %2983 = vst [vmem:[#allocation8 + $0x198] sm:$0xff] %v2881_v12  ;;  %v2873_v14 = vadd.f32 %v7831_v43, %v2872_v50 }
 0x554   :  { %v4318_v17 = vmul.f32 %v5644_v6, %v7157_v22  ;;  %v5331_v55 = vpop.f32.mrf.mxu1 }
 0x555   :  { %2981 = vst [vmem:[#allocation8 + $0x188] sm:$0xff] %v2873_v14  ;;  %v4135_v58 = vpop.xlane.xlu1 %4134  ;;  %v4145_v48 = vpop.xlane.xlu0 %4144  ;;  %v2894_v8 = vadd.f32 %v7831_v43, %v5331_v55 }
 0x556   :  { %4382 = vst [vmem:[#allocation7 + $0x10] sm:$0xff] %v4318_v17  ;;  %5657 = vrcp.f32 %v4135_v58  ;;  %v2885_v42 = vpop.f32.mrf.mxu1 }
 0x557   :  { %v5646_v61 = vpop.eup %5645  ;;  %5659 = vrcp.f32 %v4145_v48  ;;  %2986 = vst [vmem:[#allocation8 + $0x1b0] sm:$0xff] %v2894_v8  ;;  %v2886_v35 = vadd.f32 %v7831_v43, %v2885_v42 }
 0x558   :  { %v5648_v53 = vpop.eup %5647  ;;  %v4316_v31 = vmul.f32 %v5646_v61, %v7165_v56  ;;  %v5332_v18 = vpop.f32.mrf.mxu1 }
 0x559   :  { %v4319_v22 = vmul.f32 %v5648_v53, %v8036_v47  ;;  %2984 = vst [vmem:[#allocation8 + $0x1a0] sm:$0xff] %v2886_v35  ;;  %v4141_v13 = vpop.xlane.xlu0 %4140  ;;  %v4147_v26 = vpop.xlane.xlu1 %4146  ;;  %v2897_v41 = vadd.f32 %v7831_v43, %v5332_v18 }
 0x55a   :  { %4380 = vst [vmem:[#allocation7] sm:$0xff] %v4316_v31  ;;  %5661 = vrcp.f32 %v4141_v13  ;;  %v2888_v59 = vpop.f32.mrf.mxu1 }
 0x55b   :  { %v5650_v32 = vpop.eup %5649  ;;  %4383 = vst [vmem:[#allocation7 + $0x18] sm:$0xff] %v4319_v22  ;;  %5663 = vrcp.f32 %v4147_v26  ;;  %2987 = vst [vmem:[#allocation8 + $0x1b8] sm:$0xff] %v2897_v41  ;;  %v2889_v7 = vadd.f32 %v7831_v43, %v2888_v59 }
 0x55c   :  { %v5652_v38 = vpop.eup %5651  ;;  %v4317_v56 = vmul.f32 %v5650_v32, %v7181_v36  ;;  %v5335_v12 = vpop.f32.mrf.mxu1 }
 0x55d   :  { %v4322_v50 = vmul.f32 %v5652_v38, %v7188_v5  ;;  %2985 = vst [vmem:[#allocation8 + $0x1a8] sm:$0xff] %v2889_v7  ;;  %v4143_v6 = vpop.xlane.xlu1 %4142  ;;  %v4153_v14 = vpop.xlane.xlu0 %4152  ;;  %v2910_v17 = vadd.f32 %v7831_v43, %v5335_v12 }
 0x55e   :  { %4381 = vst [vmem:[#allocation7 + $0x8] sm:$0xff] %v4317_v56  ;;  %5665 = vrcp.f32 %v4143_v6  ;;  %v2901_v55 = vpop.f32.mrf.mxu1 }
 0x55f   :  { %v5654_v58 = vpop.eup %5653  ;;  %4386 = vst [vmem:[#allocation7 + $0x30] sm:$0xff] %v4322_v50  ;;  %5667 = vrcp.f32 %v4153_v14  ;;  %2990 = vst [vmem:[#allocation8 + $0x1d0] sm:$0xff] %v2910_v17  ;;  %v2902_v48 = vadd.f32 %v7831_v43, %v2901_v55 }
 0x560   :  { %v5656_v8 = vpop.eup %5655  ;;  %v4320_v36 = vmul.f32 %v5654_v58, %v7197_v46  ;;  %v5336_v42 = vpop.f32.mrf.mxu1 }
 0x561   :  { %v4323_v5 = vmul.f32 %v5656_v8, %v7204_v0  ;;  %2988 = vst [vmem:[#allocation8 + $0x1c0] sm:$0xff] %v2902_v48  ;;  %v4149_v61 = vpop.xlane.xlu0 %4148  ;;  %v4155_v35 = vpop.xlane.xlu1 %4154  ;;  %v2913_v53 = vadd.f32 %v7831_v43, %v5336_v42  ;;  %v8038_v8 = vld [vmem:[#allocation20_spill] sm:$0xff] }
 0x562   :  { %4384 = vst [vmem:[#allocation7 + $0x20] sm:$0xff] %v4320_v36  ;;  %5669 = vrcp.f32 %v4149_v61  ;;  %v2904_v31 = vpop.f32.mrf.mxu1  ;;  %v8039_v42 = vld [vmem:[#allocation32_spill] sm:$0xff] }
 0x563   :  { %v5658_v18 = vpop.eup %5657  ;;  %4387 = vst [vmem:[#allocation7 + $0x38] sm:$0xff] %v4323_v5  ;;  %5671 = vrcp.f32 %v4155_v35  ;;  %2991 = vst [vmem:[#allocation8 + $0x1d8] sm:$0xff] %v2913_v53  ;;  %v2905_v47 = vadd.f32 %v7831_v43, %v2904_v31 }
 0x564   :  { %v5660_v22 = vpop.eup %5659  ;;  %v4321_v46 = vmul.f32 %v5658_v18, %v7213_v10  ;;  %v5339_v13 = vpop.f32.mrf.mxu1 }
 0x565   :  { %v4326_v0 = vmul.f32 %v5660_v22, %v7220_v15  ;;  %2989 = vst [vmem:[#allocation8 + $0x1c8] sm:$0xff] %v2905_v47  ;;  %v4151_v26 = vpop.xlane.xlu1 %4150  ;;  %v4161_v41 = vpop.xlane.xlu0 %4160  ;;  %v2926_v59 = vadd.f32 %v7831_v43, %v5339_v13  ;;  %v8037_v15 = vld [vmem:[#allocation19_spill] sm:$0xff] }
 0x566   :  { %4385 = vst [vmem:[#allocation7 + $0x28] sm:$0xff] %v4321_v46  ;;  %5673 = vrcp.f32 %v4151_v26  ;;  %v2917_v32 = vpop.f32.mrf.mxu1 }
 0x567   :  { %v5662_v7 = vpop.eup %5661  ;;  %4390 = vst [vmem:[#allocation7 + $0x50] sm:$0xff] %v4326_v0  ;;  %5675 = vrcp.f32 %v4161_v41  ;;  %2994 = vst [vmem:[#allocation8 + $0x1f0] sm:$0xff] %v2926_v59  ;;  %v2918_v38 = vadd.f32 %v7831_v43, %v2917_v32 }
 0x568   :  { %v5664_v56 = vpop.eup %5663  ;;  %v4324_v10 = vmul.f32 %v5662_v7, %v7229_v23  ;;  %v5340_v12 = vpop.f32.mrf.mxu1 }
 0x569   :  { %v4327_v50 = vmul.f32 %v5664_v56, %v8037_v15  ;;  %2992 = vst [vmem:[#allocation8 + $0x1e0] sm:$0xff] %v2918_v38  ;;  %v4157_v6 = vpop.xlane.xlu0 %4156  ;;  %v4163_v14 = vpop.xlane.xlu1 %4162  ;;  %v2929_v17 = vadd.f32 %v7831_v43, %v5340_v12 }
 0x56a   :  { %4388 = vst [vmem:[#allocation7 + $0x40] sm:$0xff] %v4324_v10  ;;  %5677 = vrcp.f32 %v4157_v6  ;;  %v2920_v55 = vpop.f32.mrf.mxu1 }
 0x56b   :  { %v5666_v58 = vpop.eup %5665  ;;  %4391 = vst [vmem:[#allocation7 + $0x58] sm:$0xff] %v4327_v50  ;;  %5679 = vrcp.f32 %v4163_v14  ;;  %2995 = vst [vmem:[#allocation8 + $0x1f8] sm:$0xff] %v2929_v17  ;;  %v2921_v48 = vadd.f32 %v7831_v43, %v2920_v55 }
 0x56c   :  { %v5668_v23 = vpop.eup %5667  ;;  %v4325_v36 = vmul.f32 %v5666_v58, %v8038_v8 }
 0x56d   :  { %v4330_v5 = vmul.f32 %v5668_v23, %v8039_v42  ;;  %2993 = vst [vmem:[#allocation8 + $0x1e8] sm:$0xff] %v2921_v48  ;;  %v4159_v61 = vpop.xlane.xlu1 %4158  ;;  %v4169_v35 = vpop.xlane.xlu0 %4168 }
 0x56e   :  { %4389 = vst [vmem:[#allocation7 + $0x48] sm:$0xff] %v4325_v36  ;;  %5681 = vrcp.f32 %v4159_v61 }
 0x56f   :  { %5824 = shalt.err (!%p5821_p0)
}
 0x570   :  { %s5866_s8 = smov 128   ;;  %s5867_s25 = smov 8   ;;  %v5670_v43 = vpop.eup %5669  ;;  %4394 = vst [vmem:[#allocation7 + $0x70] sm:$0xff] %v4330_v5  ;;  %5683 = vrcp.f32 %v4169_v35  ;;  %v8040_v14 = vld [vmem:[#allocation21_spill] sm:$0xff]  ;;  %v8044_v35 = vld [vmem:[#allocation36_spill] sm:$0xff] }
 0x571   :  { %4467 = dma.vmem_to_hbm [thread:$0]  %s4462_s9, 8192, %s7940_s16, [#allocation9], %s5866_s8, %s5866_s8, %s5867_s25   ;;  %v5672_v53 = vpop.eup %5671  ;;  %v4328_v31 = vmul.f32 %v5670_v43, %v7261_v33  ;;  %v4165_v47 = vpop.xlane.xlu0 %4164 }
 0x572   :  { %v4331_v18 = vmul.f32 %v5672_v53, %v7268_v57  ;;  %v4171_v22 = vpop.xlane.xlu1 %4170  ;;  %5685 = vrcp.f32 %v4165_v47  ;;  %s5868_s16 = smov [#allocation7]  }
 0x573   :  { %4392 = vst [vmem:[#allocation7 + $0x60] sm:$0xff] %v4328_v31  ;;  %v5674_v46 = vpop.eup %5673  ;;  %5687 = vrcp.f32 %v4171_v22  ;;  %s4449_s28 = sshll.u32 %s5868_s16, 4  ;;  %s4450_s28 = int_to_ptr.vmem [resolvable:$true] %s4449_s28 }
 0x574   :  { %4395 = vst [vmem:[#allocation7 + $0x78] sm:$0xff] %v4331_v18  ;;  %v5676_v13 = vpop.eup %5675  ;;  %v4329_v0 = vmul.f32 %v5674_v46, %v7277_v21  ;;  %v8045_v18 = vld [vmem:[#allocation37_spill] sm:$0xff]  ;;  %s5833_s7 = scalar_lea.vmem %s4450_s28, 8192  ;;  %p5838_p2 = scmp.lt.s32.totalorder %s4450_s28, %s4450_s28 }
 0x575   :  { %v4334_v26 = vmul.f32 %v5676_v13, %v7284_v24  ;;  %v4177_v59 = vpop.xlane.xlu0 %4176  ;;  %v8046_v13 = vld [vmem:[#allocation38_spill] sm:$0xff]  ;;  %p5834_p1 = scmp.ne.s32.totalorder %s4450_s28, %s5833_s7  ;;  %p5839_p3 = scmp.lt.s32.totalorder %s5833_s7, %s5833_s7 }
 0x576   :  { %v4167_v41 = vpop.xlane.xlu1 %4166  ;;  %4393 = vst [vmem:[#allocation7 + $0x68] sm:$0xff] %v4329_v0 }
 0x577   :  { %5689 = vrcp.f32 %v4167_v41  ;;  %v5678_v32 = vpop.eup %5677  ;;  %4398 = vst [vmem:[#allocation7 + $0x90] sm:$0xff] %v4334_v26  ;;  %p5840_p4 = por %p5839_p3, %p5838_p2 }
 0x578   :  { %5691 = vrcp.f32 %v4177_v59  ;;  %v5680_v33 = vpop.eup %5679  ;;  %v4332_v57 = vmul.f32 %v5678_v32, %v7293_v28  ;;  %v8047_v32 = vld [vmem:[#allocation22_spill] sm:$0xff] }
 0x579   :  { %v4335_v7 = vmul.f32 %v5680_v33, %v7300_v49  ;;  %v4173_v38 = vpop.xlane.xlu0 %4172  ;;  %p5841_p5 = pnand %p5840_p4, %p5834_p1 }
 0x57a   :  { %v4179_v56 = vpop.xlane.xlu1 %4178  ;;  %4396 = vst [vmem:[#allocation7 + $0x80] sm:$0xff] %v4332_v57  ;;  %5693 = vrcp.f32 %v4173_v38 }
 0x57b   :  { %v5682_v10 = vpop.eup %5681  ;;  %4399 = vst [vmem:[#allocation7 + $0x98] sm:$0xff] %v4335_v7  ;;  %5695 = vrcp.f32 %v4179_v56  ;;  %v8048_v7 = vld [vmem:[#allocation23_spill] sm:$0xff] }
 0x57c   :  { %v4333_v24 = vmul.f32 %v5682_v10, %v7309_v45  ;;  %v8041_v45 = vld [vmem:[#allocation33_spill] sm:$0xff] }
 0x57d   :  { %v5684_v21 = vpop.eup %5683 }
 0x57e   :  { %v4338_v12 = vmul.f32 %v5684_v21, %v7316_v1  ;;  %v4175_v15 = vpop.xlane.xlu1 %4174  ;;  %4397 = vst [vmem:[#allocation7 + $0x88] sm:$0xff] %v4333_v24  ;;  %v8042_v1 = vld [vmem:[#allocation34_spill] sm:$0xff] }
 0x57f   :  { %5697 = vrcp.f32 %v4175_v15  ;;  %v5686_v50 = vpop.eup %5685  ;;  %v8049_v24 = vld [vmem:[#allocation14_spill] sm:$0xff] }
 0x580   :  { %4402 = vst [vmem:[#allocation7 + $0xb0] sm:$0xff] %v4338_v12  ;;  %v4185_v28 = vpop.xlane.xlu0 %4184  ;;  %v5688_v6 = vpop.eup %5687  ;;  %v4336_v49 = vmul.f32 %v5686_v50, %v7325_v29  ;;  %v8043_v29 = vld [vmem:[#allocation35_spill] sm:$0xff] }
 0x581   :  { %5699 = vrcp.f32 %v4185_v28  ;;  %v4339_v17 = vmul.f32 %v5688_v6, %v8040_v14  ;;  %v8050_v6 = vld [vmem:[#allocation15_spill] sm:$0xff] }
 0x582   :  { %4400 = vst [vmem:[#allocation7 + $0xa0] sm:$0xff] %v4336_v49 }
 0x583   :  { %4403 = vst [vmem:[#allocation7 + $0xb8] sm:$0xff] %v4339_v17 }
 0x584   :  { %v5690_v55 = vpop.eup %5689  ;;  %v4181_v58 = vpop.xlane.xlu0 %4180 }
 0x585   :  { %v5692_v48 = vpop.eup %5691  ;;  %v4337_v23 = vmul.f32 %v5690_v55, %v8041_v45  ;;  %5701 = vrcp.f32 %v4181_v58 }
 0x586   :  { %v4342_v8 = vmul.f32 %v5692_v48, %v8042_v1  ;;  %v4187_v36 = vpop.xlane.xlu1 %4186  ;;  %v8051_v48 = vld [vmem:[#allocation16_spill] sm:$0xff] }
 0x587   :  { %4401 = vst [vmem:[#allocation7 + $0xa8] sm:$0xff] %v4337_v23  ;;  %5703 = vrcp.f32 %v4187_v36  ;;  %v5694_v42 = vpop.eup %5693  ;;  %v8052_v23 = vld [vmem:[#allocation39_spill] sm:$0xff] }
 0x588   :  { %4406 = vst [vmem:[#allocation7 + $0xd0] sm:$0xff] %v4342_v8  ;;  %v5696_v5 = vpop.eup %5695  ;;  %v4340_v61 = vmul.f32 %v5694_v42, %v8043_v29 }
 0x589   :  { %v4343_v43 = vmul.f32 %v5696_v5, %v8044_v35 }
 0x58a   :  { %v4183_v53 = vpop.xlane.xlu1 %4182  ;;  %4404 = vst [vmem:[#allocation7 + $0xc0] sm:$0xff] %v4340_v61  ;;  %v8053_v61 = vld [vmem:[#allocation40_spill] sm:$0xff] }
 0x58b   :  { %5705 = vrcp.f32 %v4183_v53  ;;  %4407 = vst [vmem:[#allocation7 + $0xd8] sm:$0xff] %v4343_v43 }
 0x58c   :  { %v5698_v31 = vpop.eup %5697 }
 0x58d   :  { %v4341_v47 = vmul.f32 %v5698_v31, %v8045_v18  ;;  %v4193_v22 = vpop.xlane.xlu0 %4192 }
 0x58e   :  { %v5700_v46 = vpop.eup %5699  ;;  %5707 = vrcp.f32 %v4193_v22 }
 0x58f   :  { %4405 = vst [vmem:[#allocation7 + $0xc8] sm:$0xff] %v4341_v47  ;;  %v4346_v0 = vmul.f32 %v5700_v46, %v8046_v13  ;;  %v8054_v47 = vld [vmem:[#allocation41_spill] sm:$0xff]  ;;  %v8055_v46 = vld [vmem:[#allocation42_spill] sm:$0xff] }
 0x591   :  { %4410 = vst [vmem:[#allocation7 + $0xf0] sm:$0xff] %v4346_v0  ;;  %v4189_v26 = vpop.xlane.xlu0 %4188 }
 0x592   :  { %v5702_v41 = vpop.eup %5701  ;;  %5709 = vrcp.f32 %v4189_v26  ;;  %v4195_v59 = vpop.xlane.xlu1 %4194 }
 0x593   :  { %v4344_v33 = vmul.f32 %v5702_v41, %v8047_v32  ;;  %5711 = vrcp.f32 %v4195_v59  ;;  %v8056_v59 = vld [vmem:[#allocation17_spill] sm:$0xff] }
 0x594   :  { %v5704_v57 = vpop.eup %5703 }
 0x595   :  { %4408 = vst [vmem:[#allocation7 + $0xe0] sm:$0xff] %v4344_v33  ;;  %v4347_v38 = vmul.f32 %v5704_v57, %v8048_v7  ;;  %v8057_v33 = vld [vmem:[#allocation18_spill] sm:$0xff] }
 0x596   :  { %v4191_v56 = vpop.xlane.xlu1 %4190  ;;  %v4201_v10 = vpop.xlane.xlu0 %4200 }
 0x597   :  { %4411 = vst [vmem:[#allocation7 + $0xf8] sm:$0xff] %v4347_v38  ;;  %5713 = vrcp.f32 %v4191_v56 }
 0x598   :  { %v5706_v21 = vpop.eup %5705  ;;  %5715 = vrcp.f32 %v4201_v10 }
 0x599   :  { %v4345_v12 = vmul.f32 %v5706_v21, %v8049_v24 }
 0x59a   :  { %v4197_v15 = vpop.xlane.xlu0 %4196  ;;  %v4203_v50 = vpop.xlane.xlu1 %4202 }
 0x59b   :  { %v5708_v28 = vpop.eup %5707  ;;  %4409 = vst [vmem:[#allocation7 + $0xe8] sm:$0xff] %v4345_v12  ;;  %5717 = vrcp.f32 %v4197_v15 }
 0x59c   :  { %v4350_v49 = vmul.f32 %v5708_v28, %v8050_v6  ;;  %5719 = vrcp.f32 %v4203_v50  ;;  %v8058_v6 = vld [vmem:[#allocation24_spill] sm:$0xff] }
 0x59e   :  { %4414 = vst [vmem:[#allocation7 + $0x110] sm:$0xff] %v4350_v49  ;;  %v4199_v14 = vpop.xlane.xlu1 %4198  ;;  %v4209_v17 = vpop.xlane.xlu0 %4208 }
 0x59f   :  { %v5710_v55 = vpop.eup %5709  ;;  %5721 = vrcp.f32 %v4199_v14  ;;  %v8059_v14 = vld [vmem:[#allocation25_spill] sm:$0xff] }
 0x5a0   :  { %v5712_v58 = vpop.eup %5711  ;;  %v4348_v45 = vmul.f32 %v5710_v55, %v8051_v48  ;;  %5723 = vrcp.f32 %v4209_v17 }
 0x5a1   :  { %v4351_v1 = vmul.f32 %v5712_v58, %v8052_v23 }
 0x5a2   :  { %4412 = vst [vmem:[#allocation7 + $0x100] sm:$0xff] %v4348_v45  ;;  %v4205_v8 = vpop.xlane.xlu0 %4204  ;;  %v4211_v36 = vpop.xlane.xlu1 %4210 }
 0x5a3   :  { %4415 = vst [vmem:[#allocation7 + $0x118] sm:$0xff] %v4351_v1  ;;  %5725 = vrcp.f32 %v4205_v8 }
 0x5a4   :  { %v5714_v42 = vpop.eup %5713  ;;  %5727 = vrcp.f32 %v4211_v36 }
 0x5a5   :  { %v5716_v5 = vpop.eup %5715  ;;  %v4349_v29 = vmul.f32 %v5714_v42, %v7540_v39 }
 0x5a6   :  { %v4354_v35 = vmul.f32 %v5716_v5, %v8053_v61  ;;  %v4207_v43 = vpop.xlane.xlu1 %4206  ;;  %v4217_v53 = vpop.xlane.xlu0 %4216 }
 0x5a7   :  { %4413 = vst [vmem:[#allocation7 + $0x108] sm:$0xff] %v4349_v29  ;;  %5729 = vrcp.f32 %v4207_v43 }
 0x5a8   :  { %v5718_v31 = vpop.eup %5717  ;;  %4418 = vst [vmem:[#allocation7 + $0x130] sm:$0xff] %v4354_v35  ;;  %5731 = vrcp.f32 %v4217_v53 }
 0x5a9   :  { %v5720_v18 = vpop.eup %5719  ;;  %v4352_v22 = vmul.f32 %v5718_v31, %v8054_v47 }
 0x5aa   :  { %v4355_v13 = vmul.f32 %v5720_v18, %v8055_v46  ;;  %v4213_v0 = vpop.xlane.xlu0 %4212 }
 0x5ab   :  { %4416 = vst [vmem:[#allocation7 + $0x120] sm:$0xff] %v4352_v22  ;;  %5733 = vrcp.f32 %v4213_v0  ;;  %v4219_v26 = vpop.xlane.xlu1 %4218 }
 0x5ac   :  { %v5722_v41 = vpop.eup %5721  ;;  %4419 = vst [vmem:[#allocation7 + $0x138] sm:$0xff] %v4355_v13  ;;  %5735 = vrcp.f32 %v4219_v26 }
 0x5ad   :  { %v5724_v39 = vpop.eup %5723  ;;  %v4353_v32 = vmul.f32 %v5722_v41, %v8056_v59 }
 0x5ae   :  { %v4358_v57 = vmul.f32 %v5724_v39, %v8057_v33 }
 0x5af   :  { %4417 = vst [vmem:[#allocation7 + $0x128] sm:$0xff] %v4353_v32  ;;  %v4215_v7 = vpop.xlane.xlu1 %4214 }
 0x5b0   :  { %v5726_v38 = vpop.eup %5725  ;;  %4422 = vst [vmem:[#allocation7 + $0x150] sm:$0xff] %v4358_v57  ;;  %5737 = vrcp.f32 %v4215_v7  ;;  %v4225_v56 = vpop.xlane.xlu0 %4224 }
 0x5b1   :  { %v5728_v10 = vpop.eup %5727  ;;  %v4356_v21 = vmul.f32 %v5726_v38, %v7634_v52  ;;  %5739 = vrcp.f32 %v4225_v56 }
 0x5b2   :  { %v4359_v24 = vmul.f32 %v5728_v10, %v7637_v2 }
 0x5b3   :  { %4420 = vst [vmem:[#allocation7 + $0x140] sm:$0xff] %v4356_v21  ;;  %v4227_v50 = vpop.xlane.xlu1 %4226 }
 0x5b4   :  { %v5730_v12 = vpop.eup %5729  ;;  %4423 = vst [vmem:[#allocation7 + $0x158] sm:$0xff] %v4359_v24  ;;  %v4221_v15 = vpop.xlane.xlu0 %4220 }
 0x5b5   :  { %v5732_v28 = vpop.eup %5731  ;;  %v4357_v49 = vmul.f32 %v5730_v12, %v8058_v6  ;;  %5741 = vrcp.f32 %v4221_v15 }
 0x5b6   :  { %v4362_v17 = vmul.f32 %v5732_v28, %v8059_v14  ;;  %5743 = vrcp.f32 %v4227_v50 }
 0x5b7   :  { %4421 = vst [vmem:[#allocation7 + $0x148] sm:$0xff] %v4357_v49  ;;  %v4223_v58 = vpop.xlane.xlu1 %4222 }
 0x5b8   :  { %v5734_v55 = vpop.eup %5733  ;;  %4426 = vst [vmem:[#allocation7 + $0x170] sm:$0xff] %v4362_v17  ;;  %v4233_v52 = vpop.xlane.xlu0 %4232  ;;  %5745 = vrcp.f32 %v4223_v58 }
 0x5b9   :  { %v5736_v48 = vpop.eup %5735  ;;  %v4360_v2 = vmul.f32 %v5734_v55, %v7686_v27  ;;  %5747 = vrcp.f32 %v4233_v52 }
 0x5ba   :  { %v4363_v45 = vmul.f32 %v5736_v48, %v7694_v34 }
 0x5bb   :  { %4424 = vst [vmem:[#allocation7 + $0x160] sm:$0xff] %v4360_v2  ;;  %v4235_v1 = vpop.xlane.xlu1 %4234 }
 0x5bc   :  { %4427 = vst [vmem:[#allocation7 + $0x178] sm:$0xff] %v4363_v45  ;;  %v4229_v23 = vpop.xlane.xlu0 %4228 }
 0x5bd   :  { %v5738_v8 = vpop.eup %5737  ;;  %5749 = vrcp.f32 %v4229_v23 }
 0x5be   :  { %v5740_v36 = vpop.eup %5739  ;;  %v4361_v42 = vmul.f32 %v5738_v8, %v7719_v62  ;;  %5751 = vrcp.f32 %v4235_v1 }
 0x5bf   :  { %v4366_v5 = vmul.f32 %v5740_v36, %v7727_v16  ;;  %v4231_v29 = vpop.xlane.xlu1 %4230 }
 0x5c0   :  { %4425 = vst [vmem:[#allocation7 + $0x168] sm:$0xff] %v4361_v42  ;;  %v4241_v61 = vpop.xlane.xlu0 %4240  ;;  %5753 = vrcp.f32 %v4231_v29 }
 0x5c1   :  { %4430 = vst [vmem:[#allocation7 + $0x190] sm:$0xff] %v4366_v5  ;;  %5755 = vrcp.f32 %v4241_v61 }
 0x5c2   :  { %v5742_v27 = vpop.eup %5741 }
 0x5c3   :  { %v5744_v34 = vpop.eup %5743  ;;  %v4364_v35 = vmul.f32 %v5742_v27, %v7743_v54  ;;  %v4243_v31 = vpop.xlane.xlu1 %4242 }
 0x5c4   :  { %v4367_v43 = vmul.f32 %v5744_v34, %v7748_v60  ;;  %v4237_v53 = vpop.xlane.xlu0 %4236 }
 0x5c5   :  { %4428 = vst [vmem:[#allocation7 + $0x180] sm:$0xff] %v4364_v35  ;;  %5757 = vrcp.f32 %v4237_v53  ;;  %v5746_v62 = vpop.eup %5745 }
 0x5c6   :  { %4431 = vst [vmem:[#allocation7 + $0x198] sm:$0xff] %v4367_v43  ;;  %5759 = vrcp.f32 %v4243_v31  ;;  %v5748_v16 = vpop.eup %5747  ;;  %v4365_v18 = vmul.f32 %v5746_v62, %v7765_v25 }
 0x5c7   :  { %v4370_v47 = vmul.f32 %v5748_v16, %v7757_v20  ;;  %v4239_v22 = vpop.xlane.xlu1 %4238 }
 0x5c8   :  { %v4245_v46 = vpop.xlane.xlu0 %4244  ;;  %4429 = vst [vmem:[#allocation7 + $0x188] sm:$0xff] %v4365_v18  ;;  %5761 = vrcp.f32 %v4239_v22 }
 0x5c9   :  { %4434 = vst [vmem:[#allocation7 + $0x1b0] sm:$0xff] %v4370_v47  ;;  %5763 = vrcp.f32 %v4245_v46 }
 0x5ca   :  { %v5750_v13 = vpop.eup %5749 }
 0x5cb   :  { %v5752_v54 = vpop.eup %5751  ;;  %v4368_v60 = vmul.f32 %v5750_v13, %v7777_v19  ;;  %v4247_v41 = vpop.xlane.xlu1 %4246 }
 0x5cc   :  { %v4371_v0 = vmul.f32 %v5752_v54, %v7772_v44  ;;  %v4249_v26 = vpop.xlane.xlu0 %4248 }
 0x5cd   :  { %4432 = vst [vmem:[#allocation7 + $0x1a0] sm:$0xff] %v4368_v60  ;;  %5765 = vrcp.f32 %v4249_v26  ;;  %v5754_v39 = vpop.eup %5753 }
 0x5ce   :  { %4435 = vst [vmem:[#allocation7 + $0x1b8] sm:$0xff] %v4371_v0  ;;  %5767 = vrcp.f32 %v4247_v41  ;;  %v5756_v20 = vpop.eup %5755  ;;  %v4369_v25 = vmul.f32 %v5754_v39, %v7786_v11 }
 0x5cf   :  { %v4374_v59 = vmul.f32 %v5756_v20, %v7782_v9  ;;  %v4251_v32 = vpop.xlane.xlu1 %4250 }
 0x5d0   :  { %4433 = vst [vmem:[#allocation7 + $0x1a8] sm:$0xff] %v4369_v25  ;;  %5769 = vrcp.f32 %v4251_v32 }
 0x5d1   :  { %4438 = vst [vmem:[#allocation7 + $0x1d0] sm:$0xff] %v4374_v59 }
 0x5d2   :  { %v5758_v33 = vpop.eup %5757 }
 0x5d3   :  { %v5760_v19 = vpop.eup %5759  ;;  %v4372_v44 = vmul.f32 %v5758_v33, %v7797_v3 }
 0x5d4   :  { %v4375_v57 = vmul.f32 %v5760_v19, %v7792_v40 }
 0x5d5   :  { %4436 = vst [vmem:[#allocation7 + $0x1c0] sm:$0xff] %v4372_v44  ;;  %v5762_v7 = vpop.eup %5761 }
 0x5d6   :  { %4439 = vst [vmem:[#allocation7 + $0x1d8] sm:$0xff] %v4375_v57  ;;  %v5764_v38 = vpop.eup %5763  ;;  %v4373_v56 = vmul.f32 %v5762_v7, %v7806_v63 }
 0x5d7   :  { %v4376_v11 = vmul.f32 %v5764_v38, %v7802_v37 }
 0x5d8   :  { %4437 = vst [vmem:[#allocation7 + $0x1c8] sm:$0xff] %v4373_v56 }
 0x5d9   :  { %4440 = vst [vmem:[#allocation7 + $0x1e0] sm:$0xff] %v4376_v11 }
 0x5da   :  { %v5766_v9 = vpop.eup %5765 }
 0x5db   :  { %v5768_v10 = vpop.eup %5767  ;;  %v4378_v21 = vmul.f32 %v5766_v9, %v7814_v51 }
 0x5dc   :  { %v4377_v24 = vmul.f32 %v5768_v10, %v7811_v4 }
 0x5dd   :  { %4442 = vst [vmem:[#allocation7 + $0x1f0] sm:$0xff] %v4378_v21  ;;  %v5770_v40 = vpop.eup %5769 }
 0x5de   :  { %4441 = vst [vmem:[#allocation7 + $0x1e8] sm:$0xff] %v4377_v24  ;;  %v4379_v3 = vmul.f32 %v5770_v40, %v7820_v30 }
 0x5e0   :  { %4443 = vst [vmem:[#allocation7 + $0x1f8] sm:$0xff] %v4379_v3 }
 0x5e1   :  { %5844 = shalt.err (!%p5841_p5)
}
 0x5e2   :  { %4455 = dma.vmem_to_hbm [thread:$0]  %s4450_s28, 8192, %s7939_s15, [#allocation4], %s5866_s8, %s5866_s8, %s5867_s25  }
 0x5e3   :  { %5857 = dma.done.wait [#allocation4], 8192  }
 0x5e4   :  { %5858 = vsyncadd [#allocation4], 4294959104 }
 0x5e5   :  { %5859 = dma.done.wait [#allocation9], 8192  }
 0x5e6   :  { %5860 = vsyncadd [#allocation9], 4294959104 }
 0x5e7   :  { %4474 = vsyncpa [#allocation3], 1 }
 0x5e8   :  { %4475 = vsyncpa [#allocation6], 1 }
 0x5e9   :  { %4476 = vsyncpa [#allocation4], 1 }
 0x5ea   :  { %4477 = vsyncpa [#allocation9], 1 }

</bundles_post_ra>
